<compile_context>
chip_gen: v5e
topology: v5e:2x2
jax: 0.10.0
libtpu: 0.0.40
codegen_flags: <defaults>
</compile_context>

<pallas_src>
import functools

import jax
import jax.numpy as jnp
import numpy as np
from jax.experimental import pallas as pl
from jax.experimental.pallas import tpu as pltpu

BN_EPS = 1e-5
LANE = 128


def _conv_rows(x_ref, w_ref, mask_ref, *, kh, kw, w, hw, halo, cout):
    """Implicit-im2col 'same' conv for one image's flattened NHWC rows.

    x_ref   : (hw + 2*halo, cin)     bf16  flattened rows with zero halo
    w_ref   : (kh*kw, cin, cout_mm)  bf16  per-tap weights (lane-padded)
    mask_ref: (hw, kh*kw)            f32   per-tap border masks (1 = valid)
    returns : (hw, cout)             f32   conv output rows
    """
    pad_h = (kh - 1) // 2
    pad_w = (kw - 1) // 2
    # Load + upcast once; all shifted slices are taken on the f32 value (plain
    # sublane-shift relayouts), then cast back to bf16 for the MXU.  The 0/1
    # mask multiply and the f32<->bf16 round trip are exact, so pass 1 and
    # pass 2 compute bit-identical conv values (BN stats stay coherent).
    xf = x_ref[...].astype(jnp.float32)
    acc = None
    for k in range(kh * kw):
        ki, kj = divmod(k, kw)
        start = halo + (ki - pad_h) * w + (kj - pad_w)
        patch = xf[start:start + hw, :]                  # (hw, cin) f32
        if not (ki == pad_h and kj == pad_w):            # center tap: no mask
            patch = patch * mask_ref[:, k:k + 1]
        contrib = jnp.dot(patch.astype(jnp.bfloat16), w_ref[k],
                          preferred_element_type=jnp.float32)
        acc = contrib if acc is None else acc + contrib
    return acc[:, :cout]                                 # drop matmul lane pad


def _stats_kernel(x_ref, w_ref, mask_ref, stats_ref, **consts):
    """Pass 1: per-image channel sum and sum-of-squares of the conv output."""
    acc = _conv_rows(x_ref, w_ref, mask_ref, **consts)
    stats_ref[0:1, :] = jnp.sum(acc, axis=0, keepdims=True)
    stats_ref[1:2, :] = jnp.sum(acc * acc, axis=0, keepdims=True)


def _apply_kernel(x_ref, w_ref, mask_ref, params_ref, out_ref, **consts):
    """Pass 2: recompute conv, apply folded BN (scale/bias) + PReLU, store."""
    acc = _conv_rows(x_ref, w_ref, mask_ref, **consts)
    y = acc * params_ref[0:1, :] + params_ref[1:2, :]
    out_ref[...] = jnp.where(y > 0.0, y, params_ref[2:3, :] * y)


@functools.partial(jax.jit, static_argnames=("padding",))
def conv_block(x, conv_w, bn_gamma, bn_beta, prelu_a, padding=1):
    """Forward of ConvBlock.  x: (N, Cin, H, W) NCHW; conv_w: (Cout, Cin, KH, KW)."""
    n, cin, h, w = x.shape
    cout, _, kh, kw = conv_w.shape
    assert kh == 2 * padding + 1 and kw == 2 * padding + 1, (
        "implicit-im2col kernel assumes a 'same' convolution")
    hw = h * w
    halo = padding * w + padding            # max |flattened-row shift| of a tap
    hw_pad = hw + 2 * halo
    m_rows = n * hw
    cout_mm = (cout + LANE - 1) // LANE * LANE

    # One cheap relayout of the raw input (replaces the old 9x im2col blowup):
    # NCHW -> flattened NHWC rows, bf16, zero halo rows per image.
    x_rows = x.transpose(0, 2, 3, 1).reshape(n, hw, cin).astype(jnp.bfloat16)
    x_rows = jnp.pad(x_rows, ((0, 0), (halo, halo), (0, 0)))

    # (Cout, Cin, KH, KW) -> (KH*KW, Cin, Cout_mm): one lane-padded slice per tap.
    w_taps = conv_w.transpose(2, 3, 1, 0).reshape(kh * kw, cin, cout)
    w_taps = jnp.pad(w_taps.astype(jnp.bfloat16),
                     ((0, 0), (0, 0), (0, cout_mm - cout)))

    # Per-tap border masks: tap (ki, kj) at output (hh, ww) reads input pixel
    # (hh + ki - pad, ww + kj - pad); zero it when that falls outside the image.
    rows = np.arange(hw)
    hh, ww = rows // w, rows % w
    cols = []
    for ki in range(kh):
        for kj in range(kw):
            ok_h = (hh + ki - padding >= 0) & (hh + ki - padding < h)
            ok_w = (ww + kj - padding >= 0) & (ww + kj - padding < w)
            cols.append(ok_h & ok_w)
    masks = jnp.asarray(np.stack(cols, axis=1).astype(np.float32))  # (hw, kh*kw)

    consts = dict(kh=kh, kw=kw, w=w, hw=hw, halo=halo, cout=cout)
    cparams = pltpu.CompilerParams(
        dimension_semantics=("parallel",),   # images independent (v7x: 2 TCs)
        vmem_limit_bytes=32 * 1024 * 1024,   # safe on v5e/v6e/v7x
    )
    x_spec = pl.BlockSpec((None, hw_pad, cin), lambda i: (i, 0, 0))
    w_spec = pl.BlockSpec((kh * kw, cin, cout_mm), lambda i: (0, 0, 0))
    m_spec = pl.BlockSpec((hw, kh * kw), lambda i: (0, 0))

    # ---- Pass 1: implicit-im2col conv -> per-image channel sum / sumsq -----
    stats = pl.pallas_call(
        functools.partial(_stats_kernel, **consts),
        out_shape=jax.ShapeDtypeStruct((n, 2, cout), jnp.float32),
        grid=(n,),
        in_specs=[x_spec, w_spec, m_spec],
        out_specs=pl.BlockSpec((None, 2, cout), lambda i: (i, 0, 0)),
        compiler_params=cparams,
    )(x_rows, w_taps, masks)

    # ---- Tiny cross-image reduction + BN folding (plain JAX) ---------------
    # NOTE: E[x^2]-E[x]^2 in f32 can cancel when |mean| >> std; guarded at 0
    # and adequate here - switch to a centered pass if inputs drift far.
    tot = jnp.sum(stats, axis=0)                                    # (2, cout)
    mean = tot[0] / m_rows
    var = jnp.maximum(tot[1] / m_rows - mean * mean, 0.0)
    inv_std = jax.lax.rsqrt(var + BN_EPS)
    scale = bn_gamma.astype(jnp.float32) * inv_std
    bias = bn_beta.astype(jnp.float32) - mean * scale
    alpha = jnp.broadcast_to(jnp.asarray(prelu_a, jnp.float32).reshape(-1),
                             (cout,))
    params = jnp.stack([scale, bias, alpha], axis=0)                # (3, cout)

    # ---- Pass 2: recompute conv, fused folded-BN affine + PReLU ------------
    out_rows = pl.pallas_call(
        functools.partial(_apply_kernel, **consts),
        out_shape=jax.ShapeDtypeStruct((n, hw, cout), jnp.float32),
        grid=(n,),
        in_specs=[x_spec, w_spec, m_spec,
                  pl.BlockSpec((3, cout), lambda i: (0, 0))],
        out_specs=pl.BlockSpec((None, hw, cout), lambda i: (i, 0, 0)),
        compiler_params=cparams,
    )(x_rows, w_taps, masks, params)

    # TODO(synk): return NHWC (or fuse this relayout into the consumer); kept
    # only to match the PyTorch module's NCHW output layout.
    return out_rows.reshape(n, h, w, cout).transpose(0, 3, 1, 2)


def _reference(x, conv_w, bn_gamma, bn_beta, prelu_a):
    """Pure-JAX reference (f32 conv + training-mode BN + PReLU)."""
    y = jax.lax.conv_general_dilated(
        x.astype(jnp.float32),
        conv_w.astype(jnp.float32),
        window_strides=(1, 1),
        padding=((1, 1), (1, 1)),
        dimension_numbers=("NCHW", "OIHW", "NCHW"),
        precision=jax.lax.Precision.HIGHEST,
    )
    mean = jnp.mean(y, axis=(0, 2, 3), keepdims=True)
    var = jnp.mean((y - mean) ** 2, axis=(0, 2, 3), keepdims=True)
    y = (y - mean) * jax.lax.rsqrt(var + BN_EPS)
    y = y * bn_gamma.reshape(1, -1, 1, 1) + bn_beta.reshape(1, -1, 1, 1)
    return jnp.where(y > 0, y, prelu_a * y)


if __name__ == "__main__":
    # Small shapes consistent with ConvBlock(in_channels=4, out_channels=8)
    N, CIN, COUT, H, W = 2, 4, 8, 16, 16

    key = jax.random.PRNGKey(0)
    kx, kw_, kg, kb = jax.random.split(key, 4)

    x = jax.random.normal(kx, (N, CIN, H, W), dtype=jnp.float32)
    conv_w = jax.random.normal(kw_, (COUT, CIN, 3, 3), dtype=jnp.float32) * 0.1
    bn_gamma = 1.0 + 0.1 * jax.random.normal(kg, (COUT,), dtype=jnp.float32)
    bn_beta = 0.1 * jax.random.normal(kb, (COUT,), dtype=jnp.float32)
    prelu_a = jnp.float32(0.25)  # PyTorch nn.PReLU() default init (1 shared param)

    out = jax.block_until_ready(conv_block(x, conv_w, bn_gamma, bn_beta, prelu_a))
    assert out.shape == (N, COUT, H, W), out.shape

    ref = jax.block_until_ready(_reference(x, conv_w, bn_gamma, bn_beta, prelu_a))
    # bf16 matmul inputs (f32 accumulation) vs. an f32 HIGHEST-precision
    # reference -> allow bf16-level tolerance.
    np.testing.assert_allclose(np.asarray(out), np.asarray(ref), rtol=2e-2, atol=2e-2)

    print("KERNEL_OK")
</pallas_src>

<mosaic_0001>
module attributes {stable_mosaic.version = 11 : i64} {
  func.func @_stats_kernel(%arg0: i32, %arg1: memref<1x290x4xbf16, #tpu.memory_space<vmem>>, %arg2: memref<9x4x128xbf16, #tpu.memory_space<vmem>>, %arg3: memref<256x9xf32, #tpu.memory_space<vmem>>, %arg4: memref<1x2x8xf32, #tpu.memory_space<vmem>>) attributes {dimension_semantics = [#tpu.dimension_semantics<parallel>], iteration_bounds = array<i64: 2>, scalar_prefetch = 0 : i64, scratch_operands = 0 : i64, tpu.core_type = #tpu.core_type<tc>, window_params = [{transform_indices = @transform_0, window_bounds = array<i64: 1, 290, 4>}, {pipeline_mode = #tpu.pipeline_mode<synchronous>, transform_indices = @transform_1, window_bounds = array<i64: 9, 4, 128>}, {pipeline_mode = #tpu.pipeline_mode<synchronous>, transform_indices = @transform_2, window_bounds = array<i64: 256, 9>}, {transform_indices = @transform_3, window_bounds = array<i64: 1, 2, 8>}]} {
    %c0 = arith.constant 0 : index
    %c0_0 = arith.constant 0 : index
    %c0_1 = arith.constant 0 : index
    %0 = vector.load %arg1[%c0, %c0_0, %c0_1] : memref<1x290x4xbf16, #tpu.memory_space<vmem>>, vector<1x290x4xbf16>
    %1 = vector.shape_cast %0 : vector<1x290x4xbf16> to vector<290x4xbf16>
    %2 = arith.extf %1 : vector<290x4xbf16> to vector<290x4xf32>
    %3 = vector.extract_strided_slice %2 {offsets = [0, 0], sizes = [256, 4], strides = [1, 1]} : vector<290x4xf32> to vector<256x4xf32>
    %c0_2 = arith.constant 0 : index
    %c0_3 = arith.constant 0 : index
    %4 = vector.load %arg3[%c0_2, %c0_3] : memref<256x9xf32, #tpu.memory_space<vmem>>, vector<256x1xf32>
    %5 = vector.broadcast %4 : vector<256x1xf32> to vector<256x4xf32>
    %6 = arith.mulf %3, %5 : vector<256x4xf32>
    %7 = arith.truncf %6 : vector<256x4xf32> to vector<256x4xbf16>
    %c0_4 = arith.constant 0 : index
    %c0_5 = arith.constant 0 : index
    %c0_6 = arith.constant 0 : index
    %8 = vector.load %arg2[%c0_4, %c0_5, %c0_6] : memref<9x4x128xbf16, #tpu.memory_space<vmem>>, vector<1x4x128xbf16>
    %9 = vector.shape_cast %8 : vector<1x4x128xbf16> to vector<4x128xbf16>
    %cst = arith.constant dense<0.000000e+00> : vector<256x128xf32>
    %10 = tpu.matmul %7, %9, %cst {dimension_numbers = #tpu.dot_dimension_numbers<[1], [0], [0], [1], [0, 0, 1, 1], [], []>} : vector<256x4xbf16>, vector<4x128xbf16>, vector<256x128xf32> -> vector<256x128xf32>
    %11 = vector.extract_strided_slice %2 {offsets = [1, 0], sizes = [256, 4], strides = [1, 1]} : vector<290x4xf32> to vector<256x4xf32>
    %c0_7 = arith.constant 0 : index
    %c1 = arith.constant 1 : index
    %12 = vector.load %arg3[%c0_7, %c1] : memref<256x9xf32, #tpu.memory_space<vmem>>, vector<256x1xf32>
    %13 = vector.broadcast %12 : vector<256x1xf32> to vector<256x4xf32>
    %14 = arith.mulf %11, %13 : vector<256x4xf32>
    %15 = arith.truncf %14 : vector<256x4xf32> to vector<256x4xbf16>
    %c1_8 = arith.constant 1 : index
    %c0_9 = arith.constant 0 : index
    %c0_10 = arith.constant 0 : index
    %16 = vector.load %arg2[%c1_8, %c0_9, %c0_10] : memref<9x4x128xbf16, #tpu.memory_space<vmem>>, vector<1x4x128xbf16>
    %17 = vector.shape_cast %16 : vector<1x4x128xbf16> to vector<4x128xbf16>
    %cst_11 = arith.constant dense<0.000000e+00> : vector<256x128xf32>
    %18 = tpu.matmul %15, %17, %cst_11 {dimension_numbers = #tpu.dot_dimension_numbers<[1], [0], [0], [1], [0, 0, 1, 1], [], []>} : vector<256x4xbf16>, vector<4x128xbf16>, vector<256x128xf32> -> vector<256x128xf32>
    %19 = arith.addf %10, %18 : vector<256x128xf32>
    %20 = vector.extract_strided_slice %2 {offsets = [2, 0], sizes = [256, 4], strides = [1, 1]} : vector<290x4xf32> to vector<256x4xf32>
    %c0_12 = arith.constant 0 : index
    %c2 = arith.constant 2 : index
    %21 = vector.load %arg3[%c0_12, %c2] : memref<256x9xf32, #tpu.memory_space<vmem>>, vector<256x1xf32>
    %22 = vector.broadcast %21 : vector<256x1xf32> to vector<256x4xf32>
    %23 = arith.mulf %20, %22 : vector<256x4xf32>
    %24 = arith.truncf %23 : vector<256x4xf32> to vector<256x4xbf16>
    %c2_13 = arith.constant 2 : index
    %c0_14 = arith.constant 0 : index
    %c0_15 = arith.constant 0 : index
    %25 = vector.load %arg2[%c2_13, %c0_14, %c0_15] : memref<9x4x128xbf16, #tpu.memory_space<vmem>>, vector<1x4x128xbf16>
    %26 = vector.shape_cast %25 : vector<1x4x128xbf16> to vector<4x128xbf16>
    %cst_16 = arith.constant dense<0.000000e+00> : vector<256x128xf32>
    %27 = tpu.matmul %24, %26, %cst_16 {dimension_numbers = #tpu.dot_dimension_numbers<[1], [0], [0], [1], [0, 0, 1, 1], [], []>} : vector<256x4xbf16>, vector<4x128xbf16>, vector<256x128xf32> -> vector<256x128xf32>
    %28 = arith.addf %19, %27 : vector<256x128xf32>
    %29 = vector.extract_strided_slice %2 {offsets = [16, 0], sizes = [256, 4], strides = [1, 1]} : vector<290x4xf32> to vector<256x4xf32>
    %c0_17 = arith.constant 0 : index
    %c3 = arith.constant 3 : index
    %30 = vector.load %arg3[%c0_17, %c3] : memref<256x9xf32, #tpu.memory_space<vmem>>, vector<256x1xf32>
    %31 = vector.broadcast %30 : vector<256x1xf32> to vector<256x4xf32>
    %32 = arith.mulf %29, %31 : vector<256x4xf32>
    %33 = arith.truncf %32 : vector<256x4xf32> to vector<256x4xbf16>
    %c3_18 = arith.constant 3 : index
    %c0_19 = arith.constant 0 : index
    %c0_20 = arith.constant 0 : index
    %34 = vector.load %arg2[%c3_18, %c0_19, %c0_20] : memref<9x4x128xbf16, #tpu.memory_space<vmem>>, vector<1x4x128xbf16>
    %35 = vector.shape_cast %34 : vector<1x4x128xbf16> to vector<4x128xbf16>
    %cst_21 = arith.constant dense<0.000000e+00> : vector<256x128xf32>
    %36 = tpu.matmul %33, %35, %cst_21 {dimension_numbers = #tpu.dot_dimension_numbers<[1], [0], [0], [1], [0, 0, 1, 1], [], []>} : vector<256x4xbf16>, vector<4x128xbf16>, vector<256x128xf32> -> vector<256x128xf32>
    %37 = arith.addf %28, %36 : vector<256x128xf32>
    %38 = vector.extract_strided_slice %2 {offsets = [17, 0], sizes = [256, 4], strides = [1, 1]} : vector<290x4xf32> to vector<256x4xf32>
    %39 = arith.truncf %38 : vector<256x4xf32> to vector<256x4xbf16>
    %c4 = arith.constant 4 : index
    %c0_22 = arith.constant 0 : index
    %c0_23 = arith.constant 0 : index
    %40 = vector.load %arg2[%c4, %c0_22, %c0_23] : memref<9x4x128xbf16, #tpu.memory_space<vmem>>, vector<1x4x128xbf16>
    %41 = vector.shape_cast %40 : vector<1x4x128xbf16> to vector<4x128xbf16>
    %cst_24 = arith.constant dense<0.000000e+00> : vector<256x128xf32>
    %42 = tpu.matmul %39, %41, %cst_24 {dimension_numbers = #tpu.dot_dimension_numbers<[1], [0], [0], [1], [0, 0, 1, 1], [], []>} : vector<256x4xbf16>, vector<4x128xbf16>, vector<256x128xf32> -> vector<256x128xf32>
    %43 = arith.addf %37, %42 : vector<256x128xf32>
    %44 = vector.extract_strided_slice %2 {offsets = [18, 0], sizes = [256, 4], strides = [1, 1]} : vector<290x4xf32> to vector<256x4xf32>
    %c0_25 = arith.constant 0 : index
    %c5 = arith.constant 5 : index
    %45 = vector.load %arg3[%c0_25, %c5] : memref<256x9xf32, #tpu.memory_space<vmem>>, vector<256x1xf32>
    %46 = vector.broadcast %45 : vector<256x1xf32> to vector<256x4xf32>
    %47 = arith.mulf %44, %46 : vector<256x4xf32>
    %48 = arith.truncf %47 : vector<256x4xf32> to vector<256x4xbf16>
    %c5_26 = arith.constant 5 : index
    %c0_27 = arith.constant 0 : index
    %c0_28 = arith.constant 0 : index
    %49 = vector.load %arg2[%c5_26, %c0_27, %c0_28] : memref<9x4x128xbf16, #tpu.memory_space<vmem>>, vector<1x4x128xbf16>
    %50 = vector.shape_cast %49 : vector<1x4x128xbf16> to vector<4x128xbf16>
    %cst_29 = arith.constant dense<0.000000e+00> : vector<256x128xf32>
    %51 = tpu.matmul %48, %50, %cst_29 {dimension_numbers = #tpu.dot_dimension_numbers<[1], [0], [0], [1], [0, 0, 1, 1], [], []>} : vector<256x4xbf16>, vector<4x128xbf16>, vector<256x128xf32> -> vector<256x128xf32>
    %52 = arith.addf %43, %51 : vector<256x128xf32>
    %53 = vector.extract_strided_slice %2 {offsets = [32, 0], sizes = [256, 4], strides = [1, 1]} : vector<290x4xf32> to vector<256x4xf32>
    %c0_30 = arith.constant 0 : index
    %c6 = arith.constant 6 : index
    %54 = vector.load %arg3[%c0_30, %c6] : memref<256x9xf32, #tpu.memory_space<vmem>>, vector<256x1xf32>
    %55 = vector.broadcast %54 : vector<256x1xf32> to vector<256x4xf32>
    %56 = arith.mulf %53, %55 : vector<256x4xf32>
    %57 = arith.truncf %56 : vector<256x4xf32> to vector<256x4xbf16>
    %c6_31 = arith.constant 6 : index
    %c0_32 = arith.constant 0 : index
    %c0_33 = arith.constant 0 : index
    %58 = vector.load %arg2[%c6_31, %c0_32, %c0_33] : memref<9x4x128xbf16, #tpu.memory_space<vmem>>, vector<1x4x128xbf16>
    %59 = vector.shape_cast %58 : vector<1x4x128xbf16> to vector<4x128xbf16>
    %cst_34 = arith.constant dense<0.000000e+00> : vector<256x128xf32>
    %60 = tpu.matmul %57, %59, %cst_34 {dimension_numbers = #tpu.dot_dimension_numbers<[1], [0], [0], [1], [0, 0, 1, 1], [], []>} : vector<256x4xbf16>, vector<4x128xbf16>, vector<256x128xf32> -> vector<256x128xf32>
    %61 = arith.addf %52, %60 : vector<256x128xf32>
    %62 = vector.extract_strided_slice %2 {offsets = [33, 0], sizes = [256, 4], strides = [1, 1]} : vector<290x4xf32> to vector<256x4xf32>
    %c0_35 = arith.constant 0 : index
    %c7 = arith.constant 7 : index
    %63 = vector.load %arg3[%c0_35, %c7] : memref<256x9xf32, #tpu.memory_space<vmem>>, vector<256x1xf32>
    %64 = vector.broadcast %63 : vector<256x1xf32> to vector<256x4xf32>
    %65 = arith.mulf %62, %64 : vector<256x4xf32>
    %66 = arith.truncf %65 : vector<256x4xf32> to vector<256x4xbf16>
    %c7_36 = arith.constant 7 : index
    %c0_37 = arith.constant 0 : index
    %c0_38 = arith.constant 0 : index
    %67 = vector.load %arg2[%c7_36, %c0_37, %c0_38] : memref<9x4x128xbf16, #tpu.memory_space<vmem>>, vector<1x4x128xbf16>
    %68 = vector.shape_cast %67 : vector<1x4x128xbf16> to vector<4x128xbf16>
    %cst_39 = arith.constant dense<0.000000e+00> : vector<256x128xf32>
    %69 = tpu.matmul %66, %68, %cst_39 {dimension_numbers = #tpu.dot_dimension_numbers<[1], [0], [0], [1], [0, 0, 1, 1], [], []>} : vector<256x4xbf16>, vector<4x128xbf16>, vector<256x128xf32> -> vector<256x128xf32>
    %70 = arith.addf %61, %69 : vector<256x128xf32>
    %71 = vector.extract_strided_slice %2 {offsets = [34, 0], sizes = [256, 4], strides = [1, 1]} : vector<290x4xf32> to vector<256x4xf32>
    %c0_40 = arith.constant 0 : index
    %c8 = arith.constant 8 : index
    %72 = vector.load %arg3[%c0_40, %c8] : memref<256x9xf32, #tpu.memory_space<vmem>>, vector<256x1xf32>
    %73 = vector.broadcast %72 : vector<256x1xf32> to vector<256x4xf32>
    %74 = arith.mulf %71, %73 : vector<256x4xf32>
    %75 = arith.truncf %74 : vector<256x4xf32> to vector<256x4xbf16>
    %c8_41 = arith.constant 8 : index
    %c0_42 = arith.constant 0 : index
    %c0_43 = arith.constant 0 : index
    %76 = vector.load %arg2[%c8_41, %c0_42, %c0_43] : memref<9x4x128xbf16, #tpu.memory_space<vmem>>, vector<1x4x128xbf16>
    %77 = vector.shape_cast %76 : vector<1x4x128xbf16> to vector<4x128xbf16>
    %cst_44 = arith.constant dense<0.000000e+00> : vector<256x128xf32>
    %78 = tpu.matmul %75, %77, %cst_44 {dimension_numbers = #tpu.dot_dimension_numbers<[1], [0], [0], [1], [0, 0, 1, 1], [], []>} : vector<256x4xbf16>, vector<4x128xbf16>, vector<256x128xf32> -> vector<256x128xf32>
    %79 = arith.addf %70, %78 : vector<256x128xf32>
    %80 = vector.extract_strided_slice %79 {offsets = [0, 0], sizes = [256, 8], strides = [1, 1]} : vector<256x128xf32> to vector<256x8xf32>
    %cst_45 = arith.constant dense<0.000000e+00> : vector<8xf32>
    %81 = vector.multi_reduction <add>, %80, %cst_45 [0] : vector<256x8xf32> to vector<8xf32>
    %82 = vector.shape_cast %81 : vector<8xf32> to vector<1x8xf32>
    %c0_46 = arith.constant 0 : index
    %c0_47 = arith.constant 0 : index
    %c0_48 = arith.constant 0 : index
    %83 = vector.load %arg4[%c0_46, %c0_47, %c0_48] : memref<1x2x8xf32, #tpu.memory_space<vmem>>, vector<1x1x8xf32>
    %84 = vector.shape_cast %83 : vector<1x1x8xf32> to vector<1x8xf32>
    %85 = vector.shape_cast %82 : vector<1x8xf32> to vector<1x1x8xf32>
    tpu.vector_store %arg4[%c0_46, %c0_47, %c0_48], %85 {strides = array<i32>} : memref<1x2x8xf32, #tpu.memory_space<vmem>>, vector<1x1x8xf32>,
    %86 = arith.mulf %80, %80 : vector<256x8xf32>
    %cst_49 = arith.constant dense<0.000000e+00> : vector<8xf32>
    %87 = vector.multi_reduction <add>, %86, %cst_49 [0] : vector<256x8xf32> to vector<8xf32>
    %88 = vector.shape_cast %87 : vector<8xf32> to vector<1x8xf32>
    %c0_50 = arith.constant 0 : index
    %c1_51 = arith.constant 1 : index
    %c0_52 = arith.constant 0 : index
    %89 = vector.load %arg4[%c0_50, %c1_51, %c0_52] : memref<1x2x8xf32, #tpu.memory_space<vmem>>, vector<1x1x8xf32>
    %90 = vector.shape_cast %89 : vector<1x1x8xf32> to vector<1x8xf32>
    %91 = vector.shape_cast %88 : vector<1x8xf32> to vector<1x1x8xf32>
    tpu.vector_store %arg4[%c0_50, %c1_51, %c0_52], %91 {strides = array<i32>} : memref<1x2x8xf32, #tpu.memory_space<vmem>>, vector<1x1x8xf32>,
    return
  }
  func.func @transform_0(%arg0: i32) -> (i32, i32, i32) {
    %c0_i32 = arith.constant 0 : i32
    %c0_i32_0 = arith.constant 0 : i32
    %c0_i32_1 = arith.constant 0 : i32
    return %arg0, %c0_i32, %c0_i32_0 : i32, i32, i32
  }
  func.func @transform_1(%arg0: i32) -> (i32, i32, i32) {
    %c0_i32 = arith.constant 0 : i32
    %c0_i32_0 = arith.constant 0 : i32
    %c0_i32_1 = arith.constant 0 : i32
    %c0_i32_2 = arith.constant 0 : i32
    return %c0_i32, %c0_i32_0, %c0_i32_1 : i32, i32, i32
  }
  func.func @transform_2(%arg0: i32) -> (i32, i32) {
    %c0_i32 = arith.constant 0 : i32
    %c0_i32_0 = arith.constant 0 : i32
    %c0_i32_1 = arith.constant 0 : i32
    return %c0_i32, %c0_i32_0 : i32, i32
  }
  func.func @transform_3(%arg0: i32) -> (i32, i32, i32) {
    %c0_i32 = arith.constant 0 : i32
    %c0_i32_0 = arith.constant 0 : i32
    %c0_i32_1 = arith.constant 0 : i32
    return %arg0, %c0_i32, %c0_i32_0 : i32, i32, i32
  }
}

module attributes {stable_mosaic.version = 11 : i64} {
  func.func @_apply_kernel(%arg0: i32, %arg1: memref<1x290x4xbf16, #tpu.memory_space<vmem>>, %arg2: memref<9x4x128xbf16, #tpu.memory_space<vmem>>, %arg3: memref<256x9xf32, #tpu.memory_space<vmem>>, %arg4: memref<3x8xf32, #tpu.memory_space<vmem>>, %arg5: memref<1x256x8xf32, #tpu.memory_space<vmem>>) attributes {dimension_semantics = [#tpu.dimension_semantics<parallel>], iteration_bounds = array<i64: 2>, scalar_prefetch = 0 : i64, scratch_operands = 0 : i64, tpu.core_type = #tpu.core_type<tc>, window_params = [{transform_indices = @transform_0, window_bounds = array<i64: 1, 290, 4>}, {pipeline_mode = #tpu.pipeline_mode<synchronous>, transform_indices = @transform_1, window_bounds = array<i64: 9, 4, 128>}, {pipeline_mode = #tpu.pipeline_mode<synchronous>, transform_indices = @transform_2, window_bounds = array<i64: 256, 9>}, {pipeline_mode = #tpu.pipeline_mode<synchronous>, transform_indices = @transform_3, window_bounds = array<i64: 3, 8>}, {transform_indices = @transform_4, window_bounds = array<i64: 1, 256, 8>}]} {
    %c0 = arith.constant 0 : index
    %c0_0 = arith.constant 0 : index
    %c0_1 = arith.constant 0 : index
    %0 = vector.load %arg1[%c0, %c0_0, %c0_1] : memref<1x290x4xbf16, #tpu.memory_space<vmem>>, vector<1x290x4xbf16>
    %1 = vector.shape_cast %0 : vector<1x290x4xbf16> to vector<290x4xbf16>
    %2 = arith.extf %1 : vector<290x4xbf16> to vector<290x4xf32>
    %3 = vector.extract_strided_slice %2 {offsets = [0, 0], sizes = [256, 4], strides = [1, 1]} : vector<290x4xf32> to vector<256x4xf32>
    %c0_2 = arith.constant 0 : index
    %c0_3 = arith.constant 0 : index
    %4 = vector.load %arg3[%c0_2, %c0_3] : memref<256x9xf32, #tpu.memory_space<vmem>>, vector<256x1xf32>
    %5 = vector.broadcast %4 : vector<256x1xf32> to vector<256x4xf32>
    %6 = arith.mulf %3, %5 : vector<256x4xf32>
    %7 = arith.truncf %6 : vector<256x4xf32> to vector<256x4xbf16>
    %c0_4 = arith.constant 0 : index
    %c0_5 = arith.constant 0 : index
    %c0_6 = arith.constant 0 : index
    %8 = vector.load %arg2[%c0_4, %c0_5, %c0_6] : memref<9x4x128xbf16, #tpu.memory_space<vmem>>, vector<1x4x128xbf16>
    %9 = vector.shape_cast %8 : vector<1x4x128xbf16> to vector<4x128xbf16>
    %cst = arith.constant dense<0.000000e+00> : vector<256x128xf32>
    %10 = tpu.matmul %7, %9, %cst {dimension_numbers = #tpu.dot_dimension_numbers<[1], [0], [0], [1], [0, 0, 1, 1], [], []>} : vector<256x4xbf16>, vector<4x128xbf16>, vector<256x128xf32> -> vector<256x128xf32>
    %11 = vector.extract_strided_slice %2 {offsets = [1, 0], sizes = [256, 4], strides = [1, 1]} : vector<290x4xf32> to vector<256x4xf32>
    %c0_7 = arith.constant 0 : index
    %c1 = arith.constant 1 : index
    %12 = vector.load %arg3[%c0_7, %c1] : memref<256x9xf32, #tpu.memory_space<vmem>>, vector<256x1xf32>
    %13 = vector.broadcast %12 : vector<256x1xf32> to vector<256x4xf32>
    %14 = arith.mulf %11, %13 : vector<256x4xf32>
    %15 = arith.truncf %14 : vector<256x4xf32> to vector<256x4xbf16>
    %c1_8 = arith.constant 1 : index
    %c0_9 = arith.constant 0 : index
    %c0_10 = arith.constant 0 : index
    %16 = vector.load %arg2[%c1_8, %c0_9, %c0_10] : memref<9x4x128xbf16, #tpu.memory_space<vmem>>, vector<1x4x128xbf16>
    %17 = vector.shape_cast %16 : vector<1x4x128xbf16> to vector<4x128xbf16>
    %cst_11 = arith.constant dense<0.000000e+00> : vector<256x128xf32>
    %18 = tpu.matmul %15, %17, %cst_11 {dimension_numbers = #tpu.dot_dimension_numbers<[1], [0], [0], [1], [0, 0, 1, 1], [], []>} : vector<256x4xbf16>, vector<4x128xbf16>, vector<256x128xf32> -> vector<256x128xf32>
    %19 = arith.addf %10, %18 : vector<256x128xf32>
    %20 = vector.extract_strided_slice %2 {offsets = [2, 0], sizes = [256, 4], strides = [1, 1]} : vector<290x4xf32> to vector<256x4xf32>
    %c0_12 = arith.constant 0 : index
    %c2 = arith.constant 2 : index
    %21 = vector.load %arg3[%c0_12, %c2] : memref<256x9xf32, #tpu.memory_space<vmem>>, vector<256x1xf32>
    %22 = vector.broadcast %21 : vector<256x1xf32> to vector<256x4xf32>
    %23 = arith.mulf %20, %22 : vector<256x4xf32>
    %24 = arith.truncf %23 : vector<256x4xf32> to vector<256x4xbf16>
    %c2_13 = arith.constant 2 : index
    %c0_14 = arith.constant 0 : index
    %c0_15 = arith.constant 0 : index
    %25 = vector.load %arg2[%c2_13, %c0_14, %c0_15] : memref<9x4x128xbf16, #tpu.memory_space<vmem>>, vector<1x4x128xbf16>
    %26 = vector.shape_cast %25 : vector<1x4x128xbf16> to vector<4x128xbf16>
    %cst_16 = arith.constant dense<0.000000e+00> : vector<256x128xf32>
    %27 = tpu.matmul %24, %26, %cst_16 {dimension_numbers = #tpu.dot_dimension_numbers<[1], [0], [0], [1], [0, 0, 1, 1], [], []>} : vector<256x4xbf16>, vector<4x128xbf16>, vector<256x128xf32> -> vector<256x128xf32>
    %28 = arith.addf %19, %27 : vector<256x128xf32>
    %29 = vector.extract_strided_slice %2 {offsets = [16, 0], sizes = [256, 4], strides = [1, 1]} : vector<290x4xf32> to vector<256x4xf32>
    %c0_17 = arith.constant 0 : index
    %c3 = arith.constant 3 : index
    %30 = vector.load %arg3[%c0_17, %c3] : memref<256x9xf32, #tpu.memory_space<vmem>>, vector<256x1xf32>
    %31 = vector.broadcast %30 : vector<256x1xf32> to vector<256x4xf32>
    %32 = arith.mulf %29, %31 : vector<256x4xf32>
    %33 = arith.truncf %32 : vector<256x4xf32> to vector<256x4xbf16>
    %c3_18 = arith.constant 3 : index
    %c0_19 = arith.constant 0 : index
    %c0_20 = arith.constant 0 : index
    %34 = vector.load %arg2[%c3_18, %c0_19, %c0_20] : memref<9x4x128xbf16, #tpu.memory_space<vmem>>, vector<1x4x128xbf16>
    %35 = vector.shape_cast %34 : vector<1x4x128xbf16> to vector<4x128xbf16>
    %cst_21 = arith.constant dense<0.000000e+00> : vector<256x128xf32>
    %36 = tpu.matmul %33, %35, %cst_21 {dimension_numbers = #tpu.dot_dimension_numbers<[1], [0], [0], [1], [0, 0, 1, 1], [], []>} : vector<256x4xbf16>, vector<4x128xbf16>, vector<256x128xf32> -> vector<256x128xf32>
    %37 = arith.addf %28, %36 : vector<256x128xf32>
    %38 = vector.extract_strided_slice %2 {offsets = [17, 0], sizes = [256, 4], strides = [1, 1]} : vector<290x4xf32> to vector<256x4xf32>
    %39 = arith.truncf %38 : vector<256x4xf32> to vector<256x4xbf16>
    %c4 = arith.constant 4 : index
    %c0_22 = arith.constant 0 : index
    %c0_23 = arith.constant 0 : index
    %40 = vector.load %arg2[%c4, %c0_22, %c0_23] : memref<9x4x128xbf16, #tpu.memory_space<vmem>>, vector<1x4x128xbf16>
    %41 = vector.shape_cast %40 : vector<1x4x128xbf16> to vector<4x128xbf16>
    %cst_24 = arith.constant dense<0.000000e+00> : vector<256x128xf32>
    %42 = tpu.matmul %39, %41, %cst_24 {dimension_numbers = #tpu.dot_dimension_numbers<[1], [0], [0], [1], [0, 0, 1, 1], [], []>} : vector<256x4xbf16>, vector<4x128xbf16>, vector<256x128xf32> -> vector<256x128xf32>
    %43 = arith.addf %37, %42 : vector<256x128xf32>
    %44 = vector.extract_strided_slice %2 {offsets = [18, 0], sizes = [256, 4], strides = [1, 1]} : vector<290x4xf32> to vector<256x4xf32>
    %c0_25 = arith.constant 0 : index
    %c5 = arith.constant 5 : index
    %45 = vector.load %arg3[%c0_25, %c5] : memref<256x9xf32, #tpu.memory_space<vmem>>, vector<256x1xf32>
    %46 = vector.broadcast %45 : vector<256x1xf32> to vector<256x4xf32>
    %47 = arith.mulf %44, %46 : vector<256x4xf32>
    %48 = arith.truncf %47 : vector<256x4xf32> to vector<256x4xbf16>
    %c5_26 = arith.constant 5 : index
    %c0_27 = arith.constant 0 : index
    %c0_28 = arith.constant 0 : index
    %49 = vector.load %arg2[%c5_26, %c0_27, %c0_28] : memref<9x4x128xbf16, #tpu.memory_space<vmem>>, vector<1x4x128xbf16>
    %50 = vector.shape_cast %49 : vector<1x4x128xbf16> to vector<4x128xbf16>
    %cst_29 = arith.constant dense<0.000000e+00> : vector<256x128xf32>
    %51 = tpu.matmul %48, %50, %cst_29 {dimension_numbers = #tpu.dot_dimension_numbers<[1], [0], [0], [1], [0, 0, 1, 1], [], []>} : vector<256x4xbf16>, vector<4x128xbf16>, vector<256x128xf32> -> vector<256x128xf32>
    %52 = arith.addf %43, %51 : vector<256x128xf32>
    %53 = vector.extract_strided_slice %2 {offsets = [32, 0], sizes = [256, 4], strides = [1, 1]} : vector<290x4xf32> to vector<256x4xf32>
    %c0_30 = arith.constant 0 : index
    %c6 = arith.constant 6 : index
    %54 = vector.load %arg3[%c0_30, %c6] : memref<256x9xf32, #tpu.memory_space<vmem>>, vector<256x1xf32>
    %55 = vector.broadcast %54 : vector<256x1xf32> to vector<256x4xf32>
    %56 = arith.mulf %53, %55 : vector<256x4xf32>
    %57 = arith.truncf %56 : vector<256x4xf32> to vector<256x4xbf16>
    %c6_31 = arith.constant 6 : index
    %c0_32 = arith.constant 0 : index
    %c0_33 = arith.constant 0 : index
    %58 = vector.load %arg2[%c6_31, %c0_32, %c0_33] : memref<9x4x128xbf16, #tpu.memory_space<vmem>>, vector<1x4x128xbf16>
    %59 = vector.shape_cast %58 : vector<1x4x128xbf16> to vector<4x128xbf16>
    %cst_34 = arith.constant dense<0.000000e+00> : vector<256x128xf32>
    %60 = tpu.matmul %57, %59, %cst_34 {dimension_numbers = #tpu.dot_dimension_numbers<[1], [0], [0], [1], [0, 0, 1, 1], [], []>} : vector<256x4xbf16>, vector<4x128xbf16>, vector<256x128xf32> -> vector<256x128xf32>
    %61 = arith.addf %52, %60 : vector<256x128xf32>
    %62 = vector.extract_strided_slice %2 {offsets = [33, 0], sizes = [256, 4], strides = [1, 1]} : vector<290x4xf32> to vector<256x4xf32>
    %c0_35 = arith.constant 0 : index
    %c7 = arith.constant 7 : index
    %63 = vector.load %arg3[%c0_35, %c7] : memref<256x9xf32, #tpu.memory_space<vmem>>, vector<256x1xf32>
    %64 = vector.broadcast %63 : vector<256x1xf32> to vector<256x4xf32>
    %65 = arith.mulf %62, %64 : vector<256x4xf32>
    %66 = arith.truncf %65 : vector<256x4xf32> to vector<256x4xbf16>
    %c7_36 = arith.constant 7 : index
    %c0_37 = arith.constant 0 : index
    %c0_38 = arith.constant 0 : index
    %67 = vector.load %arg2[%c7_36, %c0_37, %c0_38] : memref<9x4x128xbf16, #tpu.memory_space<vmem>>, vector<1x4x128xbf16>
    %68 = vector.shape_cast %67 : vector<1x4x128xbf16> to vector<4x128xbf16>
    %cst_39 = arith.constant dense<0.000000e+00> : vector<256x128xf32>
    %69 = tpu.matmul %66, %68, %cst_39 {dimension_numbers = #tpu.dot_dimension_numbers<[1], [0], [0], [1], [0, 0, 1, 1], [], []>} : vector<256x4xbf16>, vector<4x128xbf16>, vector<256x128xf32> -> vector<256x128xf32>
    %70 = arith.addf %61, %69 : vector<256x128xf32>
    %71 = vector.extract_strided_slice %2 {offsets = [34, 0], sizes = [256, 4], strides = [1, 1]} : vector<290x4xf32> to vector<256x4xf32>
    %c0_40 = arith.constant 0 : index
    %c8 = arith.constant 8 : index
    %72 = vector.load %arg3[%c0_40, %c8] : memref<256x9xf32, #tpu.memory_space<vmem>>, vector<256x1xf32>
    %73 = vector.broadcast %72 : vector<256x1xf32> to vector<256x4xf32>
    %74 = arith.mulf %71, %73 : vector<256x4xf32>
    %75 = arith.truncf %74 : vector<256x4xf32> to vector<256x4xbf16>
    %c8_41 = arith.constant 8 : index
    %c0_42 = arith.constant 0 : index
    %c0_43 = arith.constant 0 : index
    %76 = vector.load %arg2[%c8_41, %c0_42, %c0_43] : memref<9x4x128xbf16, #tpu.memory_space<vmem>>, vector<1x4x128xbf16>
    %77 = vector.shape_cast %76 : vector<1x4x128xbf16> to vector<4x128xbf16>
    %cst_44 = arith.constant dense<0.000000e+00> : vector<256x128xf32>
    %78 = tpu.matmul %75, %77, %cst_44 {dimension_numbers = #tpu.dot_dimension_numbers<[1], [0], [0], [1], [0, 0, 1, 1], [], []>} : vector<256x4xbf16>, vector<4x128xbf16>, vector<256x128xf32> -> vector<256x128xf32>
    %79 = arith.addf %70, %78 : vector<256x128xf32>
    %80 = vector.extract_strided_slice %79 {offsets = [0, 0], sizes = [256, 8], strides = [1, 1]} : vector<256x128xf32> to vector<256x8xf32>
    %c0_45 = arith.constant 0 : index
    %c0_46 = arith.constant 0 : index
    %81 = vector.load %arg4[%c0_45, %c0_46] : memref<3x8xf32, #tpu.memory_space<vmem>>, vector<1x8xf32>
    %82 = vector.broadcast %81 : vector<1x8xf32> to vector<256x8xf32>
    %83 = arith.mulf %80, %82 : vector<256x8xf32>
    %c1_47 = arith.constant 1 : index
    %c0_48 = arith.constant 0 : index
    %84 = vector.load %arg4[%c1_47, %c0_48] : memref<3x8xf32, #tpu.memory_space<vmem>>, vector<1x8xf32>
    %85 = vector.broadcast %84 : vector<1x8xf32> to vector<256x8xf32>
    %86 = arith.addf %83, %85 : vector<256x8xf32>
    %cst_49 = arith.constant 0.000000e+00 : f32
    %87 = vector.broadcast %cst_49 : f32 to vector<256x8xf32>
    %88 = arith.cmpf ogt, %86, %87 : vector<256x8xf32>
    %c2_50 = arith.constant 2 : index
    %c0_51 = arith.constant 0 : index
    %89 = vector.load %arg4[%c2_50, %c0_51] : memref<3x8xf32, #tpu.memory_space<vmem>>, vector<1x8xf32>
    %90 = vector.broadcast %89 : vector<1x8xf32> to vector<256x8xf32>
    %91 = arith.mulf %90, %86 : vector<256x8xf32>
    %92 = arith.select %88, %86, %91 : vector<256x8xi1>, vector<256x8xf32>
    %c0_52 = arith.constant 0 : index
    %c0_53 = arith.constant 0 : index
    %c0_54 = arith.constant 0 : index
    %93 = vector.load %arg5[%c0_52, %c0_53, %c0_54] : memref<1x256x8xf32, #tpu.memory_space<vmem>>, vector<1x256x8xf32>
    %94 = vector.shape_cast %93 : vector<1x256x8xf32> to vector<256x8xf32>
    %95 = vector.shape_cast %92 : vector<256x8xf32> to vector<1x256x8xf32>
    tpu.vector_store %arg5[%c0_52, %c0_53, %c0_54], %95 {strides = array<i32>} : memref<1x256x8xf32, #tpu.memory_space<vmem>>, vector<1x256x8xf32>,
    return
  }
  func.func @transform_0(%arg0: i32) -> (i32, i32, i32) {
    %c0_i32 = arith.constant 0 : i32
    %c0_i32_0 = arith.constant 0 : i32
    %c0_i32_1 = arith.constant 0 : i32
    return %arg0, %c0_i32, %c0_i32_0 : i32, i32, i32
  }
  func.func @transform_1(%arg0: i32) -> (i32, i32, i32) {
    %c0_i32 = arith.constant 0 : i32
    %c0_i32_0 = arith.constant 0 : i32
    %c0_i32_1 = arith.constant 0 : i32
    %c0_i32_2 = arith.constant 0 : i32
    return %c0_i32, %c0_i32_0, %c0_i32_1 : i32, i32, i32
  }
  func.func @transform_2(%arg0: i32) -> (i32, i32) {
    %c0_i32 = arith.constant 0 : i32
    %c0_i32_0 = arith.constant 0 : i32
    %c0_i32_1 = arith.constant 0 : i32
    return %c0_i32, %c0_i32_0 : i32, i32
  }
  func.func @transform_3(%arg0: i32) -> (i32, i32) {
    %c0_i32 = arith.constant 0 : i32
    %c0_i32_0 = arith.constant 0 : i32
    %c0_i32_1 = arith.constant 0 : i32
    return %c0_i32, %c0_i32_0 : i32, i32
  }
  func.func @transform_4(%arg0: i32) -> (i32, i32, i32) {
    %c0_i32 = arith.constant 0 : i32
    %c0_i32_0 = arith.constant 0 : i32
    %c0_i32_1 = arith.constant 0 : i32
    return %arg0, %c0_i32, %c0_i32_0 : i32, i32, i32
  }
}

</mosaic_0001>

<bundles_post_ra>
// kernel: conv_block.3
= control target key start
LH: loop header
LB: loop body
LE: loop exit
PB: predicated region body
PF: predicated region fallthrough
CT: control target
= control target key end

     0   :  { %s4869_s15 = smov 0   ;;  %s8371_s0 = inlined_call_operand.vmem [shape: bf16[2,290,4], index: 0, kind: input, shape index: {}]   ;;  %s8372_s1 = inlined_call_operand.vmem [shape: bf16[9,4,128], index: 1, kind: input, shape index: {}]   ;;  %s8373_s2 = inlined_call_operand.vmem [shape: f32[256,9], index: 2, kind: input, shape index: {}]   ;;  %s8374_s3 = inlined_call_operand.vmem [shape: f32[3,8], index: 3, kind: input, shape index: {}]   ;;  %s8375_s4 = inlined_call_operand.vmem [shape: f32[2,256,8], index: 4, kind: output, shape index: {}]  }
   0x1 LB: > { %s4398_s16 = sadd.s32 4294967295, %s4834_s15   ;;  %p4402_p0 = scmp.ge.s32.totalorder %s4834_s15, 1  ;;  %s4834_s15 = sphi %s4869_s15, %s14_s15  }
   0x2   : > { %p162_p1 = scmp.lt.s32.totalorder %s4834_s15, 3 }
   0x4   : > { %p163_p2 = pnand %p4402_p0, %p162_p1 }
   0x6   : > { %166 = sbr.rel (%p163_p2) target bundleno = 1047 (0x417), region = 36 }
   0xb   : > { %v4880_v0 = vld [vmem:[%s8373_s2 + $0x20] sm:$0xff]  ;;  %v4885_v1 = vld [vmem:[%s8373_s2 + $0x10] sm:$0xff]  ;;  %v4836_v3 = vmov 0   ;;  %v4898_v4 = vld [vmem:[%s8373_s2 + $0x28] sm:$0xff]  ;;  %v4837_v33 = vmov 1   ;;  %v4838_v58 = vmov 2  }
   0xc   : > { %v4890_v2 = vld [vmem:[%s8373_s2] sm:$0xff]  ;;  %4672 = vset.pattern.permute.xlu2 %v4836_v3  ;;  %4671 = vset.pattern.permute.xlu1 %v4836_v3  ;;  %v4903_v5 = vld [vmem:[%s8373_s2 + $0x18] sm:$0xff]  ;;  %v4908_v6 = vld [vmem:[%s8373_s2 + $0x8] sm:$0xff]  ;;  %vm941_vm0 = vcmask 1041408   ;;  %p188_p3 = scmp.lt.s32.totalorder %s4398_s16, 1  ;;  %vm610_vm1 = vcmask 1040384  }
   0xd   : > { %4670 = vset.pattern.permute.xlu0 %v4836_v3  ;;  %327 = vperm.xlu2 %4672, %v4880_v0   ;;  %v4916_v7 = vld [vmem:[%s8373_s2 + $0x40] sm:$0xff]  ;;  %v4921_v8 = vld [vmem:[%s8373_s2 + $0x38] sm:$0xff]  ;;  %v4926_v9 = vld [vmem:[%s8373_s2 + $0x30] sm:$0xff]  ;;  %vm759_vm2 = vsmask.f32 7424  ;;  %vm892_vm3 = vcmask 31744  }
   0xe   : > { %317 = vperm.xlu1 %4671, %v4885_v1   ;;  %307 = vperm.xlu0 %4670, %v4890_v2   ;;  %v4934_v10 = vld [vmem:[%s8373_s2 + $0x58] sm:$0xff]  ;;  %v4939_v11 = vld [vmem:[%s8373_s2 + $0x50] sm:$0xff]  ;;  %v4944_v12 = vld [vmem:[%s8373_s2 + $0x48] sm:$0xff]  ;;  %s9046_s16 = smov (!%p188_p3, %s4398_s16), 1  ;;  %vm1435_vm4 = vcmask 1046528   ;;  %vm4310_vm6 = vcmask 64512  }
   0xf   : > { %v4952_v13 = vld [vmem:[%s8373_s2 + $0x70] sm:$0xff]  ;;  %v4957_v14 = vld [vmem:[%s8373_s2 + $0x68] sm:$0xff]  ;;  %v4962_v15 = vld [vmem:[%s8373_s2 + $0x60] sm:$0xff]  ;;  %s4653_s9 = smul.u32 148, %s9046_s16  ;;  %s4560_s27 = sshll.u32 %s9046_s16, 8 }
  0x10   : > { %v4970_v16 = vld [vmem:[%s8373_s2 + $0x88] sm:$0xff]  ;;  %v4975_v17 = vld [vmem:[%s8373_s2 + $0x80] sm:$0xff]  ;;  %v4980_v18 = vld [vmem:[%s8373_s2 + $0x78] sm:$0xff]  ;;  %s7837_s30 = scalar_lea.vmem %s8375_s4, %s4560_s27 }
  0x11   : > { %v4988_v19 = vld [vmem:[%s8373_s2 + $0xa0] sm:$0xff]  ;;  %v4993_v20 = vld [vmem:[%s8373_s2 + $0x98] sm:$0xff]  ;;  %v4998_v21 = vld [vmem:[%s8373_s2 + $0x90] sm:$0xff]  ;;  %s5196_s12 = scalar_lea.vmem %s8371_s0, %s4653_s9 }
  0x12   : > { %8549 = vst [vmem:[#allocation2_spill] sm:$0xff] %v4988_v19  ;;  %v5006_v22 = vld [vmem:[%s8373_s2 + $0xb8] sm:$0xff]  ;;  %v5011_v23 = vld [vmem:[%s8373_s2 + $0xb0] sm:$0xff]  ;;  %v5016_v24 = vld [vmem:[%s8373_s2 + $0xa8] sm:$0xff] }
  0x13   : > { %8550 = vst [vmem:[#allocation3_spill] sm:$0xff] %v4993_v20  ;;  %v5024_v25 = vld [vmem:[%s8373_s2 + $0xd0] sm:$0xff]  ;;  %v5029_v26 = vld [vmem:[%s8373_s2 + $0xc8] sm:$0xff]  ;;  %v5034_v27 = vld [vmem:[%s8373_s2 + $0xc0] sm:$0xff] }
  0x14   : > { %v5042_v28 = vld [vmem:[%s8373_s2 + $0xe8] sm:$0xff]  ;;  %v5047_v29 = vld [vmem:[%s8373_s2 + $0xe0] sm:$0xff]  ;;  %v5052_v30 = vld [vmem:[%s8373_s2 + $0xd8] sm:$0xff] }
  0x15   : > { %332 = vperm.xlu2 %4672, %v4898_v4   ;;  %v5060_v31 = vld [vmem:[%s8373_s2 + $0xf8] sm:$0xff]  ;;  %v5065_v32 = vld [vmem:[%s8373_s2 + $0xf0] sm:$0xff] }
  0x16   : > { %322 = vperm.xlu1 %4671, %v4903_v5   ;;  %312 = vperm.xlu0 %4670, %v4908_v6  }
  0x1d   : > { %347 = vperm.xlu2 %4672, %v4916_v7  }
  0x1e   : > { %342 = vperm.xlu1 %4671, %v4921_v8   ;;  %337 = vperm.xlu0 %4670, %v4926_v9  }
  0x25   : > { %362 = vperm.xlu2 %4672, %v4934_v10  }
  0x26   : > { %357 = vperm.xlu1 %4671, %v4939_v11   ;;  %352 = vperm.xlu0 %4670, %v4944_v12  }
  0x2d   : > { %377 = vperm.xlu2 %4672, %v4952_v13  }
  0x2e   : > { %372 = vperm.xlu1 %4671, %v4957_v14   ;;  %367 = vperm.xlu0 %4670, %v4962_v15  }
  0x35   : > { %392 = vperm.xlu2 %4672, %v4970_v16  }
  0x36   : > { %387 = vperm.xlu1 %4671, %v4975_v17   ;;  %382 = vperm.xlu0 %4670, %v4980_v18  }
  0x3d   : > { %407 = vperm.xlu2 %4672, %v4988_v19  }
  0x3e   : > { %402 = vperm.xlu1 %4671, %v4993_v20   ;;  %397 = vperm.xlu0 %4670, %v4998_v21  }
  0x45   : > { %422 = vperm.xlu2 %4672, %v5006_v22  }
  0x46   : > { %417 = vperm.xlu1 %4671, %v5011_v23   ;;  %412 = vperm.xlu0 %4670, %v5016_v24  }
  0x4d   : > { %437 = vperm.xlu2 %4672, %v5024_v25  }
  0x4e   : > { %432 = vperm.xlu1 %4671, %v5029_v26   ;;  %427 = vperm.xlu0 %4670, %v5034_v27  }
  0x55   : > { %452 = vperm.xlu2 %4672, %v5042_v28  }
  0x56   : > { %447 = vperm.xlu1 %4671, %v5047_v29   ;;  %442 = vperm.xlu0 %4670, %v5052_v30  }
  0x5d   : > { %4673 = vset.pattern.permute.xlu2 %v4837_v33 }
  0x5e   : > { %462 = vperm.xlu1 %4671, %v5060_v31   ;;  %457 = vperm.xlu0 %4670, %v5065_v32  }
  0x5f   : > { %515 = vperm.xlu2 %4673, %v4890_v2  }
  0x66   : > { %4675 = vset.pattern.permute.xlu1 %v4837_v33  ;;  %4674 = vset.pattern.permute.xlu0 %v4837_v33  ;;  %v4406_v33 = vld [vmem:[%s8372_s1 + $0x2] sm:$0x3] }
  0x67   : > { %521 = vperm.xlu1 %4675, %v4885_v1   ;;  %524 = vperm.xlu2 %4673, %v4903_v5   ;;  %v5072_v34 = vpop.permute.xlu2 %327 }
  0x68   : > { %8551 = vst [vmem:[#allocation4_spill] sm:$0xff] %v5072_v34  ;;  %518 = vperm.xlu0 %4674, %v4908_v6  }
  0x6f   : > { %527 = vperm.xlu1 %4675, %v4880_v0   ;;  %530 = vperm.xlu2 %4673, %v4898_v4   ;;  %v5077_v35 = vpop.permute.xlu2 %332 }
  0x70   : > { %8552 = vst [vmem:[#allocation5_spill] sm:$0xff] %v5077_v35  ;;  %533 = vperm.xlu0 %4674, %v4926_v9  }
  0x77   : > { %536 = vperm.xlu1 %4675, %v4921_v8   ;;  %539 = vperm.xlu2 %4673, %v4916_v7   ;;  %v5082_v36 = vpop.permute.xlu2 %347 }
  0x78   : > { %8553 = vst [vmem:[#allocation6_spill] sm:$0xff] %v5082_v36  ;;  %542 = vperm.xlu0 %4674, %v4944_v12   ;;  %v5233_v36 = vld [vmem:[%s5196_s12 + $0x10] sm:$0xff]  }
  0x79   : > { %8584 = vst [vmem:[#allocation37_spill] sm:$0xff] %v5233_v36 }
  0x7f   : > { %545 = vperm.xlu1 %4675, %v4939_v11   ;;  %548 = vperm.xlu2 %4673, %v4934_v10   ;;  %v5087_v37 = vpop.permute.xlu2 %362 }
  0x80   : > { %8554 = vst [vmem:[#allocation7_spill] sm:$0xff] %v5087_v37  ;;  %551 = vperm.xlu0 %4674, %v4962_v15   ;;  %v5090_v38 = vpop.permute.xlu1 %317  ;;  %v5092_v39 = vpop.permute.xlu0 %307 }
  0x81   : > { %8555 = vst [vmem:[#allocation8_spill] sm:$0xff] %v5090_v38 }
  0x87   : > { %554 = vperm.xlu1 %4675, %v4957_v14   ;;  %557 = vperm.xlu2 %4673, %v4952_v13   ;;  %v5096_v40 = vpop.permute.xlu2 %377 }
  0x88   : > { %8556 = vst [vmem:[#allocation9_spill] sm:$0xff] %v5096_v40  ;;  %560 = vperm.xlu0 %4674, %v4980_v18   ;;  %v5099_v41 = vpop.permute.xlu1 %322  ;;  %v5101_v42 = vpop.permute.xlu0 %312 }
  0x89   : > { %8557 = vst [vmem:[#allocation10_spill] sm:$0xff] %v5099_v41 }
  0x8f   : > { %563 = vperm.xlu1 %4675, %v4975_v17   ;;  %566 = vperm.xlu2 %4673, %v4970_v16   ;;  %v5105_v43 = vpop.permute.xlu2 %392 }
  0x90   : > { %8558 = vst [vmem:[#allocation11_spill] sm:$0xff] %v5105_v43  ;;  %569 = vperm.xlu0 %4674, %v4998_v21   ;;  %v5108_v44 = vpop.permute.xlu1 %342  ;;  %v5110_v45 = vpop.permute.xlu0 %337 }
  0x91   : > { %8559 = vst [vmem:[#allocation12_spill] sm:$0xff] %v5108_v44 }
  0x92   : > { %8560 = vst [vmem:[#allocation13_spill] sm:$0xff] %v5110_v45  ;;  %v5243_v45 = vunpack.c.h.bf16 %v5233_v36 }
  0x94   : > { %8586 = vst [vmem:[#allocation39_spill] sm:$0xff] %v5243_v45 }
  0x97   : > { %572 = vperm.xlu1 %4675, %v4993_v20   ;;  %575 = vperm.xlu2 %4673, %v4988_v19   ;;  %v5114_v46 = vpop.permute.xlu2 %407 }
  0x98   : > { %8561 = vst [vmem:[#allocation14_spill] sm:$0xff] %v5114_v46  ;;  %578 = vperm.xlu0 %4674, %v5016_v24   ;;  %v5117_v47 = vpop.permute.xlu1 %357  ;;  %v5119_v48 = vpop.permute.xlu0 %352 }
  0x99   : > { %8562 = vst [vmem:[#allocation15_spill] sm:$0xff] %v5117_v47 }
  0x9a   : > { %8563 = vst [vmem:[#allocation16_spill] sm:$0xff] %v5119_v48 }
  0x9f   : > { %581 = vperm.xlu1 %4675, %v5011_v23   ;;  %584 = vperm.xlu2 %4673, %v5006_v22   ;;  %v5123_v49 = vpop.permute.xlu2 %422 }
  0xa0   : > { %8564 = vst [vmem:[#allocation17_spill] sm:$0xff] %v5123_v49  ;;  %587 = vperm.xlu0 %4674, %v5034_v27   ;;  %v5126_v50 = vpop.permute.xlu1 %372  ;;  %v5128_v51 = vpop.permute.xlu0 %367 }
  0xa1   : > { %8565 = vst [vmem:[#allocation18_spill] sm:$0xff] %v5126_v50 }
  0xa2   : > { %8566 = vst [vmem:[#allocation19_spill] sm:$0xff] %v5128_v51 }
  0xa7   : > { %590 = vperm.xlu1 %4675, %v5029_v26   ;;  %593 = vperm.xlu2 %4673, %v5024_v25   ;;  %v5132_v52 = vpop.permute.xlu2 %437 }
  0xa8   : > { %8567 = vst [vmem:[#allocation20_spill] sm:$0xff] %v5132_v52  ;;  %596 = vperm.xlu0 %4674, %v5052_v30   ;;  %v5135_v53 = vpop.permute.xlu1 %387  ;;  %v5137_v54 = vpop.permute.xlu0 %382 }
  0xa9   : > { %8568 = vst [vmem:[#allocation21_spill] sm:$0xff] %v5135_v53 }
  0xaa   : > { %8569 = vst [vmem:[#allocation22_spill] sm:$0xff] %v5137_v54 }
  0xaf   : > { %599 = vperm.xlu1 %4675, %v5047_v29   ;;  %602 = vperm.xlu2 %4673, %v5042_v28   ;;  %v5141_v55 = vpop.permute.xlu2 %452 }
  0xb0   : > { %8570 = vst [vmem:[#allocation23_spill] sm:$0xff] %v5141_v55  ;;  %605 = vperm.xlu0 %4674, %v5065_v32   ;;  %v5144_v56 = vpop.permute.xlu1 %402  ;;  %v5146_v57 = vpop.permute.xlu0 %397 }
  0xb1   : > { %8571 = vst [vmem:[#allocation24_spill] sm:$0xff] %v5144_v56 }
  0xb2   : > { %8572 = vst [vmem:[#allocation25_spill] sm:$0xff] %v5146_v57 }
  0xb7   : > { %608 = vperm.xlu1 %4675, %v5060_v31   ;;  %4676 = vset.pattern.permute.xlu2 %v4838_v58 }
  0xb8   : > { %4677 = vset.pattern.permute.xlu0 %v4838_v58  ;;  %v5149_v59 = vpop.permute.xlu1 %417  ;;  %1175 = vperm.xlu2 %4676, %v4890_v2   ;;  %v5152_v60 = vpop.permute.xlu0 %412 }
  0xb9   : > { %8573 = vst [vmem:[#allocation26_spill] sm:$0xff] %v5149_v59  ;;  %1178 = vperm.xlu0 %4677, %v4908_v6   ;;  %v516_v61 = vpop.permute.xlu2 %515 }
  0xba   : > { %8574 = vst [vmem:[#allocation27_spill] sm:$0xff] %v5152_v60  ;;  %v611_v49 = vrot.slane %v516_v61, 7 }
  0xbf   : > { %4678 = vset.pattern.permute.xlu1 %v4838_v58  ;;  %v943_v58 = vsel %vm941_vm0, %v4406_v33, 0 }
  0xc0   : > { %1181 = vperm.xlu1 %4678, %v4885_v1   ;;  %v5156_v62 = vpop.permute.xlu1 %432  ;;  %1184 = vperm.xlu2 %4676, %v4903_v5   ;;  %v5159_v63 = vpop.permute.xlu0 %427 }
  0xc1   : > { %8575 = vst [vmem:[#allocation28_spill] sm:$0xff] %v5156_v62  ;;  %1193 = vperm.xlu0 %4677, %v4926_v9   ;;  %v5162_v3 = vpop.permute.xlu2 %524  ;;  %952 = vmatpush.bf16.msra.mxu0 %v943_v58 }
  0xc2   : > { %8576 = vst [vmem:[#allocation29_spill] sm:$0xff] %v5159_v63  ;;  %4650 = vmatpush.bf16.msra.mxu1 %v943_v58  ;;  %4651 = vmatpush.bf16.msra.mxu2 %v943_v58  ;;  %v616_v59 = vrot.slane %v5162_v3, 7 }
  0xc3   : > { %4652 = vmatpush.bf16.msra.mxu3 %v943_v58 }
  0xc8   : > { %1187 = vperm.xlu1 %4678, %v4880_v0   ;;  %v5169_v55 = vpop.permute.xlu1 %447  ;;  %1190 = vperm.xlu2 %4676, %v4898_v4   ;;  %v5172_v52 = vpop.permute.xlu0 %442 }
  0xc9   : > { %8577 = vst [vmem:[#allocation30_spill] sm:$0xff] %v5169_v55  ;;  %1202 = vperm.xlu0 %4677, %v4944_v12   ;;  %v5175_v63 = vpop.permute.xlu2 %530 }
  0xca   : > { %8578 = vst [vmem:[#allocation31_spill] sm:$0xff] %v5172_v52  ;;  %v4562_v52 = vld [vmem:[%s5196_s12] sm:$0xff]  }
  0xcb   : > { %v5214_v53 = vunpack.c.l.bf16 %v4562_v52  ;;  %v5216_v40 = vunpack.c.h.bf16 %v4562_v52 }
  0xcd   : > { %v707_v51 = vmul.f32 %v5214_v53, %v611_v49 }
  0xd0   : > { %1196 = vperm.xlu1 %4678, %v4921_v8   ;;  %v5184_v33 = vpop.permute.xlu1 %462  ;;  %1199 = vperm.xlu2 %4676, %v4916_v7   ;;  %v5187_v58 = vpop.permute.xlu0 %457 }
  0xd1   : > { %8579 = vst [vmem:[#allocation32_spill] sm:$0xff] %v5184_v33  ;;  %1211 = vperm.xlu0 %4677, %v4962_v15   ;;  %v5190_v55 = vpop.permute.xlu2 %539  ;;  %v5201_v33 = vld [vmem:[%s5196_s12 + $0x8] sm:$0xff]  }
  0xd2   : > { %8580 = vst [vmem:[#allocation33_spill] sm:$0xff] %v5187_v58  ;;  %v5209_v57 = vunpack.c.h.bf16 %v5201_v33  ;;  %v5212_v43 = vunpack.c.l.bf16 %v5201_v33 }
  0xd3   : > { %8581 = vst [vmem:[#allocation34_spill] sm:$0xff] %v5201_v33  ;;  %v5246_v33 = vld [vmem:[%s5196_s12 + $0x20] sm:$0xff]  }
  0xd4   : > { %8582 = vst [vmem:[#allocation35_spill] sm:$0xff] %v5209_v57 }
  0xd5   : > { %8583 = vst [vmem:[#allocation36_spill] sm:$0xff] %v5212_v43 }
  0xd6   : > { %8587 = vst [vmem:[#allocation40_spill] sm:$0xff] %v5246_v33 }
  0xd8   : > { %1205 = vperm.xlu1 %4678, %v4939_v11   ;;  %1208 = vperm.xlu2 %4676, %v4934_v10  }
  0xd9   : > { %1220 = vperm.xlu0 %4677, %v4980_v18   ;;  %v522_v58 = vpop.permute.xlu1 %521  ;;  %v5205_v62 = vpop.permute.xlu2 %548 }
  0xda   : > { %v614_v46 = vrot.slane %v522_v58, 7  ;;  %v519_v60 = vpop.permute.xlu0 %518 }
  0xdb   : > { %v612_v56 = vrot.slane %v519_v60, 7 }
  0xdc   : > { %v617_v54 = vsel %vm610_vm1, %v614_v46, %v616_v59 }
  0xdd   : > { %v710_v61 = vmul.f32 %v5209_v57, %v617_v54  ;;  %v613_v3 = vsel %vm610_vm1, %v611_v49, %v612_v56  ;;  %v615_v58 = vsel %vm610_vm1, %v612_v56, %v614_v46 }
  0xde   : > { %v708_v60 = vmul.f32 %v5216_v40, %v613_v3  ;;  %v709_v50 = vmul.f32 %v5212_v43, %v615_v58  ;;  %v620_v3 = vrot.slane %v5175_v63, 7 }
  0xe0   : > { %v740_v37 = vpack.c.bf16 %v708_v60, %v707_v51  ;;  %1214 = vperm.xlu1 %4678, %v4957_v14   ;;  %1217 = vperm.xlu2 %4676, %v4952_v13   ;;  %v5227_v52 = vpack.c.bf16 %v710_v61, %v709_v50  ;;  %v5238_v50 = vunpack.c.l.bf16 %v5233_v36  ;;  %v5262_v36 = vunpack.c.h.bf16 %v5246_v33 }
  0xe1   : > { %1229 = vperm.xlu0 %4677, %v4998_v21   ;;  %v528_v54 = vpop.permute.xlu1 %527  ;;  %v5230_v47 = vpop.permute.xlu2 %557 }
  0xe2   : > { %v618_v46 = vrot.slane %v528_v54, 7  ;;  %v534_v49 = vpop.permute.xlu0 %533  ;;  %v763_v56 = vshll.u32 %v740_v37, 16  ;;  %v768_v51 = vshll.u32 %v5227_v52, 16  ;;  %v761_v58 = vshrl.u32 %v740_v37, 16  ;;  %8585 = vst [vmem:[#allocation38_spill] sm:$0xff] %v5238_v50 }
  0xe3   : > { %8589 = vst [vmem:[#allocation42_spill] sm:$0xff] %v5262_v36  ;;  %v772_v43 = vshrl.u32 %v5227_v52, 16  ;;  %v4638_v52 = vld [vmem:[%s5196_s12 + $0x30] sm:$0xff]  }
  0xe4   : > { %v765_v60 = vrot.slane %v763_v56, 1  ;;  %v619_v61 = vsel %vm610_vm1, %v616_v59, %v618_v46  ;;  %v621_v48 = vsel %vm610_vm1, %v618_v46, %v620_v3  ;;  %v770_v44 = vrot.slane %v768_v51, 1 }
  0xe5   : > { %v711_v63 = vmul.f32 %v5238_v50, %v619_v61  ;;  %v712_v37 = vmul.f32 %v5243_v45, %v621_v48  ;;  %v626_v51 = vrot.slane %v5190_v55, 7  ;;  %v5259_v48 = vunpack.c.l.bf16 %v5246_v33 }
  0xe6   : > { %v766_v54 = vor.u32 %v765_v60, %v761_v58 }
  0xe7   : > { %8588 = vst [vmem:[#allocation41_spill] sm:$0xff] %v5259_v48  ;;  %v5265_v45 = vpack.c.bf16 %v712_v37, %v711_v63  ;;  %v632_v37 = vrot.slane %v5205_v62, 7 }
  0xe8   : > { %1223 = vperm.xlu1 %4678, %v4975_v17   ;;  %1226 = vperm.xlu2 %4676, %v4970_v16   ;;  %v771_v59 = vsel %vm759_vm2, %v766_v54, %v770_v44 }
  0xe9   : > { %1238 = vperm.xlu0 %4677, %v5016_v24   ;;  %4407 = vmatmul.msk.bf16.vlgmr.msra.gmra.mxu0 %vm892_vm3, %v771_v59  ;;  %v537_v46 = vpop.permute.xlu1 %536  ;;  %v5255_v56 = vpop.permute.xlu2 %566 }
  0xea   : > { %v624_v58 = vrot.slane %v537_v46, 7  ;;  %v543_v60 = vpop.permute.xlu0 %542  ;;  %v4637_v46 = vld [vmem:[%s5196_s12 + $0x28] sm:$0xff]  }
  0xeb   : > { %v628_v61 = vrot.slane %v543_v60, 7  ;;  %v776_v60 = vshll.u32 %v5265_v45, 16 }
  0xec   : > { %v627_v54 = vsel %vm610_vm1, %v624_v58, %v626_v51 }
  0xed   : > { %v715_v59 = vmul.f32 %v5259_v48, %v627_v54  ;;  %v629_v35 = vsel %vm610_vm1, %v626_v51, %v628_v61  ;;  %v5278_v51 = vunpack.c.h.bf16 %v4637_v46  ;;  %v778_v38 = vrot.slane %v776_v60, 1 }
  0xee   : > { %v716_v55 = vmul.f32 %v5262_v36, %v629_v35  ;;  %v5281_v35 = vld [vmem:[%s5196_s12 + $0x18] sm:$0xff]  }
  0xef   : > { %8590 = vst [vmem:[#allocation43_spill] sm:$0xff] %v5278_v51  ;;  %v5292_v57 = vunpack.c.h.bf16 %v5281_v35 }
  0xf0   : > { %v744_v50 = vpack.c.bf16 %v716_v55, %v715_v59  ;;  %1232 = vperm.xlu1 %4678, %v4993_v20   ;;  %1235 = vperm.xlu2 %4676, %v4988_v19   ;;  %8591 = vst [vmem:[#allocation44_spill] sm:$0xff] %v5281_v35  ;;  %v5283_v59 = vunpack.c.l.bf16 %v4637_v46  ;;  %v622_v55 = vrot.slane %v534_v49, 7  ;;  %v774_v46 = vor.u32 %v772_v43, %v770_v44 }
  0xf1   : > { %1247 = vperm.xlu0 %4677, %v5034_v27   ;;  %v546_v33 = vpop.permute.xlu1 %545  ;;  %v5275_v63 = vpop.permute.xlu2 %575  ;;  %8593 = vst [vmem:[#allocation46_spill] sm:$0xff] %v5292_v57 }
  0xf2   : > { %v630_v54 = vrot.slane %v546_v33, 7  ;;  %v552_v48 = vpop.permute.xlu0 %551  ;;  %8592 = vst [vmem:[#allocation45_spill] sm:$0xff] %v5283_v59  ;;  %v792_v36 = vshll.u32 %v744_v50, 16  ;;  %v625_v62 = vsel %vm610_vm1, %v622_v55, %v624_v58  ;;  %v623_v49 = vsel %vm610_vm1, %v620_v3, %v622_v55 }
  0xf3   : > { %v714_v58 = vmul.f32 %v5292_v57, %v625_v62  ;;  %v634_v60 = vrot.slane %v552_v48, 7  ;;  %v5313_v55 = vunpack.c.h.bf16 %v4638_v52 }
  0xf4   : > { %v631_v34 = vsel %vm610_vm1, %v628_v61, %v630_v54  ;;  %v633_v19 = vsel %vm610_vm1, %v630_v54, %v632_v37  ;;  %v5297_v61 = vrot.slane %v792_v36, 1  ;;  %v5300_v54 = vunpack.c.l.bf16 %v5281_v35 }
  0xf5   : > { %v717_v33 = vmul.f32 %v5283_v59, %v631_v34  ;;  %v718_v20 = vmul.f32 %v5278_v51, %v633_v19  ;;  %v779_v19 = vsel %vm759_vm2, %v774_v46, %v778_v38  ;;  %v796_v36 = vshrl.u32 %v744_v50, 16  ;;  %8595 = vst [vmem:[#allocation48_spill] sm:$0xff] %v5313_v55 }
  0xf6   : > { %8594 = vst [vmem:[#allocation47_spill] sm:$0xff] %v5300_v54  ;;  %v713_v44 = vmul.f32 %v5300_v54, %v623_v49  ;;  %v635_v46 = vsel %vm610_vm1, %v632_v37, %v634_v60  ;;  %v5320_v59 = vunpack.c.l.bf16 %v4638_v52  ;;  %v638_v54 = vrot.slane %v5230_v47, 7 }
  0xf7   : > { %v5295_v41 = vpack.c.bf16 %v718_v20, %v717_v33  ;;  %v798_v62 = vor.u32 %v796_v36, %v5297_v61  ;;  %v644_v36 = vrot.slane %v5255_v56, 7 }
  0xf8   : > { %1241 = vperm.xlu1 %4678, %v5011_v23   ;;  %1244 = vperm.xlu2 %4676, %v5006_v22   ;;  %v5318_v51 = vpack.c.bf16 %v714_v58, %v713_v44  ;;  %8596 = vst [vmem:[#allocation49_spill] sm:$0xff] %v5320_v59  ;;  %v719_v49 = vmul.f32 %v5320_v59, %v635_v46 }
  0xf9   : > { %1256 = vperm.xlu0 %4677, %v5052_v30   ;;  %4408 = vmatmul.msk.bf16.gmra.mxu0 %vm892_vm3, %v779_v19  ;;  %v555_v20 = vpop.permute.xlu1 %554  ;;  %v5309_v34 = vpop.permute.xlu2 %584  ;;  %v800_v43 = vshll.u32 %v5295_v41, 16 }
  0xfa   : > { %v636_v3 = vrot.slane %v555_v20, 7  ;;  %v561_v48 = vpop.permute.xlu0 %560  ;;  %v4640_v20 = vld [vmem:[%s5196_s12 + $0x40] sm:$0xff]   ;;  %v784_v37 = vshll.u32 %v5318_v51, 16 }
  0xfb   : > { %v802_v33 = vrot.slane %v800_v43, 1 }
  0xfc   : > { %v637_v19 = vsel %vm610_vm1, %v634_v60, %v636_v3  ;;  %v786_v59 = vrot.slane %v784_v37, 1  ;;  %v639_v37 = vsel %vm610_vm1, %v636_v3, %v638_v54 }
  0xfd   : > { %v720_v50 = vmul.f32 %v5313_v55, %v637_v19  ;;  %v803_v35 = vsel %vm759_vm2, %v798_v62, %v802_v33  ;;  %v5336_v62 = vunpack.c.h.bf16 %v4640_v20  ;;  %v780_v19 = vshrl.u32 %v5265_v45, 16  ;;  %v4639_v55 = vld [vmem:[%s5196_s12 + $0x38] sm:$0xff]  }
  0xfe   : > { %4411 = vmatmul.msk.bf16.vlgmr.msra.gmra.mxu1 %vm892_vm3, %v803_v35  ;;  %v640_v35 = vrot.slane %v561_v48, 7 }
  0xff   : > { %v5333_v60 = vpack.c.bf16 %v720_v50, %v719_v49  ;;  %8597 = vst [vmem:[#allocation50_spill] sm:$0xff] %v5336_v62 }
 0x100   : > { %1250 = vperm.xlu1 %4678, %v5029_v26   ;;  %1253 = vperm.xlu2 %4676, %v5024_v25   ;;  %v5338_v26 = vunpack.c.l.bf16 %v4640_v20  ;;  %v4641_v20 = vld [vmem:[%s5196_s12 + $0x48] sm:$0xff]  }
 0x101   : > { %1265 = vperm.xlu0 %4677, %v5065_v32   ;;  %v564_v58 = vpop.permute.xlu1 %563  ;;  %v5331_v52 = vpop.permute.xlu2 %593  ;;  %v808_v56 = vshll.u32 %v5333_v60, 16 }
 0x102   : > { %v642_v43 = vrot.slane %v564_v58, 7  ;;  %v570_v44 = vpop.permute.xlu0 %569  ;;  %v782_v58 = vor.u32 %v780_v19, %v778_v38  ;;  %v804_v38 = vshrl.u32 %v5295_v41, 16 }
 0x103   : > { %v646_v48 = vrot.slane %v570_v44, 7  ;;  %v810_v47 = vrot.slane %v808_v56, 1 }
 0x104   : > { %v643_v25 = vsel %vm610_vm1, %v640_v35, %v642_v43  ;;  %v645_v46 = vsel %vm610_vm1, %v642_v43, %v644_v36  ;;  %v787_v45 = vsel %vm759_vm2, %v782_v58, %v786_v59  ;;  %v4839_v43 = vmov 3  }
 0x105   : > { %v723_v50 = vmul.f32 %v5338_v26, %v643_v25  ;;  %v724_v49 = vmul.f32 %v5336_v62, %v645_v46  ;;  %v5357_v46 = vunpack.c.l.bf16 %v4639_v55  ;;  %v5368_v58 = vunpack.c.l.bf16 %v4641_v20 }
 0x107   : > { %v748_v57 = vpack.c.bf16 %v724_v49, %v723_v50  ;;  %v5364_v50 = vunpack.c.h.bf16 %v4639_v55  ;;  %v5366_v49 = vunpack.c.h.bf16 %v4641_v20  ;;  %8599 = vst [vmem:[#allocation52_spill] sm:$0xff] %v5368_v58  ;;  %v721_v41 = vmul.f32 %v5357_v46, %v639_v37 }
 0x108   : > { %1259 = vperm.xlu1 %4678, %v5047_v29   ;;  %1262 = vperm.xlu2 %4676, %v5042_v28   ;;  %v641_v29 = vsel %vm610_vm1, %v638_v54, %v640_v35  ;;  %v647_v28 = vsel %vm610_vm1, %v644_v36, %v646_v48 }
 0x109   : > { %4680 = vset.pattern.permute.xlu0 %v4839_v43  ;;  %4409 = vmatmul.msk.bf16.gmra.mxu0 %vm892_vm3, %v787_v45  ;;  %v573_v25 = vpop.permute.xlu1 %572  ;;  %v5354_v44 = vpop.permute.xlu2 %602  ;;  %8598 = vst [vmem:[#allocation51_spill] sm:$0xff] %v5366_v49  ;;  %v806_v45 = vor.u32 %v804_v38, %v802_v33  ;;  %v824_v62 = vshll.u32 %v748_v57, 16  ;;  %v722_v54 = vmul.f32 %v5364_v50, %v641_v29 }
 0x10a   : > { %v648_v19 = vrot.slane %v573_v25, 7  ;;  %1646 = vperm.xlu0 %4680, %v4908_v6   ;;  %v5362_v3 = vpop.permute.xlu0 %578  ;;  %v725_v36 = vmul.f32 %v5368_v58, %v647_v28  ;;  %v4642_v28 = vld [vmem:[%s5196_s12 + $0x50] sm:$0xff]  }
 0x10b   : > { %v811_v35 = vsel %vm759_vm2, %v806_v45, %v810_v47  ;;  %v5380_v33 = vrot.slane %v824_v62, 1  ;;  %v5387_v25 = vpack.c.bf16 %v722_v54, %v721_v41  ;;  %v788_v62 = vshrl.u32 %v5318_v51, 16  ;;  %v4645_v51 = vld [vmem:[%s5196_s12 + $0x68] sm:$0xff]  }
 0x10c   : > { %v649_v56 = vsel %vm610_vm1, %v646_v48, %v648_v19  ;;  %v8411_v48 = vrot.slane %v5362_v3, 7  ;;  %v650_v45 = vrot.slane %v5275_v63, 7  ;;  %v812_v54 = vshrl.u32 %v5333_v60, 16 }
 0x10d   : > { %v726_v6 = vmul.f32 %v5366_v49, %v649_v56 }
 0x10e   : > { %4412 = vmatmul.msk.bf16.gmra.mxu1 %vm892_vm3, %v811_v35  ;;  %v651_v41 = vsel %vm610_vm1, %v648_v19, %v650_v45  ;;  %v5407_v35 = vunpack.c.h.bf16 %v4642_v28  ;;  %v814_v19 = vor.u32 %v812_v54, %v810_v47 }
 0x10f   : > { %v5377_v55 = vpack.c.bf16 %v726_v6, %v725_v36  ;;  %v790_v36 = vor.u32 %v788_v62, %v786_v59  ;;  %v5404_v6 = vunpack.c.l.bf16 %v4642_v28  ;;  %v4644_v59 = vld [vmem:[%s5196_s12 + $0x60] sm:$0xff]   ;;  %v5418_v28 = vunpack.c.l.bf16 %v4645_v51 }
 0x110   : > { %1268 = vperm.xlu1 %4678, %v5060_v31   ;;  %4679 = vset.pattern.permute.xlu2 %v4839_v43  ;;  %v828_v31 = vshrl.u32 %v748_v57, 16  ;;  %v816_v57 = vshll.u32 %v5387_v25, 16  ;;  %8601 = vst [vmem:[#allocation54_spill] sm:$0xff] %v5407_v35  ;;  %v5424_v47 = vunpack.c.h.bf16 %v4644_v59 }
 0x111   : > { %v5383_v20 = vpop.permute.xlu1 %581  ;;  %1642 = vperm.xlu2 %4679, %v4890_v2   ;;  %v832_v37 = vshll.u32 %v5377_v55, 16  ;;  %8600 = vst [vmem:[#allocation53_spill] sm:$0xff] %v5404_v6  ;;  %v727_v62 = vmul.f32 %v5404_v6, %v651_v41 }
 0x112   : > { %1666 = vperm.xlu0 %4680, %v4926_v9   ;;  %v588_v38 = vpop.permute.xlu0 %587  ;;  %v5390_v29 = vpop.permute.xlu2 %1175  ;;  %v830_v2 = vor.u32 %v828_v31, %v5380_v33  ;;  %v653_v9 = vsel %vm610_vm1, %v650_v45, %v8411_v48  ;;  %v656_v31 = vrot.slane %v5309_v34, 7  ;;  %v795_v45 = vsel %vm759_vm2, %v790_v36, %v5297_v61  ;;  %8602 = vst [vmem:[#allocation55_spill] sm:$0xff] %v5418_v28 }
 0x113   : > { %v5395_v56 = vrot.slane %v832_v37, 1  ;;  %v658_v63 = vrot.slane %v588_v38, 7  ;;  %v728_v60 = vmul.f32 %v5407_v35, %v653_v9  ;;  %8603 = vst [vmem:[#allocation56_spill] sm:$0xff] %v5424_v47  ;;  %v662_v34 = vrot.slane %v5331_v52, 7  ;;  %v513_v52 = vld [vmem:[%s8372_s1] sm:$0x3] }
 0x114   : > { %v5432_v36 = vunpack.c.l.bf16 %v4644_v59 }
 0x115   : > { %v835_v37 = vsel %vm759_vm2, %v830_v2, %v5395_v56  ;;  %v5422_v2 = vrot.slane %v816_v57, 1  ;;  %v659_v41 = vsel %vm610_vm1, %v656_v31, %v658_v63 }
 0x116   : > { %4415 = vmatmul.msk.bf16.vlgmr.msra.gmra.mxu2 %vm892_vm3, %v835_v37  ;;  %8604 = vst [vmem:[#allocation57_spill] sm:$0xff] %v5432_v36  ;;  %v5443_v37 = vpack.c.bf16 %v728_v60, %v727_v62  ;;  %v731_v59 = vmul.f32 %v5432_v36, %v659_v41  ;;  %v836_v60 = vshrl.u32 %v5377_v55, 16 }
 0x117   : > { %v819_v57 = vsel %vm759_vm2, %v814_v19, %v5422_v2 }
 0x118   : > { %4681 = vset.pattern.permute.xlu1 %v4839_v43  ;;  %v840_v41 = vshll.u32 %v5443_v37, 16 }
 0x119   : > { %4410 = vmatmul.msk.bf16.gmra.mxu0 %vm892_vm3, %v795_v45  ;;  %1650 = vperm.xlu1 %4681, %v4885_v1   ;;  %v591_v38 = vpop.permute.xlu1 %590  ;;  %v5434_v1 = vunpack.c.h.bf16 %v4645_v51  ;;  %v1083_v45 = vsel %vm941_vm0, %v513_v52, 0 }
 0x11a   : > { %v660_v9 = vrot.slane %v591_v38, 7  ;;  %1654 = vperm.xlu2 %4679, %v4903_v5   ;;  %1678 = vperm.xlu0 %4680, %v4944_v12   ;;  %v597_v61 = vpop.permute.xlu0 %596  ;;  %v5430_v43 = vpop.permute.xlu2 %1184 }
 0x11b   : > { %8605 = vst [vmem:[#allocation58_spill] sm:$0xff] %v5434_v1  ;;  %v664_v54 = vrot.slane %v597_v61, 7  ;;  %1092 = vmatpush.bf16.msrb.mxu1 %v1083_v45  ;;  %v4643_v61 = vld [vmem:[%s5196_s12 + $0x58] sm:$0xff]   ;;  %v668_v45 = vrot.slane %v5354_v44, 7  ;;  %v466_v44 = vmul.f32 %v5216_v40, %v5101_v42 }
 0x11c   : > { %v661_v5 = vsel %vm610_vm1, %v658_v63, %v660_v9  ;;  %v663_v12 = vsel %vm610_vm1, %v660_v9, %v662_v34  ;;  %v654_v63 = vrot.slane %v5383_v20, 7  ;;  %v5458_v52 = vunpack.c.h.bf16 %v4643_v61 }
 0x11d   : > { %v732_v51 = vmul.f32 %v5424_v47, %v661_v5  ;;  %v733_v38 = vmul.f32 %v5418_v28, %v663_v12  ;;  %v665_v19 = vsel %vm610_vm1, %v662_v34, %v664_v54  ;;  %v4646_v12 = vld [vmem:[%s5196_s12 + $0x70] sm:$0xff]  }
 0x11e   : > { %v734_v48 = vmul.f32 %v5434_v1, %v665_v19  ;;  %4413 = vmatmul.msk.bf16.gmra.mxu1 %vm892_vm3, %v819_v57  ;;  %8606 = vst [vmem:[#allocation59_spill] sm:$0xff] %v5458_v52  ;;  %v5485_v35 = vunpack.c.l.bf16 %v4646_v12 }
 0x11f   : > { %v752_v62 = vpack.c.bf16 %v732_v51, %v731_v59  ;;  %v657_v51 = vsel %vm610_vm1, %v654_v63, %v656_v31 }
 0x120   : > { %v5456_v9 = vpack.c.bf16 %v734_v48, %v733_v38  ;;  %v838_v48 = vor.u32 %v836_v60, %v5395_v56  ;;  %v842_v56 = vrot.slane %v840_v41, 1  ;;  %v5483_v60 = vunpack.c.h.bf16 %v4646_v12  ;;  %8610 = vst [vmem:[#allocation62_spill] sm:$0xff] %v5485_v35 }
 0x121   : > { %1658 = vperm.xlu1 %4681, %v4880_v0   ;;  %v600_v34 = vpop.permute.xlu1 %599  ;;  %v856_v5 = vshll.u32 %v752_v62, 16  ;;  %v8607_v0 = vrot.slane %v5362_v3, 7  ;;  %v820_v12 = vshrl.u32 %v5387_v25, 16  ;;  %v4439_v25 = vld [vmem:[%s8372_s1 + $0x4] sm:$0x3] }
 0x122   : > { %v666_v19 = vrot.slane %v600_v34, 7  ;;  %1662 = vperm.xlu2 %4679, %v4898_v4   ;;  %1690 = vperm.xlu0 %4680, %v4962_v15   ;;  %v5465_v20 = vpop.permute.xlu0 %605  ;;  %v5467_v55 = vpop.permute.xlu2 %1190  ;;  %v864_v57 = vshll.u32 %v5456_v9, 16  ;;  %v860_v34 = vshrl.u32 %v752_v62, 16  ;;  %v5477_v4 = vunpack.c.l.bf16 %v4643_v61  ;;  %8609 = vst [vmem:[#allocation61_spill] sm:$0xff] %v5483_v60 }
 0x123   : > { %v655_v59 = vsel %vm610_vm1, %v8607_v0, %v654_v63  ;;  %v5475_v38 = vrot.slane %v856_v5, 1  ;;  %v730_v63 = vmul.f32 %v5458_v52, %v657_v51  ;;  %v843_v61 = vsel %vm759_vm2, %v838_v48, %v842_v56  ;;  %v4456_v51 = vld [vmem:[%s8372_s1 + $0x6] sm:$0x3] }
 0x124   : > { %8608 = vst [vmem:[#allocation60_spill] sm:$0xff] %v5477_v4  ;;  %v667_v15 = vsel %vm610_vm1, %v664_v54, %v666_v19  ;;  %v669_v6 = vsel %vm610_vm1, %v666_v19, %v668_v45  ;;  %v866_v0 = vrot.slane %v864_v57, 1  ;;  %v729_v31 = vmul.f32 %v5477_v4, %v655_v59 }
 0x125   : > { %v862_v3 = vor.u32 %v860_v34, %v5475_v38  ;;  %v735_v54 = vmul.f32 %v5485_v35, %v667_v15  ;;  %v736_v62 = vmul.f32 %v5483_v60, %v669_v6  ;;  %v822_v57 = vor.u32 %v820_v12, %v5422_v2  ;;  %v4647_v15 = vld [vmem:[%s5196_s12 + $0x78] sm:$0xff]  }
 0x126   : > { %4416 = vmatmul.msk.bf16.gmra.mxu2 %vm892_vm3, %v843_v61  ;;  %v5504_v6 = vpack.c.bf16 %v730_v63, %v729_v31  ;;  %v1518_v34 = vsel %vm941_vm0, %v4439_v25, 0  ;;  %v844_v61 = vshrl.u32 %v5443_v37, 16 }
 0x127   : > { %v867_v41 = vsel %vm759_vm2, %v862_v3, %v866_v0  ;;  %v5509_v59 = vpack.c.bf16 %v736_v62, %v735_v54  ;;  %1527 = vmatpush.bf16.msrb.mxu2 %v1518_v34  ;;  %v670_v3 = vrot.slane %v5465_v20, 7 }
 0x128   : > { %4419 = vmatmul.msk.bf16.vlgmr.msra.gmra.mxu3 %vm892_vm3, %v867_v41  ;;  %v868_v41 = vshrl.u32 %v5456_v9, 16  ;;  %v846_v20 = vor.u32 %v844_v61, %v842_v56  ;;  %v4473_v56 = vld [vmem:[%s8372_s1 + $0x8] sm:$0x3] }
 0x129   : > { %1670 = vperm.xlu1 %4681, %v4921_v8   ;;  %v5497_v5 = vpop.permute.xlu1 %608  ;;  %v827_v8 = vsel %vm759_vm2, %v822_v57, %v5380_v33  ;;  %v1868_v33 = vsel %vm941_vm0, %v4456_v51, 0  ;;  %v671_v57 = vsel %vm610_vm1, %v668_v45, %v670_v3  ;;  %v2191_v45 = vsel %vm941_vm0, %v4473_v56, 0 }
 0x12a   : > { %1674 = vperm.xlu2 %4679, %v4916_v7   ;;  %1702 = vperm.xlu0 %4680, %v4980_v18   ;;  %v5502_v19 = vpop.permute.xlu2 %1199  ;;  %v848_v7 = vshll.u32 %v5504_v6, 16  ;;  %v872_v18 = vshll.u32 %v5509_v59, 16  ;;  %v672_v2 = vrot.slane %v5497_v5, 7 }
 0x12b   : > { %v5506_v48 = vpop.permute.xlu0 %1178  ;;  %1877 = vmatpush.bf16.msrb.mxu3 %v1868_v33  ;;  %2200 = vmatpush.bf16.msrb.mxu0 %v2191_v45  ;;  %v8620_v45 = vld [vmem:[#allocation2_spill] sm:$0xff] }
 0x12c   : > { %v850_v54 = vrot.slane %v848_v7, 1  ;;  %v874_v12 = vrot.slane %v872_v18, 1 }
 0x12e   : > { %4414 = vmatmul.msk.bf16.gmra.mxu1 %vm892_vm3, %v827_v8  ;;  %v851_v37 = vsel %vm759_vm2, %v846_v20, %v850_v54  ;;  %v5545_v8 = vunpack.c.l.bf16 %v4647_v15 }
 0x130   : > { %8612 = vst [vmem:[#allocation64_spill] sm:$0xff] %v5545_v8  ;;  %v737_v18 = vmul.f32 %v5545_v8, %v671_v57 }
 0x131   : > { %1682 = vperm.xlu1 %4681, %v4939_v11   ;;  %v673_v11 = vsel %vm610_vm1, %v670_v3, %v672_v2 }
 0x132   : > { %1686 = vperm.xlu2 %4679, %v4934_v10   ;;  %1714 = vperm.xlu0 %4680, %v4998_v21   ;;  %v1182_v31 = vpop.permute.xlu1 %1181  ;;  %v5530_v63 = vpop.permute.xlu2 %1208  ;;  %v5539_v10 = vunpack.c.h.bf16 %v4647_v15  ;;  %v870_v21 = vor.u32 %v868_v41, %v866_v0  ;;  %v465_v0 = vmul.f32 %v5214_v53, %v5092_v39  ;;  %v5571_v15 = vld [vmem:[%s5196_s12 + $0x80] sm:$0xff]   ;;  %v876_v41 = vshrl.u32 %v5509_v59, 16 }
 0x133   : > { %v5533_v62 = vpop.permute.xlu0 %1193  ;;  %8613 = vst [vmem:[#allocation65_spill] sm:$0xff] %v5571_v15  ;;  %v1273_v3 = vrot.slane %v1182_v31, 6  ;;  %v5585_v20 = vunpack.c.l.bf16 %v5571_v15  ;;  %v8635_v15 = vld [vmem:[#allocation47_spill] sm:$0xff] }
 0x134   : > { %8611 = vst [vmem:[#allocation63_spill] sm:$0xff] %v5539_v10  ;;  %v738_v9 = vmul.f32 %v5539_v10, %v673_v11  ;;  %v875_v7 = vsel %vm759_vm2, %v870_v21, %v874_v12  ;;  %v497_v34 = vpack.c.bf16 %v466_v44, %v465_v0  ;;  %v1271_v21 = vrot.slane %v5506_v48, 6  ;;  %v8618_v48 = vld [vmem:[#allocation8_spill] sm:$0xff] }
 0x135   : > { %8614 = vst [vmem:[#allocation66_spill] sm:$0xff] %v5585_v20  ;;  %v878_v57 = vor.u32 %v876_v41, %v874_v12  ;;  %v8619_v12 = vld [vmem:[#allocation36_spill] sm:$0xff] }
 0x136   : > { %4417 = vmatmul.msk.bf16.gmra.mxu2 %vm892_vm3, %v851_v37  ;;  %v755_v42 = vpack.c.bf16 %v738_v9, %v737_v18  ;;  %v1274_v31 = vsel %vm941_vm0, %v1271_v21, %v1273_v3  ;;  %v8615_v9 = vld [vmem:[#allocation10_spill] sm:$0xff]  ;;  %v467_v56 = vmul.f32 %v8619_v12, %v8618_v48 }
 0x137   : > { %v1368_v0 = vmul.f32 %v8619_v12, %v1274_v31 }
 0x138   : > { %4420 = vmatmul.msk.bf16.gmra.mxu3 %vm892_vm3, %v875_v7  ;;  %v880_v33 = vshll.u32 %v755_v42, 16 }
 0x139   : > { %1694 = vperm.xlu1 %4681, %v4957_v14  }
 0x13a   : > { %1698 = vperm.xlu2 %4679, %v4952_v13   ;;  %1726 = vperm.xlu0 %4680, %v5016_v24   ;;  %v5563_v25 = vpop.permute.xlu1 %1187  ;;  %v5565_v39 = vpop.permute.xlu2 %1217  ;;  %v852_v24 = vshrl.u32 %v5504_v6, 16  ;;  %v882_v11 = vrot.slane %v880_v33, 1 }
 0x13b   : > { %v5567_v51 = vpop.permute.xlu0 %1202 }
 0x13c   : > { %v883_v59 = vsel %vm759_vm2, %v878_v57, %v882_v11 }
 0x13e   : > { %4423 = vmatmul.msk.bf16.vlgmr.msrb.gmra.mxu1 %vm892_vm3, %v497_v34 }
 0x141   : > { %1706 = vperm.xlu1 %4681, %v4975_v17   ;;  %v854_v17 = vor.u32 %v852_v24, %v850_v54  ;;  %v8616_v54 = vld [vmem:[#allocation35_spill] sm:$0xff] }
 0x142   : > { %1710 = vperm.xlu2 %4679, %v4970_v16   ;;  %1738 = vperm.xlu0 %4680, %v5034_v27   ;;  %v5576_v13 = vpop.permute.xlu1 %1196  ;;  %v5578_v14 = vpop.permute.xlu2 %1226  ;;  %v1270_v16 = vrot.slane %v5390_v29, 6  ;;  %v1275_v27 = vrot.slane %v5430_v43, 6  ;;  %v468_v7 = vmul.f32 %v8616_v54, %v8615_v9  ;;  %v739_v29 = vmul.f32 %v5585_v20, %v672_v2  ;;  %v8634_v20 = vld [vmem:[#allocation13_spill] sm:$0xff] }
 0x143   : > { %v5581_v61 = vpop.permute.xlu0 %1211  ;;  %v859_v6 = vsel %vm759_vm2, %v854_v17, %v5475_v38  ;;  %v8617_v38 = vld [vmem:[#allocation3_spill] sm:$0xff] }
 0x144   : > { %v1276_v37 = vsel %vm941_vm0, %v1273_v3, %v1275_v27  ;;  %v1272_v43 = vsel %vm941_vm0, %v1270_v16, %v1271_v21  ;;  %v498_v34 = vpack.c.bf16 %v468_v7, %v467_v56  ;;  %v1366_v33 = vmul.f32 %v5214_v53, %v1270_v16  ;;  %v8623_v7 = vld [vmem:[#allocation4_spill] sm:$0xff] }
 0x145   : > { %v1369_v44 = vmul.f32 %v8616_v54, %v1276_v37  ;;  %v1367_v24 = vmul.f32 %v5216_v40, %v1272_v43  ;;  %v756_v3 = vpack.c.bf16 %v739_v29, %v739_v29  ;;  %v1277_v40 = vrot.slane %v5563_v25, 6  ;;  %v8624_v25 = vld [vmem:[#allocation38_spill] sm:$0xff]  ;;  %v8625_v43 = vld [vmem:[#allocation5_spill] sm:$0xff]  ;;  %v5651_v56 = vld [vmem:[%s8373_s2 + $0xd0] sm:$0xff] }
 0x146   : > { %4418 = vmatmul.msk.bf16.gmra.mxu2 %vm892_vm3, %v859_v6  ;;  %v469_v29 = vmul.f32 %v8624_v25, %v8623_v7 }
 0x147   : > { %v1400_v41 = vpack.c.bf16 %v1369_v44, %v1368_v0  ;;  %v1399_v17 = vpack.c.bf16 %v1367_v24, %v1366_v33  ;;  %v888_v21 = vshll.u32 %v756_v3, 16  ;;  %v8416_v0 = vmov 5  }
 0x148   : > { %4421 = vmatmul.msk.bf16.gmra.mxu3 %vm892_vm3, %v883_v59  ;;  %v1279_v59 = vrot.slane %v5467_v55, 6  ;;  %v5643_v55 = vld [vmem:[%s8373_s2 + $0xc8] sm:$0xff] }
 0x149   : > { %1718 = vperm.xlu1 %4681, %v8617_v38   ;;  %v1437_v53 = vrot.slane %v1400_v41, 1  ;;  %v1436_v37 = vrot.slane %v1399_v17, 1  ;;  %v8626_v38 = vld [vmem:[#allocation39_spill] sm:$0xff]  ;;  %v8421_v41 = vrot.slane %v5576_v13, 6  ;;  %v5672_v17 = vld [vmem:[%s8373_s2 + $0xe0] sm:$0xff] }
 0x14a   : > { %1722 = vperm.xlu2 %4679, %v8620_v45   ;;  %1750 = vperm.xlu0 %4680, %v5052_v30   ;;  %v5610_v18 = vpop.permute.xlu1 %1205  ;;  %v5612_v5 = vpop.permute.xlu2 %1235  ;;  %v884_v30 = vshrl.u32 %v755_v42, 16 }
 0x14b   : > { %8621 = vst [vmem:[#allocation10_spill] sm:$0xff] %v5612_v5  ;;  %v5614_v2 = vpop.permute.xlu0 %1220  ;;  %v1438_v42 = vsel %vm1435_vm4, %v1436_v37, %v1437_v53  ;;  %v1281_v37 = vrot.slane %v5533_v62, 6  ;;  %v471_v5 = vmul.f32 %v8635_v15, %v8634_v20 }
 0x14c   : > { %v886_v31 = vor.u32 %v884_v30, %v882_v11  ;;  %v470_v11 = vmul.f32 %v8626_v38, %v8625_v43  ;;  %v8631_v43 = vld [vmem:[#allocation37_spill] sm:$0xff] }
 0x14e   : > { %4424 = vmatmul.msk.bf16.gmra.mxu1 %vm892_vm3, %v498_v34  ;;  %v5662_v34 = vld [vmem:[%s8373_s2 + $0x8] sm:$0xff]  ;;  %v499_v24 = vpack.c.bf16 %v470_v11, %v469_v29  ;;  %v2018_v11 = vshll.u32 %v8631_v43, 16 }
 0x151   : > { %1730 = vperm.xlu1 %4681, %v5011_v23   ;;  %v890_v23 = vrot.slane %v888_v21, 1  ;;  %v5678_v21 = vld [vmem:[%s8373_s2 + $0xe8] sm:$0xff] }
 0x152   : > { %1734 = vperm.xlu2 %4679, %v5006_v22   ;;  %1762 = vperm.xlu0 %4680, %v5065_v32   ;;  %v5622_v57 = vpop.permute.xlu1 %1214  ;;  %v5624_v6 = vpop.permute.xlu2 %1244  ;;  %v1278_v22 = vsel %vm941_vm0, %v1275_v27, %v1277_v40  ;;  %v1280_v32 = vsel %vm941_vm0, %v1277_v40, %v1279_v59 }
 0x153   : > { %v5627_v16 = vpop.permute.xlu0 %1229  ;;  %v891_v9 = vsel %vm759_vm2, %v886_v31, %v890_v23  ;;  %v1370_v27 = vmul.f32 %v8624_v25, %v1278_v22  ;;  %v1371_v48 = vmul.f32 %v8626_v38, %v1280_v32  ;;  %v5691_v23 = vld [vmem:[%s8373_s2 + $0x30] sm:$0xff]  ;;  %v8630_v22 = vld [vmem:[#allocation34_spill] sm:$0xff] }
 0x154   : > { %8622 = vst [vmem:[#allocation3_spill] sm:$0xff] %v5627_v16  ;;  %v2013_v32 = vshll.u32 %v8630_v22, 16  ;;  %v2011_v7 = vshrl.u32 %v8630_v22, 16  ;;  %v5711_v22 = vrot.slane %v2018_v11, 1 }
 0x155   : > { %v1401_v3 = vpack.c.bf16 %v1371_v48, %v1370_v27  ;;  %8629 = vst [vmem:[#allocation4_spill] sm:$0xff] %v5691_v23  ;;  %v1282_v27 = vsel %vm941_vm0, %v1279_v59, %v1281_v37 }
 0x156   : > { %4440 = vmatmul.msk.bf16.vlgmr.msrb.gmra.mxu2 %vm892_vm3, %v1438_v42  ;;  %v2015_v29 = vrot.slane %v2013_v32, 1  ;;  %v1372_v59 = vmul.f32 %v8635_v15, %v1282_v27 }
 0x157   : > { %v5685_v31 = vrot.slane %v1401_v3, 1  ;;  %v8633_v3 = vld [vmem:[#allocation46_spill] sm:$0xff] }
 0x158   : > { %4422 = vmatmul.msk.bf16.gmra.mxu3 %vm892_vm3, %v891_v9  ;;  %v1284_v9 = vsel %vm941_vm0, %v1281_v37, %v8421_v41  ;;  %v2016_v48 = vor.u32 %v2015_v29, %v2011_v7  ;;  %v8637_v37 = vmov 5   ;;  %v5732_v29 = vld [vmem:[%s8373_s2 + $0x48] sm:$0xff] }
 0x159   : > { %1742 = vperm.xlu1 %4681, %v5643_v55   ;;  %v1440_v62 = vsel %vm1435_vm4, %v1437_v53, %v5685_v31  ;;  %v1373_v41 = vmul.f32 %v8633_v3, %v1284_v9  ;;  %v5716_v53 = vld [vmem:[%s8373_s2 + $0xf8] sm:$0xff]  ;;  %v5726_v9 = vld [vmem:[%s8373_s2] sm:$0xff] }
 0x15a   : > { %1746 = vperm.xlu2 %4679, %v5651_v56   ;;  %4683 = vset.pattern.permute.xlu0 %v8416_v0  ;;  %v5655_v44 = vpop.permute.xlu1 %1223  ;;  %v5657_v45 = vpop.permute.xlu2 %1253  ;;  %8636 = vst [vmem:[#allocation5_spill] sm:$0xff] %v5716_v53  ;;  %v2021_v7 = vsel %vm759_vm2, %v2016_v48, %v5711_v22 }
 0x15b   : > { %2318 = vperm.xlu0 %4683, %v5662_v34   ;;  %v5665_v33 = vpop.permute.xlu0 %1238  ;;  %8638 = vst [vmem:[#allocation34_spill] sm:$0xff] %v5726_v9  ;;  %v1402_v48 = vpack.c.bf16 %v1373_v41, %v1372_v59  ;;  %4474 = vmatmul.msk.bf16.vlgmr.msrb.gmra.mxu0 %vm892_vm3, %v2021_v7  ;;  %v1285_v7 = vrot.slane %v5502_v19, 6  ;;  %v5774_v19 = vld [vmem:[%s8373_s2 + $0x10] sm:$0xff] }
 0x15c   : > { %8627 = vst [vmem:[#allocation8_spill] sm:$0xff] %v5665_v33 }
 0x15d   : > { %v5756_v41 = vrot.slane %v1402_v48, 1  ;;  %8639 = vst [vmem:[#allocation37_spill] sm:$0xff] %v5774_v19 }
 0x15e   : > { %4425 = vmatmul.msk.bf16.gmra.mxu1 %vm892_vm3, %v499_v24  ;;  %v8632_v24 = vld [vmem:[#allocation12_spill] sm:$0xff] }
 0x15f   : > { %v472_v0 = vmul.f32 %v8633_v3, %v8632_v24  ;;  %v1315_v24 = vrot.slane %v5624_v6, 6  ;;  %v4524_v6 = vld [vmem:[%s8372_s1 + $0xe] sm:$0x3] }
 0x160   : > { %v3555_v59 = vsel %vm941_vm0, %v4524_v6, 0  ;;  %v5788_v6 = vld [vmem:[%s8373_s2 + $0x60] sm:$0xff] }
 0x161   : > { %1754 = vperm.xlu1 %4681, %v5672_v17   ;;  %v500_v27 = vpack.c.bf16 %v472_v0, %v471_v5  ;;  %v4507_v5 = vld [vmem:[%s8372_s1 + $0xc] sm:$0x3]  ;;  %v1321_v0 = vrot.slane %v5657_v45, 6  ;;  %3564 = vmatpush.bf16.msra.mxu3 %v3555_v59  ;;  %8641 = vst [vmem:[#allocation13_spill] sm:$0xff] %v5788_v6  ;;  %v8642_v59 = vrot.slane %v5576_v13, 6 }
 0x162   : > { %1758 = vperm.xlu2 %4679, %v5678_v21   ;;  %v5681_v30 = vpop.permute.xlu1 %1232  ;;  %v5683_v40 = vpop.permute.xlu2 %1262 }
 0x163   : > { %8628 = vst [vmem:[#allocation2_spill] sm:$0xff] %v5681_v30  ;;  %2333 = vperm.xlu0 %4683, %v5691_v23   ;;  %v5694_v42 = vpop.permute.xlu0 %1247  ;;  %v8645_v30 = vld [vmem:[#allocation42_spill] sm:$0xff] }
 0x164   : > { %v1317_v58 = vrot.slane %v5694_v42, 6  ;;  %v3007_v42 = vsel %vm941_vm0, %v4507_v5, 0  ;;  %v1442_v5 = vsel %vm1435_vm4, %v5685_v31, %v5756_v41  ;;  %v8646_v31 = vrot.slane %v5567_v51, 6 }
 0x165   : > { %3016 = vmatpush.bf16.msra.mxu2 %v3007_v42 }
 0x166   : > { %4441 = vmatmul.msk.bf16.gmra.mxu2 %vm892_vm3, %v1440_v62 }
 0x169   : > { %1766 = vperm.xlu1 %4681, %v5716_v53  }
 0x16a   : > { %4682 = vset.pattern.permute.xlu2 %v8637_v37  ;;  %v1242_v32 = vpop.permute.xlu1 %1241 }
 0x16b   : > { %v1313_v20 = vrot.slane %v1242_v32, 6  ;;  %2315 = vperm.xlu2 %4682, %v5726_v9   ;;  %2342 = vperm.xlu0 %4683, %v5732_v29   ;;  %v5735_v62 = vpop.permute.xlu0 %1256  ;;  %v5737_v11 = vpop.permute.xlu2 %1642  ;;  %v8427_v32 = vrot.slane %v5665_v33, 6 }
 0x16c   : > { %v8428_v49 = vrot.slane %v5735_v62, 6 }
 0x16d   : > { %v1314_v16 = vsel %vm941_vm0, %v8427_v32, %v1313_v20  ;;  %v1316_v9 = vsel %vm941_vm0, %v1313_v20, %v1315_v24  ;;  %v1318_v20 = vsel %vm941_vm0, %v1315_v24, %v1317_v58 }
 0x16e   : > { %4426 = vmatmul.msk.bf16.gmra.mxu1 %vm892_vm3, %v500_v27  ;;  %v4490_v27 = vld [vmem:[%s8372_s1 + $0xa] sm:$0x3]  ;;  %v1388_v32 = vmul.f32 %v5477_v4, %v1314_v16  ;;  %v1389_v45 = vmul.f32 %v5458_v52, %v1316_v9  ;;  %v1324_v48 = vsel %vm941_vm0, %v1321_v0, %v8428_v49  ;;  %v5782_v9 = vld [vmem:[%s8373_s2 + $0x18] sm:$0xff] }
 0x16f   : > { %v2657_v24 = vsel %vm941_vm0, %v4490_v27, 0  ;;  %8640 = vst [vmem:[#allocation12_spill] sm:$0xff] %v5782_v9  ;;  %v1286_v27 = vsel %vm941_vm0, %v8642_v59, %v1285_v7  ;;  %v1393_v52 = vmul.f32 %v5434_v1, %v1324_v48  ;;  %v1288_v48 = vsel %vm941_vm0, %v1285_v7, %v8646_v31  ;;  %v5828_v7 = vld [vmem:[%s8373_s2 + $0x20] sm:$0xff] }
 0x170   : > { %2666 = vmatpush.bf16.msra.mxu1 %v2657_v24  ;;  %v8648_v24 = vld [vmem:[#allocation41_spill] sm:$0xff] }
 0x171   : > { %4684 = vset.pattern.permute.xlu1 %v8637_v37 }
 0x172   : > { %2321 = vperm.xlu1 %4684, %v5774_v19   ;;  %v1251_v37 = vpop.permute.xlu1 %1250  ;;  %v1410_v19 = vpack.c.bf16 %v1389_v45, %v1388_v32  ;;  %v8647_v45 = vld [vmem:[#allocation6_spill] sm:$0xff] }
 0x173   : > { %v1319_v16 = vrot.slane %v1251_v37, 6  ;;  %2324 = vperm.xlu2 %4682, %v5782_v9   ;;  %2351 = vperm.xlu0 %4683, %v5788_v6   ;;  %v5791_v42 = vpop.permute.xlu0 %1265  ;;  %v1390_v37 = vmul.f32 %v5432_v36, %v1318_v20  ;;  %v2022_v9 = vshrl.u32 %v8631_v43, 16  ;;  %v8643_v20 = vld [vmem:[#allocation44_spill] sm:$0xff] }
 0x174   : > { %v5797_v49 = vpop.permute.xlu2 %1654  ;;  %v2026_v36 = vshll.u32 %v8643_v20, 16  ;;  %v8644_v6 = vld [vmem:[#allocation16_spill] sm:$0xff] }
 0x175   : > { %v1320_v4 = vsel %vm941_vm0, %v1317_v58, %v1319_v16  ;;  %v1322_v33 = vsel %vm941_vm0, %v1319_v16, %v1321_v0  ;;  %v474_v53 = vmul.f32 %v8645_v30, %v8644_v6  ;;  %v4541_v58 = vld [vmem:[%s8372_s1 + $0x10] sm:$0x3]  ;;  %v473_v16 = vmul.f32 %v8648_v24, %v8647_v45 }
 0x176   : > { %v1391_v13 = vmul.f32 %v5424_v47, %v1320_v4  ;;  %v1392_v59 = vmul.f32 %v5418_v28, %v1322_v33  ;;  %4442 = vmatmul.msk.bf16.gmra.mxu2 %vm892_vm3, %v1442_v5  ;;  %v2024_v4 = vor.u32 %v2022_v9, %v5711_v22  ;;  %v4021_v33 = vsel %vm941_vm0, %v4541_v58, 0 }
 0x177   : > { %v5820_v43 = vrot.slane %v2026_v36, 1  ;;  %v1374_v6 = vmul.f32 %v8648_v24, %v1286_v27  ;;  %4030 = vmatpush.bf16.msra.mxu0 %v4021_v33  ;;  %v5833_v5 = vrot.slane %v1410_v19, 1  ;;  %v1769_v27 = vmul.f32 %v8619_v12, %v5737_v11  ;;  %v5849_v19 = vld [vmem:[%s8373_s2 + $0x78] sm:$0xff] }
 0x178   : > { %v1411_v32 = vpack.c.bf16 %v1391_v13, %v1390_v37  ;;  %v1412_v0 = vpack.c.bf16 %v1393_v52, %v1392_v59  ;;  %v1375_v37 = vmul.f32 %v8645_v30, %v1288_v48  ;;  %v5843_v59 = vld [vmem:[%s8373_s2 + $0x28] sm:$0xff]  ;;  %v501_v48 = vpack.c.bf16 %v474_v53, %v473_v16 }
 0x179   : > { %v2029_v36 = vsel %vm759_vm2, %v2024_v4, %v5820_v43  ;;  %8649 = vst [vmem:[#allocation44_spill] sm:$0xff] %v5833_v5  ;;  %v1329_v53 = vrot.slane %v5791_v42, 6  ;;  %v8654_v16 = vrot.slane %v5735_v62, 6  ;;  %v5883_v62 = vld [vmem:[%s8373_s2 + $0x38] sm:$0xff] }
 0x17a   : > { %2327 = vperm.xlu1 %4684, %v5828_v7   ;;  %v1260_v22 = vpop.permute.xlu1 %1259  ;;  %v1459_v52 = vrot.slane %v1411_v32, 1  ;;  %v5835_v9 = vrot.slane %v1412_v0, 1  ;;  %4475 = vmatmul.msk.bf16.gmra.mxu0 %vm892_vm3, %v2029_v36  ;;  %v1327_v32 = vrot.slane %v5683_v40, 6  ;;  %v1403_v45 = vpack.c.bf16 %v1375_v37, %v1374_v6 }
 0x17b   : > { %v1325_v13 = vrot.slane %v1260_v22, 6  ;;  %2330 = vperm.xlu2 %4682, %v5843_v59   ;;  %2360 = vperm.xlu0 %4683, %v5849_v19   ;;  %v5852_v31 = vpop.f32.mrf.mxu1 }
 0x17c   : > { %8650 = vst [vmem:[#allocation16_spill] sm:$0xff] %v5835_v9  ;;  %v5854_v58 = vpop.permute.xlu2 %1662  ;;  %v1647_v11 = vpop.permute.xlu0 %1646  ;;  %v5859_v4 = vsel %vm1435_vm4, %v5833_v5, %v1459_v52  ;;  %v5863_v33 = vsel %vm1435_vm4, %v1459_v52, %v5835_v9  ;;  %v5875_v52 = vrot.slane %v1403_v45, 1  ;;  %v1330_v40 = vsel %vm941_vm0, %v1327_v32, %v1329_v53 }
 0x17d   : > { %8651 = vst [vmem:[#allocation6_spill] sm:$0xff] %v5852_v31  ;;  %v1770_v0 = vmul.f32 %v8616_v54, %v1647_v11  ;;  %v1326_v22 = vsel %vm941_vm0, %v8654_v16, %v1325_v13  ;;  %v1328_v36 = vsel %vm941_vm0, %v1325_v13, %v1327_v32  ;;  %v5898_v13 = vld [vmem:[%s8373_s2 + $0x90] sm:$0xff]  ;;  %v1396_v16 = vmul.f32 %v5545_v8, %v1330_v40  ;;  %v8660_v40 = vld [vmem:[#allocation15_spill] sm:$0xff] }
 0x17e   : > { %8652 = vst [vmem:[#allocation67_spill] sm:$0xff] %v5859_v4  ;;  %4427 = vmatmul.msk.bf16.gmra.mxu1 %vm892_vm3, %v501_v48  ;;  %v1289_v4 = vrot.slane %v5610_v18, 6  ;;  %v1394_v6 = vmul.f32 %v5485_v35, %v1326_v22  ;;  %v1395_v42 = vmul.f32 %v5483_v60, %v1328_v36  ;;  %v1444_v36 = vsel %vm1435_vm4, %v5756_v41, %v5875_v52  ;;  %v8662_v54 = vld [vmem:[#allocation7_spill] sm:$0xff] }
 0x17f   : > { %8653 = vst [vmem:[#allocation68_spill] sm:$0xff] %v5863_v33  ;;  %v1801_v31 = vpack.c.bf16 %v1770_v0, %v1769_v27  ;;  %v5892_v27 = vld [vmem:[%s8373_s2 + $0x40] sm:$0xff]  ;;  %v8657_v0 = vrot.slane %v5567_v51, 6  ;;  %v2030_v9 = vshrl.u32 %v8643_v20, 16  ;;  %v8659_v51 = vrot.slane %v5530_v63, 6 }
 0x180   : > { %v1413_v5 = vpack.c.bf16 %v1395_v42, %v1394_v6 }
 0x181   : > { %4457 = vmatmul.msk.bf16.vlgmr.msrb.gmra.mxu3 %vm892_vm3, %v1801_v31  ;;  %v1290_v45 = vsel %vm941_vm0, %v8657_v0, %v1289_v4  ;;  %v1292_v0 = vsel %vm941_vm0, %v1289_v4, %v8659_v51  ;;  %v5935_v4 = vld [vmem:[%s8373_s2 + $0x50] sm:$0xff] }
 0x182   : > { %2336 = vperm.xlu1 %4684, %v5883_v62   ;;  %v5886_v37 = vpop.permute.xlu1 %1268 }
 0x183   : > { %8655 = vst [vmem:[#allocation69_spill] sm:$0xff] %v5886_v37  ;;  %v8446_v18 = vrot.slane %v5886_v37, 6  ;;  %2339 = vperm.xlu2 %4682, %v5892_v27   ;;  %2369 = vperm.xlu0 %4683, %v5898_v13   ;;  %v5901_v31 = vpop.f32.mrf.mxu1  ;;  %v8661_v37 = vld [vmem:[#allocation45_spill] sm:$0xff] }
 0x184   : > { %8656 = vst [vmem:[#allocation70_spill] sm:$0xff] %v5901_v31  ;;  %v5904_v11 = vpop.permute.xlu2 %1674  ;;  %v5906_v32 = vpop.permute.xlu0 %1666  ;;  %v8658_v31 = vld [vmem:[#allocation40_spill] sm:$0xff]  ;;  %v1376_v20 = vmul.f32 %v8661_v37, %v1290_v45 }
 0x185   : > { %v1332_v22 = vsel %vm941_vm0, %v1329_v53, %v8446_v18  ;;  %v2034_v33 = vshll.u32 %v8658_v31, 16  ;;  %v475_v53 = vmul.f32 %v8661_v37, %v8660_v40  ;;  %v2032_v18 = vor.u32 %v2030_v9, %v5820_v43  ;;  %8664 = vst [vmem:[#allocation40_spill] sm:$0xff] %v5935_v4  ;;  %v5952_v9 = vld [vmem:[%s8373_s2 + $0xa8] sm:$0xff] }
 0x186   : > { %v1397_v48 = vmul.f32 %v5539_v10, %v1332_v22  ;;  %4443 = vmatmul.msk.bf16.gmra.mxu2 %vm892_vm3, %v1444_v36  ;;  %v8663_v22 = vld [vmem:[#allocation43_spill] sm:$0xff]  ;;  %v5939_v31 = vrot.slane %v1413_v5, 1 }
 0x187   : > { %v2036_v47 = vrot.slane %v2034_v33, 1  ;;  %v476_v12 = vmul.f32 %v8663_v22, %v8662_v54  ;;  %v1377_v6 = vmul.f32 %v8663_v22, %v1292_v0  ;;  %v5946_v54 = vld [vmem:[%s8373_s2 + $0x58] sm:$0xff] }
 0x188   : > { %v1414_v41 = vpack.c.bf16 %v1397_v48, %v1396_v16  ;;  %8665 = vst [vmem:[#allocation15_spill] sm:$0xff] %v5939_v31  ;;  %v1772_v48 = vmul.f32 %v8626_v38, %v5797_v49  ;;  %v5975_v49 = vld [vmem:[%s8373_s2 + $0x68] sm:$0xff]  ;;  %v6010_v38 = vpop.f32.mrf.mxu0 }
 0x189   : > { %v2037_v42 = vsel %vm759_vm2, %v2032_v18, %v2036_v47  ;;  %8667 = vst [vmem:[#allocation71_spill] sm:$0xff] %v5946_v54  ;;  %v502_v5 = vpack.c.bf16 %v476_v12, %v475_v53  ;;  %v1404_v12 = vpack.c.bf16 %v1377_v6, %v1376_v20  ;;  %v4770_v20 = vld [vmem:[%s8373_s2 + $0xc0] sm:$0xff] }
 0x18a   : > { %2345 = vperm.xlu1 %4684, %v5935_v4   ;;  %v5941_v43 = vrot.slane %v1414_v41, 1  ;;  %4476 = vmatmul.msk.bf16.gmra.mxu0 %vm892_vm3, %v2037_v42  ;;  %8670 = vst [vmem:[#allocation74_spill] sm:$0xff] %v5975_v49  ;;  %v5984_v41 = vld [vmem:[%s8373_s2 + $0x70] sm:$0xff] }
 0x18b   : > { %2348 = vperm.xlu2 %4682, %v5946_v54   ;;  %2378 = vperm.xlu0 %4683, %v5952_v9   ;;  %v1651_v33 = vpop.permute.xlu1 %1650  ;;  %v5955_v18 = vpop.f32.mrf.mxu1  ;;  %v5978_v40 = vrot.slane %v1404_v12, 1  ;;  %8671 = vst [vmem:[#allocation75_spill] sm:$0xff] %v5984_v41  ;;  %v4772_v12 = vld [vmem:[%s5196_s12 + $0x28] sm:$0xff]  }
 0x18c   : > { %8666 = vst [vmem:[#allocation7_spill] sm:$0xff] %v5941_v43  ;;  %v1771_v45 = vmul.f32 %v8624_v25, %v1651_v33  ;;  %v5960_v16 = vpop.permute.xlu2 %1686  ;;  %v5962_v36 = vpop.permute.xlu0 %1678  ;;  %v5968_v51 = vsel %vm1435_vm4, %v5939_v31, %v5941_v43  ;;  %v2042_v53 = vshll.u32 %v4772_v12, 16  ;;  %v8675_v31 = vld [vmem:[#allocation18_spill] sm:$0xff]  ;;  %v8679_v25 = vrot.slane %v5530_v63, 6  ;;  %v6029_v63 = vld [vmem:[%s8373_s2 + $0x88] sm:$0xff] }
 0x18d   : > { %8668 = vst [vmem:[#allocation72_spill] sm:$0xff] %v5955_v18  ;;  %v1446_v43 = vsel %vm1435_vm4, %v5875_v52, %v5978_v40 }
 0x18e   : > { %8669 = vst [vmem:[#allocation73_spill] sm:$0xff] %v5968_v51  ;;  %v1802_v0 = vpack.c.bf16 %v1772_v48, %v1771_v45  ;;  %4428 = vmatmul.msk.bf16.gmra.mxu1 %vm892_vm3, %v502_v5  ;;  %v1293_v48 = vrot.slane %v5581_v61, 6  ;;  %v4771_v45 = vld [vmem:[%s5196_s12 + $0x20] sm:$0xff]   ;;  %v8674_v51 = vrot.slane %v5622_v57, 6  ;;  %v2044_v18 = vrot.slane %v2042_v53, 1  ;;  %v8677_v61 = vld [vmem:[#allocation19_spill] sm:$0xff] }
 0x18f   : > { %8682 = vst [vmem:[#allocation78_spill] sm:$0xff] %v6029_v63 }
 0x190   : > { %v1294_v52 = vsel %vm941_vm0, %v8679_v25, %v1293_v48  ;;  %v4775_v25 = vld [vmem:[%s8373_s2 + $0xd8] sm:$0xff] }
 0x191   : > { %4458 = vmatmul.msk.bf16.gmra.mxu3 %vm892_vm3, %v1802_v0  ;;  %v2038_v0 = vshrl.u32 %v4771_v45, 16 }
 0x192   : > { %2354 = vperm.xlu1 %4684, %v5975_v49   ;;  %v8678_v49 = vld [vmem:[#allocation49_spill] sm:$0xff] }
 0x193   : > { %2357 = vperm.xlu2 %4682, %v5984_v41   ;;  %2387 = vperm.xlu0 %4683, %v4770_v20   ;;  %v1659_v6 = vpop.permute.xlu1 %1658  ;;  %v5990_v42 = vpop.f32.mrf.mxu1  ;;  %v1296_v20 = vsel %vm941_vm0, %v1293_v48, %v8674_v51  ;;  %v8676_v41 = vld [vmem:[#allocation48_spill] sm:$0xff]  ;;  %v477_v45 = vmul.f32 %v8678_v49, %v8677_v61  ;;  %v1378_v48 = vmul.f32 %v8678_v49, %v1294_v52 }
 0x194   : > { %8672 = vst [vmem:[#allocation76_spill] sm:$0xff] %v5990_v42  ;;  %v5992_v33 = vpop.permute.xlu2 %1698  ;;  %v5994_v5 = vpop.permute.xlu0 %1690  ;;  %v2040_v42 = vor.u32 %v2038_v0, %v2036_v47  ;;  %v1379_v51 = vmul.f32 %v8676_v41, %v1296_v20  ;;  %v6022_v47 = vld [vmem:[%s8373_s2 + $0x80] sm:$0xff]  ;;  %v1774_v20 = vmul.f32 %v8633_v3, %v5854_v58 }
 0x195   : > { %8673 = vst [vmem:[#allocation77_spill] sm:$0xff] %v5992_v33  ;;  %v478_v33 = vmul.f32 %v8676_v41, %v8675_v31  ;;  %v1773_v31 = vmul.f32 %v8635_v15, %v1659_v6  ;;  %v6060_v58 = vld [vmem:[%s8373_s2 + $0xa0] sm:$0xff] }
 0x196   : > { %4444 = vmatmul.msk.bf16.gmra.mxu2 %vm892_vm3, %v1446_v43  ;;  %v2045_v54 = vsel %vm759_vm2, %v2040_v42, %v2044_v18  ;;  %8681 = vst [vmem:[#allocation19_spill] sm:$0xff] %v6022_v47  ;;  %v1405_v61 = vpack.c.bf16 %v1379_v51, %v1378_v48  ;;  %v1297_v48 = vrot.slane %v5565_v39, 6 }
 0x197   : > { %v503_v42 = vpack.c.bf16 %v478_v33, %v477_v45  ;;  %v6054_v45 = vld [vmem:[%s8373_s2 + $0x98] sm:$0xff]  ;;  %8687 = vst [vmem:[#allocation83_spill] sm:$0xff] %v6060_v58 }
 0x198   : > { %8686 = vst [vmem:[#allocation82_spill] sm:$0xff] %v6054_v45 }
 0x199   : > { %v6017_v4 = vpop.f32.mrf.mxu2 }
 0x19a   : > { %8680 = vst [vmem:[#allocation18_spill] sm:$0xff] %v6017_v4  ;;  %2363 = vperm.xlu1 %4684, %v6022_v47   ;;  %4477 = vmatmul.msk.bf16.gmra.mxu0 %vm892_vm3, %v2045_v54  ;;  %v1803_v4 = vpack.c.bf16 %v1774_v20, %v1773_v31  ;;  %v1447_v54 = vrot.slane %v1405_v61, 1  ;;  %v1299_v20 = vrot.slane %v5614_v2, 6  ;;  %v2046_v61 = vshrl.u32 %v4772_v12, 16  ;;  %v8693_v12 = vld [vmem:[#allocation9_spill] sm:$0xff] }
 0x19b   : > { %2366 = vperm.xlu2 %4682, %v6029_v63   ;;  %2396 = vperm.xlu0 %4683, %v4775_v25   ;;  %v1671_v43 = vpop.permute.xlu1 %1670  ;;  %v6035_v53 = vpop.f32.mrf.mxu1  ;;  %v479_v63 = vmul.f32 %v5357_v46, %v8693_v12 }
 0x19c   : > { %8683 = vst [vmem:[#allocation79_spill] sm:$0xff] %v6035_v53  ;;  %v6038_v0 = vpop.permute.xlu2 %1710  ;;  %v6040_v6 = vpop.permute.xlu0 %1702  ;;  %v1300_v39 = vsel %vm941_vm0, %v1297_v48, %v1299_v20 }
 0x19d   : > { %8684 = vst [vmem:[#allocation80_spill] sm:$0xff] %v6038_v0  ;;  %v6047_v25 = vpop.f32.mrf.mxu0  ;;  %v1448_v0 = vsel %vm1435_vm4, %v5978_v40, %v1447_v54 }
 0x19e   : > { %4429 = vmatmul.msk.bf16.gmra.mxu1 %vm892_vm3, %v503_v42 }
 0x1a1   : > { %4459 = vmatmul.msk.bf16.gmra.mxu3 %vm892_vm3, %v1803_v4  ;;  %v6049_v33 = vpop.f32.mrf.mxu2  ;;  %v4778_v4 = vld [vmem:[%s8373_s2 + $0xf0] sm:$0xff] }
 0x1a2   : > { %8685 = vst [vmem:[#allocation81_spill] sm:$0xff] %v6049_v33  ;;  %2372 = vperm.xlu1 %4684, %v6054_v45   ;;  %v4779_v33 = vld [vmem:[%s5196_s12 + $0x30] sm:$0xff]   ;;  %v8692_v45 = vld [vmem:[#allocation22_spill] sm:$0xff] }
 0x1a3   : > { %2375 = vperm.xlu2 %4682, %v6060_v58   ;;  %2405 = vperm.xlu0 %4683, %v4778_v4   ;;  %v6066_v52 = vpop.permute.xlu1 %1682  ;;  %v6068_v51 = vpop.f32.mrf.mxu1  ;;  %v2050_v53 = vshll.u32 %v4779_v33, 16  ;;  %v8691_v4 = vrot.slane %v5622_v57, 6  ;;  %v4780_v57 = vld [vmem:[%s8373_s2 + $0xb0] sm:$0xff] }
 0x1a4   : > { %8688 = vst [vmem:[#allocation84_spill] sm:$0xff] %v6068_v51  ;;  %v6070_v31 = vpop.permute.xlu2 %1722  ;;  %v6072_v42 = vpop.permute.xlu0 %1714  ;;  %v2048_v51 = vor.u32 %v2046_v61, %v2044_v18  ;;  %v1776_v18 = vmul.f32 %v8645_v30, %v1671_v43 }
 0x1a5   : > { %8689 = vst [vmem:[#allocation85_spill] sm:$0xff] %v6070_v31  ;;  %v1298_v58 = vsel %vm941_vm0, %v8691_v4, %v1297_v48  ;;  %v2052_v31 = vrot.slane %v2050_v53, 1  ;;  %v4781_v53 = vld [vmem:[%s8373_s2 + $0xb8] sm:$0xff]  ;;  %v1381_v48 = vmul.f32 %v5364_v50, %v1300_v39  ;;  %v1775_v4 = vmul.f32 %v8648_v24, %v5906_v32  ;;  %v6113_v12 = vpop.f32.mrf.mxu0 }
 0x1a6   : > { %8690 = vst [vmem:[#allocation86_spill] sm:$0xff] %v6072_v42  ;;  %4445 = vmatmul.msk.bf16.gmra.mxu2 %vm892_vm3, %v1448_v0  ;;  %v480_v42 = vmul.f32 %v5364_v50, %v8692_v45  ;;  %v1380_v40 = vmul.f32 %v5357_v46, %v1298_v58  ;;  %v8467_v0 = vmov 6   ;;  %v1301_v39 = vrot.slane %v5655_v44, 6 }
 0x1a7   : > { %v2053_v2 = vsel %vm759_vm2, %v2048_v51, %v2052_v31 }
 0x1a8   : > { %v504_v51 = vpack.c.bf16 %v480_v42, %v479_v63  ;;  %v1804_v63 = vpack.c.bf16 %v1776_v18, %v1775_v4  ;;  %v1303_v18 = vrot.slane %v5578_v14, 6 }
 0x1a9   : > { %v6090_v47 = vpop.f32.mrf.mxu2 }
 0x1aa   : > { %8694 = vst [vmem:[#allocation22_spill] sm:$0xff] %v6090_v47  ;;  %2381 = vperm.xlu1 %4684, %v4780_v57   ;;  %4478 = vmatmul.msk.bf16.gmra.mxu0 %vm892_vm3, %v2053_v2  ;;  %v1406_v57 = vpack.c.bf16 %v1381_v48, %v1380_v40  ;;  %v4782_v48 = vld [vmem:[%s5196_s12 + $0x38] sm:$0xff]  }
 0x1ab   : > { %2384 = vperm.xlu2 %4682, %v4781_v53   ;;  %4686 = vset.pattern.permute.xlu0 %v8467_v0  ;;  %v6100_v45 = vpop.permute.xlu1 %1694  ;;  %v6102_v58 = vpop.f32.mrf.mxu1 }
 0x1ac   : > { %8695 = vst [vmem:[#allocation9_spill] sm:$0xff] %v6102_v58  ;;  %v6105_v61 = vpop.permute.xlu2 %1734  ;;  %2785 = vperm.xlu0 %4686, %v5662_v34   ;;  %v6108_v43 = vpop.permute.xlu0 %1726  ;;  %v6120_v34 = vrot.slane %v1406_v57, 1  ;;  %v1304_v57 = vsel %vm941_vm0, %v1301_v39, %v1303_v18 }
 0x1ad   : > { %8696 = vst [vmem:[#allocation87_spill] sm:$0xff] %v6105_v61  ;;  %v6133_v4 = vpop.f32.mrf.mxu3  ;;  %v6142_v14 = vpop.f32.mrf.mxu0 }
 0x1ae   : > { %8697 = vst [vmem:[#allocation88_spill] sm:$0xff] %v6108_v43  ;;  %4430 = vmatmul.msk.bf16.gmra.mxu1 %vm892_vm3, %v504_v51  ;;  %v2054_v51 = vshrl.u32 %v4779_v33, 16  ;;  %v1450_v44 = vsel %vm1435_vm4, %v1447_v54, %v6120_v34 }
 0x1af   : > { %8701 = vst [vmem:[#allocation92_spill] sm:$0xff] %v6133_v4  ;;  %v8704_v4 = vld [vmem:[#allocation50_spill] sm:$0xff] }
 0x1b1   : > { %4460 = vmatmul.msk.bf16.gmra.mxu3 %vm892_vm3, %v1804_v63  ;;  %v6117_v42 = vpop.f32.mrf.mxu2  ;;  %v2056_v63 = vor.u32 %v2054_v51, %v2052_v31  ;;  %v1778_v31 = vmul.f32 %v8663_v22, %v5962_v36 }
 0x1b2   : > { %8698 = vst [vmem:[#allocation89_spill] sm:$0xff] %v6117_v42  ;;  %2390 = vperm.xlu1 %4684, %v5643_v55   ;;  %v2058_v55 = vshll.u32 %v4782_v48, 16  ;;  %v8702_v42 = vld [vmem:[#allocation21_spill] sm:$0xff] }
 0x1b3   : > { %2393 = vperm.xlu2 %4682, %v5651_v56   ;;  %v6124_v32 = vpop.permute.xlu1 %1706  ;;  %v6126_v2 = vpop.f32.mrf.mxu1  ;;  %v1302_v56 = vsel %vm941_vm0, %v1299_v20, %v1301_v39  ;;  %v481_v47 = vmul.f32 %v5338_v26, %v8702_v42  ;;  %v1383_v20 = vmul.f32 %v8704_v4, %v1304_v57 }
 0x1b4   : > { %8699 = vst [vmem:[#allocation90_spill] sm:$0xff] %v6124_v32  ;;  %v1747_v53 = vpop.permute.xlu2 %1746  ;;  %2805 = vperm.xlu0 %4686, %v5691_v23   ;;  %v6129_v40 = vpop.permute.xlu0 %1738  ;;  %v2060_v0 = vrot.slane %v2058_v55, 1  ;;  %v1382_v54 = vmul.f32 %v5338_v26, %v1302_v56  ;;  %v8725_v23 = vld [vmem:[#allocation37_spill] sm:$0xff] }
 0x1b5   : > { %8700 = vst [vmem:[#allocation91_spill] sm:$0xff] %v6126_v2  ;;  %v8703_v2 = vld [vmem:[#allocation11_spill] sm:$0xff]  ;;  %v6177_v56 = vpop.f32.mrf.mxu0 }
 0x1b6   : > { %4446 = vmatmul.msk.bf16.gmra.mxu2 %vm892_vm3, %v1450_v44  ;;  %v2061_v33 = vsel %vm759_vm2, %v2056_v63, %v2060_v0  ;;  %v482_v58 = vmul.f32 %v8704_v4, %v8703_v2  ;;  %v6166_v44 = vmul.f32 %v5485_v35, %v1747_v53  ;;  %v1407_v36 = vpack.c.bf16 %v1383_v20, %v1382_v54  ;;  %v8711_v53 = vld [vmem:[#allocation5_spill] sm:$0xff]  ;;  %v8712_v63 = vld [vmem:[#allocation2_spill] sm:$0xff] }
 0x1b7   : > { %v8713_v54 = vmov 6  }
 0x1b8   : > { %v505_v51 = vpack.c.bf16 %v482_v58, %v481_v47  ;;  %8707 = vst [vmem:[#allocation50_spill] sm:$0xff] %v6166_v44  ;;  %v6182_v57 = vrot.slane %v1407_v36, 1  ;;  %v2062_v36 = vshrl.u32 %v4782_v48, 16 }
 0x1b9   : > { %v6149_v61 = vpop.f32.mrf.mxu2 }
 0x1ba   : > { %8705 = vst [vmem:[#allocation21_spill] sm:$0xff] %v6149_v61  ;;  %2399 = vperm.xlu1 %4684, %v5672_v17   ;;  %4479 = vmatmul.msk.bf16.gmra.mxu0 %vm892_vm3, %v2061_v33  ;;  %v1777_v17 = vmul.f32 %v8661_v37, %v5904_v11  ;;  %v8718_v33 = vld [vmem:[#allocation24_spill] sm:$0xff]  ;;  %v8719_v61 = vld [vmem:[#allocation51_spill] sm:$0xff] }
 0x1bb   : > { %2402 = vperm.xlu2 %4682, %v5678_v21   ;;  %v6155_v42 = vpop.permute.xlu1 %1718  ;;  %v6157_v39 = vpop.f32.mrf.mxu1  ;;  %v484_v44 = vmul.f32 %v8719_v61, %v8718_v33 }
 0x1bc   : > { %8706 = vst [vmem:[#allocation11_spill] sm:$0xff] %v6155_v42  ;;  %v6159_v55 = vpop.permute.xlu2 %1758  ;;  %2817 = vperm.xlu0 %4686, %v5732_v29   ;;  %v1751_v2 = vpop.permute.xlu0 %1750  ;;  %v1805_v47 = vpack.c.bf16 %v1778_v31, %v1777_v17 }
 0x1bd   : > { %v6169_v21 = vmul.f32 %v5483_v60, %v1751_v2  ;;  %v6174_v29 = vpop.f32.mrf.mxu3  ;;  %v8716_v2 = vld [vmem:[#allocation13_spill] sm:$0xff] }
 0x1be   : > { %4431 = vmatmul.msk.bf16.gmra.mxu1 %vm892_vm3, %v505_v51  ;;  %8709 = vst [vmem:[#allocation94_spill] sm:$0xff] %v6174_v29  ;;  %v8715_v51 = vld [vmem:[#allocation34_spill] sm:$0xff] }
 0x1bf   : > { %8708 = vst [vmem:[#allocation93_spill] sm:$0xff] %v6169_v21  ;;  %v1452_v21 = vsel %vm1435_vm4, %v6120_v34, %v6182_v57 }
 0x1c1   : > { %4461 = vmatmul.msk.bf16.gmra.mxu3 %vm892_vm3, %v1805_v47  ;;  %v6179_v11 = vpop.f32.mrf.mxu2  ;;  %v8717_v47 = vld [vmem:[#allocation3_spill] sm:$0xff] }
 0x1c2   : > { %8710 = vst [vmem:[#allocation95_spill] sm:$0xff] %v6179_v11  ;;  %2408 = vperm.xlu1 %4684, %v8711_v53   ;;  %v1305_v58 = vrot.slane %v8717_v47, 6  ;;  %v4783_v53 = vld [vmem:[%s5196_s12 + $0x40] sm:$0xff]   ;;  %v2064_v47 = vor.u32 %v2062_v36, %v2060_v0 }
 0x1c3   : > { %4685 = vset.pattern.permute.xlu2 %v8713_v54  ;;  %v6186_v20 = vpop.permute.xlu1 %1730  ;;  %v6188_v31 = vpop.f32.mrf.mxu1  ;;  %v2066_v11 = vshll.u32 %v4783_v53, 16 }
 0x1c4   : > { %8714 = vst [vmem:[#allocation5_spill] sm:$0xff] %v6186_v20  ;;  %2781 = vperm.xlu2 %4685, %v8715_v51   ;;  %2829 = vperm.xlu0 %4686, %v8716_v2   ;;  %v6192_v17 = vpop.permute.xlu0 %1762  ;;  %v8720_v20 = vld [vmem:[#allocation25_spill] sm:$0xff]  ;;  %v8721_v51 = vld [vmem:[#allocation52_spill] sm:$0xff]  ;;  %v8722_v2 = vrot.slane %v8712_v63, 6  ;;  %v1306_v35 = vsel %vm941_vm0, %v1303_v18, %v1305_v58 }
 0x1c5   : > { %v6195_v29 = vpop.permute.xlu2 %2315  ;;  %v483_v43 = vmul.f32 %v8721_v51, %v8720_v20  ;;  %v2068_v48 = vrot.slane %v2066_v11, 1  ;;  %v6211_v33 = vpop.f32.mrf.mxu3  ;;  %v1384_v18 = vmul.f32 %v8721_v51, %v1306_v35  ;;  %v8728_v11 = vld [vmem:[#allocation12_spill] sm:$0xff]  ;;  %v6254_v35 = vmul.f32 %v5539_v10, %v6159_v55  ;;  %v8734_v55 = vld [vmem:[#allocation27_spill] sm:$0xff] }
 0x1c6   : > { %v1308_v60 = vsel %vm941_vm0, %v1305_v58, %v8722_v2  ;;  %4447 = vmatmul.msk.bf16.gmra.mxu2 %vm892_vm3, %v1452_v21  ;;  %8723 = vst [vmem:[#allocation2_spill] sm:$0xff] %v6211_v33  ;;  %v1779_v2 = vmul.f32 %v8678_v49, %v6066_v52  ;;  %v1780_v52 = vmul.f32 %v8676_v41, %v5960_v16 }
 0x1c7   : > { %v1385_v42 = vmul.f32 %v8719_v61, %v1308_v60  ;;  %v2069_v34 = vsel %vm759_vm2, %v2064_v47, %v2068_v48  ;;  %v506_v20 = vpack.c.bf16 %v484_v44, %v483_v43  ;;  %v6225_v60 = vmul.f32 %v5418_v28, %v6129_v40  ;;  %v6234_v43 = vpop.f32.mrf.mxu0  ;;  %8730 = vst [vmem:[#allocation25_spill] sm:$0xff] %v6254_v35  ;;  %v8739_v35 = vld [vmem:[#allocation14_spill] sm:$0xff] }
 0x1c8   : > { %v1806_v47 = vpack.c.bf16 %v1780_v52, %v1779_v2  ;;  %v6267_v52 = vld [vmem:[%s5196_s12 + $0x48] sm:$0xff]  }
 0x1c9   : > { %v6213_v32 = vpop.f32.mrf.mxu2  ;;  %8726 = vst [vmem:[#allocation13_spill] sm:$0xff] %v6225_v60  ;;  %v1408_v36 = vpack.c.bf16 %v1385_v42, %v1384_v18  ;;  %v8740_v60 = vld [vmem:[#allocation53_spill] sm:$0xff] }
 0x1ca   : > { %8724 = vst [vmem:[#allocation34_spill] sm:$0xff] %v6213_v32  ;;  %4687 = vset.pattern.permute.xlu1 %v8713_v54  ;;  %4480 = vmatmul.msk.bf16.gmra.mxu0 %vm892_vm3, %v2069_v34 }
 0x1cb   : > { %2789 = vperm.xlu1 %4687, %v8725_v23   ;;  %v1743_v0 = vpop.permute.xlu1 %1742  ;;  %v6220_v21 = vpop.f32.mrf.mxu1  ;;  %v6247_v16 = vrot.slane %v1408_v36, 1  ;;  %v2074_v36 = vshll.u32 %v6267_v52, 16 }
 0x1cc   : > { %v6228_v58 = vmul.f32 %v5434_v1, %v1743_v0  ;;  %2793 = vperm.xlu2 %4685, %v8728_v11   ;;  %2841 = vperm.xlu0 %4686, %v5849_v19  }
 0x1cd   : > { %v6236_v44 = vpop.permute.xlu2 %2324  ;;  %v6241_v40 = vpop.permute.xlu0 %2318 }
 0x1ce   : > { %8727 = vst [vmem:[#allocation3_spill] sm:$0xff] %v6228_v58  ;;  %4432 = vmatmul.msk.bf16.gmra.mxu1 %vm892_vm3, %v506_v20  ;;  %v6256_v33 = vpop.f32.mrf.mxu3  ;;  %v8733_v20 = vld [vmem:[#allocation10_spill] sm:$0xff]  ;;  %v485_v58 = vmul.f32 %v8740_v60, %v8739_v35 }
 0x1cf   : > { %8731 = vst [vmem:[#allocation37_spill] sm:$0xff] %v6256_v33  ;;  %v1309_v2 = vrot.slane %v8733_v20, 6  ;;  %v6283_v32 = vpop.f32.mrf.mxu0  ;;  %v8737_v33 = vld [vmem:[#allocation65_spill] sm:$0xff] }
 0x1d1   : > { %4462 = vmatmul.msk.bf16.gmra.mxu3 %vm892_vm3, %v1806_v47  ;;  %v6245_v19 = vpop.f32.mrf.mxu2  ;;  %v8735_v47 = vld [vmem:[#allocation54_spill] sm:$0xff] }
 0x1d2   : > { %8729 = vst [vmem:[#allocation24_spill] sm:$0xff] %v6245_v19  ;;  %v486_v19 = vmul.f32 %v8735_v47, %v8734_v55 }
 0x1d3   : > { %2797 = vperm.xlu1 %4687, %v5828_v7   ;;  %v1755_v0 = vpop.permute.xlu1 %1754  ;;  %v6250_v34 = vpop.f32.mrf.mxu1  ;;  %v2070_v7 = vshrl.u32 %v4783_v53, 16  ;;  %v8736_v53 = vrot.slane %v8712_v63, 6 }
 0x1d4   : > { %v6259_v42 = vmul.f32 %v5545_v8, %v1755_v0  ;;  %2801 = vperm.xlu2 %4685, %v5843_v59   ;;  %2853 = vperm.xlu0 %4686, %v5898_v13   ;;  %v1454_v13 = vsel %vm1435_vm4, %v6182_v57, %v6247_v16  ;;  %v6287_v0 = vrot.slane %v2074_v36, 1  ;;  %v8741_v57 = vld [vmem:[#allocation8_spill] sm:$0xff]  ;;  %v507_v36 = vpack.c.bf16 %v486_v19, %v485_v58 }
 0x1d5   : > { %v6264_v18 = vpop.permute.xlu2 %2330  ;;  %v6275_v59 = vpop.permute.xlu0 %2333  ;;  %v1310_v20 = vsel %vm941_vm0, %v8736_v53, %v1309_v2  ;;  %v2072_v55 = vor.u32 %v2070_v7, %v2068_v48  ;;  %v8742_v8 = vrot.slane %v8741_v57, 6  ;;  %v1095_v53 = vadd.f32 %v6157_v39, %v6010_v38 }
 0x1d6   : > { %8732 = vst [vmem:[#allocation12_spill] sm:$0xff] %v6259_v42  ;;  %v8483_v54 = vrot.slane %v6275_v59, 6  ;;  %4448 = vmatmul.msk.bf16.gmra.mxu2 %vm892_vm3, %v1454_v13  ;;  %v6290_v42 = vunpack.c.h.bf16 %v8737_v33  ;;  %v8743_v13 = vrot.slane %v6264_v18, 6  ;;  %v1386_v33 = vmul.f32 %v8740_v60, %v1310_v20 }
 0x1d7   : > { %v1312_v63 = vsel %vm941_vm0, %v1309_v2, %v8742_v8  ;;  %v2077_v35 = vsel %vm759_vm2, %v2072_v55, %v6287_v0  ;;  %v1782_v8 = vmul.f32 %v5364_v50, %v6100_v45  ;;  %v1781_v45 = vmul.f32 %v5357_v46, %v5994_v5 }
 0x1d8   : > { %8738 = vst [vmem:[#allocation10_spill] sm:$0xff] %v6290_v42  ;;  %v6304_v48 = vsel %vm941_vm0, %v8743_v13, %v8483_v54  ;;  %v1387_v57 = vmul.f32 %v8735_v47, %v1312_v63  ;;  %v8744_v13 = vld [vmem:[#allocation66_spill] sm:$0xff]  ;;  %v2411_v58 = vrot.slane %v6241_v40, 6  ;;  %v6342_v40 = vpop.f32.mrf.mxu0 }
 0x1d9   : > { %v1529_v7 = vpop.f32.mrf.mxu2  ;;  %v6319_v20 = vmul.f32 %v8744_v13, %v6192_v17  ;;  %v6333_v17 = vpop.f32.mrf.mxu3  ;;  %v1807_v5 = vpack.c.bf16 %v1782_v8, %v1781_v45  ;;  %v8751_v45 = vld [vmem:[#allocation35_spill] sm:$0xff] }
 0x1da   : > { %v6311_v2 = vadd.f32 %v1529_v7, %v1095_v53  ;;  %4481 = vmatmul.msk.bf16.gmra.mxu0 %vm892_vm3, %v2077_v35  ;;  %8747 = vst [vmem:[#allocation14_spill] sm:$0xff] %v6333_v17  ;;  %v1097_v53 = vadd.f32 %v6188_v31, %v6047_v25  ;;  %v8750_v31 = vld [vmem:[#allocation36_spill] sm:$0xff]  ;;  %v8752_v17 = vld [vmem:[#allocation71_spill] sm:$0xff] }
 0x1db   : > { %2809 = vperm.xlu1 %4687, %v5883_v62   ;;  %v1767_v38 = vpop.permute.xlu1 %1766  ;;  %v6314_v39 = vpop.f32.mrf.mxu1  ;;  %8745 = vst [vmem:[#allocation27_spill] sm:$0xff] %v6319_v20  ;;  %v2410_v62 = vrot.slane %v6195_v29, 6 }
 0x1dc   : > { %v6322_v54 = vmul.f32 %v6290_v42, %v1767_v38  ;;  %2813 = vperm.xlu2 %4685, %v5892_v27   ;;  %2865 = vperm.xlu0 %4686, %v5952_v9   ;;  %v1409_v9 = vpack.c.bf16 %v1387_v57, %v1386_v33  ;;  %v8749_v38 = vld [vmem:[#allocation40_spill] sm:$0xff] }
 0x1dd   : > { %v6330_v19 = vpop.permute.xlu2 %2339  ;;  %v6338_v63 = vpop.permute.xlu0 %2342  ;;  %v2412_v7 = vsel %vm941_vm0, %v2410_v62, %v2411_v58  ;;  %v2506_v57 = vmul.f32 %v8750_v31, %v2410_v62  ;;  %v8754_v31 = vld [vmem:[#allocation60_spill] sm:$0xff] }
 0x1de   : > { %8746 = vst [vmem:[#allocation65_spill] sm:$0xff] %v6322_v54  ;;  %v8485_v27 = vrot.slane %v6330_v19, 6  ;;  %4433 = vmatmul.msk.bf16.gmra.mxu1 %vm892_vm3, %v507_v36  ;;  %v8484_v29 = vrot.slane %v6338_v63, 6  ;;  %v6355_v36 = vrot.slane %v1409_v9, 1  ;;  %v2507_v55 = vmul.f32 %v8751_v45, %v2412_v7  ;;  %v8753_v7 = vld [vmem:[#allocation26_spill] sm:$0xff] }
 0x1df   : > { %v487_v45 = vmul.f32 %v8754_v31, %v8753_v7  ;;  %v8756_v54 = vld [vmem:[#allocation38_spill] sm:$0xff]  ;;  %v8757_v31 = vld [vmem:[#allocation39_spill] sm:$0xff] }
 0x1e0   : > { %v6352_v35 = vsel %vm941_vm0, %v8485_v27, %v8484_v29  ;;  %v8490_v27 = vmov 7   ;;  %v2539_v13 = vpack.c.bf16 %v2507_v55, %v2506_v57  ;;  %v8759_v55 = vld [vmem:[#allocation17_spill] sm:$0xff]  ;;  %v8760_v57 = vld [vmem:[#allocation59_spill] sm:$0xff] }
 0x1e1   : > { %4463 = vmatmul.msk.bf16.gmra.mxu3 %vm892_vm3, %v1807_v5  ;;  %v1531_v33 = vpop.f32.mrf.mxu2  ;;  %v2415_v5 = vrot.slane %v6236_v44, 6  ;;  %v1456_v44 = vsel %vm1435_vm4, %v6247_v16, %v6355_v36  ;;  %v6388_v7 = vpop.f32.mrf.mxu3  ;;  %v1100_v16 = vadd.f32 %v6220_v21, %v6113_v12 }
 0x1e2   : > { %v6357_v8 = vadd.f32 %v1531_v33, %v1097_v53  ;;  %v2078_v53 = vshrl.u32 %v6267_v52, 16  ;;  %v6372_v33 = vld [vmem:[%s5196_s12 + $0x50] sm:$0xff]   ;;  %8755 = vst [vmem:[#allocation40_spill] sm:$0xff] %v6388_v7 }
 0x1e3   : > { %2821 = vperm.xlu1 %4687, %v8749_v38   ;;  %v6360_v25 = vpop.f32.mrf.mxu1  ;;  %v2082_v62 = vshll.u32 %v6372_v33, 16 }
 0x1e4   : > { %8748 = vst [vmem:[#allocation8_spill] sm:$0xff] %v6357_v8  ;;  %2825 = vperm.xlu2 %4685, %v8752_v17   ;;  %v2322_v29 = vpop.permute.xlu1 %2321  ;;  %4690 = vset.pattern.permute.xlu0 %v8490_v27  ;;  %v2080_v27 = vor.u32 %v2078_v53, %v6287_v0  ;;  %v6403_v0 = vpop.f32.mrf.mxu0  ;;  %v488_v53 = vmul.f32 %v8760_v57, %v8759_v55  ;;  %v8763_v57 = vld [vmem:[#allocation75_spill] sm:$0xff] }
 0x1e5   : > { %v2413_v9 = vrot.slane %v2322_v29, 6  ;;  %v6367_v20 = vpop.permute.xlu2 %2348  ;;  %3137 = vperm.xlu0 %4690, %v8725_v23   ;;  %v6378_v42 = vpop.permute.xlu0 %2351  ;;  %v6392_v8 = vrot.slane %v2082_v62, 1 }
 0x1e6   : > { %v8494_v52 = vrot.slane %v6378_v42, 6  ;;  %4449 = vmatmul.msk.bf16.gmra.mxu2 %vm892_vm3, %v1456_v44  ;;  %v1784_v44 = vmul.f32 %v8704_v4, %v6040_v6 }
 0x1e7   : > { %v2414_v29 = vsel %vm941_vm0, %v2411_v58, %v2413_v9  ;;  %v2416_v23 = vsel %vm941_vm0, %v2413_v9, %v2415_v5  ;;  %v8758_v58 = vrot.slane %v6367_v20, 6  ;;  %v2085_v12 = vsel %vm759_vm2, %v2080_v27, %v6392_v8 }
 0x1e8   : > { %v2508_v10 = vmul.f32 %v8756_v54, %v2414_v29  ;;  %v2509_v17 = vmul.f32 %v8757_v31, %v2416_v23  ;;  %v8761_v23 = vld [vmem:[#allocation74_spill] sm:$0xff]  ;;  %v2575_v54 = vrot.slane %v2539_v13, 1 }
 0x1e9   : > { %v6401_v9 = vsel %vm941_vm0, %v8758_v58, %v8494_v52  ;;  %v1534_v29 = vpop.f32.mrf.mxu2  ;;  %v508_v58 = vpack.c.bf16 %v488_v53, %v487_v45  ;;  %v8762_v52 = vld [vmem:[#allocation77_spill] sm:$0xff] }
 0x1ea   : > { %v2540_v62 = vpack.c.bf16 %v2509_v17, %v2508_v10  ;;  %v6411_v21 = vadd.f32 %v1534_v29, %v1100_v16  ;;  %v1783_v31 = vmul.f32 %v5338_v26, %v8762_v52  ;;  %4482 = vmatmul.msk.bf16.gmra.mxu0 %vm892_vm3, %v2085_v12  ;;  %v8765_v52 = vrot.slane %v6264_v18, 6 }
 0x1eb   : > { %2833 = vperm.xlu1 %4687, %v8761_v23   ;;  %v6414_v7 = vpop.f32.mrf.mxu1  ;;  %v1102_v23 = vadd.f32 %v6250_v34, %v6142_v14  ;;  %v8767_v14 = vld [vmem:[#allocation19_spill] sm:$0xff] }
 0x1ec   : > { %v2576_v55 = vrot.slane %v2540_v62, 1  ;;  %2837 = vperm.xlu2 %4685, %v8763_v57   ;;  %v2328_v6 = vpop.permute.xlu1 %2327  ;;  %v1808_v27 = vpack.c.bf16 %v1784_v44, %v1783_v31  ;;  %v8496_v44 = vmov 8   ;;  %v6447_v18 = vpop.f32.mrf.mxu0 }
 0x1ed   : > { %v2417_v10 = vrot.slane %v2328_v6, 6  ;;  %v6419_v17 = vpop.permute.xlu2 %2357  ;;  %v6423_v29 = vpop.permute.xlu0 %2360  ;;  %4693 = vset.pattern.permute.xlu0 %v8496_v44 }
 0x1ee   : > { %v8498_v16 = vrot.slane %v6419_v17, 6  ;;  %4434 = vmatmul.msk.bf16.gmra.mxu1 %vm892_vm3, %v508_v58  ;;  %v6427_v45 = vsel %vm1435_vm4, %v2575_v54, %v2576_v55  ;;  %v8495_v62 = vrot.slane %v6423_v29, 6  ;;  %3688 = vperm.xlu0 %4693, %v8728_v11  }
 0x1ef   : > { %8764 = vst [vmem:[#allocation36_spill] sm:$0xff] %v6427_v45  ;;  %v2418_v13 = vsel %vm941_vm0, %v2415_v5, %v2417_v10  ;;  %v2420_v53 = vsel %vm941_vm0, %v2417_v10, %v8765_v52  ;;  %v6450_v5 = vpop.f32.mrf.mxu3  ;;  %v8769_v52 = vld [vmem:[#allocation56_spill] sm:$0xff]  ;;  %v8775_v45 = vrot.slane %v6330_v19, 6  ;;  %v1105_v19 = vadd.f32 %v6314_v39, %v6177_v56  ;;  %v8779_v56 = vld [vmem:[#allocation90_spill] sm:$0xff] }
 0x1f0   : > { %v2510_v12 = vmul.f32 %v8635_v15, %v2418_v13  ;;  %v2511_v31 = vmul.f32 %v8633_v3, %v2420_v53  ;;  %v6444_v54 = vsel %vm941_vm0, %v8498_v16, %v8495_v62  ;;  %8766 = vst [vmem:[#allocation35_spill] sm:$0xff] %v6450_v5  ;;  %v8768_v13 = vld [vmem:[#allocation28_spill] sm:$0xff]  ;;  %v8770_v62 = vld [vmem:[#allocation78_spill] sm:$0xff]  ;;  %v8771_v16 = vld [vmem:[#allocation29_spill] sm:$0xff]  ;;  %v1785_v39 = vmul.f32 %v8721_v51, %v8779_v56 }
 0x1f1   : > { %4464 = vmatmul.msk.bf16.gmra.mxu3 %vm892_vm3, %v1808_v27  ;;  %v1536_v6 = vpop.f32.mrf.mxu2  ;;  %v490_v53 = vmul.f32 %v8769_v52, %v8768_v13  ;;  %v8772_v3 = vld [vmem:[#allocation57_spill] sm:$0xff]  ;;  %v2512_v13 = vmul.f32 %v8648_v24, %v6304_v48  ;;  %v8787_v56 = vrot.slane %v6367_v20, 6 }
 0x1f2   : > { %v2541_v58 = vpack.c.bf16 %v2511_v31, %v2510_v12  ;;  %v6452_v10 = vadd.f32 %v1536_v6, %v1102_v23  ;;  %v489_v5 = vmul.f32 %v8772_v3, %v8771_v16  ;;  %v2086_v23 = vshrl.u32 %v6372_v33, 16  ;;  %v6467_v6 = vld [vmem:[%s5196_s12 + $0x58] sm:$0xff]  }
 0x1f3   : > { %2845 = vperm.xlu1 %4687, %v8767_v14   ;;  %v1111_v34 = vpop.f32.mrf.mxu1  ;;  %v2090_v14 = vshll.u32 %v6467_v6, 16  ;;  %v8774_v33 = vrot.slane %v6275_v59, 6 }
 0x1f4   : > { %2849 = vperm.xlu2 %4685, %v8770_v62   ;;  %v6459_v27 = vadd.f32 %v1111_v34, %v6342_v40  ;;  %v2337_v44 = vpop.permute.xlu1 %2336  ;;  %v2578_v11 = vrot.slane %v2541_v58, 1  ;;  %v8773_v58 = vld [vmem:[#allocation44_spill] sm:$0xff]  ;;  %v2088_v40 = vor.u32 %v2086_v23, %v6392_v8  ;;  %v8777_v23 = vmov 7  }
 0x1f5   : > { %v2423_v12 = vrot.slane %v2337_v44, 6  ;;  %v6463_v31 = vpop.permute.xlu2 %2366  ;;  %v6473_v34 = vpop.permute.xlu0 %2369  ;;  %v1458_v16 = vsel %vm1435_vm4, %v6355_v36, %v8773_v58  ;;  %v2515_v36 = vmul.f32 %v8663_v22, %v6352_v35  ;;  %v6494_v59 = vrot.slane %v2090_v14, 1  ;;  %v8778_v14 = vld [vmem:[#allocation4_spill] sm:$0xff] }
 0x1f6   : > { %v6479_v44 = vsel %vm1435_vm4, %v2576_v55, %v2578_v11  ;;  %v8502_v48 = vrot.slane %v6473_v34, 6  ;;  %4450 = vmatmul.msk.bf16.gmra.mxu2 %vm892_vm3, %v1458_v16  ;;  %4698 = vset.pattern.permute.xlu0 %v8777_v23 }
 0x1f7   : > { %v2424_v15 = vsel %vm941_vm0, %v8774_v33, %v2423_v12  ;;  %v2426_v62 = vsel %vm941_vm0, %v2423_v12, %v8775_v45  ;;  %v8776_v45 = vrot.slane %v6463_v31, 6  ;;  %v6505_v8 = vpop.f32.mrf.mxu0  ;;  %3149 = vperm.xlu0 %4698, %v8778_v14   ;;  %v6518_v22 = vpop.f32.mrf.mxu3 }
 0x1f8   : > { %v2513_v55 = vmul.f32 %v8645_v30, %v2424_v15  ;;  %v2514_v58 = vmul.f32 %v8661_v37, %v2426_v62  ;;  %v2093_v62 = vsel %vm759_vm2, %v2088_v40, %v6494_v59  ;;  %v8780_v37 = vld [vmem:[#allocation82_spill] sm:$0xff]  ;;  %8781 = vst [vmem:[#allocation26_spill] sm:$0xff] %v6518_v22  ;;  %v8783_v40 = vld [vmem:[#allocation80_spill] sm:$0xff]  ;;  %v8790_v22 = vrot.slane %v6378_v42, 6 }
 0x1f9   : > { %v6503_v12 = vsel %vm941_vm0, %v8776_v45, %v8502_v48  ;;  %v1539_v16 = vpop.f32.mrf.mxu2  ;;  %v509_v48 = vpack.c.bf16 %v490_v53, %v489_v5  ;;  %v1786_v14 = vmul.f32 %v8719_v61, %v8783_v40  ;;  %v8788_v40 = vld [vmem:[#allocation31_spill] sm:$0xff] }
 0x1fa   : > { %v2542_v35 = vpack.c.bf16 %v2513_v55, %v2512_v13  ;;  %v2543_v15 = vpack.c.bf16 %v2515_v36, %v2514_v58  ;;  %v6513_v33 = vadd.f32 %v1539_v16, %v1105_v19  ;;  %v8782_v13 = vld [vmem:[#allocation83_spill] sm:$0xff]  ;;  %4483 = vmatmul.msk.bf16.gmra.mxu0 %vm892_vm3, %v2093_v62 }
 0x1fb   : > { %2857 = vperm.xlu1 %4687, %v8780_v37   ;;  %v6516_v45 = vpop.f32.mrf.mxu1 }
 0x1fc   : > { %2861 = vperm.xlu2 %4685, %v8782_v13   ;;  %v2346_v36 = vpop.permute.xlu1 %2345  ;;  %v2580_v55 = vrot.slane %v2542_v35, 1  ;;  %v2582_v58 = vrot.slane %v2543_v15, 1  ;;  %v1809_v35 = vpack.c.bf16 %v1786_v14, %v1785_v39  ;;  %v8786_v15 = vrot.slane %v6338_v63, 6 }
 0x1fd   : > { %v2429_v30 = vrot.slane %v2346_v36, 6  ;;  %v6523_v24 = vpop.permute.xlu2 %2375  ;;  %v6527_v19 = vpop.permute.xlu0 %2378  ;;  %v492_v14 = vmul.f32 %v5434_v1, %v8788_v40  ;;  %v6585_v40 = vld [vmem:[%s5196_s12 + $0x60] sm:$0xff]  }
 0x1fe   : > { %v8507_v37 = vrot.slane %v6523_v24, 6  ;;  %4435 = vmatmul.msk.bf16.gmra.mxu1 %vm892_vm3, %v509_v48  ;;  %v6531_v5 = vsel %vm1435_vm4, %v2578_v11, %v2580_v55  ;;  %v6534_v53 = vsel %vm1435_vm4, %v2580_v55, %v2582_v58  ;;  %v8506_v13 = vrot.slane %v6527_v19, 6  ;;  %v6560_v55 = vld [vmem:[%s8373_s2 + $0x48] sm:$0xff] }
 0x1ff   : > { %8784 = vst [vmem:[#allocation17_spill] sm:$0xff] %v6531_v5  ;;  %v2430_v16 = vsel %vm941_vm0, %v8786_v15, %v2429_v30  ;;  %v2432_v62 = vsel %vm941_vm0, %v2429_v30, %v8787_v56  ;;  %v1107_v11 = vadd.f32 %v6360_v25, %v6234_v43  ;;  %v6555_v20 = vpop.f32.mrf.mxu0  ;;  %3158 = vperm.xlu0 %4698, %v6560_v55  }
 0x200   : > { %8785 = vst [vmem:[#allocation74_spill] sm:$0xff] %v6534_v53  ;;  %v2516_v36 = vmul.f32 %v8678_v49, %v2430_v16  ;;  %v2517_v48 = vmul.f32 %v8676_v41, %v2432_v62  ;;  %v6552_v63 = vsel %vm941_vm0, %v8507_v37, %v8506_v13  ;;  %v4788_v16 = vld [vmem:[%s8373_s2] sm:$0xff]  ;;  %v2098_v13 = vshll.u32 %v6585_v40, 16 }
 0x201   : > { %4465 = vmatmul.msk.bf16.gmra.mxu3 %vm892_vm3, %v1809_v35  ;;  %v1541_v39 = vpop.f32.mrf.mxu2  ;;  %v8791_v49 = vrot.slane %v6419_v17, 6 }
 0x202   : > { %v2544_v30 = vpack.c.bf16 %v2517_v48, %v2516_v36  ;;  %v6563_v43 = vadd.f32 %v1541_v39, %v1107_v11  ;;  %v6580_v11 = vld [vmem:[%s8373_s2 + $0x8] sm:$0xff]  ;;  %v2094_v39 = vshrl.u32 %v6467_v6, 16 }
 0x203   : > { %4688 = vset.pattern.permute.xlu1 %v8777_v23  ;;  %v6566_v25 = vpop.f32.mrf.mxu1 }
 0x204   : > { %v1879_v35 = vpop.f32.mrf.mxu3  ;;  %v2355_v15 = vpop.permute.xlu1 %2354  ;;  %3131 = vperm.xlu1 %4688, %v4788_v16   ;;  %4689 = vset.pattern.permute.xlu2 %v8777_v23  ;;  %v2584_v56 = vrot.slane %v2544_v30, 1  ;;  %v2518_v30 = vmul.f32 %v5357_v46, %v6401_v9  ;;  %v2096_v42 = vor.u32 %v2094_v39, %v6494_v59 }
 0x205   : > { %v1959_v62 = vadd.f32 %v1879_v35, %v6311_v2  ;;  %v2435_v36 = vrot.slane %v2355_v15, 6  ;;  %v6575_v48 = vpop.permute.xlu2 %2384  ;;  %3134 = vperm.xlu2 %4689, %v6580_v11   ;;  %v2521_v2 = vmul.f32 %v8704_v4, %v6444_v54  ;;  %v6593_v15 = vpop.permute.xlu0 %2387  ;;  %v8793_v54 = vld [vmem:[#allocation67_spill] sm:$0xff] }
 0x206   : > { %v6596_v37 = vsel %vm1435_vm4, %v2582_v58, %v2584_v56  ;;  %v8510_v9 = vrot.slane %v6593_v15, 6  ;;  %4451 = vmatmul.msk.bf16.gmra.mxu2 %vm892_vm3, %v8793_v54 }
 0x207   : > { %8789 = vst [vmem:[#allocation77_spill] sm:$0xff] %v6596_v37  ;;  %v2436_v6 = vsel %vm941_vm0, %v8790_v22, %v2435_v36  ;;  %v2438_v41 = vsel %vm941_vm0, %v2435_v36, %v8791_v49  ;;  %v6606_v53 = vadd.f32 %v6403_v0, %v1959_v62  ;;  %v6613_v37 = vrot.slane %v2098_v13, 1  ;;  %v8794_v22 = vld [vmem:[#allocation20_spill] sm:$0xff]  ;;  %v6626_v36 = vpop.f32.mrf.mxu0  ;;  %3161 = vperm.xlu0 %4698, %v8749_v38  }
 0x208   : > { %v2519_v35 = vmul.f32 %v5364_v50, %v2436_v6  ;;  %v2520_v58 = vmul.f32 %v5338_v26, %v2438_v41  ;;  %v491_v17 = vmul.f32 %v5418_v28, %v8794_v22  ;;  %v1110_v49 = vadd.f32 %v6414_v7, %v6283_v32  ;;  %v8796_v41 = vld [vmem:[#allocation11_spill] sm:$0xff] }
 0x209   : > { %8792 = vst [vmem:[#allocation75_spill] sm:$0xff] %v6606_v53  ;;  %v8795_v0 = vrot.slane %v6575_v48, 6  ;;  %v1788_v59 = vmul.f32 %v8735_v47, %v8796_v41  ;;  %v1544_v6 = vpop.f32.mrf.mxu2  ;;  %v2101_v54 = vsel %vm759_vm2, %v2096_v42, %v6613_v37  ;;  %v8799_v41 = vmov 8  }
 0x20a   : > { %v2545_v13 = vpack.c.bf16 %v2519_v35, %v2518_v30  ;;  %v2546_v39 = vpack.c.bf16 %v2521_v2, %v2520_v58  ;;  %v6633_v32 = vadd.f32 %v1544_v6, %v1110_v49  ;;  %v510_v22 = vpack.c.bf16 %v492_v14, %v491_v17  ;;  %v4791_v30 = vld [vmem:[%s8373_s2 + $0x18] sm:$0xff]  ;;  %v8798_v58 = vld [vmem:[#allocation8_spill] sm:$0xff]  ;;  %4484 = vmatmul.msk.bf16.gmra.mxu0 %vm892_vm3, %v2101_v54 }
 0x20b   : > { %v6624_v62 = vsel %vm941_vm0, %v8795_v0, %v8510_v9  ;;  %v6635_v7 = vpop.f32.mrf.mxu1  ;;  %v8797_v0 = vld [vmem:[#allocation86_spill] sm:$0xff]  ;;  %v8803_v54 = vrot.slane %v6463_v31, 6 }
 0x20c   : > { %v1787_v9 = vmul.f32 %v8740_v60, %v8797_v0  ;;  %v1881_v53 = vpop.f32.mrf.mxu3  ;;  %v2364_v5 = vpop.permute.xlu1 %2363  ;;  %3140 = vperm.xlu1 %4688, %v4791_v30   ;;  %v2586_v2 = vrot.slane %v2545_v13, 1  ;;  %v2588_v35 = vrot.slane %v2546_v39, 1 }
 0x20d   : > { %v1960_v42 = vadd.f32 %v1881_v53, %v8798_v58  ;;  %v2441_v38 = vrot.slane %v2364_v5, 6  ;;  %v6643_v49 = vpop.permute.xlu2 %2393  ;;  %4691 = vset.pattern.permute.xlu2 %v8799_v41  ;;  %v6648_v6 = vpop.permute.xlu0 %2396  ;;  %v8802_v5 = vrot.slane %v6423_v29, 6  ;;  %v8805_v58 = vld [vmem:[#allocation71_spill] sm:$0xff] }
 0x20e   : > { %v1810_v14 = vpack.c.bf16 %v1788_v59, %v1787_v9  ;;  %v8512_v17 = vrot.slane %v6643_v49, 6  ;;  %4436 = vmatmul.msk.bf16.gmra.mxu1 %vm892_vm3, %v510_v22  ;;  %3679 = vperm.xlu2 %4691, %v4788_v16   ;;  %v6652_v13 = vsel %vm1435_vm4, %v2584_v56, %v2586_v2  ;;  %v6655_v53 = vsel %vm1435_vm4, %v2586_v2, %v2588_v35 }
 0x20f   : > { %8800 = vst [vmem:[#allocation19_spill] sm:$0xff] %v6652_v13  ;;  %v2442_v39 = vsel %vm941_vm0, %v8802_v5, %v2441_v38  ;;  %v2444_v9 = vsel %vm941_vm0, %v2441_v38, %v8803_v54  ;;  %v8511_v59 = vrot.slane %v6648_v6, 6  ;;  %v6665_v0 = vadd.f32 %v6447_v18, %v1960_v42  ;;  %v6677_v31 = vpop.f32.mrf.mxu0  ;;  %4704 = vset.pattern.permute.xlu0 %v8799_v41  ;;  %v8806_v42 = vld [vmem:[#allocation30_spill] sm:$0xff] }
 0x210   : > { %8801 = vst [vmem:[#allocation28_spill] sm:$0xff] %v6655_v53  ;;  %v2522_v16 = vmul.f32 %v8721_v51, %v2442_v39  ;;  %v2523_v56 = vmul.f32 %v8719_v61, %v2444_v9  ;;  %3712 = vperm.xlu0 %4704, %v8805_v58   ;;  %v8807_v38 = vld [vmem:[#allocation62_spill] sm:$0xff]  ;;  %v8813_v53 = vld [vmem:[#allocation68_spill] sm:$0xff] }
 0x211   : > { %8804 = vst [vmem:[#allocation29_spill] sm:$0xff] %v6665_v0  ;;  %v6674_v29 = vsel %vm941_vm0, %v8512_v17, %v8511_v59  ;;  %4466 = vmatmul.msk.bf16.gmra.mxu3 %vm892_vm3, %v1810_v14  ;;  %v1546_v30 = vpop.f32.mrf.mxu2  ;;  %v493_v5 = vmul.f32 %v8807_v38, %v8806_v42  ;;  %v2524_v42 = vmul.f32 %v8740_v60, %v6503_v12  ;;  %v8808_v59 = vld [vmem:[#allocation59_spill] sm:$0xff]  ;;  %v8811_v12 = vrot.slane %v6523_v24, 6 }
 0x212   : > { %v2547_v22 = vpack.c.bf16 %v2523_v56, %v2522_v16  ;;  %v6681_v18 = vadd.f32 %v1546_v30, %v6459_v27  ;;  %v2102_v27 = vshrl.u32 %v6585_v40, 16  ;;  %v6695_v30 = vld [vmem:[%s5196_s12 + $0x68] sm:$0xff]   ;;  %v2527_v17 = vmul.f32 %v8808_v59, %v6552_v63 }
 0x213   : > { %v6683_v2 = vpop.f32.mrf.mxu1  ;;  %v2106_v58 = vshll.u32 %v6695_v30, 16 }
 0x214   : > { %v1884_v39 = vpop.f32.mrf.mxu3  ;;  %v2373_v54 = vpop.permute.xlu1 %2372  ;;  %4692 = vset.pattern.permute.xlu1 %v8799_v41  ;;  %v2590_v14 = vrot.slane %v2547_v22, 1 }
 0x215   : > { %v1961_v9 = vadd.f32 %v1884_v39, %v6411_v21  ;;  %v2447_v16 = vrot.slane %v2373_v54, 6  ;;  %v6690_v56 = vpop.permute.xlu2 %2402  ;;  %3682 = vperm.xlu1 %4692, %v6580_v11   ;;  %v6703_v21 = vpop.permute.xlu0 %2405  ;;  %v4793_v11 = vld [vmem:[%s8373_s2 + $0x10] sm:$0xff]  ;;  %v8810_v39 = vrot.slane %v6473_v34, 6  ;;  %v2104_v34 = vor.u32 %v2102_v27, %v6613_v37 }
 0x216   : > { %3685 = vperm.xlu2 %4691, %v4793_v11   ;;  %v6709_v40 = vsel %vm1435_vm4, %v2588_v35, %v2590_v14  ;;  %v8514_v22 = vrot.slane %v6703_v21, 6  ;;  %4452 = vmatmul.msk.bf16.gmra.mxu2 %vm892_vm3, %v8813_v53  ;;  %v8814_v35 = vld [vmem:[#allocation60_spill] sm:$0xff]  ;;  %v6726_v13 = vrot.slane %v2106_v58, 1  ;;  %v8817_v53 = vld [vmem:[#allocation23_spill] sm:$0xff] }
 0x217   : > { %8809 = vst [vmem:[#allocation44_spill] sm:$0xff] %v6709_v40  ;;  %v2448_v54 = vsel %vm941_vm0, %v8810_v39, %v2447_v16  ;;  %v2450_v63 = vsel %vm941_vm0, %v2447_v16, %v8811_v12  ;;  %v6719_v0 = vadd.f32 %v6505_v8, %v1961_v9  ;;  %v8815_v39 = vld [vmem:[#allocation6_spill] sm:$0xff]  ;;  %v8816_v16 = vrot.slane %v6690_v56, 6  ;;  %v6737_v9 = vpop.f32.mrf.mxu0  ;;  %v8819_v58 = vld [vmem:[#allocation88_spill] sm:$0xff] }
 0x218   : > { %v2525_v11 = vmul.f32 %v8735_v47, %v2448_v54  ;;  %v2526_v40 = vmul.f32 %v8814_v35, %v2450_v63  ;;  %v1115_v24 = vadd.f32 %v6516_v45, %v8815_v39  ;;  %v8818_v54 = vld [vmem:[#allocation61_spill] sm:$0xff]  ;;  %v2109_v27 = vsel %vm759_vm2, %v2104_v34, %v6726_v13  ;;  %4708 = vset.pattern.permute.xlu0 %v8777_v23 }
 0x219   : > { %8812 = vst [vmem:[#allocation4_spill] sm:$0xff] %v6719_v0  ;;  %v6735_v8 = vsel %vm941_vm0, %v8816_v16, %v8514_v22  ;;  %v494_v12 = vmul.f32 %v8818_v54, %v8817_v53  ;;  %v1549_v37 = vpop.f32.mrf.mxu2  ;;  %v1790_v45 = vmul.f32 %v8808_v59, %v8819_v58  ;;  %3173 = vperm.xlu0 %4708, %v8763_v57   ;;  %v4794_v57 = vld [vmem:[%s8373_s2 + $0x20] sm:$0xff] }
 0x21a   : > { %v2548_v63 = vpack.c.bf16 %v2525_v11, %v2524_v42  ;;  %v2549_v0 = vpack.c.bf16 %v2527_v17, %v2526_v40  ;;  %v6745_v39 = vadd.f32 %v1549_v37, %v1115_v24  ;;  %v8820_v40 = vld [vmem:[#allocation85_spill] sm:$0xff]  ;;  %4485 = vmatmul.msk.bf16.gmra.mxu0 %vm892_vm3, %v2109_v27 }
 0x21b   : > { %v6747_v60 = vpop.f32.mrf.mxu1  ;;  %v511_v16 = vpack.c.bf16 %v494_v12, %v493_v5  ;;  %v1789_v11 = vmul.f32 %v8814_v35, %v8820_v40  ;;  %v8823_v5 = vrot.slane %v6527_v19, 6  ;;  %v8824_v12 = vrot.slane %v6575_v48, 6  ;;  %v8826_v19 = vld [vmem:[#allocation70_spill] sm:$0xff] }
 0x21c   : > { %v1886_v22 = vpop.f32.mrf.mxu3  ;;  %v2382_v47 = vpop.permute.xlu1 %2381  ;;  %v2592_v42 = vrot.slane %v2548_v63, 1  ;;  %v2594_v17 = vrot.slane %v2549_v0, 1  ;;  %v1117_v48 = vadd.f32 %v6566_v25, %v8826_v19  ;;  %v2110_v25 = vshrl.u32 %v6695_v30, 16  ;;  %v6798_v19 = vld [vmem:[%s5196_s12 + $0x70] sm:$0xff]  }
 0x21d   : > { %v1962_v34 = vadd.f32 %v1886_v22, %v6452_v10  ;;  %v2453_v53 = vrot.slane %v2382_v47, 6  ;;  %4694 = vset.pattern.permute.xlu1 %v8777_v23  ;;  %v1811_v10 = vpack.c.bf16 %v1790_v45, %v1789_v11  ;;  %v4795_v45 = vld [vmem:[%s8373_s2 + $0x28] sm:$0xff] }
 0x21e   : > { %v6756_v24 = vpop.permute.xlu2 %2781  ;;  %v6758_v37 = vpop.permute.xlu0 %2785  ;;  %3143 = vperm.xlu1 %4694, %v4794_v57   ;;  %4437 = vmatmul.msk.bf16.gmra.mxu1 %vm892_vm3, %v511_v16  ;;  %v6765_v0 = vsel %vm1435_vm4, %v2590_v14, %v2592_v42  ;;  %v6768_v47 = vsel %vm1435_vm4, %v2592_v42, %v2594_v17 }
 0x21f   : > { %8821 = vst [vmem:[#allocation90_spill] sm:$0xff] %v6765_v0  ;;  %v2454_v22 = vsel %vm941_vm0, %v8823_v5, %v2453_v53  ;;  %v2456_v63 = vsel %vm941_vm0, %v2453_v53, %v8824_v12  ;;  %4695 = vset.pattern.permute.xlu2 %v8777_v23  ;;  %v6780_v14 = vadd.f32 %v6555_v20, %v1962_v34  ;;  %v6788_v16 = vpop.f32.mrf.mxu0  ;;  %v8827_v5 = vld [vmem:[#allocation78_spill] sm:$0xff] }
 0x220   : > { %8822 = vst [vmem:[#allocation82_spill] sm:$0xff] %v6768_v47  ;;  %v2528_v27 = vmul.f32 %v8772_v3, %v2454_v22  ;;  %v2529_v58 = vmul.f32 %v8769_v52, %v2456_v63  ;;  %3146 = vperm.xlu2 %4695, %v4795_v45  }
 0x221   : > { %8825 = vst [vmem:[#allocation83_spill] sm:$0xff] %v6780_v14  ;;  %4467 = vmatmul.msk.bf16.gmra.mxu3 %vm892_vm3, %v1811_v10  ;;  %v1551_v40 = vpop.f32.mrf.mxu2  ;;  %3182 = vperm.xlu0 %4708, %v8827_v5   ;;  %v2114_v10 = vshll.u32 %v6798_v19, 16  ;;  %v8831_v14 = vld [vmem:[#allocation64_spill] sm:$0xff]  ;;  %v2533_v5 = vmul.f32 %v8818_v54, %v6674_v29 }
 0x222   : > { %v2550_v42 = vpack.c.bf16 %v2529_v58, %v2528_v27  ;;  %v6790_v11 = vadd.f32 %v1551_v40, %v1117_v48  ;;  %v8828_v27 = vld [vmem:[#allocation32_spill] sm:$0xff]  ;;  %v8829_v58 = vld [vmem:[#allocation63_spill] sm:$0xff]  ;;  %v8830_v40 = vld [vmem:[#allocation33_spill] sm:$0xff] }
 0x223   : > { %v6792_v53 = vpop.f32.mrf.mxu1  ;;  %v496_v48 = vmul.f32 %v8829_v58, %v8828_v27  ;;  %v495_v47 = vmul.f32 %v8831_v14, %v8830_v40  ;;  %v8835_v27 = vrot.slane %v6593_v15, 6  ;;  %v8838_v15 = vld [vmem:[#allocation72_spill] sm:$0xff] }
 0x224   : > { %v1889_v20 = vpop.f32.mrf.mxu3  ;;  %v2391_v34 = vpop.permute.xlu1 %2390  ;;  %v2596_v22 = vrot.slane %v2550_v42, 1  ;;  %v8834_v42 = vld [vmem:[#allocation16_spill] sm:$0xff]  ;;  %v1120_v29 = vadd.f32 %v6635_v7, %v8838_v15 }
 0x225   : > { %v1963_v12 = vadd.f32 %v1889_v20, %v6513_v33  ;;  %v2459_v63 = vrot.slane %v2391_v34, 6  ;;  %v8833_v33 = vld [vmem:[#allocation15_spill] sm:$0xff]  ;;  %v2530_v34 = vmul.f32 %v5418_v28, %v6624_v62  ;;  %v6833_v62 = vrot.slane %v2114_v10, 1 }
 0x226   : > { %v6805_v0 = vpop.permute.xlu2 %2793  ;;  %v6807_v59 = vpop.permute.xlu0 %2805  ;;  %4696 = vset.pattern.permute.xlu1 %v8799_v41  ;;  %v1464_v30 = vsel %vm1435_vm4, %v8834_v42, %v8833_v33  ;;  %v6814_v20 = vsel %vm1435_vm4, %v2594_v17, %v2596_v22 }
 0x227   : > { %8832 = vst [vmem:[#allocation80_spill] sm:$0xff] %v6807_v59  ;;  %v2460_v40 = vsel %vm941_vm0, %v8835_v27, %v2459_v63  ;;  %v8836_v59 = vrot.slane %v6643_v49, 6  ;;  %4453 = vmatmul.msk.bf16.gmra.mxu2 %vm892_vm3, %v1464_v30  ;;  %v6830_v42 = vadd.f32 %v6626_v36, %v1963_v12  ;;  %3691 = vperm.xlu1 %4696, %v4794_v57   ;;  %v6837_v49 = vpop.f32.mrf.mxu0 }
 0x228   : > { %v2531_v33 = vmul.f32 %v5434_v1, %v2460_v40  ;;  %4697 = vset.pattern.permute.xlu2 %v8799_v41  ;;  %v512_v40 = vpack.c.bf16 %v496_v48, %v495_v47 }
 0x229   : > { %v2462_v35 = vsel %vm941_vm0, %v2459_v63, %v8836_v59  ;;  %8837 = vst [vmem:[#allocation31_spill] sm:$0xff] %v6830_v42  ;;  %3694 = vperm.xlu2 %4697, %v4795_v45   ;;  %v2112_v59 = vor.u32 %v2110_v25, %v6726_v13  ;;  %v1554_v27 = vpop.f32.mrf.mxu2  ;;  %v6851_v13 = vld [vmem:[%s8373_s2 + $0x90] sm:$0xff]  ;;  %v8855_v42 = vld [vmem:[#allocation79_spill] sm:$0xff] }
 0x22a   : > { %v2532_v17 = vmul.f32 %v8807_v38, %v2462_v35  ;;  %v2551_v63 = vpack.c.bf16 %v2531_v33, %v2530_v34  ;;  %v8839_v35 = vld [vmem:[#allocation5_spill] sm:$0xff]  ;;  %v6842_v12 = vadd.f32 %v1554_v27, %v1120_v29  ;;  %3185 = vperm.xlu0 %4708, %v6851_v13   ;;  %v8844_v27 = vrot.slane %v6690_v56, 6 }
 0x22b   : > { %v1791_v36 = vmul.f32 %v8772_v3, %v8839_v35  ;;  %v6844_v57 = vpop.f32.mrf.mxu1  ;;  %v2117_v10 = vsel %vm759_vm2, %v2112_v59, %v6833_v62 }
 0x22c   : > { %v2552_v30 = vpack.c.bf16 %v2533_v5, %v2532_v17  ;;  %v1891_v7 = vpop.f32.mrf.mxu3  ;;  %v2400_v45 = vpop.permute.xlu1 %2399  ;;  %v2598_v25 = vrot.slane %v2551_v63, 1  ;;  %v8840_v5 = vld [vmem:[#allocation87_spill] sm:$0xff]  ;;  %4486 = vmatmul.msk.bf16.gmra.mxu0 %vm892_vm3, %v2117_v10 }
 0x22d   : > { %v1792_v33 = vmul.f32 %v8769_v52, %v8840_v5  ;;  %v1964_v17 = vadd.f32 %v1891_v7, %v6563_v43  ;;  %v2465_v15 = vrot.slane %v2400_v45, 6  ;;  %v8846_v45 = vld [vmem:[#allocation76_spill] sm:$0xff] }
 0x22e   : > { %v2600_v34 = vrot.slane %v2552_v30, 1  ;;  %v6858_v47 = vpop.permute.xlu2 %2801  ;;  %v6860_v48 = vpop.permute.xlu0 %2817  ;;  %4438 = vmatmul.msk.bf16.gmra.mxu1 %vm892_vm3, %v512_v40  ;;  %v6864_v29 = vsel %vm1435_vm4, %v2596_v22, %v2598_v25  ;;  %v8843_v30 = vrot.slane %v6648_v6, 6  ;;  %v4649_v22 = vld [vmem:[%s5196_s12 + $0x88] sm:$0xff]   ;;  %v4798_v6 = vld [vmem:[%s8373_s2 + $0x38] sm:$0xff] }
 0x22f   : > { %8841 = vst [vmem:[#allocation67_spill] sm:$0xff] %v6864_v29  ;;  %v1812_v63 = vpack.c.bf16 %v1792_v33, %v1791_v36  ;;  %v2468_v35 = vsel %vm941_vm0, %v2465_v15, %v8844_v27  ;;  %v6878_v40 = vadd.f32 %v6677_v31, %v1964_v17  ;;  %4699 = vset.pattern.permute.xlu1 %v8777_v23  ;;  %v6888_v56 = vpop.f32.mrf.mxu0  ;;  %v4799_v31 = vld [vmem:[%s8373_s2 + $0x30] sm:$0xff]  ;;  %v6897_v17 = vunpack.c.l.bf16 %v4649_v22 }
 0x230   : > { %v6867_v59 = vsel %vm1435_vm4, %v2598_v25, %v2600_v34  ;;  %v2466_v43 = vsel %vm941_vm0, %v8843_v30, %v2465_v15  ;;  %v2535_v7 = vmul.f32 %v8829_v58, %v2468_v35  ;;  %v1122_v36 = vadd.f32 %v6683_v2, %v8846_v45  ;;  %3152 = vperm.xlu1 %4699, %v4798_v6   ;;  %v6909_v45 = vld [vmem:[%s8373_s2 + $0x98] sm:$0xff] }
 0x231   : > { %8842 = vst [vmem:[#allocation20_spill] sm:$0xff] %v6867_v59  ;;  %v2534_v10 = vmul.f32 %v8831_v14, %v2466_v43  ;;  %4468 = vmatmul.msk.bf16.gmra.mxu3 %vm892_vm3, %v1812_v63  ;;  %v1556_v5 = vpop.f32.mrf.mxu2  ;;  %3697 = vperm.xlu2 %4697, %v4799_v31   ;;  %v2118_v35 = vshrl.u32 %v6798_v19, 16  ;;  %v8850_v19 = vld [vmem:[#allocation66_spill] sm:$0xff] }
 0x232   : > { %8845 = vst [vmem:[#allocation11_spill] sm:$0xff] %v6878_v40  ;;  %v6893_v33 = vadd.f32 %v1556_v5, %v1122_v36  ;;  %4714 = vset.pattern.permute.xlu0 %v8799_v41  ;;  %v8851_v5 = vrot.slane %v6703_v21, 6 }
 0x233   : > { %8847 = vst [vmem:[#allocation86_spill] sm:$0xff] %v6888_v56  ;;  %v2553_v25 = vpack.c.bf16 %v2535_v7, %v2534_v10  ;;  %v6895_v2 = vpop.f32.mrf.mxu1  ;;  %v6903_v10 = vld [vmem:[%s5196_s12 + $0x78] sm:$0xff]   ;;  %3736 = vperm.xlu0 %4714, %v6909_v45   ;;  %v8853_v56 = vld [vmem:[#allocation10_spill] sm:$0xff] }
 0x234   : > { %8848 = vst [vmem:[#allocation8_spill] sm:$0xff] %v6897_v17  ;;  %v1894_v15 = vpop.f32.mrf.mxu3  ;;  %v2409_v30 = vpop.permute.xlu1 %2408  ;;  %v2122_v7 = vshll.u32 %v6903_v10, 16 }
 0x235   : > { %v2602_v63 = vrot.slane %v2553_v25, 1  ;;  %v1965_v43 = vadd.f32 %v1894_v15, %v6633_v32  ;;  %v2471_v27 = vrot.slane %v2409_v30, 6  ;;  %v2536_v25 = vmul.f32 %v8850_v19, %v6735_v8  ;;  %v8852_v30 = vld [vmem:[#allocation73_spill] sm:$0xff] }
 0x236   : > { %v6912_v22 = vpop.permute.xlu2 %2813  ;;  %v6914_v36 = vpop.permute.xlu0 %2829  ;;  %v2124_v40 = vrot.slane %v2122_v7, 1  ;;  %v1125_v8 = vadd.f32 %v6747_v60, %v8855_v42  ;;  %v4802_v42 = vld [vmem:[%s8373_s2 + $0x40] sm:$0xff] }
 0x237   : > { %v6917_v32 = vsel %vm1435_vm4, %v2600_v34, %v2602_v63  ;;  %v2472_v31 = vsel %vm941_vm0, %v8851_v5, %v2471_v27  ;;  %v2538_v15 = vmul.f32 %v6897_v17, %v2471_v27  ;;  %4454 = vmatmul.msk.bf16.gmra.mxu2 %vm892_vm3, %v8852_v30  ;;  %v6929_v58 = vadd.f32 %v6737_v9, %v1965_v43  ;;  %v6935_v21 = vpop.f32.mrf.mxu0  ;;  %v8856_v27 = vld [vmem:[#allocation69_spill] sm:$0xff] }
 0x238   : > { %8849 = vst [vmem:[#allocation71_spill] sm:$0xff] %v6917_v32  ;;  %v2537_v14 = vmul.f32 %v8853_v56, %v2472_v31  ;;  %v2120_v34 = vor.u32 %v2118_v35, %v6833_v62  ;;  %4700 = vset.pattern.permute.xlu1 %v8799_v41  ;;  %v8857_v5 = vrot.slane %v8856_v27, 6  ;;  %v8904_v32 = vld [vmem:[#allocation74_spill] sm:$0xff] }
 0x239   : > { %8854 = vst [vmem:[#allocation30_spill] sm:$0xff] %v6929_v58  ;;  %v2555_v54 = vpack.c.bf16 %v2538_v15, %v2538_v15  ;;  %3700 = vperm.xlu1 %4700, %v4798_v6   ;;  %v1559_v31 = vpop.f32.mrf.mxu2  ;;  %4701 = vset.pattern.permute.xlu2 %v8777_v23  ;;  %v8858_v15 = vld [vmem:[#allocation36_spill] sm:$0xff] }
 0x23a   : > { %v1398_v30 = vmul.f32 %v8850_v19, %v8857_v5  ;;  %v2554_v38 = vpack.c.bf16 %v2537_v14, %v2536_v25  ;;  %v2125_v9 = vsel %vm759_vm2, %v2120_v34, %v2124_v40  ;;  %v6942_v43 = vadd.f32 %v1559_v31, %v1125_v8  ;;  %3155 = vperm.xlu2 %4701, %v4802_v42   ;;  %v6961_v34 = vld [vmem:[%s8373_s2 + $0xb0] sm:$0xff]  ;;  %v8863_v31 = vld [vmem:[#allocation3_spill] sm:$0xff] }
 0x23b   : > { %v2606_v62 = vrot.slane %v2555_v54, 1  ;;  %v6944_v60 = vpop.f32.mrf.mxu1  ;;  %4718 = vset.pattern.permute.xlu0 %v8777_v23  ;;  %v8862_v5 = vld [vmem:[#allocation84_spill] sm:$0xff] }
 0x23c   : > { %v1896_v35 = vpop.f32.mrf.mxu3  ;;  %v2604_v7 = vrot.slane %v2554_v38, 1  ;;  %4487 = vmatmul.msk.bf16.gmra.mxu0 %vm892_vm3, %v2125_v9  ;;  %v1415_v54 = vpack.c.bf16 %v1398_v30, %v1398_v30  ;;  %3197 = vperm.xlu0 %4718, %v6961_v34   ;;  %v1127_v30 = vadd.f32 %v6792_v53, %v8862_v5  ;;  %v8864_v9 = vld [vmem:[#allocation13_spill] sm:$0xff] }
 0x23d   : > { %v1966_v14 = vadd.f32 %v1896_v35, %v6681_v18  ;;  %v6950_v6 = vpop.permute.xlu1 %2789  ;;  %v8865_v35 = vpack.c.bf16 %v8863_v31, %v8864_v9 }
 0x23e   : > { %v6954_v25 = vpop.permute.xlu2 %2825  ;;  %4491 = vmatmul.msk.bf16.vlgmr.msra.gmra.mxu1 %vm892_vm3, %v8858_v15  ;;  %v6965_v18 = vsel %vm1435_vm4, %v2602_v63, %v2604_v7  ;;  %v6968_v38 = vsel %vm1435_vm4, %v2604_v7, %v2606_v62  ;;  %v2842_v8 = vpop.permute.xlu0 %2841  ;;  %v1467_v63 = vrot.slane %v1415_v54, 1  ;;  %v2126_v54 = vshrl.u32 %v6903_v10, 16 }
 0x23f   : > { %8859 = vst [vmem:[#allocation68_spill] sm:$0xff] %v6965_v18  ;;  %v6971_v27 = vadd.f32 %v6788_v16, %v1966_v14  ;;  %v6979_v15 = vpop.f32.mrf.mxu0  ;;  %v6988_v53 = vmul.f32 %v8719_v61, %v2842_v8 }
 0x240   : > { %8860 = vst [vmem:[#allocation6_spill] sm:$0xff] %v6968_v38  ;;  %v2128_v10 = vor.u32 %v2126_v54, %v2124_v40  ;;  %v4806_v40 = vld [vmem:[%s8373_s2 + $0x58] sm:$0xff] }
 0x241   : > { %8861 = vst [vmem:[#allocation23_spill] sm:$0xff] %v6971_v27  ;;  %4469 = vmatmul.msk.bf16.gmra.mxu3 %vm892_vm3, %v8865_v35  ;;  %3703 = vperm.xlu1 %4700, %v4802_v42   ;;  %v1561_v56 = vpop.f32.mrf.mxu2  ;;  %v4804_v42 = vld [vmem:[%s5196_s12 + $0x80] sm:$0xff]   ;;  %v7000_v35 = vld [vmem:[%s8373_s2 + $0xc8] sm:$0xff] }
 0x242   : > { %8866 = vst [vmem:[#allocation88_spill] sm:$0xff] %v6979_v15  ;;  %v6981_v62 = vadd.f32 %v1561_v56, %v1127_v30  ;;  %4702 = vset.pattern.permute.xlu2 %v8799_v41  ;;  %v2130_v31 = vshll.u32 %v4804_v42, 16  ;;  %v8868_v30 = vld [vmem:[#allocation7_spill] sm:$0xff] }
 0x243   : > { %v6983_v7 = vpop.f32.mrf.mxu1  ;;  %3706 = vperm.xlu2 %4702, %v6560_v55   ;;  %v1468_v9 = vsel %vm1435_vm4, %v8868_v30, %v1467_v63  ;;  %v8875_v30 = vld [vmem:[#allocation93_spill] sm:$0xff] }
 0x244   : > { %8867 = vst [vmem:[#allocation85_spill] sm:$0xff] %v6981_v62  ;;  %v1899_v16 = vpop.f32.mrf.mxu3  ;;  %3206 = vperm.xlu0 %4718, %v7000_v35   ;;  %v2132_v8 = vrot.slane %v2130_v31, 1  ;;  %v4807_v31 = vld [vmem:[%s8373_s2 + $0x50] sm:$0xff] }
 0x245   : > { %v1967_v14 = vadd.f32 %v1899_v16, %v6745_v39  ;;  %v6991_v5 = vpop.permute.xlu1 %2797  ;;  %v8870_v16 = vld [vmem:[#allocation9_spill] sm:$0xff] }
 0x246   : > { %v2838_v56 = vpop.permute.xlu2 %2837  ;;  %v1130_v63 = vadd.f32 %v6844_v57, %v8870_v16  ;;  %v7014_v62 = vpop.permute.xlu0 %2853 }
 0x247   : > { %v7004_v55 = vmul.f32 %v8721_v51, %v2838_v56  ;;  %v7007_v39 = vadd.f32 %v6837_v49, %v1967_v14  ;;  %4455 = vmatmul.msk.bf16.gmra.mxu2 %vm892_vm3, %v1468_v9  ;;  %v7017_v56 = vpop.f32.mrf.mxu0  ;;  %v2133_v49 = vsel %vm759_vm2, %v2128_v10, %v2132_v8  ;;  %v7044_v10 = vld [vmem:[%s8373_s2 + $0xc0] sm:$0xff] }
 0x249   : > { %8869 = vst [vmem:[#allocation70_spill] sm:$0xff] %v7007_v39  ;;  %4703 = vset.pattern.permute.xlu1 %v8777_v23  ;;  %v1564_v15 = vpop.f32.mrf.mxu2 }
 0x24a   : > { %v7020_v14 = vadd.f32 %v1564_v15, %v1130_v63  ;;  %3164 = vperm.xlu1 %4703, %v4806_v40   ;;  %v8873_v40 = vld [vmem:[#allocation39_spill] sm:$0xff] }
 0x24b   : > { %v7025_v57 = vpop.f32.mrf.mxu1  ;;  %3709 = vperm.xlu2 %4702, %v4807_v31  }
 0x24c   : > { %v1901_v54 = vpop.f32.mrf.mxu3  ;;  %4488 = vmatmul.msk.bf16.gmra.mxu0 %vm892_vm3, %v2133_v49  ;;  %4724 = vset.pattern.permute.xlu0 %v8799_v41  ;;  %v2909_v49 = vmul.f32 %v8873_v40, %v6758_v37 }
 0x24d   : > { %v7031_v9 = vadd.f32 %v1901_v54, %v6790_v11  ;;  %v7033_v16 = vpop.permute.xlu1 %2809  ;;  %3751 = vperm.xlu0 %4724, %v7044_v10   ;;  %v8872_v11 = vld [vmem:[#allocation38_spill] sm:$0xff]  ;;  %v8874_v54 = vld [vmem:[#allocation91_spill] sm:$0xff] }
 0x24e   : > { %v7036_v15 = vpop.permute.xlu2 %2849  ;;  %4492 = vmatmul.msk.bf16.gmra.mxu1 %vm892_vm3, %v6479_v44  ;;  %v2908_v63 = vmul.f32 %v8872_v11, %v6756_v24  ;;  %v1132_v31 = vadd.f32 %v6895_v2, %v8874_v54  ;;  %v8876_v44 = vld [vmem:[#allocation50_spill] sm:$0xff]  ;;  %v2866_v27 = vpop.permute.xlu0 %2865  ;;  %v2007_v2 = vpack.c.bf16 %v6897_v17, %v6897_v17 }
 0x24f   : > { %8871 = vst [vmem:[#allocation78_spill] sm:$0xff] %v7031_v9  ;;  %v8877_v9 = vpack.c.bf16 %v8875_v30, %v8876_v44  ;;  %v7057_v19 = vpop.f32.mrf.mxu0  ;;  %v4809_v24 = vld [vmem:[%s8373_s2 + $0x60] sm:$0xff]  ;;  %v7078_v17 = vmul.f32 %v8769_v52, %v2866_v27  ;;  %v8906_v52 = vld [vmem:[#allocation89_spill] sm:$0xff] }
 0x250   : > { %8878 = vst [vmem:[#allocation32_spill] sm:$0xff] %v7057_v19  ;;  %v2940_v30 = vpack.c.bf16 %v2909_v49, %v2908_v63  ;;  %v7075_v19 = vmul.f32 %v5364_v50, %v6954_v25  ;;  %v8884_v27 = vld [vmem:[#allocation18_spill] sm:$0xff] }
 0x251   : > { %4470 = vmatmul.msk.bf16.gmra.mxu3 %vm892_vm3, %v8877_v9  ;;  %v1566_v39 = vpop.f32.mrf.mxu2  ;;  %8880 = vst [vmem:[#allocation15_spill] sm:$0xff] %v7078_v17  ;;  %v8893_v25 = vld [vmem:[#allocation46_spill] sm:$0xff] }
 0x252   : > { %v7059_v58 = vadd.f32 %v1566_v39, %v1132_v31  ;;  %3167 = vperm.xlu1 %4703, %v4809_v24   ;;  %v4810_v39 = vld [vmem:[%s8373_s2 + $0x68] sm:$0xff]  ;;  %v2134_v31 = vshrl.u32 %v4804_v42, 16 }
 0x253   : > { %v7064_v37 = vpop.f32.mrf.mxu1  ;;  %4705 = vset.pattern.permute.xlu2 %v8777_v23 }
 0x254   : > { %8879 = vst [vmem:[#allocation33_spill] sm:$0xff] %v7059_v58  ;;  %v1904_v54 = vpop.f32.mrf.mxu3  ;;  %3170 = vperm.xlu2 %4705, %v4810_v39   ;;  %v2138_v58 = vshll.u32 %v2007_v2, 16  ;;  %v2136_v42 = vor.u32 %v2134_v31, %v2132_v8 }
 0x255   : > { %v1969_v9 = vadd.f32 %v1904_v54, %v6842_v12  ;;  %v2822_v44 = vpop.permute.xlu1 %2821  ;;  %v8883_v54 = vmov 6  }
 0x256   : > { %v7081_v38 = vmul.f32 %v5357_v46, %v2822_v44  ;;  %v2862_v63 = vpop.permute.xlu2 %2861  ;;  %v2140_v2 = vrot.slane %v2138_v58, 1  ;;  %4729 = vset.pattern.permute.xlu0 %v8883_v54  ;;  %v1135_v44 = vadd.f32 %v6944_v60, %v8884_v27  ;;  %v7113_v27 = vmul.f32 %v5338_v26, %v6914_v36  ;;  %v8887_v36 = vld [vmem:[#allocation47_spill] sm:$0xff] }
 0x257   : > { %v7084_v12 = vmul.f32 %v8772_v3, %v2862_v63  ;;  %v7087_v49 = vadd.f32 %v6935_v21, %v1969_v9  ;;  %4508 = vmatmul.msk.bf16.vlgmr.msra.gmra.mxu2 %vm892_vm3, %v2940_v30  ;;  %2881 = vperm.xlu0 %4729, %v7000_v35   ;;  %v7098_v21 = vpop.f32.mrf.mxu0  ;;  %v8907_v3 = vld [vmem:[#allocation65_spill] sm:$0xff] }
 0x258   : > { %v2141_v30 = vsel %vm759_vm2, %v2136_v42, %v2140_v2  ;;  %v8886_v42 = vld [vmem:[#allocation17_spill] sm:$0xff]  ;;  %v7127_v2 = vld [vmem:[%s8373_s2 + $0xd0] sm:$0xff] }
 0x259   : > { %8881 = vst [vmem:[#allocation16_spill] sm:$0xff] %v7084_v12  ;;  %v1569_v18 = vpop.f32.mrf.mxu2 }
 0x25a   : > { %8882 = vst [vmem:[#allocation72_spill] sm:$0xff] %v7087_v49  ;;  %v7101_v8 = vadd.f32 %v1569_v18, %v1135_v44  ;;  %4706 = vset.pattern.permute.xlu1 %v8799_v41  ;;  %v2910_v44 = vmul.f32 %v8887_v36, %v6950_v6 }
 0x25b   : > { %v7104_v58 = vpop.f32.mrf.mxu1  ;;  %3715 = vperm.xlu1 %4706, %v4809_v24  }
 0x25c   : > { %v1906_v9 = vpop.f32.mrf.mxu3  ;;  %4707 = vset.pattern.permute.xlu2 %v8799_v41  ;;  %4489 = vmatmul.msk.bf16.gmra.mxu0 %vm892_vm3, %v2141_v30  ;;  %v8888_v30 = vld [vmem:[#allocation81_spill] sm:$0xff] }
 0x25d   : > { %v7107_v31 = vadd.f32 %v1906_v9, %v6893_v33  ;;  %v2834_v60 = vpop.permute.xlu1 %2833  ;;  %3718 = vperm.xlu2 %4707, %v4810_v39   ;;  %v1137_v9 = vadd.f32 %v6983_v7, %v8888_v30  ;;  %v8890_v39 = vld [vmem:[#allocation12_spill] sm:$0xff]  ;;  %v4812_v30 = vld [vmem:[%s8373_s2 + $0x78] sm:$0xff] }
 0x25e   : > { %v7116_v18 = vmul.f32 %v8704_v4, %v2834_v60  ;;  %4493 = vmatmul.msk.bf16.gmra.mxu1 %vm892_vm3, %v8886_v42  ;;  %v8889_v60 = vld [vmem:[#allocation25_spill] sm:$0xff] }
 0x25f   : > { %8885 = vst [vmem:[#allocation5_spill] sm:$0xff] %v7107_v31  ;;  %v7120_v24 = vpop.permute.xlu2 %3134  ;;  %2885 = vperm.xlu0 %4729, %v7127_v2   ;;  %v8891_v42 = vpack.c.bf16 %v8889_v60, %v8890_v39  ;;  %v7138_v33 = vpop.f32.mrf.mxu0  ;;  %v2911_v31 = vmul.f32 %v8893_v25, %v6805_v0  ;;  %v8895_v39 = vld [vmem:[#allocation54_spill] sm:$0xff]  ;;  %v8896_v0 = vld [vmem:[#allocation53_spill] sm:$0xff] }
 0x260   : > { %8892 = vst [vmem:[#allocation87_spill] sm:$0xff] %v7138_v33  ;;  %v8902_v33 = vld [vmem:[#allocation59_spill] sm:$0xff] }
 0x261   : > { %4471 = vmatmul.msk.bf16.gmra.mxu3 %vm892_vm3, %v8891_v42  ;;  %v1571_v63 = vpop.f32.mrf.mxu2  ;;  %v2941_v1 = vpack.c.bf16 %v2911_v31, %v2910_v44  ;;  %v7153_v42 = vmul.f32 %v8895_v39, %v7036_v15  ;;  %v8898_v15 = vld [vmem:[#allocation22_spill] sm:$0xff] }
 0x262   : > { %v7142_v49 = vadd.f32 %v1571_v63, %v1137_v9  ;;  %v4813_v9 = vld [vmem:[%s8373_s2 + $0x70] sm:$0xff] }
 0x263   : > { %v7144_v28 = vpop.f32.mrf.mxu1  ;;  %4709 = vset.pattern.permute.xlu1 %v8777_v23 }
 0x264   : > { %8894 = vst [vmem:[#allocation76_spill] sm:$0xff] %v7142_v49  ;;  %v1909_v6 = vpop.f32.mrf.mxu3  ;;  %3176 = vperm.xlu1 %4709, %v4812_v30  }
 0x265   : > { %v1971_v7 = vadd.f32 %v1909_v6, %v6942_v43  ;;  %v2846_v60 = vpop.permute.xlu1 %2845  ;;  %3721 = vperm.xlu2 %4707, %v4813_v9   ;;  %v1140_v6 = vadd.f32 %v7025_v57, %v8898_v15  ;;  %v8900_v57 = vld [vmem:[#allocation60_spill] sm:$0xff] }
 0x266   : > { %v7156_v63 = vmul.f32 %v8896_v0, %v2846_v60  ;;  %v7175_v60 = vld [vmem:[%s8373_s2 + $0xe8] sm:$0xff]  ;;  %v7189_v15 = vmul.f32 %v8900_v57, %v7014_v62  ;;  %v8905_v62 = vld [vmem:[#allocation41_spill] sm:$0xff] }
 0x267   : > { %v7162_v43 = vadd.f32 %v7017_v56, %v1971_v7  ;;  %4509 = vmatmul.msk.bf16.gmra.mxu2 %vm892_vm3, %v2941_v1  ;;  %4736 = vset.pattern.permute.xlu0 %v8799_v41  ;;  %v7178_v7 = vpop.f32.mrf.mxu0 }
 0x268   : > { %v7167_v44 = vpop.permute.xlu2 %3679  ;;  %3766 = vperm.xlu0 %4736, %v7175_v60   ;;  %8901 = vst [vmem:[#allocation69_spill] sm:$0xff] %v7189_v15  ;;  %v8921_v15 = vld [vmem:[#allocation80_spill] sm:$0xff] }
 0x269   : > { %8897 = vst [vmem:[#allocation73_spill] sm:$0xff] %v7162_v43  ;;  %v1574_v56 = vpop.f32.mrf.mxu2 }
 0x26a   : > { %v7180_v1 = vadd.f32 %v1574_v56, %v1140_v6  ;;  %v4815_v56 = vld [vmem:[%s8373_s2 + $0x80] sm:$0xff]  ;;  %v7215_v6 = vld [vmem:[%s8373_s2 + $0xf0] sm:$0xff] }
 0x26b   : > { %v7182_v9 = vpop.f32.mrf.mxu1  ;;  %8910 = vst [vmem:[#allocation84_spill] sm:$0xff] %v7215_v6 }
 0x26c   : > { %v7184_v31 = vpop.f32.mrf.mxu3  ;;  %4710 = vset.pattern.permute.xlu1 %v8799_v41 }
 0x26d   : > { %8899 = vst [vmem:[#allocation79_spill] sm:$0xff] %v7184_v31  ;;  %v2858_v49 = vpop.permute.xlu1 %2857  ;;  %3724 = vperm.xlu1 %4710, %v4812_v30   ;;  %4711 = vset.pattern.permute.xlu2 %v8777_v23  ;;  %v1142_v30 = vadd.f32 %v7064_v37, %v8906_v52 }
 0x26e   : > { %v7192_v43 = vmul.f32 %v8902_v33, %v2858_v49  ;;  %4494 = vmatmul.msk.bf16.gmra.mxu1 %vm892_vm3, %v8904_v32  ;;  %3179 = vperm.xlu2 %4711, %v4815_v56   ;;  %v2912_v49 = vmul.f32 %v8905_v62, %v6991_v5  ;;  %v8908_v32 = vld [vmem:[#allocation27_spill] sm:$0xff]  ;;  %v8912_v5 = vld [vmem:[#allocation42_spill] sm:$0xff] }
 0x26f   : > { %v8909_v57 = vpack.c.bf16 %v8907_v3, %v8908_v32  ;;  %v7218_v59 = vpop.f32.mrf.mxu0  ;;  %v2913_v12 = vmul.f32 %v8912_v5, %v6858_v47  ;;  %v8915_v47 = vld [vmem:[#allocation21_spill] sm:$0xff] }
 0x270   : > { %8903 = vst [vmem:[#allocation36_spill] sm:$0xff] %v7192_v43  ;;  %v7202_v31 = vpop.permute.xlu2 %3685  ;;  %3769 = vperm.xlu0 %4736, %v7215_v6  }
 0x271   : > { %4472 = vmatmul.msk.bf16.gmra.mxu3 %vm892_vm3, %v8909_v57  ;;  %v1576_v33 = vpop.f32.mrf.mxu2  ;;  %8911 = vst [vmem:[#allocation3_spill] sm:$0xff] %v7218_v59  ;;  %v2942_v37 = vpack.c.bf16 %v2913_v12, %v2912_v49  ;;  %v3227_v57 = vrot.slane %v7120_v24, 7  ;;  %v3138_v59 = vpop.permute.xlu0 %3137 }
 0x272   : > { %v7222_v17 = vadd.f32 %v1576_v33, %v1142_v30  ;;  %v1145_v33 = vadd.f32 %v7104_v58, %v8915_v47  ;;  %v7247_v58 = vld [vmem:[%s8373_s2 + $0xf8] sm:$0xff] }
 0x273   : > { %v7224_v52 = vpop.f32.mrf.mxu1  ;;  %8916 = vst [vmem:[#allocation9_spill] sm:$0xff] %v7247_v58 }
 0x274   : > { %8913 = vst [vmem:[#allocation13_spill] sm:$0xff] %v7222_v17  ;;  %v1914_v3 = vpop.f32.mrf.mxu3 }
 0x275   : > { %v1973_v32 = vadd.f32 %v1914_v3, %v7020_v14  ;;  %3727 = vperm.xlu1 %4710, %v4815_v56   ;;  %v4817_v14 = vld [vmem:[%s8373_s2 + $0x88] sm:$0xff] }
 0x276   : > { %v3132_v39 = vpop.permute.xlu1 %3131  ;;  %4712 = vset.pattern.permute.xlu2 %v8799_v41 }
 0x277   : > { %v7229_v0 = vadd.f32 %v7098_v21, %v1973_v32  ;;  %v3226_v29 = vrot.slane %v3132_v39, 7  ;;  %4510 = vmatmul.msk.bf16.gmra.mxu2 %vm892_vm3, %v2942_v37  ;;  %3730 = vperm.xlu2 %4712, %v4817_v14   ;;  %v7254_v3 = vpop.f32.mrf.mxu0 }
 0x278   : > { %4742 = vset.pattern.permute.xlu0 %v8883_v54 }
 0x279   : > { %8914 = vst [vmem:[#allocation7_spill] sm:$0xff] %v7229_v0  ;;  %v3228_v12 = vsel %vm610_vm1, %v3226_v29, %v3227_v57  ;;  %v3322_v24 = vmul.f32 %v8872_v11, %v3226_v29  ;;  %v1579_v39 = vpop.f32.mrf.mxu2  ;;  %2905 = vperm.xlu0 %4742, %v7247_v58   ;;  %v3229_v29 = vrot.slane %v3138_v59, 7  ;;  %v7273_v0 = vpop.permute.xlu0 %3688 }
 0x27a   : > { %v3323_v21 = vmul.f32 %v8873_v40, %v3228_v12  ;;  %v7242_v56 = vpop.permute.xlu2 %3146  ;;  %v7250_v49 = vadd.f32 %v1579_v39, %v1145_v33  ;;  %v8918_v12 = vld [vmem:[#allocation77_spill] sm:$0xff]  ;;  %v8919_v39 = vld [vmem:[#allocation43_spill] sm:$0xff] }
 0x27b   : > { %v7252_v30 = vpop.f32.mrf.mxu1  ;;  %v3230_v14 = vsel %vm610_vm1, %v3227_v57, %v3229_v29  ;;  %v2915_v17 = vmul.f32 %v8919_v39, %v7033_v16  ;;  %v8922_v16 = vld [vmem:[#allocation45_spill] sm:$0xff] }
 0x27c   : > { %v3355_v37 = vpack.c.bf16 %v3323_v21, %v3322_v24  ;;  %v7256_v32 = vpop.f32.mrf.mxu3  ;;  %v8920_v24 = vld [vmem:[#allocation95_spill] sm:$0xff]  ;;  %v3324_v57 = vmul.f32 %v8887_v36, %v3230_v14  ;;  %v2914_v43 = vmul.f32 %v8922_v16, %v8921_v15 }
 0x27d   : > { %8917 = vst [vmem:[#allocation38_spill] sm:$0xff] %v7256_v32  ;;  %4713 = vset.pattern.permute.xlu1 %v8777_v23  ;;  %v1147_v21 = vadd.f32 %v7144_v28, %v8920_v24 }
 0x27e   : > { %v7259_v47 = vpop.permute.xlu1 %3140  ;;  %4495 = vmatmul.msk.bf16.gmra.mxu1 %vm892_vm3, %v8918_v12  ;;  %3188 = vperm.xlu1 %4713, %v6909_v45   ;;  %v3377_v33 = vshll.u32 %v3355_v37, 16  ;;  %v2943_v6 = vpack.c.bf16 %v2915_v17, %v2914_v43  ;;  %v3375_v15 = vshrl.u32 %v3355_v37, 16 }
 0x27f   : > { %v8537_v59 = vrot.slane %v7259_v47, 7  ;;  %3733 = vperm.xlu2 %4712, %v6851_v13   ;;  %v8542_v13 = vrot.slane %v7273_v0, 6  ;;  %v7292_v61 = vpop.f32.mrf.mxu0 }
 0x280   : > { %v3379_v24 = vrot.slane %v3377_v33, 1 }
 0x281   : > { %v3232_v32 = vsel %vm610_vm1, %v3229_v29, %v8537_v59  ;;  %v1581_v12 = vpop.f32.mrf.mxu2  ;;  %4743 = vset.pattern.permute.xlu0 %v8799_v41  ;;  %v3777_v59 = vrot.slane %v7202_v31, 6  ;;  %v4819_v31 = vld [vmem:[%s8373_s2 + $0xa0] sm:$0xff] }
 0x282   : > { %v3325_v45 = vmul.f32 %v8893_v25, %v3232_v32  ;;  %v7281_v58 = vadd.f32 %v1581_v12, %v1147_v21  ;;  %v3774_v21 = vrot.slane %v7167_v44, 6  ;;  %v3380_v43 = vor.u32 %v3379_v24, %v3375_v15  ;;  %v4820_v15 = vld [vmem:[%s8373_s2 + $0xa8] sm:$0xff] }
 0x283   : > { %v7283_v28 = vpop.permute.xlu2 %3694  ;;  %v7289_v32 = vpop.f32.mrf.mxu1  ;;  %v3780_v37 = vsel %vm941_vm0, %v3777_v59, %v8542_v13 }
 0x284   : > { %8923 = vst [vmem:[#allocation39_spill] sm:$0xff] %v7281_v58  ;;  %v7285_v29 = vpack.c.bf16 %v3325_v45, %v3324_v57  ;;  %v1919_v14 = vpop.f32.mrf.mxu3  ;;  %v8924_v57 = vld [vmem:[#allocation34_spill] sm:$0xff] }
 0x285   : > { %v1975_v51 = vadd.f32 %v1919_v14, %v7101_v8  ;;  %v1150_v45 = vadd.f32 %v7182_v9, %v8924_v57 }
 0x286   : > { %v3382_v12 = vshll.u32 %v7285_v29, 16  ;;  %3191 = vperm.xlu1 %4713, %v4819_v31  }
 0x287   : > { %v7297_v33 = vadd.f32 %v7178_v7, %v1975_v51  ;;  %4511 = vmatmul.msk.bf16.gmra.mxu2 %vm892_vm3, %v2943_v6  ;;  %v3683_v17 = vpop.permute.xlu1 %3682  ;;  %4715 = vset.pattern.permute.xlu2 %v8777_v23  ;;  %v3870_v51 = vmul.f32 %v8872_v11, %v3774_v21 }
 0x288   : > { %v3384_v8 = vrot.slane %v3382_v12, 1  ;;  %v3775_v44 = vrot.slane %v3683_v17, 6  ;;  %3194 = vperm.xlu2 %4715, %v4820_v15   ;;  %v3873_v12 = vmul.f32 %v8893_v25, %v3780_v37  ;;  %v8926_v37 = vld [vmem:[#allocation48_spill] sm:$0xff] }
 0x289   : > { %v1584_v6 = vpop.f32.mrf.mxu2 }
 0x28a   : > { %v3776_v7 = vsel %vm941_vm0, %v3774_v21, %v3775_v44  ;;  %v3778_v14 = vsel %vm941_vm0, %v3775_v44, %v3777_v59  ;;  %v3385_v24 = vsel %vm759_vm2, %v3380_v43, %v3384_v8  ;;  %v7319_v57 = vadd.f32 %v1584_v6, %v1150_v45  ;;  %v8925_v44 = vld [vmem:[#allocation19_spill] sm:$0xff]  ;;  %v8928_v6 = vld [vmem:[#allocation24_spill] sm:$0xff] }
 0x28b   : > { %v3871_v9 = vmul.f32 %v8873_v40, %v3776_v7  ;;  %v3872_v17 = vmul.f32 %v8887_v36, %v3778_v14  ;;  %4525 = vmatmul.msk.bf16.vlgmr.msra.gmra.mxu3 %vm892_vm3, %v3385_v24  ;;  %v7324_v59 = vpop.permute.xlu2 %3697  ;;  %v8543_v40 = vrot.slane %v7242_v56, 7  ;;  %v7331_v25 = vpop.f32.mrf.mxu1  ;;  %v2917_v45 = vmul.f32 %v8926_v37, %v6860_v48  ;;  %v8927_v7 = vld [vmem:[#allocation49_spill] sm:$0xff] }
 0x28c   : > { %v7322_v11 = vpop.f32.mrf.mxu3  ;;  %v7334_v36 = vpop.f32.mrf.mxu0  ;;  %v2916_v14 = vmul.f32 %v8927_v7, %v6912_v22  ;;  %v1152_v24 = vadd.f32 %v7224_v52, %v8928_v6 }
 0x28d   : > { %v3903_v21 = vpack.c.bf16 %v3871_v9, %v3870_v51  ;;  %v3904_v43 = vpack.c.bf16 %v3873_v12, %v3872_v17 }
 0x28e   : > { %4496 = vmatmul.msk.bf16.gmra.mxu1 %vm892_vm3, %v8925_v44  ;;  %4716 = vset.pattern.permute.xlu1 %v8799_v41  ;;  %v2944_v44 = vpack.c.bf16 %v2917_v45, %v2916_v14 }
 0x28f   : > { %v3939_v13 = vrot.slane %v3903_v21, 1  ;;  %v7328_v58 = vrot.slane %v3904_v43, 1  ;;  %3739 = vperm.xlu1 %4716, %v4819_v31   ;;  %v8929_v21 = vrot.slane %v7259_v47, 7 }
 0x290   : > { %v3144_v51 = vpop.permute.xlu1 %3143  ;;  %4717 = vset.pattern.permute.xlu2 %v8799_v41 }
 0x291   : > { %v3233_v12 = vrot.slane %v3144_v51, 7  ;;  %v3941_v9 = vsel %vm1435_vm4, %v3939_v13, %v7328_v58  ;;  %v1586_v17 = vpop.f32.mrf.mxu2  ;;  %3742 = vperm.xlu2 %4717, %v4820_v15   ;;  %v3386_v15 = vshrl.u32 %v7285_v29, 16 }
 0x292   : > { %4542 = vmatmul.msk.bf16.vlgmr.msra.gmra.mxu0 %vm892_vm3, %v3941_v9  ;;  %v7352_v31 = vadd.f32 %v1586_v17, %v1152_v24 }
 0x293   : > { %v3234_v48 = vsel %vm610_vm1, %v8929_v21, %v3233_v12  ;;  %v3236_v22 = vsel %vm610_vm1, %v3233_v12, %v8543_v40  ;;  %v8930_v12 = vld [vmem:[#allocation92_spill] sm:$0xff]  ;;  %v7371_v14 = vpop.f32.mrf.mxu1 }
 0x294   : > { %v3326_v52 = vmul.f32 %v8905_v62, %v3234_v48  ;;  %v3327_v13 = vmul.f32 %v8912_v5, %v3236_v22  ;;  %v1924_v43 = vpop.f32.mrf.mxu3  ;;  %v7357_v6 = vpop.permute.xlu2 %3155  ;;  %v1155_v45 = vadd.f32 %v7252_v30, %v8930_v12  ;;  %v3388_v48 = vor.u32 %v3386_v15, %v3384_v8 }
 0x295   : > { %v1977_v51 = vadd.f32 %v1924_v43, %v7180_v1  ;;  %v3783_v1 = vrot.slane %v7283_v28, 6  ;;  %v7379_v17 = vpop.f32.mrf.mxu0 }
 0x296   : > { %v7359_v47 = vpack.c.bf16 %v3327_v13, %v3326_v52 }
 0x297   : > { %v7362_v9 = vadd.f32 %v7254_v3, %v1977_v51  ;;  %4512 = vmatmul.msk.bf16.gmra.mxu2 %vm892_vm3, %v2944_v44  ;;  %4719 = vset.pattern.permute.xlu1 %v8777_v23  ;;  %v7376_v3 = vld [vmem:[%s8373_s2 + $0xb8] sm:$0xff]  ;;  %v3150_v44 = vpop.permute.xlu0 %3149  ;;  %v8931_v51 = vrot.slane %v7273_v0, 6  ;;  %v8933_v0 = vld [vmem:[#allocation94_spill] sm:$0xff] }
 0x298   : > { %v3390_v24 = vshll.u32 %v7359_v47, 16  ;;  %3200 = vperm.xlu1 %4719, %v7376_v3  }
 0x299   : > { %v3692_v21 = vpop.permute.xlu1 %3691  ;;  %v1589_v29 = vpop.f32.mrf.mxu2  ;;  %3745 = vperm.xlu2 %4717, %v6961_v34  }
 0x29a   : > { %v3392_v22 = vrot.slane %v3390_v24, 1  ;;  %v3781_v52 = vrot.slane %v3692_v21, 6  ;;  %v7381_v13 = vadd.f32 %v1589_v29, %v1155_v45  ;;  %v8932_v24 = vld [vmem:[#allocation28_spill] sm:$0xff]  ;;  %v3237_v21 = vrot.slane %v3150_v44, 7 }
 0x29b   : > { %v8935_v44 = vrot.slane %v7242_v56, 7 }
 0x29c   : > { %v7384_v30 = vpop.f32.mrf.mxu3  ;;  %v3393_v43 = vsel %vm759_vm2, %v3388_v48, %v3392_v22  ;;  %v3782_v12 = vsel %vm941_vm0, %v8931_v51, %v3781_v52  ;;  %v3784_v40 = vsel %vm941_vm0, %v3781_v52, %v3783_v1  ;;  %v1157_v48 = vadd.f32 %v7289_v32, %v8933_v0 }
 0x29d   : > { %4526 = vmatmul.msk.bf16.gmra.mxu3 %vm892_vm3, %v3393_v43  ;;  %v3874_v8 = vmul.f32 %v8905_v62, %v3782_v12  ;;  %v3875_v15 = vmul.f32 %v8912_v5, %v3784_v40  ;;  %v7398_v45 = vpop.permute.xlu2 %3706  ;;  %v7406_v62 = vpop.f32.mrf.mxu1  ;;  %v3238_v51 = vsel %vm610_vm1, %v8935_v44, %v3237_v21  ;;  %v3785_v44 = vrot.slane %v7324_v59, 6 }
 0x29e   : > { %4497 = vmatmul.msk.bf16.gmra.mxu1 %vm892_vm3, %v8932_v24  ;;  %v3328_v56 = vmul.f32 %v8922_v16, %v3238_v51 }
 0x29f   : > { %v3905_v29 = vpack.c.bf16 %v3875_v15, %v3874_v8  ;;  %v7418_v15 = vpop.f32.mrf.mxu0 }
 0x2a0   : > { %4720 = vset.pattern.permute.xlu1 %v8799_v41 }
 0x2a1   : > { %3748 = vperm.xlu1 %4720, %v7376_v3   ;;  %v1591_v52 = vpop.f32.mrf.mxu2  ;;  %v7404_v43 = vrot.slane %v3905_v29, 1  ;;  %4721 = vset.pattern.permute.xlu2 %v8777_v23 }
 0x2a2   : > { %v7408_v5 = vadd.f32 %v1591_v52, %v1157_v48  ;;  %v3153_v40 = vpop.permute.xlu1 %3152  ;;  %3203 = vperm.xlu2 %4721, %v7044_v10  }
 0x2a3   : > { %v3239_v12 = vrot.slane %v3153_v40, 7  ;;  %v3943_v8 = vsel %vm1435_vm4, %v7328_v58, %v7404_v43  ;;  %v8936_v58 = vpack.c.bf16 %v7075_v19, %v7081_v38  ;;  %v8937_v40 = vld [vmem:[#allocation2_spill] sm:$0xff] }
 0x2a4   : > { %8934 = vst [vmem:[#allocation91_spill] sm:$0xff] %v7408_v5  ;;  %v1929_v32 = vpop.f32.mrf.mxu3  ;;  %4543 = vmatmul.msk.bf16.gmra.mxu0 %vm892_vm3, %v3943_v8  ;;  %v3394_v8 = vshrl.u32 %v7359_v47, 16  ;;  %v8998_v5 = vld [vmem:[#allocation6_spill] sm:$0xff] }
 0x2a5   : > { %v1979_v24 = vadd.f32 %v1929_v32, %v7250_v49  ;;  %v3240_v29 = vsel %vm610_vm1, %v3237_v21, %v3239_v12  ;;  %v7432_v52 = vpop.permute.xlu2 %3709  ;;  %v1160_v49 = vadd.f32 %v7331_v25, %v8937_v40  ;;  %v7437_v21 = vpop.permute.xlu0 %3158  ;;  %v8938_v40 = vld [vmem:[#allocation44_spill] sm:$0xff] }
 0x2a6   : > { %v3329_v0 = vmul.f32 %v8919_v39, %v3240_v29  ;;  %v3243_v32 = vrot.slane %v7437_v21, 7  ;;  %v7455_v29 = vpop.f32.mrf.mxu1  ;;  %v8944_v21 = vld [vmem:[#allocation40_spill] sm:$0xff] }
 0x2a7   : > { %v7426_v48 = vadd.f32 %v7334_v36, %v1979_v24  ;;  %4513 = vmatmul.msk.bf16.gmra.mxu2 %vm892_vm3, %v8936_v58  ;;  %v3241_v36 = vrot.slane %v7357_v6, 7  ;;  %v3786_v6 = vsel %vm941_vm0, %v3783_v1, %v3785_v44 }
 0x2a8   : > { %v7439_v51 = vpack.c.bf16 %v3329_v0, %v3328_v56  ;;  %v3396_v0 = vor.u32 %v3394_v8, %v3392_v22  ;;  %v3876_v22 = vmul.f32 %v8922_v16, %v3786_v6 }
 0x2a9   : > { %4722 = vset.pattern.permute.xlu1 %v8883_v54  ;;  %v3244_v47 = vsel %vm610_vm1, %v3241_v36, %v3243_v32 }
 0x2aa   : > { %v1594_v19 = vpop.f32.mrf.mxu2  ;;  %2869 = vperm.xlu1 %4722, %v6961_v34   ;;  %v3398_v25 = vshll.u32 %v7439_v51, 16  ;;  %4723 = vset.pattern.permute.xlu2 %v8883_v54  ;;  %v3242_v34 = vsel %vm610_vm1, %v3239_v12, %v3241_v36  ;;  %v8939_v12 = vld [vmem:[#allocation37_spill] sm:$0xff] }
 0x2ab   : > { %v7444_v38 = vadd.f32 %v1594_v19, %v1160_v49  ;;  %v3701_v59 = vpop.permute.xlu1 %3700  ;;  %2873 = vperm.xlu2 %4723, %v7376_v3   ;;  %v7464_v49 = vpop.f32.mrf.mxu0  ;;  %v1162_v36 = vadd.f32 %v7371_v14, %v8939_v12  ;;  %v3330_v8 = vmul.f32 %v8927_v7, %v3242_v34 }
 0x2ac   : > { %v7449_v24 = vpop.f32.mrf.mxu3  ;;  %v3787_v56 = vrot.slane %v3701_v59, 6  ;;  %v3400_v58 = vrot.slane %v3398_v25, 1  ;;  %v3331_v25 = vmul.f32 %v8926_v37, %v3244_v47 }
 0x2ae   : > { %4498 = vmatmul.msk.bf16.gmra.mxu1 %vm892_vm3, %v8938_v40  ;;  %v3788_v28 = vsel %vm941_vm0, %v3785_v44, %v3787_v56  ;;  %v3401_v1 = vsel %vm759_vm2, %v3396_v0, %v3400_v58  ;;  %v7471_v3 = vpop.permute.xlu2 %3170  ;;  %v3791_v44 = vrot.slane %v7398_v45, 6  ;;  %v8949_v45 = vld [vmem:[#allocation35_spill] sm:$0xff] }
 0x2af   : > { %v3877_v19 = vmul.f32 %v8919_v39, %v3788_v28  ;;  %4527 = vmatmul.msk.bf16.gmra.mxu3 %vm892_vm3, %v3401_v1  ;;  %v7482_v28 = vpack.c.bf16 %v3331_v25, %v3330_v8  ;;  %v3162_v1 = vpop.permute.xlu0 %3161 }
 0x2b1   : > { %v3906_v59 = vpack.c.bf16 %v3877_v19, %v3876_v22  ;;  %v1169_v22 = vpop.f32.mrf.mxu1  ;;  %v3406_v25 = vshll.u32 %v7482_v28, 16 }
 0x2b2   : > { %v1596_v40 = vpop.f32.mrf.mxu2  ;;  %4725 = vset.pattern.permute.xlu1 %v8799_v41 }
 0x2b3   : > { %v7478_v0 = vadd.f32 %v1596_v40, %v1162_v36  ;;  %3754 = vperm.xlu1 %4725, %v7000_v35   ;;  %v3704_v39 = vpop.permute.xlu1 %3703  ;;  %v3944_v6 = vrot.slane %v3906_v59, 1  ;;  %4726 = vset.pattern.permute.xlu2 %v8777_v23  ;;  %v8942_v36 = vld [vmem:[#allocation14_spill] sm:$0xff]  ;;  %v3245_v59 = vrot.slane %v3162_v1, 7 }
 0x2b4   : > { %v1934_v16 = vpop.f32.mrf.mxu3  ;;  %v3789_v14 = vrot.slane %v3704_v39, 6  ;;  %3209 = vperm.xlu2 %4726, %v7127_v2   ;;  %v1165_v8 = vadd.f32 %v7406_v62, %v8942_v36  ;;  %v7517_v62 = vld [vmem:[%s8373_s2 + $0xd8] sm:$0xff] }
 0x2b5   : > { %8940 = vst [vmem:[#allocation93_spill] sm:$0xff] %v7478_v0  ;;  %v1981_v34 = vadd.f32 %v1934_v16, %v7319_v57  ;;  %v3945_v47 = vsel %vm1435_vm4, %v7404_v43, %v3944_v6  ;;  %v8941_v57 = vpack.c.bf16 %v7116_v18, %v7113_v27  ;;  %v2262_v43 = vpop.f32.mrf.mxu0 }
 0x2b6   : > { %v3790_v19 = vsel %vm941_vm0, %v3787_v56, %v3789_v14  ;;  %v3792_v35 = vsel %vm941_vm0, %v3789_v14, %v3791_v44  ;;  %4544 = vmatmul.msk.bf16.gmra.mxu0 %vm892_vm3, %v3945_v47  ;;  %v3402_v56 = vshrl.u32 %v7439_v51, 16  ;;  %v3408_v51 = vrot.slane %v3406_v25, 1 }
 0x2b7   : > { %v7494_v12 = vadd.f32 %v7418_v15, %v1981_v34  ;;  %4514 = vmatmul.msk.bf16.gmra.mxu2 %vm892_vm3, %v8941_v57  ;;  %v3878_v40 = vmul.f32 %v8927_v7, %v3790_v19  ;;  %v3879_v15 = vmul.f32 %v8926_v37, %v3792_v35  ;;  %v7507_v16 = vpop.permute.xlu2 %3718  ;;  %v3246_v37 = vsel %vm610_vm1, %v3243_v32, %v3245_v59  ;;  %v7533_v57 = vpop.permute.xlu0 %3712 }
 0x2b8   : > { %v3404_v18 = vor.u32 %v3402_v56, %v3400_v58  ;;  %v8943_v58 = vld [vmem:[#allocation90_spill] sm:$0xff]  ;;  %v3332_v35 = vmul.f32 %v5357_v46, %v3246_v37  ;;  %v1167_v32 = vadd.f32 %v7455_v29, %v8944_v21 }
 0x2b9   : > { %v3907_v34 = vpack.c.bf16 %v3879_v15, %v3878_v40  ;;  %v7535_v36 = vpop.f32.mrf.mxu1 }
 0x2ba   : > { %v1599_v39 = vpop.f32.mrf.mxu2  ;;  %v3409_v1 = vsel %vm759_vm2, %v3404_v18, %v3408_v51  ;;  %8945 = vst [vmem:[#allocation50_spill] sm:$0xff] %v7535_v36 }
 0x2bb   : > { %v7509_v27 = vadd.f32 %v1599_v39, %v1165_v8  ;;  %4727 = vset.pattern.permute.xlu1 %v8777_v23  ;;  %v7538_v25 = vrot.slane %v3907_v34, 1  ;;  %v3795_v39 = vrot.slane %v7533_v57, 6 }
 0x2bc   : > { %v7512_v14 = vpop.f32.mrf.mxu3  ;;  %3212 = vperm.xlu1 %4727, %v7517_v62   ;;  %v3165_v7 = vpop.permute.xlu1 %3164  ;;  %4728 = vset.pattern.permute.xlu2 %v8883_v54 }
 0x2bd   : > { %v3247_v47 = vrot.slane %v3165_v7, 7  ;;  %2877 = vperm.xlu2 %4728, %v7044_v10   ;;  %v7540_v40 = vpop.f32.mrf.mxu0  ;;  %v3793_v10 = vrot.slane %v7432_v52, 6  ;;  %v3947_v34 = vsel %vm1435_vm4, %v3944_v6, %v7538_v25 }
 0x2be   : > { %4499 = vmatmul.msk.bf16.gmra.mxu1 %vm892_vm3, %v8943_v58  ;;  %8946 = vst [vmem:[#allocation18_spill] sm:$0xff] %v7540_v40 }
 0x2bf   : > { %v3248_v19 = vsel %vm610_vm1, %v3245_v59, %v3247_v47  ;;  %4528 = vmatmul.msk.bf16.gmra.mxu3 %vm892_vm3, %v3409_v1  ;;  %v7548_v18 = vpop.permute.xlu2 %3721  ;;  %v3794_v52 = vsel %vm941_vm0, %v3791_v44, %v3793_v10  ;;  %v8948_v1 = vpack.c.bf16 %v6988_v53, %v7004_v55  ;;  %v1170_v44 = vadd.f32 %v1169_v22, %v8949_v45 }
 0x2c0   : > { %v3333_v8 = vmul.f32 %v5364_v50, %v3248_v19  ;;  %v3251_v19 = vrot.slane %v7471_v3, 7  ;;  %v8958_v3 = vld [vmem:[#allocation52_spill] sm:$0xff] }
 0x2c2   : > { %v1601_v56 = vpop.f32.mrf.mxu2  ;;  %v7543_v59 = vpack.c.bf16 %v3333_v8, %v3332_v35  ;;  %v7573_v35 = vpop.f32.mrf.mxu1 }
 0x2c3   : > { %v7545_v15 = vadd.f32 %v1601_v56, %v1167_v32  ;;  %v3410_v32 = vshrl.u32 %v7482_v28, 16 }
 0x2c4   : > { %v1939_v29 = vpop.f32.mrf.mxu3  ;;  %4730 = vset.pattern.permute.xlu1 %v8799_v41  ;;  %v3168_v37 = vpop.permute.xlu1 %3167 }
 0x2c5   : > { %8947 = vst [vmem:[#allocation17_spill] sm:$0xff] %v7545_v15  ;;  %v1983_v7 = vadd.f32 %v1939_v29, %v7381_v13  ;;  %3757 = vperm.xlu1 %4730, %v7127_v2   ;;  %v3414_v13 = vshll.u32 %v7543_v59, 16  ;;  %v3796_v2 = vsel %vm941_vm0, %v3793_v10, %v3795_v39  ;;  %v3249_v6 = vrot.slane %v3168_v37, 7  ;;  %4731 = vset.pattern.permute.xlu2 %v8799_v41  ;;  %v2267_v10 = vpop.f32.mrf.mxu0  ;;  %v8951_v29 = vld [vmem:[#allocation82_spill] sm:$0xff]  ;;  %v8984_v15 = vld [vmem:[#allocation71_spill] sm:$0xff] }
 0x2c6   : > { %4545 = vmatmul.msk.bf16.gmra.mxu0 %vm892_vm3, %v3947_v34  ;;  %3760 = vperm.xlu2 %4731, %v7517_v62   ;;  %v3881_v55 = vmul.f32 %v5364_v50, %v3796_v2  ;;  %v7594_v34 = vld [vmem:[%s8373_s2 + $0xe0] sm:$0xff]  ;;  %v8544_v2 = vrot.slane %v7507_v16, 6 }
 0x2c7   : > { %v7558_v58 = vadd.f32 %v2262_v43, %v1983_v7  ;;  %4515 = vmatmul.msk.bf16.gmra.mxu2 %vm892_vm3, %v8948_v1  ;;  %v3880_v43 = vmul.f32 %v5357_v46, %v3794_v52  ;;  %v3416_v57 = vrot.slane %v3414_v13, 1  ;;  %v3250_v8 = vsel %vm610_vm1, %v3247_v47, %v3249_v6 }
 0x2c8   : > { %v3252_v22 = vsel %vm610_vm1, %v3249_v6, %v3251_v19  ;;  %v3412_v46 = vor.u32 %v3410_v32, %v3408_v51  ;;  %v7587_v7 = vpop.permute.xlu2 %3179  ;;  %v3334_v37 = vmul.f32 %v5338_v26, %v3250_v8  ;;  %v8955_v8 = vpack.c.bf16 %v7153_v42, %v7156_v63  ;;  %v3174_v63 = vpop.permute.xlu0 %3173 }
 0x2c9   : > { %v3908_v28 = vpack.c.bf16 %v3881_v55, %v3880_v43  ;;  %v3335_v47 = vmul.f32 %v8704_v4, %v3252_v22 }
 0x2ca   : > { %v1604_v53 = vpop.f32.mrf.mxu2  ;;  %v3417_v51 = vsel %vm759_vm2, %v3412_v46, %v3416_v57 }
 0x2cb   : > { %v7575_v21 = vadd.f32 %v1604_v53, %v1170_v44  ;;  %v7603_v1 = vpack.c.bf16 %v3335_v47, %v3334_v37  ;;  %v3948_v13 = vrot.slane %v3908_v28, 1  ;;  %v7606_v44 = vpop.f32.mrf.mxu1  ;;  %v3418_v37 = vshrl.u32 %v7543_v59, 16 }
 0x2cc   : > { %v7582_v56 = vpop.f32.mrf.mxu3 }
 0x2cd   : > { %8950 = vst [vmem:[#allocation47_spill] sm:$0xff] %v7582_v56  ;;  %4732 = vset.pattern.permute.xlu1 %v8777_v23  ;;  %v3716_v50 = vpop.permute.xlu1 %3715  ;;  %v7609_v53 = vpop.f32.mrf.mxu0  ;;  %v3949_v22 = vsel %vm1435_vm4, %v7538_v25, %v3948_v13  ;;  %v3422_v46 = vshll.u32 %v7603_v1, 16 }
 0x2ce   : > { %4500 = vmatmul.msk.bf16.gmra.mxu1 %vm892_vm3, %v8951_v29  ;;  %3215 = vperm.xlu1 %4732, %v7594_v34   ;;  %v3797_v6 = vrot.slane %v3716_v50, 6  ;;  %8953 = vst [vmem:[#allocation25_spill] sm:$0xff] %v7609_v53  ;;  %v3253_v29 = vrot.slane %v3174_v63, 7 }
 0x2cf   : > { %4529 = vmatmul.msk.bf16.gmra.mxu3 %vm892_vm3, %v3417_v51  ;;  %4733 = vset.pattern.permute.xlu2 %v8777_v23  ;;  %v3424_v47 = vrot.slane %v3422_v46, 1 }
 0x2d0   : > { %3218 = vperm.xlu2 %4733, %v7175_v60  }
 0x2d1   : > { %v7630_v42 = vpop.permute.xlu2 %3730 }
 0x2d2   : > { %v7600_v52 = vpop.f32.mrf.mxu2 }
 0x2d3   : > { %8952 = vst [vmem:[#allocation81_spill] sm:$0xff] %v7600_v52 }
 0x2d4   : > { %v1944_v45 = vpop.f32.mrf.mxu3 }
 0x2d5   : > { %v1985_v43 = vadd.f32 %v1944_v45, %v7444_v38  ;;  %v3798_v38 = vsel %vm941_vm0, %v3795_v39, %v3797_v6  ;;  %v3254_v45 = vsel %vm610_vm1, %v3251_v19, %v3253_v29  ;;  %v8959_v19 = vld [vmem:[#allocation84_spill] sm:$0xff] }
 0x2d6   : > { %4734 = vset.pattern.permute.xlu1 %v8883_v54  ;;  %v7614_v32 = vpop.permute.xlu1 %3176  ;;  %4546 = vmatmul.msk.bf16.gmra.mxu0 %vm892_vm3, %v3949_v22  ;;  %v3882_v25 = vmul.f32 %v5338_v26, %v3798_v38  ;;  %v7647_v26 = vpop.f32.mrf.mxu1  ;;  %v3336_v22 = vmul.f32 %v8958_v3, %v3254_v45  ;;  %v8962_v45 = vld [vmem:[#allocation36_spill] sm:$0xff] }
 0x2d7   : > { %v7611_v55 = vadd.f32 %v2267_v10, %v1985_v43  ;;  %4516 = vmatmul.msk.bf16.gmra.mxu2 %vm892_vm3, %v8955_v8  ;;  %v3800_v10 = vsel %vm941_vm0, %v3797_v6, %v8544_v2  ;;  %v3255_v50 = vrot.slane %v7614_v32, 7  ;;  %2889 = vperm.xlu1 %4734, %v7517_v62   ;;  %v3420_v6 = vor.u32 %v3418_v37, %v3416_v57  ;;  %v8957_v43 = vld [vmem:[#allocation51_spill] sm:$0xff]  ;;  %v2272_v57 = vpop.f32.mrf.mxu0 }
 0x2d8   : > { %4735 = vset.pattern.permute.xlu2 %v8799_v41  ;;  %v3883_v39 = vmul.f32 %v8704_v4, %v3800_v10 }
 0x2d9   : > { %8954 = vst [vmem:[#allocation12_spill] sm:$0xff] %v7611_v55  ;;  %3763 = vperm.xlu2 %4735, %v7594_v34   ;;  %v3256_v51 = vsel %vm610_vm1, %v3253_v29, %v3255_v50  ;;  %v3425_v59 = vsel %vm759_vm2, %v3420_v6, %v3424_v47 }
 0x2da   : > { %v7632_v28 = vpop.f32.mrf.mxu2  ;;  %v3909_v4 = vpack.c.bf16 %v3883_v39, %v3882_v25  ;;  %v3337_v32 = vmul.f32 %v8957_v43, %v3256_v51  ;;  %v8960_v25 = vld [vmem:[#allocation9_spill] sm:$0xff]  ;;  %v7666_v39 = vpop.permute.xlu0 %3182  ;;  %v3801_v51 = vrot.slane %v7548_v18, 6 }
 0x2dc   : > { %v7640_v62 = vpop.f32.mrf.mxu3  ;;  %v7661_v38 = vpack.c.bf16 %v3337_v32, %v3336_v22  ;;  %v3950_v10 = vrot.slane %v3909_v4, 1  ;;  %v3259_v22 = vrot.slane %v7666_v39, 7 }
 0x2dd   : > { %8956 = vst [vmem:[#allocation46_spill] sm:$0xff] %v7640_v62 }
 0x2de   : > { %4501 = vmatmul.msk.bf16.gmra.mxu1 %vm892_vm3, %v6814_v20  ;;  %v7659_v20 = vpop.permute.xlu2 %3733  ;;  %v3430_v4 = vshll.u32 %v7661_v38, 16  ;;  %v7682_v18 = vpop.f32.mrf.mxu1 }
 0x2df   : > { %4737 = vset.pattern.permute.xlu1 %v8777_v23  ;;  %v7652_v8 = vpop.permute.xlu1 %3724  ;;  %4530 = vmatmul.msk.bf16.gmra.mxu3 %vm892_vm3, %v3425_v59  ;;  %v8963_v59 = vld [vmem:[#allocation69_spill] sm:$0xff] }
 0x2e0   : > { %3221 = vperm.xlu1 %4737, %v8959_v19   ;;  %v3803_v63 = vrot.slane %v7652_v8, 6  ;;  %v8964_v32 = vpack.c.bf16 %v8962_v45, %v8963_v59  ;;  %v3257_v8 = vrot.slane %v7587_v7, 7  ;;  %v3432_v45 = vrot.slane %v3430_v4, 1  ;;  %v8970_v4 = vld [vmem:[#allocation54_spill] sm:$0xff] }
 0x2e1   : > { %4738 = vset.pattern.permute.xlu2 %v8777_v23  ;;  %v3951_v23 = vsel %vm1435_vm4, %v3948_v13, %v3950_v10  ;;  %v7689_v13 = vpop.f32.mrf.mxu0 }
 0x2e2   : > { %v7657_v46 = vpop.f32.mrf.mxu2  ;;  %3224 = vperm.xlu2 %4738, %v8960_v25   ;;  %v3804_v2 = vsel %vm941_vm0, %v3801_v51, %v3803_v63  ;;  %8966 = vst [vmem:[#allocation74_spill] sm:$0xff] %v7689_v13  ;;  %v3258_v59 = vsel %vm610_vm1, %v3255_v50, %v3257_v8 }
 0x2e3   : > { %v3885_v7 = vmul.f32 %v8957_v43, %v3804_v2  ;;  %v8968_v2 = vld [vmem:[#allocation67_spill] sm:$0xff] }
 0x2e4   : > { %v1949_v29 = vpop.f32.mrf.mxu3 }
 0x2e5   : > { %v1987_v37 = vadd.f32 %v1949_v29, %v7509_v27 }
 0x2e6   : > { %4547 = vmatmul.msk.bf16.gmra.mxu0 %vm892_vm3, %v3951_v23 }
 0x2e7   : > { %v7670_v6 = vadd.f32 %v2272_v57, %v1987_v37  ;;  %4517 = vmatmul.msk.bf16.gmra.mxu2 %vm892_vm3, %v8964_v32  ;;  %v3728_v27 = vpop.permute.xlu1 %3727  ;;  %v8965_v57 = vrot.slane %v7507_v16, 6  ;;  %v3426_v37 = vshrl.u32 %v7603_v1, 16  ;;  %v3260_v32 = vsel %vm610_vm1, %v3257_v8, %v3259_v22  ;;  %v7699_v16 = vpop.permute.xlu2 %3194  ;;  %v8969_v1 = vld [vmem:[#allocation53_spill] sm:$0xff] }
 0x2e8   : > { %4739 = vset.pattern.permute.xlu1 %v8883_v54  ;;  %v3338_v43 = vmul.f32 %v8969_v1, %v3258_v59  ;;  %v3339_v50 = vmul.f32 %v8970_v4, %v3260_v32  ;;  %v3186_v59 = vpop.permute.xlu0 %3185 }
 0x2e9   : > { %8961 = vst [vmem:[#allocation22_spill] sm:$0xff] %v7670_v6  ;;  %v3802_v29 = vsel %vm941_vm0, %v8965_v57, %v3801_v51  ;;  %2893 = vperm.xlu1 %4739, %v7594_v34   ;;  %v3428_v51 = vor.u32 %v3426_v37, %v3424_v47  ;;  %v7715_v47 = vpop.f32.mrf.mxu1 }
 0x2ea   : > { %v7692_v39 = vpop.f32.mrf.mxu2  ;;  %4740 = vset.pattern.permute.xlu2 %v8883_v54  ;;  %v3884_v34 = vmul.f32 %v8958_v3, %v3802_v29  ;;  %v7713_v54 = vpack.c.bf16 %v3339_v50, %v3338_v43  ;;  %v3807_v3 = vrot.slane %v7630_v42, 6  ;;  %v3805_v29 = vrot.slane %v3728_v27, 6  ;;  %v8973_v43 = vld [vmem:[#allocation16_spill] sm:$0xff] }
 0x2eb   : > { %2897 = vperm.xlu2 %4740, %v7175_v60   ;;  %v3433_v8 = vsel %vm759_vm2, %v3428_v51, %v3432_v45 }
 0x2ec   : > { %v7697_v23 = vpop.f32.mrf.mxu3  ;;  %v3910_v57 = vpack.c.bf16 %v3885_v7, %v3884_v34  ;;  %v2277_v7 = vpop.f32.mrf.mxu0  ;;  %v3438_v27 = vshll.u32 %v7713_v54, 16  ;;  %v3806_v50 = vsel %vm941_vm0, %v3803_v63, %v3805_v29 }
 0x2ed   : > { %8967 = vst [vmem:[#allocation41_spill] sm:$0xff] %v7697_v23 }
 0x2ee   : > { %4502 = vmatmul.msk.bf16.gmra.mxu1 %vm892_vm3, %v8968_v2  ;;  %v3952_v60 = vrot.slane %v3910_v57, 1  ;;  %v8972_v2 = vld [vmem:[#allocation15_spill] sm:$0xff]  ;;  %v3808_v57 = vsel %vm941_vm0, %v3805_v29, %v3807_v3  ;;  %v8975_v29 = vld [vmem:[#allocation20_spill] sm:$0xff] }
 0x2ef   : > { %4531 = vmatmul.msk.bf16.gmra.mxu3 %vm892_vm3, %v3433_v8  ;;  %v3434_v8 = vshrl.u32 %v7661_v38, 16  ;;  %v8976_v38 = vld [vmem:[#allocation59_spill] sm:$0xff] }
 0x2f0   : > { %v7710_v52 = vpop.permute.xlu1 %3188  ;;  %v3953_v42 = vsel %vm1435_vm4, %v3950_v10, %v3952_v60  ;;  %v3440_v10 = vrot.slane %v3438_v27, 1  ;;  %v3809_v27 = vrot.slane %v7659_v20, 6 }
 0x2f1   : > { %4741 = vset.pattern.permute.xlu1 %v8799_v41  ;;  %v7723_v41 = vpop.permute.xlu2 %3742 }
 0x2f2   : > { %3772 = vperm.xlu1 %4741, %v8960_v25   ;;  %v7719_v32 = vpop.f32.mrf.mxu2  ;;  %v8974_v25 = vpack.c.bf16 %v8972_v2, %v8973_v43  ;;  %v3436_v2 = vor.u32 %v3434_v8, %v3432_v45 }
 0x2f3   : > { %2901 = vperm.xlu2 %4740, %v8959_v19  }
 0x2f4   : > { %v1954_v37 = vpop.f32.mrf.mxu3 }
 0x2f5   : > { %v1989_v34 = vadd.f32 %v1954_v37, %v7575_v21  ;;  %v3263_v21 = vrot.slane %v7710_v52, 7  ;;  %v3261_v37 = vrot.slane %v3186_v59, 7 }
 0x2f6   : > { %4548 = vmatmul.msk.bf16.gmra.mxu0 %vm892_vm3, %v3953_v42  ;;  %v7746_v42 = vpop.permute.xlu0 %3736 }
 0x2f7   : > { %v7725_v51 = vadd.f32 %v2277_v7, %v1989_v34  ;;  %4518 = vmatmul.msk.bf16.gmra.mxu2 %vm892_vm3, %v8974_v25  ;;  %v3886_v7 = vmul.f32 %v8969_v1, %v3806_v50  ;;  %v3887_v34 = vmul.f32 %v8970_v4, %v3808_v57  ;;  %v3264_v43 = vsel %vm610_vm1, %v3261_v37, %v3263_v21  ;;  %v7742_v25 = vpop.f32.mrf.mxu1  ;;  %v8977_v4 = vld [vmem:[#allocation60_spill] sm:$0xff] }
 0x2f8   : > { %v3192_v19 = vpop.permute.xlu1 %3191  ;;  %v3262_v63 = vsel %vm610_vm1, %v3259_v22, %v3261_v37  ;;  %v3341_v59 = vmul.f32 %v8976_v38, %v3264_v43  ;;  %v3441_v1 = vsel %vm759_vm2, %v3436_v2, %v3440_v10  ;;  %v8545_v50 = vrot.slane %v7746_v42, 6 }
 0x2f9   : > { %8971 = vst [vmem:[#allocation89_spill] sm:$0xff] %v7725_v51  ;;  %v3911_v52 = vpack.c.bf16 %v3887_v34, %v3886_v7  ;;  %v7752_v45 = vpop.permute.xlu2 %3745  ;;  %v3340_v22 = vmul.f32 %v8977_v4, %v3262_v63  ;;  %v3810_v7 = vsel %vm941_vm0, %v3807_v3, %v3809_v27  ;;  %v3265_v63 = vrot.slane %v3192_v19, 7  ;;  %v8980_v19 = vld [vmem:[#allocation75_spill] sm:$0xff] }
 0x2fa   : > { %v7749_v51 = vpop.f32.mrf.mxu2  ;;  %v3812_v34 = vsel %vm941_vm0, %v3809_v27, %v8545_v50  ;;  %v2748_v43 = vadd.f32 %v7573_v35, %v8980_v19 }
 0x2fb   : > { %v7760_v8 = vpack.c.bf16 %v3341_v59, %v3340_v22  ;;  %v3954_v37 = vrot.slane %v3911_v52, 1  ;;  %v3442_v52 = vshrl.u32 %v7713_v54, 16  ;;  %v3888_v22 = vmul.f32 %v8977_v4, %v3810_v7  ;;  %v8982_v7 = vld [vmem:[#allocation57_spill] sm:$0xff] }
 0x2fc   : > { %v7766_v2 = vpop.f32.mrf.mxu3  ;;  %v3889_v27 = vmul.f32 %v8976_v38, %v3812_v34  ;;  %v3098_v54 = vadd.f32 %v7632_v28, %v2748_v43  ;;  %v8983_v34 = vld [vmem:[#allocation56_spill] sm:$0xff]  ;;  %v7800_v28 = vld [vmem:[%s8374_s3] ss:$0 sm:$0xff] }
 0x2fd   : > { %8978 = vst [vmem:[#allocation65_spill] sm:$0xff] %v7766_v2  ;;  %v3955_v20 = vsel %vm1435_vm4, %v3952_v60, %v3954_v37  ;;  %v3266_v60 = vsel %vm610_vm1, %v3263_v21, %v3265_v63  ;;  %v3444_v13 = vor.u32 %v3442_v52, %v3440_v10 }
 0x2fe   : > { %4503 = vmatmul.msk.bf16.gmra.mxu1 %vm892_vm3, %v8975_v29  ;;  %v7769_v29 = vpop.f32.mrf.mxu0  ;;  %v3912_v4 = vpack.c.bf16 %v3889_v27, %v3888_v22  ;;  %v3342_v38 = vmul.f32 %v8982_v7, %v3266_v60  ;;  %v3198_v21 = vpop.permute.xlu0 %3197  ;;  %v8546_v27 = vrot.slane %v7723_v41, 6 }
 0x2ff   : > { %4532 = vmatmul.msk.bf16.gmra.mxu3 %vm892_vm3, %v3441_v1  ;;  %8979 = vst [vmem:[#allocation27_spill] sm:$0xff] %v7769_v29  ;;  %v3446_v1 = vshll.u32 %v7760_v8, 16  ;;  %v7773_v59 = vpop.f32.mrf.mxu1  ;;  %v8981_v29 = vrot.slane %v7699_v16, 7  ;;  %v3269_v0 = vrot.slane %v3198_v21, 7 }
 0x301   : > { %v7758_v57 = vpop.permute.xlu1 %3739  ;;  %v7781_v50 = vpop.permute.xlu2 %3203  ;;  %v3268_v2 = vsel %vm610_vm1, %v3265_v63, %v8981_v29  ;;  %v3448_v36 = vrot.slane %v3446_v1, 1  ;;  %v8985_v29 = vld [vmem:[#allocation29_spill] sm:$0xff] }
 0x302   : > { %v7776_v3 = vpop.f32.mrf.mxu2  ;;  %v3343_v23 = vmul.f32 %v8983_v34, %v3268_v2  ;;  %v7806_v2 = vld [vmem:[%s8374_s3 + $0x1] ss:$0 sm:$0xff]  ;;  %v2749_v1 = vadd.f32 %v7606_v44, %v8985_v29  ;;  %v3813_v60 = vrot.slane %v7758_v57, 6 }
 0x303   : > { %v3449_v6 = vsel %vm759_vm2, %v3444_v13, %v3448_v36  ;;  %v7812_v13 = vrot.slane %v3912_v4, 1 }
 0x304   : > { %v7810_v43 = vpack.c.bf16 %v3343_v23, %v3342_v38  ;;  %v3099_v4 = vadd.f32 %v7657_v46, %v2749_v1 }
 0x306   : > { %4549 = vmatmul.msk.bf16.gmra.mxu0 %vm892_vm3, %v3955_v20  ;;  %v3458_v55 = vshrl.u32 %v7810_v43, 16 }
 0x309   : > { %v2874_v23 = vpop.permute.xlu2 %2873 }
 0x30a   : > { %v7789_v20 = vpop.permute.xlu1 %3200  ;;  %v7816_v52 = vpop.f32.mrf.mxu2 }
 0x30b   : > { %v8997_v56 = vrot.slane %v7789_v20, 7 }
 0x30e   : > { %4504 = vmatmul.msk.bf16.gmra.mxu1 %vm892_vm3, %v8984_v15  ;;  %v3566_v35 = vpop.f32.mrf.mxu3  ;;  %v7808_v15 = vpop.f32.mrf.mxu1 }
 0x30f   : > { %v3646_v19 = vadd.f32 %v3566_v35, %v3098_v54  ;;  %v4032_v63 = vpop.f32.mrf.mxu0  ;;  %4533 = vmatmul.msk.bf16.gmra.mxu3 %vm892_vm3, %v3449_v6  ;;  %v7822_v6 = vld [vmem:[%s8374_s3 + $0x2] ss:$0 sm:$0xff]  ;;  %v3957_v35 = vsel %vm1435_vm4, %v3954_v37, %v7812_v13  ;;  %v3816_v37 = vsel %vm941_vm0, %v3813_v60, %v8546_v27  ;;  %v8987_v27 = vld [vmem:[#allocation4_spill] sm:$0xff] }
 0x311   : > { %v4112_v10 = vadd.f32 %v4032_v63, %v3646_v19  ;;  %v3454_v19 = vshll.u32 %v7810_v43, 16 }
 0x313   : > { %v4146_v22 = vmul.f32 %v7800_v28, %v4112_v10  ;;  %v7827_v54 = vpop.permute.xlu1 %3748  ;;  %v8986_v10 = vrot.slane %v7746_v42, 6  ;;  %v7853_v42 = vrot.slane %v3454_v19, 1  ;;  %v7866_v19 = vpop.f32.mrf.mxu2 }
 0x315   : > { %v4180_v44 = vadd.f32 %v7806_v2, %v4146_v22  ;;  %v3814_v29 = vsel %vm941_vm0, %v8986_v10, %v3813_v60  ;;  %v7848_v22 = vpop.permute.xlu0 %3206  ;;  %v3891_v10 = vmul.f32 %v8983_v34, %v3816_v37  ;;  %v8992_v37 = vld [vmem:[#allocation68_spill] sm:$0xff] }
 0x316   : > { %v3568_v38 = vpop.f32.mrf.mxu3  ;;  %4550 = vmatmul.msk.bf16.gmra.mxu0 %vm892_vm3, %v3957_v35  ;;  %v2750_v35 = vadd.f32 %v7647_v26, %v8987_v27  ;;  %v7860_v1 = vpop.f32.mrf.mxu1 }
 0x317   : > { %vm4212_vm5 = vcmp.gt.f32.partialorder %v4180_v44, 0.0  ;;  %v4246_v57 = vmul.f32 %v7822_v6, %v4180_v44  ;;  %v3647_v63 = vadd.f32 %v3568_v38, %v3099_v4  ;;  %v4034_v46 = vpop.f32.mrf.mxu0  ;;  %v3450_v4 = vshrl.u32 %v7760_v8, 16  ;;  %v7873_v27 = vpop.permute.xlu2 %3209 }
 0x318   : > { %v3890_v38 = vmul.f32 %v8982_v7, %v3814_v29  ;;  %v3100_v34 = vadd.f32 %v7692_v39, %v2750_v35 }
 0x319   : > { %v4278_v53 = vsel %vm4212_vm5, %v4180_v44, %v4246_v57  ;;  %v4113_v62 = vadd.f32 %v4034_v46, %v3647_v63  ;;  %v8988_v44 = vrot.slane %v7789_v20, 7  ;;  %v3452_v8 = vor.u32 %v3450_v4, %v3448_v36  ;;  %v8991_v46 = vld [vmem:[#allocation55_spill] sm:$0xff] }
 0x31a   : > { %4311 = vst.msk [vmem:[%s7837_s30] sm:$0xff] %vm4310_vm6, %v4278_v53  ;;  %v8989_v53 = vld [vmem:[#allocation58_spill] sm:$0xff] }
 0x31b   : > { %v4147_v60 = vmul.f32 %v7800_v28, %v4113_v62  ;;  %v3272_v21 = vsel %vm610_vm1, %v3269_v0, %v8988_v44  ;;  %v2931_v57 = vmul.f32 %v8989_v53, %v2874_v23  ;;  %v8990_v62 = vrot.slane %v7699_v16, 7 }
 0x31c   : > { %v2870_v63 = vpop.permute.xlu1 %2869  ;;  %v3457_v36 = vsel %vm759_vm2, %v3452_v8, %v7853_v42  ;;  %v3913_v23 = vpack.c.bf16 %v3891_v10, %v3890_v38  ;;  %v3345_v4 = vmul.f32 %v8989_v53, %v3272_v21 }
 0x31d   : > { %v4181_v7 = vadd.f32 %v7806_v2, %v4147_v60  ;;  %v3270_v26 = vsel %vm610_vm1, %v8990_v62, %v3269_v0  ;;  %v2930_v29 = vmul.f32 %v8991_v46, %v2870_v63  ;;  %v7884_v44 = vpop.permute.xlu0 %3751  ;;  %v8993_v62 = vld [vmem:[#allocation83_spill] sm:$0xff] }
 0x31e   : > { %4505 = vmatmul.msk.bf16.gmra.mxu1 %vm892_vm3, %v8992_v37  ;;  %v3344_v60 = vmul.f32 %v8991_v46, %v3270_v26  ;;  %v7891_v8 = vrot.slane %v3913_v23, 1  ;;  %v3273_v37 = vrot.slane %v7781_v50, 7 }
 0x31f   : > { %vm4213_vm7 = vcmp.gt.f32.partialorder %v4181_v7, 0.0  ;;  %v4247_v39 = vmul.f32 %v7822_v6, %v4181_v7  ;;  %v2951_v16 = vpack.c.bf16 %v2931_v57, %v2930_v29  ;;  %4534 = vmatmul.msk.bf16.gmra.mxu3 %vm892_vm3, %v3457_v36  ;;  %v8547_v57 = vrot.slane %v7827_v54, 6 }
 0x320   : > { %v3571_v0 = vpop.f32.mrf.mxu3  ;;  %v7889_v10 = vpack.c.bf16 %v3345_v4, %v3344_v60  ;;  %v2751_v29 = vadd.f32 %v7682_v18, %v8993_v62  ;;  %v8548_v36 = vrot.slane %v7848_v22, 7  ;;  %v3959_v18 = vsel %vm1435_vm4, %v7812_v13, %v7891_v8  ;;  %v8995_v62 = vld [vmem:[#allocation62_spill] sm:$0xff] }
 0x321   : > { %v4279_v35 = vsel %vm4213_vm7, %v4181_v7, %v4247_v39  ;;  %v3648_v63 = vadd.f32 %v3571_v0, %v3100_v34  ;;  %4519 = vmatmul.msk.bf16.gmra.mxu2 %vm892_vm3, %v2951_v16  ;;  %v4037_v38 = vpop.f32.mrf.mxu0  ;;  %v3817_v7 = vrot.slane %v7752_v45, 6  ;;  %v7898_v34 = vpop.f32.mrf.mxu1 }
 0x322   : > { %4312 = vst.msk [vmem:[%s7837_s30 + $0x8] sm:$0xff] %vm4310_vm6, %v4279_v35  ;;  %v3101_v23 = vadd.f32 %v7719_v32, %v2751_v29  ;;  %v7905_v39 = vpop.f32.mrf.mxu2  ;;  %v3462_v45 = vshll.u32 %v7889_v10, 16  ;;  %v2878_v0 = vpop.permute.xlu2 %2877  ;;  %v8994_v32 = vrot.slane %v7723_v41, 6 }
 0x323   : > { %v4114_v21 = vadd.f32 %v4037_v38, %v3648_v63  ;;  %v3820_v50 = vsel %vm941_vm0, %v3817_v7, %v8547_v57  ;;  %v2932_v29 = vmul.f32 %v8995_v62, %v2878_v0 }
 0x324   : > { %v3818_v35 = vsel %vm941_vm0, %v8994_v32, %v3817_v7  ;;  %v3893_v41 = vmul.f32 %v8989_v53, %v3820_v50  ;;  %v3464_v32 = vrot.slane %v3462_v45, 1 }
 0x325   : > { %v4148_v26 = vmul.f32 %v7800_v28, %v4114_v21  ;;  %v7902_v4 = vpop.permute.xlu1 %3754  ;;  %v2882_v38 = vpop.permute.xlu0 %2881  ;;  %v3276_v21 = vsel %vm610_vm1, %v3273_v37, %v8548_v36 }
 0x326   : > { %4551 = vmatmul.msk.bf16.gmra.mxu0 %vm892_vm3, %v3959_v18 }
 0x327   : > { %v4182_v16 = vadd.f32 %v7806_v2, %v4148_v26  ;;  %v8996_v26 = vld [vmem:[#allocation61_spill] sm:$0xff] }
 0x328   : > { %v3573_v60 = vpop.f32.mrf.mxu3  ;;  %v2933_v57 = vmul.f32 %v8996_v26, %v2882_v38  ;;  %v3460_v38 = vor.u32 %v3458_v55, %v7853_v42  ;;  %v3347_v36 = vmul.f32 %v8996_v26, %v3276_v21 }
 0x329   : > { %vm4214_vm8 = vcmp.gt.f32.partialorder %v4182_v16, 0.0  ;;  %v4248_v63 = vmul.f32 %v7822_v6, %v4182_v16  ;;  %v3649_v13 = vadd.f32 %v3573_v60, %v3101_v23  ;;  %v4039_v18 = vpop.f32.mrf.mxu0  ;;  %v3274_v23 = vsel %vm610_vm1, %v8997_v56, %v3273_v37  ;;  %v7945_v55 = vpop.f32.mrf.mxu1 }
 0x32a   : > { %v3892_v60 = vmul.f32 %v8991_v46, %v3818_v35  ;;  %v2952_v43 = vpack.c.bf16 %v2933_v57, %v2932_v29  ;;  %v3346_v53 = vmul.f32 %v8995_v62, %v3274_v23  ;;  %v8999_v46 = vld [vmem:[#allocation31_spill] sm:$0xff]  ;;  %v7948_v42 = vpop.f32.mrf.mxu2  ;;  %v7952_v45 = vpop.permute.xlu2 %3760 }
 0x32b   : > { %v4280_v40 = vsel %vm4214_vm8, %v4182_v16, %v4248_v63  ;;  %v4115_v7 = vadd.f32 %v4039_v18, %v3649_v13  ;;  %v2752_v37 = vadd.f32 %v7715_v47, %v8999_v46  ;;  %v3823_v13 = vrot.slane %v7902_v4, 6  ;;  %v9000_v23 = vld [vmem:[#allocation11_spill] sm:$0xff] }
 0x32c   : > { %4313 = vst.msk [vmem:[%s7837_s30 + $0x10] sm:$0xff] %vm4310_vm6, %v4280_v40  ;;  %v3914_v16 = vpack.c.bf16 %v3893_v41, %v3892_v60  ;;  %v3465_v40 = vsel %vm759_vm2, %v3460_v38, %v3464_v32  ;;  %v7955_v50 = vpack.c.bf16 %v3347_v36, %v3346_v53  ;;  %v3821_v18 = vrot.slane %v7884_v44, 6 }
 0x32d   : > { %v4149_v0 = vmul.f32 %v7800_v28, %v4115_v7  ;;  %v3102_v57 = vadd.f32 %v7749_v51, %v2752_v37  ;;  %v2753_v60 = vadd.f32 %v7742_v25, %v9000_v23  ;;  %v3466_v53 = vshrl.u32 %v7889_v10, 16 }
 0x32e   : > { %4506 = vmatmul.msk.bf16.gmra.mxu1 %vm892_vm3, %v8998_v5  ;;  %v7940_v56 = vpop.permute.xlu1 %3212  ;;  %v7957_v47 = vrot.slane %v3914_v16, 1  ;;  %v3470_v7 = vshll.u32 %v7955_v50, 16 }
 0x32f   : > { %v4183_v20 = vadd.f32 %v7806_v2, %v4149_v0  ;;  %4535 = vmatmul.msk.bf16.gmra.mxu3 %vm892_vm3, %v3465_v40  ;;  %v3279_v51 = vrot.slane %v7940_v56, 7  ;;  %v3824_v0 = vsel %vm941_vm0, %v3821_v18, %v3823_v13 }
 0x330   : > { %v3961_v36 = vsel %vm1435_vm4, %v7891_v8, %v7957_v47  ;;  %v3103_v8 = vadd.f32 %v7776_v3, %v2753_v60  ;;  %v3895_v46 = vmul.f32 %v8996_v26, %v3824_v0  ;;  %v3472_v3 = vrot.slane %v3470_v7, 1  ;;  %v9004_v60 = vld [vmem:[#allocation30_spill] sm:$0xff] }
 0x331   : > { %vm4215_vm9 = vcmp.gt.f32.partialorder %v4183_v20, 0.0  ;;  %v4249_v5 = vmul.f32 %v7822_v6, %v4183_v20  ;;  %4520 = vmatmul.msk.bf16.gmra.mxu2 %vm892_vm3, %v2952_v43  ;;  %v3277_v43 = vrot.slane %v7873_v27, 7  ;;  %v7978_v16 = vpop.f32.mrf.mxu1  ;;  %v2754_v0 = vadd.f32 %v7773_v59, %v9004_v60 }
 0x332   : > { %v3576_v63 = vpop.f32.mrf.mxu3  ;;  %v7985_v37 = vpop.f32.mrf.mxu2 }
 0x333   : > { %v4281_v35 = vsel %vm4215_vm9, %v4183_v20, %v4249_v5  ;;  %v3650_v21 = vadd.f32 %v3576_v63, %v3102_v57  ;;  %v4042_v29 = vpop.f32.mrf.mxu0  ;;  %v9001_v20 = vrot.slane %v7827_v54, 6  ;;  %v3280_v27 = vsel %vm610_vm1, %v3277_v43, %v3279_v51  ;;  %v7990_v57 = vpop.permute.xlu2 %3218 }
 0x334   : > { %4314 = vst.msk [vmem:[%s7837_s30 + $0x18] sm:$0xff] %vm4310_vm6, %v4281_v35  ;;  %v3468_v5 = vor.u32 %v3466_v53, %v3464_v32  ;;  %v9002_v63 = vrot.slane %v7848_v22, 7 }
 0x335   : > { %v4116_v41 = vadd.f32 %v4042_v29, %v3650_v21  ;;  %v3822_v25 = vsel %vm941_vm0, %v9001_v20, %v3821_v18  ;;  %v9003_v18 = vld [vmem:[#allocation63_spill] sm:$0xff] }
 0x336   : > { %4552 = vmatmul.msk.bf16.gmra.mxu0 %vm892_vm3, %v3961_v36  ;;  %v3278_v26 = vsel %vm610_vm1, %v9002_v63, %v3277_v43  ;;  %v3894_v21 = vmul.f32 %v8995_v62, %v3822_v25  ;;  %v3473_v7 = vsel %vm759_vm2, %v3468_v5, %v3472_v3  ;;  %v3104_v43 = vadd.f32 %v7816_v52, %v2754_v0  ;;  %v2886_v5 = vpop.permute.xlu0 %2885 }
 0x337   : > { %v4150_v38 = vmul.f32 %v7800_v28, %v4116_v41  ;;  %v3758_v44 = vpop.permute.xlu1 %3757  ;;  %v3349_v41 = vmul.f32 %v9003_v18, %v3280_v27 }
 0x338   : > { %v3915_v23 = vpack.c.bf16 %v3895_v46, %v3894_v21  ;;  %v3827_v46 = vrot.slane %v7952_v45, 6  ;;  %v3825_v27 = vrot.slane %v3758_v44, 6  ;;  %v3474_v21 = vshrl.u32 %v7955_v50, 16 }
 0x339   : > { %v4184_v40 = vadd.f32 %v7806_v2, %v4150_v38  ;;  %v9005_v38 = vld [vmem:[#allocation64_spill] sm:$0xff]  ;;  %v8016_v52 = vpop.f32.mrf.mxu1 }
 0x33a   : > { %v3578_v10 = vpop.f32.mrf.mxu3  ;;  %v3348_v53 = vmul.f32 %v9005_v38, %v3278_v26  ;;  %v3826_v60 = vsel %vm941_vm0, %v3823_v13, %v3825_v27  ;;  %v3828_v50 = vsel %vm941_vm0, %v3825_v27, %v3827_v46  ;;  %v2934_v0 = vmul.f32 %v9005_v38, %v2886_v5 }
 0x33b   : > { %vm4216_vm10 = vcmp.gt.f32.partialorder %v4184_v40, 0.0  ;;  %v4250_v54 = vmul.f32 %v7822_v6, %v4184_v40  ;;  %v4044_v35 = vpop.f32.mrf.mxu0  ;;  %v3651_v29 = vadd.f32 %v3578_v10, %v3103_v8  ;;  %v8018_v63 = vpop.permute.xlu2 %3763  ;;  %v3476_v4 = vor.u32 %v3474_v21, %v3472_v3  ;;  %v9007_v21 = vld [vmem:[#allocation66_spill] sm:$0xff] }
 0x33c   : > { %v8007_v8 = vpack.c.bf16 %v3349_v41, %v3348_v53  ;;  %v9006_v41 = vld [vmem:[#allocation23_spill] sm:$0xff]  ;;  %v3896_v13 = vmul.f32 %v9005_v38, %v3826_v60 }
 0x33d   : > { %v4282_v36 = vsel %vm4216_vm10, %v4184_v40, %v4250_v54  ;;  %v4117_v32 = vadd.f32 %v4044_v35, %v3651_v29  ;;  %v8010_v40 = vrot.slane %v3915_v23, 1  ;;  %v8013_v54 = vpop.f32.mrf.mxu2  ;;  %v2755_v44 = vadd.f32 %v7808_v15, %v9006_v41  ;;  %v9008_v41 = vld [vmem:[#allocation10_spill] sm:$0xff] }
 0x33e   : > { %4315 = vst.msk [vmem:[%s7837_s30 + $0x20] sm:$0xff] %vm4310_vm6, %v4282_v36  ;;  %v3478_v29 = vshll.u32 %v8007_v8, 16  ;;  %v8068_v60 = vpop.permute.xlu0 %3766 }
 0x33f   : > { %4536 = vmatmul.msk.bf16.gmra.mxu3 %vm892_vm3, %v3473_v7  ;;  %v4151_v22 = vmul.f32 %v7800_v28, %v4117_v32  ;;  %v3963_v32 = vsel %vm1435_vm4, %v7957_v47, %v8010_v40  ;;  %v3283_v7 = vrot.slane %v7990_v57, 7  ;;  %v3105_v47 = vadd.f32 %v7866_v19, %v2755_v44 }
 0x340   : > { %v3216_v62 = vpop.permute.xlu1 %3215 }
 0x341   : > { %v4185_v20 = vadd.f32 %v7806_v2, %v4151_v22  ;;  %v3281_v23 = vrot.slane %v3216_v62, 7  ;;  %v8041_v62 = vrot.slane %v3478_v29, 1 }
 0x342   : > { %v3581_v25 = vpop.f32.mrf.mxu3 }
 0x343   : > { %v3652_v59 = vadd.f32 %v3581_v25, %v3104_v43  ;;  %v4047_v10 = vpop.f32.mrf.mxu0  ;;  %vm4217_vm11 = vcmp.gt.f32.partialorder %v4185_v20, 0.0  ;;  %v4251_v35 = vmul.f32 %v7822_v6, %v4185_v20  ;;  %v3897_v43 = vmul.f32 %v9003_v18, %v3828_v50 }
 0x344   : > { %v3284_v19 = vsel %vm610_vm1, %v3281_v23, %v3283_v7  ;;  %v3481_v56 = vsel %vm759_vm2, %v3476_v4, %v8041_v62 }
 0x345   : > { %v4118_v26 = vadd.f32 %v4047_v10, %v3652_v59  ;;  %v4283_v36 = vsel %vm4217_vm11, %v4185_v20, %v4251_v35  ;;  %v3282_v20 = vsel %vm610_vm1, %v3279_v51, %v3281_v23  ;;  %v8055_v51 = vpop.permute.xlu2 %3224  ;;  %v3351_v44 = vmul.f32 %v9008_v41, %v3284_v19 }
 0x346   : > { %4316 = vst.msk [vmem:[%s7837_s30 + $0x28] sm:$0xff] %vm4310_vm6, %v4283_v36  ;;  %4553 = vmatmul.msk.bf16.gmra.mxu0 %vm892_vm3, %v3963_v32  ;;  %v3350_v29 = vmul.f32 %v9007_v21, %v3282_v20  ;;  %v9009_v36 = vld [vmem:[#allocation70_spill] sm:$0xff]  ;;  %v8066_v32 = vpop.f32.mrf.mxu1 }
 0x347   : > { %v4152_v15 = vmul.f32 %v7800_v28, %v4118_v26  ;;  %v8057_v26 = vpop.f32.mrf.mxu2  ;;  %v2756_v23 = vadd.f32 %v7860_v1, %v9009_v36  ;;  %v9011_v20 = vld [vmem:[#allocation86_spill] sm:$0xff] }
 0x349   : > { %v4186_v53 = vadd.f32 %v7806_v2, %v4152_v15  ;;  %v2890_v22 = vpop.permute.xlu1 %2889  ;;  %v3106_v15 = vadd.f32 %v7905_v39, %v2756_v23 }
 0x34a   : > { %v2935_v25 = vmul.f32 %v9003_v18, %v2890_v22  ;;  %v3583_v27 = vpop.f32.mrf.mxu3  ;;  %v3916_v18 = vpack.c.bf16 %v3897_v43, %v3896_v13  ;;  %v8076_v22 = vpack.c.bf16 %v3351_v44, %v3350_v29  ;;  %v9010_v43 = vld [vmem:[#allocation78_spill] sm:$0xff] }
 0x34b   : > { %vm4218_vm12 = vcmp.gt.f32.partialorder %v4186_v53, 0.0  ;;  %v4252_v3 = vmul.f32 %v7822_v6, %v4186_v53  ;;  %v3653_v59 = vadd.f32 %v3583_v27, %v3105_v47  ;;  %v4049_v10 = vpop.f32.mrf.mxu0 }
 0x34c   : > { %v2953_v38 = vpack.c.bf16 %v2935_v25, %v2934_v0  ;;  %v3829_v0 = vrot.slane %v8018_v63, 6  ;;  %v8078_v13 = vrot.slane %v3916_v18, 1  ;;  %v2291_v25 = vadd.f32 %v9011_v20, %v9010_v43 }
 0x34d   : > { %v4284_v5 = vsel %vm4218_vm12, %v4186_v53, %v4252_v3  ;;  %v4119_v35 = vadd.f32 %v4049_v10, %v3653_v59  ;;  %v3831_v53 = vrot.slane %v8068_v60, 6 }
 0x34e   : > { %4317 = vst.msk [vmem:[%s7837_s30 + $0x30] sm:$0xff] %vm4310_vm6, %v4284_v5  ;;  %4521 = vmatmul.msk.bf16.gmra.mxu2 %vm892_vm3, %v2953_v38  ;;  %v2757_v63 = vadd.f32 %v7898_v34, %v2291_v25  ;;  %v3830_v3 = vsel %vm941_vm0, %v3827_v46, %v3829_v0  ;;  %v3287_v34 = vrot.slane %v8055_v51, 7  ;;  %v2898_v46 = vpop.permute.xlu2 %2897  ;;  %v8102_v44 = vpop.f32.mrf.mxu1 }
 0x34f   : > { %v4153_v50 = vmul.f32 %v7800_v28, %v4119_v35  ;;  %4537 = vmatmul.msk.bf16.gmra.mxu3 %vm892_vm3, %v3481_v56  ;;  %v3832_v38 = vsel %vm941_vm0, %v3829_v0, %v3831_v53  ;;  %v3965_v35 = vsel %vm1435_vm4, %v8010_v40, %v8078_v13  ;;  %v3486_v56 = vshll.u32 %v8076_v22, 16  ;;  %v8100_v29 = vpop.f32.mrf.mxu2 }
 0x350   : > { %v3107_v18 = vadd.f32 %v7948_v42, %v2757_v63  ;;  %v3898_v36 = vmul.f32 %v9007_v21, %v3830_v3  ;;  %v3899_v40 = vmul.f32 %v9008_v41, %v3832_v38  ;;  %v9012_v63 = vld [vmem:[#allocation8_spill] sm:$0xff] }
 0x351   : > { %v4187_v47 = vadd.f32 %v7806_v2, %v4153_v50  ;;  %v3482_v50 = vshrl.u32 %v8007_v8, 16  ;;  %v8112_v42 = vrot.slane %v3486_v56, 1  ;;  %v3770_v56 = vpop.permute.xlu0 %3769 }
 0x352   : > { %v3222_v1 = vpop.permute.xlu1 %3221  ;;  %v3586_v4 = vpop.f32.mrf.mxu3 }
 0x353   : > { %vm4219_vm13 = vcmp.gt.f32.partialorder %v4187_v47, 0.0  ;;  %v4253_v27 = vmul.f32 %v7822_v6, %v4187_v47  ;;  %v3654_v39 = vadd.f32 %v3586_v4, %v3106_v15  ;;  %v4052_v19 = vpop.f32.mrf.mxu0  ;;  %v3285_v5 = vrot.slane %v3222_v1, 7  ;;  %v4824_v1 = vld [vmem:[%s5196_s12 + $0x88] sm:$0xff]  }
 0x354   : > { %v4632_v4 = vunpack.c.h.bf16 %v4824_v1 }
 0x355   : > { %v4285_v59 = vsel %vm4219_vm13, %v4187_v47, %v4253_v27  ;;  %v4120_v10 = vadd.f32 %v4052_v19, %v3654_v39  ;;  %v3286_v15 = vsel %vm610_vm1, %v3283_v7, %v3285_v5  ;;  %v2937_v47 = vmul.f32 %v9008_v41, %v2898_v46 }
 0x356   : > { %4318 = vst.msk [vmem:[%s7837_s30 + $0x38] sm:$0xff] %vm4310_vm6, %v4285_v59  ;;  %4554 = vmatmul.msk.bf16.gmra.mxu0 %vm892_vm3, %v3965_v35  ;;  %v3288_v43 = vsel %vm610_vm1, %v3285_v5, %v3287_v34  ;;  %v3484_v27 = vor.u32 %v3482_v50, %v8041_v62  ;;  %v3917_v41 = vpack.c.bf16 %v3899_v40, %v3898_v36  ;;  %v9013_v5 = vld [vmem:[#allocation72_spill] sm:$0xff] }
 0x357   : > { %v4154_v45 = vmul.f32 %v7800_v28, %v4120_v10  ;;  %v3352_v3 = vmul.f32 %v9012_v63, %v3286_v15  ;;  %v3353_v38 = vmul.f32 %v4632_v4, %v3288_v43  ;;  %v2758_v35 = vadd.f32 %v7945_v55, %v9013_v5  ;;  %v8133_v46 = vpop.f32.mrf.mxu2  ;;  %v8139_v55 = vpop.f32.mrf.mxu1  ;;  %v9014_v15 = vld [vmem:[#allocation5_spill] sm:$0xff] }
 0x358   : > { %v3489_v10 = vsel %vm759_vm2, %v3484_v27, %v8112_v42  ;;  %v8135_v36 = vrot.slane %v3917_v41, 1  ;;  %v3490_v5 = vshrl.u32 %v8076_v22, 16 }
 0x359   : > { %v4188_v23 = vadd.f32 %v7806_v2, %v4154_v45  ;;  %v3108_v62 = vadd.f32 %v7985_v37, %v2758_v35  ;;  %v8137_v40 = vpack.c.bf16 %v3353_v38, %v3352_v3  ;;  %v2902_v3 = vpop.permute.xlu2 %2901 }
 0x35a   : > { %v3588_v0 = vpop.f32.mrf.mxu3  ;;  %v3967_v27 = vsel %vm1435_vm4, %v8078_v13, %v8135_v36  ;;  %v2938_v35 = vmul.f32 %v9012_v63, %v2902_v3 }
 0x35b   : > { %vm4220_vm14 = vcmp.gt.f32.partialorder %v4188_v23, 0.0  ;;  %v4254_v20 = vmul.f32 %v7822_v6, %v4188_v23  ;;  %v3655_v8 = vadd.f32 %v3588_v0, %v3107_v18  ;;  %v2894_v25 = vpop.permute.xlu1 %2893  ;;  %v4054_v7 = vpop.f32.mrf.mxu0  ;;  %v9015_v0 = vld [vmem:[#allocation88_spill] sm:$0xff]  ;;  %v3494_v41 = vshll.u32 %v8137_v40, 16 }
 0x35c   : > { %v2936_v57 = vmul.f32 %v9007_v21, %v2894_v25  ;;  %v2293_v37 = vadd.f32 %v9015_v0, %v9014_v15 }
 0x35d   : > { %v4286_v39 = vsel %vm4220_vm14, %v4188_v23, %v4254_v20  ;;  %v4121_v19 = vadd.f32 %v4054_v7, %v3655_v8  ;;  %v3833_v20 = vrot.slane %v3770_v56, 6  ;;  %v8149_v7 = vld [vmem:[%s5196_s12 + $0x90] sm:$0x1] }
 0x35e   : > { %4319 = vst.msk [vmem:[%s7837_s30 + $0x40] sm:$0xff] %vm4310_vm6, %v4286_v39  ;;  %v2954_v59 = vpack.c.bf16 %v2937_v47, %v2936_v57  ;;  %v2759_v57 = vadd.f32 %v7978_v16, %v2293_v37  ;;  %v2906_v16 = vpop.permute.xlu0 %2905 }
 0x35f   : > { %v4155_v21 = vmul.f32 %v7800_v28, %v4121_v19  ;;  %4538 = vmatmul.msk.bf16.gmra.mxu3 %vm892_vm3, %v3489_v10  ;;  %v272_v10 = vunpack.c.l.bf16 %v8149_v7  ;;  %v3834_v13 = vsel %vm941_vm0, %v3831_v53, %v3833_v20  ;;  %v8175_v0 = vpop.f32.mrf.mxu1 }
 0x360   : > { %4522 = vmatmul.msk.bf16.gmra.mxu2 %vm892_vm3, %v2954_v59  ;;  %v3109_v59 = vadd.f32 %v8013_v54, %v2759_v57  ;;  %v3900_v60 = vmul.f32 %v9012_v63, %v3834_v13  ;;  %v9018_v57 = vld [vmem:[#allocation79_spill] sm:$0xff] }
 0x361   : > { %v4189_v45 = vadd.f32 %v7806_v2, %v4155_v21  ;;  %v2939_v21 = vmul.f32 %v4632_v4, %v2906_v16  ;;  %v9019_v16 = vld [vmem:[#allocation32_spill] sm:$0xff] }
 0x362   : > { %v3591_v18 = vpop.f32.mrf.mxu3 }
 0x363   : > { %vm4221_vm15 = vcmp.gt.f32.partialorder %v4189_v45, 0.0  ;;  %v4255_v23 = vmul.f32 %v7822_v6, %v4189_v45  ;;  %v3656_v50 = vadd.f32 %v3591_v18, %v3108_v62  ;;  %v4057_v47 = vpop.f32.mrf.mxu0  ;;  %v2955_v37 = vpack.c.bf16 %v2939_v21, %v2938_v35 }
 0x364   : > { %v8144_v1 = vpop.permute.xlu1 %3772 }
 0x365   : > { %v4287_v43 = vsel %vm4221_vm15, %v4189_v45, %v4255_v23  ;;  %v4122_v8 = vadd.f32 %v4057_v47, %v3656_v50  ;;  %v3835_v25 = vrot.slane %v8144_v1, 6  ;;  %v3496_v45 = vrot.slane %v3494_v41, 1  ;;  %v8171_v23 = vpop.f32.mrf.mxu2 }
 0x366   : > { %4320 = vst.msk [vmem:[%s7837_s30 + $0x48] sm:$0xff] %vm4310_vm6, %v4287_v43  ;;  %4555 = vmatmul.msk.bf16.gmra.mxu0 %vm892_vm3, %v3967_v27  ;;  %v3492_v50 = vor.u32 %v3490_v5, %v8112_v42  ;;  %v9017_v42 = vld [vmem:[#allocation85_spill] sm:$0xff] }
 0x367   : > { %v4156_v39 = vmul.f32 %v7800_v28, %v4122_v8  ;;  %v3836_v19 = vsel %vm941_vm0, %v3833_v20, %v3835_v25  ;;  %v9016_v20 = vld [vmem:[#allocation73_spill] sm:$0xff]  ;;  %v1972_v51 = vadd.f32 %v9018_v57, %v9017_v42 }
 0x368   : > { %v3901_v56 = vmul.f32 %v4632_v4, %v3836_v19  ;;  %v3354_v4 = vmul.f32 %v3287_v34, %v272_v10  ;;  %v3497_v47 = vsel %vm759_vm2, %v3492_v50, %v3496_v45  ;;  %v2760_v8 = vadd.f32 %v8016_v52, %v9016_v20 }
 0x369   : > { %v4190_v38 = vadd.f32 %v7806_v2, %v4156_v39  ;;  %v3902_v50 = vmul.f32 %v3835_v25, %v272_v10  ;;  %v9021_v10 = vld [vmem:[#allocation33_spill] sm:$0xff] }
 0x36a   : > { %v3593_v62 = vpop.f32.mrf.mxu3  ;;  %v3918_v43 = vpack.c.bf16 %v3901_v56, %v3900_v60  ;;  %v3110_v34 = vadd.f32 %v8057_v26, %v2760_v8  ;;  %v3371_v27 = vpack.c.bf16 %v3354_v4, %v3354_v4 }
 0x36b   : > { %vm4222_vm1 = vcmp.gt.f32.partialorder %v4190_v38, 0.0  ;;  %v4256_v54 = vmul.f32 %v7822_v6, %v4190_v38  ;;  %v3657_v18 = vadd.f32 %v3593_v62, %v3109_v59  ;;  %v4059_v53 = vpop.f32.mrf.mxu0  ;;  %v2295_v59 = vadd.f32 %v9019_v16, %v1972_v51  ;;  %v8200_v62 = vpop.f32.mrf.mxu1 }
 0x36c   : > { %v3968_v39 = vrot.slane %v3918_v43, 1  ;;  %v3502_v5 = vshll.u32 %v3371_v27, 16  ;;  %v3919_v43 = vpack.c.bf16 %v3902_v50, %v3902_v50 }
 0x36d   : > { %v4288_v15 = vsel %vm4222_vm1, %v4190_v38, %v4256_v54  ;;  %v4123_v22 = vadd.f32 %v4059_v53, %v3657_v18  ;;  %v3058_v35 = vpop.f32.mrf.mxu2  ;;  %v2761_v21 = vadd.f32 %v8066_v32, %v2295_v59  ;;  %v3498_v54 = vshrl.u32 %v8137_v40, 16  ;;  %v9020_v40 = vld [vmem:[#allocation7_spill] sm:$0xff] }
 0x36e   : > { %4321 = vst.msk [vmem:[%s7837_s30 + $0x50] sm:$0xff] %vm4310_vm6, %v4288_v15  ;;  %v3969_v26 = vsel %vm1435_vm4, %v8135_v36, %v3968_v39  ;;  %v3504_v53 = vrot.slane %v3502_v5, 1  ;;  %v2762_v20 = vadd.f32 %v8102_v44, %v9020_v40  ;;  %v3970_v51 = vrot.slane %v3919_v43, 1  ;;  %v9025_v43 = vld [vmem:[#allocation3_spill] sm:$0xff] }
 0x36f   : > { %v4157_v63 = vmul.f32 %v7800_v28, %v4123_v22  ;;  %4539 = vmatmul.msk.bf16.gmra.mxu3 %vm892_vm3, %v3497_v47  ;;  %v3111_v18 = vadd.f32 %v8100_v29, %v2761_v21  ;;  %v3500_v15 = vor.u32 %v3498_v54, %v3496_v45  ;;  %v9022_v45 = vld [vmem:[#allocation38_spill] sm:$0xff] }
 0x370   : > { %4523 = vmatmul.msk.bf16.gmra.mxu2 %vm892_vm3, %v2955_v37  ;;  %v1974_v8 = vadd.f32 %v9022_v45, %v9021_v10  ;;  %v3971_v16 = vsel %vm1435_vm4, %v3968_v39, %v3970_v51 }
 0x371   : > { %v4191_v7 = vadd.f32 %v7806_v2, %v4157_v63  ;;  %v3505_v29 = vsel %vm759_vm2, %v3500_v15, %v3504_v53  ;;  %v3112_v63 = vadd.f32 %v8133_v46, %v2762_v20  ;;  %v9024_v53 = vld [vmem:[#allocation76_spill] sm:$0xff] }
 0x372   : > { %v3596_v41 = vpop.f32.mrf.mxu3  ;;  %v1976_v50 = vadd.f32 %v7322_v11, %v9024_v53 }
 0x373   : > { %vm4223_vm0 = vcmp.gt.f32.partialorder %v4191_v7, 0.0  ;;  %v4257_v52 = vmul.f32 %v7822_v6, %v4191_v7  ;;  %v3658_v19 = vadd.f32 %v3596_v41, %v3110_v34  ;;  %v4062_v3 = vpop.f32.mrf.mxu0  ;;  %v2713_v57 = vpop.f32.mrf.mxu1  ;;  %v9023_v41 = vld [vmem:[#allocation87_spill] sm:$0xff] }
 0x375   : > { %v4289_v13 = vsel %vm4223_vm0, %v4191_v7, %v4257_v52  ;;  %v4124_v38 = vadd.f32 %v4062_v3, %v3658_v19  ;;  %v3060_v25 = vpop.f32.mrf.mxu2  ;;  %v2297_v52 = vadd.f32 %v9023_v41, %v1974_v8 }
 0x376   : > { %4322 = vst.msk [vmem:[%s7837_s30 + $0x58] sm:$0xff] %vm4310_vm6, %v4289_v13  ;;  %4556 = vmatmul.msk.bf16.gmra.mxu0 %vm892_vm3, %v3969_v26 }
 0x377   : > { %v4158_v56 = vmul.f32 %v7800_v28, %v4124_v38  ;;  %v2763_v46 = vadd.f32 %v8139_v55, %v2297_v52  ;;  %v2764_v55 = vadd.f32 %v8175_v0, %v7297_v33 }
 0x379   : > { %v4192_v60 = vadd.f32 %v7806_v2, %v4158_v56  ;;  %v3113_v13 = vadd.f32 %v8171_v23, %v2763_v46 }
 0x37a   : > { %v3598_v36 = vpop.f32.mrf.mxu3 }
 0x37b   : > { %vm4224_vm5 = vcmp.gt.f32.partialorder %v4192_v60, 0.0  ;;  %v4258_v32 = vmul.f32 %v7822_v6, %v4192_v60  ;;  %v3659_v22 = vadd.f32 %v3598_v36, %v3111_v18  ;;  %v4064_v4 = vpop.f32.mrf.mxu0  ;;  %v2715_v54 = vpop.f32.mrf.mxu1  ;;  %v3114_v36 = vadd.f32 %v3058_v35, %v2764_v55 }
 0x37d   : > { %v4290_v37 = vsel %vm4224_vm5, %v4192_v60, %v4258_v32  ;;  %v4125_v47 = vadd.f32 %v4064_v4, %v3659_v22  ;;  %v3063_v5 = vpop.f32.mrf.mxu2 }
 0x37e   : > { %4323 = vst.msk [vmem:[%s7837_s30 + $0x60] sm:$0xff] %vm4310_vm6, %v4290_v37 }
 0x37f   : > { %v4159_v1 = vmul.f32 %v7800_v28, %v4125_v47  ;;  %4540 = vmatmul.msk.bf16.gmra.mxu3 %vm892_vm3, %v3505_v29  ;;  %v2299_v29 = vadd.f32 %v9025_v43, %v1976_v50  ;;  %v9027_v50 = vld [vmem:[#allocation39_spill] sm:$0xff] }
 0x381   : > { %v4193_v42 = vadd.f32 %v7806_v2, %v4159_v1  ;;  %v2765_v11 = vadd.f32 %v8200_v62, %v2299_v29 }
 0x382   : > { %v3601_v34 = vpop.f32.mrf.mxu3 }
 0x383   : > { %vm4225_vm2 = vcmp.gt.f32.partialorder %v4193_v42, 0.0  ;;  %v4259_v7 = vmul.f32 %v7822_v6, %v4193_v42  ;;  %v3660_v44 = vadd.f32 %v3601_v34, %v3112_v63  ;;  %v4067_v27 = vpop.f32.mrf.mxu0  ;;  %v2718_v0 = vpop.f32.mrf.mxu1  ;;  %v3115_v20 = vadd.f32 %v3060_v25, %v2765_v11  ;;  %v9026_v25 = vld [vmem:[#allocation13_spill] sm:$0xff] }
 0x385   : > { %v4291_v19 = vsel %vm4225_vm2, %v4193_v42, %v4259_v7  ;;  %v4126_v3 = vadd.f32 %v4067_v27, %v3660_v44  ;;  %v3065_v37 = vpop.f32.mrf.mxu2  ;;  %v2766_v7 = vadd.f32 %v2713_v57, %v7362_v9  ;;  %v1978_v27 = vadd.f32 %v7384_v30, %v9026_v25 }
 0x386   : > { %4324 = vst.msk [vmem:[%s7837_s30 + $0x68] sm:$0xff] %vm4310_vm6, %v4291_v19  ;;  %4557 = vmatmul.msk.bf16.gmra.mxu0 %vm892_vm3, %v3971_v16 }
 0x387   : > { %v4160_v59 = vmul.f32 %v7800_v28, %v4126_v3  ;;  %v3116_v41 = vadd.f32 %v3063_v5, %v2766_v7 }
 0x389   : > { %v4194_v38 = vadd.f32 %v7806_v2, %v4160_v59  ;;  %v2301_v59 = vadd.f32 %v7292_v61, %v1978_v27 }
 0x38a   : > { %v3603_v26 = vpop.f32.mrf.mxu3 }
 0x38b   : > { %vm4226_vm7 = vcmp.gt.f32.partialorder %v4194_v38, 0.0  ;;  %v4260_v21 = vmul.f32 %v7822_v6, %v4194_v38  ;;  %v3661_v56 = vadd.f32 %v3603_v26, %v3113_v13  ;;  %v4069_v18 = vpop.f32.mrf.mxu0  ;;  %v2720_v44 = vpop.f32.mrf.mxu1  ;;  %v2767_v57 = vadd.f32 %v2715_v54, %v2301_v59  ;;  %v8300_v59 = vld [vmem:[%s8374_s3 + $0x2] ss:$0 sm:$0xff] }
 0x38c   : > { %v2768_v54 = vadd.f32 %v2718_v0, %v7426_v48 }
 0x38d   : > { %v4292_v60 = vsel %vm4226_vm7, %v4194_v38, %v4260_v21  ;;  %v4127_v39 = vadd.f32 %v4069_v18, %v3661_v56  ;;  %v3068_v34 = vpop.f32.mrf.mxu2  ;;  %v3117_v5 = vadd.f32 %v3065_v37, %v2767_v57 }
 0x38e   : > { %4325 = vst.msk [vmem:[%s7837_s30 + $0x70] sm:$0xff] %vm4310_vm6, %v4292_v60 }
 0x38f   : > { %v4161_v23 = vmul.f32 %v7800_v28, %v4127_v39 }
 0x391   : > { %v4195_v15 = vadd.f32 %v7806_v2, %v4161_v23 }
 0x392   : > { %v3606_v32 = vpop.f32.mrf.mxu3 }
 0x393   : > { %vm4227_vm3 = vcmp.gt.f32.partialorder %v4195_v15, 0.0  ;;  %v4261_v22 = vmul.f32 %v7822_v6, %v4195_v15  ;;  %v3662_v4 = vadd.f32 %v3606_v32, %v3114_v36  ;;  %v4072_v47 = vpop.f32.mrf.mxu0  ;;  %v2723_v21 = vpop.f32.mrf.mxu1  ;;  %v1980_v36 = vadd.f32 %v7449_v24, %v9027_v50 }
 0x395   : > { %v4293_v40 = vsel %vm4227_vm3, %v4195_v15, %v4261_v22  ;;  %v4128_v33 = vadd.f32 %v4072_v47, %v3662_v4  ;;  %v3070_v30 = vpop.f32.mrf.mxu2  ;;  %v3118_v15 = vadd.f32 %v3068_v34, %v2768_v54  ;;  %v2303_v29 = vadd.f32 %v7379_v17, %v1980_v36  ;;  %v9030_v36 = vld [vmem:[#allocation18_spill] sm:$0xff] }
 0x396   : > { %4326 = vst.msk [vmem:[%s7837_s30 + $0x78] sm:$0xff] %vm4310_vm6, %v4293_v40  ;;  %v1982_v34 = vadd.f32 %v7512_v14, %v7352_v31  ;;  %v8288_v31 = vld [vmem:[%s8374_s3] ss:$0 sm:$0xff] }
 0x397   : > { %v4162_v35 = vmul.f32 %v7800_v28, %v4128_v33  ;;  %v2769_v33 = vadd.f32 %v2720_v44, %v2303_v29 }
 0x399   : > { %v4196_v1 = vadd.f32 %v7806_v2, %v4162_v35  ;;  %v3119_v0 = vadd.f32 %v3070_v30, %v2769_v33 }
 0x39a   : > { %v3608_v10 = vpop.f32.mrf.mxu3 }
 0x39b   : > { %vm4228_vm4 = vcmp.gt.f32.partialorder %v4196_v1, 0.0  ;;  %v4262_v45 = vmul.f32 %v7822_v6, %v4196_v1  ;;  %v3663_v8 = vadd.f32 %v3608_v10, %v3115_v20  ;;  %v4074_v63 = vpop.f32.mrf.mxu0  ;;  %v2725_v47 = vpop.f32.mrf.mxu1 }
 0x39d   : > { %v4294_v42 = vsel %vm4228_vm4, %v4196_v1, %v4262_v45  ;;  %v4129_v51 = vadd.f32 %v4074_v63, %v3663_v8 }
 0x39e   : > { %4327 = vst.msk [vmem:[%s7837_s30 + $0x80] sm:$0xff] %vm4310_vm6, %v4294_v42  ;;  %v2770_v42 = vadd.f32 %v2723_v21, %v7494_v12 }
 0x39f   : > { %v4163_v62 = vmul.f32 %v7800_v28, %v4129_v51 }
 0x3a1   : > { %v4197_v52 = vadd.f32 %v7806_v2, %v4163_v62 }
 0x3a2   : > { %v3611_v19 = vpop.f32.mrf.mxu3 }
 0x3a3   : > { %vm4229_vm8 = vcmp.gt.f32.partialorder %v4197_v52, 0.0  ;;  %v4263_v3 = vmul.f32 %v7822_v6, %v4197_v52  ;;  %v3664_v16 = vadd.f32 %v3611_v19, %v3116_v41  ;;  %v4077_v46 = vpop.f32.mrf.mxu0  ;;  %v2728_v63 = vpop.f32.mrf.mxu1  ;;  %v2305_v19 = vadd.f32 %v7464_v49, %v1982_v34 }
 0x3a4   : > { %v3073_v53 = vpop.f32.mrf.mxu2 }
 0x3a5   : > { %v4295_v13 = vsel %vm4229_vm8, %v4197_v52, %v4263_v3  ;;  %v4130_v9 = vadd.f32 %v4077_v46, %v3664_v16  ;;  %v3120_v7 = vadd.f32 %v3073_v53, %v2770_v42  ;;  %v2771_v12 = vadd.f32 %v2725_v47, %v2305_v19 }
 0x3a6   : > { %4328 = vst.msk [vmem:[%s7837_s30 + $0x88] sm:$0xff] %vm4310_vm6, %v4295_v13 }
 0x3a7   : > { %v4164_v38 = vmul.f32 %v7800_v28, %v4130_v9 }
 0x3a9   : > { %v4198_v26 = vadd.f32 %v7806_v2, %v4164_v38 }
 0x3aa   : > { %v3613_v56 = vpop.f32.mrf.mxu3 }
 0x3ab   : > { %vm4230_vm9 = vcmp.gt.f32.partialorder %v4198_v26, 0.0  ;;  %v4264_v18 = vmul.f32 %v7822_v6, %v4198_v26  ;;  %v3665_v60 = vadd.f32 %v3613_v56, %v3117_v5  ;;  %v4079_v39 = vpop.f32.mrf.mxu0  ;;  %v9028_v56 = vld [vmem:[#allocation91_spill] sm:$0xff] }
 0x3ac   : > { %v3075_v35 = vpop.f32.mrf.mxu2 }
 0x3ad   : > { %v4296_v61 = vsel %vm4230_vm9, %v4198_v26, %v4264_v18  ;;  %v4131_v55 = vadd.f32 %v4079_v39, %v3665_v60  ;;  %v2772_v26 = vadd.f32 %v2728_v63, %v7558_v58  ;;  %v9029_v18 = vld [vmem:[#allocation47_spill] sm:$0xff] }
 0x3ae   : > { %4329 = vst.msk [vmem:[%s7837_s30 + $0x90] sm:$0xff] %vm4310_vm6, %v4296_v61  ;;  %v1984_v60 = vadd.f32 %v9029_v18, %v9028_v56 }
 0x3af   : > { %v4165_v23 = vmul.f32 %v7800_v28, %v4131_v55 }
 0x3b1   : > { %v4199_v32 = vadd.f32 %v7806_v2, %v4165_v23 }
 0x3b2   : > { %v3616_v22 = vpop.f32.mrf.mxu3 }
 0x3b3   : > { %vm4231_vm10 = vcmp.gt.f32.partialorder %v4199_v32, 0.0  ;;  %v4265_v4 = vmul.f32 %v7822_v6, %v4199_v32  ;;  %v3666_v37 = vadd.f32 %v3616_v22, %v3118_v15  ;;  %v4082_v43 = vpop.f32.mrf.mxu0  ;;  %v2307_v15 = vadd.f32 %v9030_v36, %v1984_v60 }
 0x3b4   : > { %v3078_v41 = vpop.f32.mrf.mxu2 }
 0x3b5   : > { %v4297_v40 = vsel %vm4231_vm10, %v4199_v32, %v4265_v4  ;;  %v4132_v48 = vadd.f32 %v4082_v43, %v3666_v37  ;;  %v3122_v39 = vadd.f32 %v3078_v41, %v2772_v26  ;;  %v9036_v26 = vld [vmem:[#allocation17_spill] sm:$0xff] }
 0x3b6   : > { %4330 = vst.msk [vmem:[%s7837_s30 + $0x98] sm:$0xff] %vm4310_vm6, %v4297_v40 }
 0x3b7   : > { %v4166_v24 = vmul.f32 %v7800_v28, %v4132_v48 }
 0x3b9   : > { %v4200_v11 = vadd.f32 %v7806_v2, %v4166_v24 }
 0x3ba   : > { %v3618_v20 = vpop.f32.mrf.mxu3 }
 0x3bb   : > { %vm4232_vm11 = vcmp.gt.f32.partialorder %v4200_v11, 0.0  ;;  %v4266_v1 = vmul.f32 %v7822_v6, %v4200_v11  ;;  %v3667_v10 = vadd.f32 %v3618_v20, %v3119_v0  ;;  %v4084_v45 = vpop.f32.mrf.mxu0 }
 0x3bc   : > { %v3080_v5 = vpop.f32.mrf.mxu2 }
 0x3bd   : > { %v4298_v8 = vsel %vm4232_vm11, %v4200_v11, %v4266_v1  ;;  %v4133_v17 = vadd.f32 %v4084_v45, %v3667_v10  ;;  %v9032_v45 = vld [vmem:[#allocation93_spill] sm:$0xff] }
 0x3be   : > { %4331 = vst.msk [vmem:[%s7837_s30 + $0xa0] sm:$0xff] %vm4310_vm6, %v4298_v8  ;;  %v9033_v8 = vld [vmem:[#allocation46_spill] sm:$0xff] }
 0x3bf   : > { %v4167_v51 = vmul.f32 %v7800_v28, %v4133_v17  ;;  %v2730_v28 = vpop.f32.mrf.mxu1  ;;  %v1986_v17 = vadd.f32 %v9033_v8, %v9032_v45 }
 0x3c0   : > { %v2773_v4 = vadd.f32 %v2730_v28, %v2307_v15 }
 0x3c1   : > { %v4201_v62 = vadd.f32 %v7806_v2, %v4167_v51  ;;  %v3121_v2 = vadd.f32 %v3075_v35, %v2771_v12  ;;  %v9031_v35 = vld [vmem:[#allocation12_spill] sm:$0xff] }
 0x3c2   : > { %v3621_v44 = vpop.f32.mrf.mxu3  ;;  %v3123_v47 = vadd.f32 %v3080_v5, %v2773_v4 }
 0x3c3   : > { %vm4233_vm12 = vcmp.gt.f32.partialorder %v4201_v62, 0.0  ;;  %v4267_v25 = vmul.f32 %v7822_v6, %v4201_v62  ;;  %v3668_v27 = vadd.f32 %v3621_v44, %v3120_v7  ;;  %v4087_v52 = vpop.f32.mrf.mxu0  ;;  %v8294_v6 = vld [vmem:[%s8374_s3 + $0x1] ss:$0 sm:$0xff]  ;;  %v9034_v44 = vld [vmem:[#allocation25_spill] sm:$0xff] }
 0x3c5   : > { %v4299_v3 = vsel %vm4233_vm12, %v4201_v62, %v4267_v25  ;;  %v4134_v16 = vadd.f32 %v4087_v52, %v3668_v27  ;;  %v2309_v25 = vadd.f32 %v9034_v44, %v1986_v17  ;;  %v9043_v17 = vld [vmem:[#allocation65_spill] sm:$0xff] }
 0x3c6   : > { %4332 = vst.msk [vmem:[%s7837_s30 + $0xa8] sm:$0xff] %vm4310_vm6, %v4299_v3 }
 0x3c7   : > { %v4168_v14 = vmul.f32 %v8288_v31, %v4134_v16  ;;  %v2733_v55 = vpop.f32.mrf.mxu1 }
 0x3c8   : > { %v2774_v20 = vadd.f32 %v2733_v55, %v9031_v35 }
 0x3c9   : > { %v4202_v49 = vadd.f32 %v8294_v6, %v4168_v14 }
 0x3ca   : > { %v3623_v46 = vpop.f32.mrf.mxu3 }
 0x3cb   : > { %vm4234_vm13 = vcmp.gt.f32.partialorder %v4202_v49, 0.0  ;;  %v4268_v13 = vmul.f32 %v8300_v59, %v4202_v49  ;;  %v3669_v9 = vadd.f32 %v3623_v46, %v3121_v2  ;;  %v4089_v57 = vpop.f32.mrf.mxu0 }
 0x3cd   : > { %v4300_v38 = vsel %vm4234_vm13, %v4202_v49, %v4268_v13  ;;  %v4135_v30 = vadd.f32 %v4089_v57, %v3669_v9  ;;  %v9035_v57 = vld [vmem:[#allocation22_spill] sm:$0xff] }
 0x3ce   : > { %4333 = vst.msk [vmem:[%s7837_s30 + $0xb0] sm:$0xff] %vm4310_vm6, %v4300_v38 }
 0x3cf   : > { %v4169_v21 = vmul.f32 %v8288_v31, %v4135_v30  ;;  %v2735_v33 = vpop.f32.mrf.mxu1 }
 0x3d0   : > { %v2775_v19 = vadd.f32 %v2735_v33, %v2309_v25  ;;  %v9039_v33 = vld [vmem:[#allocation26_spill] sm:$0xff] }
 0x3d1   : > { %v4203_v61 = vadd.f32 %v8294_v6, %v4169_v21  ;;  %v3083_v22 = vpop.f32.mrf.mxu2  ;;  %v9037_v21 = vld [vmem:[#allocation41_spill] sm:$0xff] }
 0x3d2   : > { %v3626_v54 = vpop.f32.mrf.mxu3  ;;  %v3124_v63 = vadd.f32 %v3083_v22, %v2774_v20  ;;  %v1988_v56 = vadd.f32 %v9037_v21, %v9036_v26  ;;  %v9041_v20 = vld [vmem:[#allocation81_spill] sm:$0xff] }
 0x3d3   : > { %vm4235_vm14 = vcmp.gt.f32.partialorder %v4203_v61, 0.0  ;;  %v4269_v23 = vmul.f32 %v8300_v59, %v4203_v61  ;;  %v3670_v53 = vadd.f32 %v3626_v54, %v3122_v39  ;;  %v4092_v50 = vpop.f32.mrf.mxu0 }
 0x3d5   : > { %v4301_v32 = vsel %vm4235_vm14, %v4203_v61, %v4269_v23  ;;  %v4136_v58 = vadd.f32 %v4092_v50, %v3670_v53  ;;  %v9038_v53 = vld [vmem:[#allocation74_spill] sm:$0xff] }
 0x3d6   : > { %4334 = vst.msk [vmem:[%s7837_s30 + $0xb8] sm:$0xff] %vm4310_vm6, %v4301_v32  ;;  %v2311_v50 = vadd.f32 %v9038_v53, %v1988_v56 }
 0x3d7   : > { %v4170_v37 = vmul.f32 %v8288_v31, %v4136_v58  ;;  %v2738_v52 = vpop.f32.mrf.mxu1 }
 0x3d8   : > { %v2776_v38 = vadd.f32 %v2738_v52, %v9035_v57 }
 0x3d9   : > { %v4204_v43 = vadd.f32 %v8294_v6, %v4170_v37  ;;  %v3085_v10 = vpop.f32.mrf.mxu2 }
 0x3da   : > { %v3628_v29 = vpop.f32.mrf.mxu3  ;;  %v3125_v12 = vadd.f32 %v3085_v10, %v2775_v19  ;;  %v9042_v10 = vld [vmem:[#allocation89_spill] sm:$0xff] }
 0x3db   : > { %vm4236_vm15 = vcmp.gt.f32.partialorder %v4204_v43, 0.0  ;;  %v4270_v40 = vmul.f32 %v8300_v59, %v4204_v43  ;;  %v3671_v48 = vadd.f32 %v3628_v29, %v3123_v47  ;;  %v4094_v24 = vpop.f32.mrf.mxu0 }
 0x3dd   : > { %v4302_v0 = vsel %vm4236_vm15, %v4204_v43, %v4270_v40  ;;  %v4137_v11 = vadd.f32 %v4094_v24, %v3671_v48  ;;  %v9040_v24 = vld [vmem:[#allocation50_spill] sm:$0xff] }
 0x3de   : > { %4335 = vst.msk [vmem:[%s7837_s30 + $0xc0] sm:$0xff] %vm4310_vm6, %v4302_v0  ;;  %v1172_v0 = vadd.f32 %v9040_v24, %v9039_v33 }
 0x3df   : > { %v4171_v1 = vmul.f32 %v8288_v31, %v4137_v11  ;;  %v2740_v5 = vpop.f32.mrf.mxu1 }
 0x3e0   : > { %v2777_v32 = vadd.f32 %v2740_v5, %v2311_v50 }
 0x3e1   : > { %v4205_v42 = vadd.f32 %v8294_v6, %v4171_v1  ;;  %v1640_v1 = vadd.f32 %v9041_v20, %v1172_v0 }
 0x3e2   : > { %v3631_v51 = vpop.f32.mrf.mxu3 }
 0x3e3   : > { %vm4237_vm1 = vcmp.gt.f32.partialorder %v4205_v42, 0.0  ;;  %v4271_v34 = vmul.f32 %v8300_v59, %v4205_v42  ;;  %v3672_v7 = vadd.f32 %v3631_v51, %v3124_v63  ;;  %v4097_v62 = vpop.f32.mrf.mxu0  ;;  %v3088_v16 = vpop.f32.mrf.mxu2  ;;  %v1990_v63 = vadd.f32 %v9043_v17, %v1640_v1 }
 0x3e4   : > { %v3126_v18 = vadd.f32 %v3088_v16, %v2776_v38 }
 0x3e5   : > { %v4303_v27 = vsel %vm4237_vm1, %v4205_v42, %v4271_v34  ;;  %v4138_v41 = vadd.f32 %v4097_v62, %v3672_v7 }
 0x3e6   : > { %4336 = vst.msk [vmem:[%s7837_s30 + $0xc8] sm:$0xff] %vm4310_vm6, %v4303_v27  ;;  %v9044_v27 = vld [vmem:[#allocation27_spill] sm:$0xff] }
 0x3e7   : > { %v4172_v3 = vmul.f32 %v8288_v31, %v4138_v41  ;;  %v2743_v37 = vpop.f32.mrf.mxu1  ;;  %v2313_v41 = vadd.f32 %v9044_v27, %v1990_v63 }
 0x3e8   : > { %v2778_v45 = vadd.f32 %v2743_v37, %v9042_v10 }
 0x3e9   : > { %v4206_v14 = vadd.f32 %v8294_v6, %v4172_v3 }
 0x3ea   : > { %v3633_v28 = vpop.f32.mrf.mxu3 }
 0x3eb   : > { %vm4238_vm0 = vcmp.gt.f32.partialorder %v4206_v14, 0.0  ;;  %v4272_v2 = vmul.f32 %v8300_v59, %v4206_v14  ;;  %v3673_v49 = vadd.f32 %v3633_v28, %v3125_v12  ;;  %v4099_v46 = vpop.f32.mrf.mxu0  ;;  %v3090_v39 = vpop.f32.mrf.mxu2 }
 0x3ec   : > { %v3127_v22 = vadd.f32 %v3090_v39, %v2777_v32 }
 0x3ed   : > { %v4304_v13 = vsel %vm4238_vm0, %v4206_v14, %v4272_v2  ;;  %v4139_v9 = vadd.f32 %v4099_v46, %v3673_v49 }
 0x3ee   : > { %4337 = vst.msk [vmem:[%s7837_s30 + $0xd0] sm:$0xff] %vm4310_vm6, %v4304_v13 }
 0x3ef   : > { %v4173_v30 = vmul.f32 %v8288_v31, %v4139_v9  ;;  %v2745_v44 = vpop.f32.mrf.mxu1 }
 0x3f0   : > { %v2779_v16 = vadd.f32 %v2745_v44, %v2313_v41 }
 0x3f1   : > { %v4207_v60 = vadd.f32 %v8294_v6, %v4173_v30 }
 0x3f2   : > { %v3636_v61 = vpop.f32.mrf.mxu3 }
 0x3f3   : > { %vm4239_vm5 = vcmp.gt.f32.partialorder %v4207_v60, 0.0  ;;  %v4273_v55 = vmul.f32 %v8300_v59, %v4207_v60  ;;  %v3674_v54 = vadd.f32 %v3636_v61, %v3126_v18  ;;  %v4102_v23 = vpop.f32.mrf.mxu0  ;;  %v3093_v40 = vpop.f32.mrf.mxu2 }
 0x3f4   : > { %v3128_v42 = vadd.f32 %v3093_v40, %v2778_v45 }
 0x3f5   : > { %v4305_v36 = vsel %vm4239_vm5, %v4207_v60, %v4273_v55  ;;  %v4140_v15 = vadd.f32 %v4102_v23, %v3674_v54 }
 0x3f6   : > { %4338 = vst.msk [vmem:[%s7837_s30 + $0xd8] sm:$0xff] %vm4310_vm6, %v4305_v36 }
 0x3f7   : > { %v4174_v58 = vmul.f32 %v8288_v31, %v4140_v15 }
 0x3f9   : > { %v4208_v4 = vadd.f32 %v8294_v6, %v4174_v58 }
 0x3fa   : > { %v3638_v47 = vpop.f32.mrf.mxu3 }
 0x3fb   : > { %vm4240_vm2 = vcmp.gt.f32.partialorder %v4208_v4, 0.0  ;;  %v4274_v43 = vmul.f32 %v8300_v59, %v4208_v4  ;;  %v3675_v29 = vadd.f32 %v3638_v47, %v3127_v22  ;;  %v4104_v48 = vpop.f32.mrf.mxu0  ;;  %v3095_v3 = vpop.f32.mrf.mxu2 }
 0x3fc   : > { %v3129_v14 = vadd.f32 %v3095_v3, %v2779_v16 }
 0x3fd   : > { %v4306_v11 = vsel %vm4240_vm2, %v4208_v4, %v4274_v43  ;;  %v4141_v35 = vadd.f32 %v4104_v48, %v3675_v29 }
 0x3fe   : > { %4339 = vst.msk [vmem:[%s7837_s30 + $0xe0] sm:$0xff] %vm4310_vm6, %v4306_v11 }
 0x3ff   : > { %v4175_v8 = vmul.f32 %v8288_v31, %v4141_v35 }
 0x401   : > { %v4209_v51 = vadd.f32 %v8294_v6, %v4175_v8 }
 0x402   : > { %v3641_v34 = vpop.f32.mrf.mxu3 }
 0x403   : > { %vm4241_vm7 = vcmp.gt.f32.partialorder %v4209_v51, 0.0  ;;  %v4275_v7 = vmul.f32 %v8300_v59, %v4209_v51  ;;  %v3676_v62 = vadd.f32 %v3641_v34, %v3128_v42  ;;  %v4107_v25 = vpop.f32.mrf.mxu0 }
 0x405   : > { %v4307_v52 = vsel %vm4241_vm7, %v4209_v51, %v4275_v7  ;;  %v4142_v19 = vadd.f32 %v4107_v25, %v3676_v62 }
 0x406   : > { %4340 = vst.msk [vmem:[%s7837_s30 + $0xe8] sm:$0xff] %vm4310_vm6, %v4307_v52 }
 0x407   : > { %v4176_v12 = vmul.f32 %v8288_v31, %v4142_v19 }
 0x409   : > { %v4210_v28 = vadd.f32 %v8294_v6, %v4176_v12 }
 0x40a   : > { %v3643_v2 = vpop.f32.mrf.mxu3 }
 0x40b   : > { %vm4242_vm3 = vcmp.gt.f32.partialorder %v4210_v28, 0.0  ;;  %v4276_v49 = vmul.f32 %v8300_v59, %v4210_v28  ;;  %v3677_v46 = vadd.f32 %v3643_v2, %v3129_v14  ;;  %v4109_v13 = vpop.f32.mrf.mxu0 }
 0x40d   : > { %v4308_v9 = vsel %vm4242_vm3, %v4210_v28, %v4276_v49  ;;  %v4143_v57 = vadd.f32 %v4109_v13, %v3677_v46 }
 0x40e   : > { %4341 = vst.msk [vmem:[%s7837_s30 + $0xf0] sm:$0xff] %vm4310_vm6, %v4308_v9 }
 0x40f   : > { %v4177_v38 = vmul.f32 %v8288_v31, %v4143_v57 }
 0x411   : > { %v4211_v30 = vadd.f32 %v8294_v6, %v4177_v38 }
 0x413   : > { %vm4243_vm4 = vcmp.gt.f32.partialorder %v4211_v30, 0.0  ;;  %v4277_v5 = vmul.f32 %v8300_v59, %v4211_v30 }
 0x415   : > { %v4309_v26 = vsel %vm4243_vm4, %v4211_v30, %v4277_v5 }
 0x416   : > { %4342 = vst.msk [vmem:[%s7837_s30 + $0xf8] sm:$0xff] %vm4310_vm6, %v4309_v26 }
 0x417 PF: > { %s14_s15 = sadd.s32 1, %s4834_s15  }
 0x418   : > { %p11_p4 = scmp.ge.s32.totalorder %s14_s15, 4  }
 0x41a   :  { %13 = sbr.rel (!%p11_p4) target bundleno = 1 (0x1), region = 74 }

// kernel: conv_block.2
= control target key start
LH: loop header
LB: loop body
LE: loop exit
PB: predicated region body
PF: predicated region fallthrough
CT: control target
= control target key end

     0   :  { %s4800_s12 = smov 0   ;;  %s8178_s0 = inlined_call_operand.vmem [shape: bf16[2,290,4], index: 0, kind: input, shape index: {}]   ;;  %s8179_s1 = inlined_call_operand.vmem [shape: bf16[9,4,128], index: 1, kind: input, shape index: {}]   ;;  %s8180_s2 = inlined_call_operand.vmem [shape: f32[256,9], index: 2, kind: input, shape index: {}]   ;;  %s8181_s3 = inlined_call_operand.vmem [shape: f32[2,2,8], index: 3, kind: output, shape index: {}]  }
   0x1 LB: > { %s4342_s13 = sadd.s32 4294967295, %s4770_s12   ;;  %p4346_p0 = scmp.ge.s32.totalorder %s4770_s12, 1  ;;  %s4770_s12 = sphi %s4800_s12, %s13_s12  }
   0x2   : > { %p137_p1 = scmp.lt.s32.totalorder %s4770_s12, 3 }
   0x4   : > { %p138_p2 = pnand %p4346_p0, %p137_p1 }
   0x6   : > { %141 = sbr.rel (%p138_p2) target bundleno = 1056 (0x420), region = 32 }
   0xb   : > { %v4811_v0 = vld [vmem:[%s8180_s2 + $0x20] sm:$0xff]  ;;  %v4816_v1 = vld [vmem:[%s8180_s2 + $0x10] sm:$0xff]  ;;  %v4772_v3 = vmov 0   ;;  %v4829_v4 = vld [vmem:[%s8180_s2 + $0x28] sm:$0xff]  ;;  %v4773_v33 = vmov 1   ;;  %v4774_v58 = vmov 2  }
   0xc   : > { %v4821_v2 = vld [vmem:[%s8180_s2] sm:$0xff]  ;;  %4614 = vset.pattern.permute.xlu2 %v4772_v3  ;;  %4613 = vset.pattern.permute.xlu1 %v4772_v3  ;;  %v4834_v5 = vld [vmem:[%s8180_s2 + $0x18] sm:$0xff]  ;;  %v4839_v6 = vld [vmem:[%s8180_s2 + $0x8] sm:$0xff]  ;;  %vm912_vm0 = vcmask 1041408   ;;  %p160_p3 = scmp.lt.s32.totalorder %s4342_s13, 1  ;;  %vm581_vm1 = vcmask 1040384  }
   0xd   : > { %4612 = vset.pattern.permute.xlu0 %v4772_v3  ;;  %298 = vperm.xlu2 %4614, %v4811_v0   ;;  %v4847_v7 = vld [vmem:[%s8180_s2 + $0x40] sm:$0xff]  ;;  %v4852_v8 = vld [vmem:[%s8180_s2 + $0x38] sm:$0xff]  ;;  %v4857_v9 = vld [vmem:[%s8180_s2 + $0x30] sm:$0xff]  ;;  %vm730_vm2 = vsmask.f32 7424  ;;  %vm863_vm3 = vcmask 31744  }
   0xe   : > { %288 = vperm.xlu1 %4613, %v4816_v1   ;;  %278 = vperm.xlu0 %4612, %v4821_v2   ;;  %v4865_v10 = vld [vmem:[%s8180_s2 + $0x58] sm:$0xff]  ;;  %v4870_v11 = vld [vmem:[%s8180_s2 + $0x50] sm:$0xff]  ;;  %v4875_v12 = vld [vmem:[%s8180_s2 + $0x48] sm:$0xff]  ;;  %s8821_s13 = smov (!%p160_p3, %s4342_s13), 1  ;;  %vm1406_vm4 = vcmask 1046528   ;;  %vm4115_vm5 = vcmask 64512  }
   0xf   : > { %v4883_v13 = vld [vmem:[%s8180_s2 + $0x70] sm:$0xff]  ;;  %v4888_v14 = vld [vmem:[%s8180_s2 + $0x68] sm:$0xff]  ;;  %v4893_v15 = vld [vmem:[%s8180_s2 + $0x60] sm:$0xff]  ;;  %s4595_s30 = smul.u32 148, %s8821_s13  ;;  %vm4185_vm6 = vcmask 57344  }
  0x10   : > { %v4901_v16 = vld [vmem:[%s8180_s2 + $0x88] sm:$0xff]  ;;  %v4906_v17 = vld [vmem:[%s8180_s2 + $0x80] sm:$0xff]  ;;  %v4911_v18 = vld [vmem:[%s8180_s2 + $0x78] sm:$0xff] }
  0x11   : > { %v4919_v19 = vld [vmem:[%s8180_s2 + $0xa0] sm:$0xff]  ;;  %v4924_v20 = vld [vmem:[%s8180_s2 + $0x98] sm:$0xff]  ;;  %v4929_v21 = vld [vmem:[%s8180_s2 + $0x90] sm:$0xff]  ;;  %s5127_s6 = scalar_lea.vmem %s8178_s0, %s4595_s30 }
  0x12   : > { %8354 = vst [vmem:[#allocation2_spill] sm:$0xff] %v4919_v19  ;;  %v4937_v22 = vld [vmem:[%s8180_s2 + $0xb8] sm:$0xff]  ;;  %v4942_v23 = vld [vmem:[%s8180_s2 + $0xb0] sm:$0xff]  ;;  %v4947_v24 = vld [vmem:[%s8180_s2 + $0xa8] sm:$0xff] }
  0x13   : > { %8355 = vst [vmem:[#allocation3_spill] sm:$0xff] %v4924_v20  ;;  %v4955_v25 = vld [vmem:[%s8180_s2 + $0xd0] sm:$0xff]  ;;  %v4960_v26 = vld [vmem:[%s8180_s2 + $0xc8] sm:$0xff]  ;;  %v4965_v27 = vld [vmem:[%s8180_s2 + $0xc0] sm:$0xff] }
  0x14   : > { %v4973_v28 = vld [vmem:[%s8180_s2 + $0xe8] sm:$0xff]  ;;  %v4978_v29 = vld [vmem:[%s8180_s2 + $0xe0] sm:$0xff]  ;;  %v4983_v30 = vld [vmem:[%s8180_s2 + $0xd8] sm:$0xff] }
  0x15   : > { %303 = vperm.xlu2 %4614, %v4829_v4   ;;  %v4991_v31 = vld [vmem:[%s8180_s2 + $0xf8] sm:$0xff]  ;;  %v4996_v32 = vld [vmem:[%s8180_s2 + $0xf0] sm:$0xff] }
  0x16   : > { %293 = vperm.xlu1 %4613, %v4834_v5   ;;  %283 = vperm.xlu0 %4612, %v4839_v6  }
  0x1d   : > { %318 = vperm.xlu2 %4614, %v4847_v7  }
  0x1e   : > { %313 = vperm.xlu1 %4613, %v4852_v8   ;;  %308 = vperm.xlu0 %4612, %v4857_v9  }
  0x25   : > { %333 = vperm.xlu2 %4614, %v4865_v10  }
  0x26   : > { %328 = vperm.xlu1 %4613, %v4870_v11   ;;  %323 = vperm.xlu0 %4612, %v4875_v12  }
  0x2d   : > { %348 = vperm.xlu2 %4614, %v4883_v13  }
  0x2e   : > { %343 = vperm.xlu1 %4613, %v4888_v14   ;;  %338 = vperm.xlu0 %4612, %v4893_v15  }
  0x35   : > { %363 = vperm.xlu2 %4614, %v4901_v16  }
  0x36   : > { %358 = vperm.xlu1 %4613, %v4906_v17   ;;  %353 = vperm.xlu0 %4612, %v4911_v18  }
  0x3d   : > { %378 = vperm.xlu2 %4614, %v4919_v19  }
  0x3e   : > { %373 = vperm.xlu1 %4613, %v4924_v20   ;;  %368 = vperm.xlu0 %4612, %v4929_v21  }
  0x45   : > { %393 = vperm.xlu2 %4614, %v4937_v22  }
  0x46   : > { %388 = vperm.xlu1 %4613, %v4942_v23   ;;  %383 = vperm.xlu0 %4612, %v4947_v24  }
  0x4d   : > { %408 = vperm.xlu2 %4614, %v4955_v25  }
  0x4e   : > { %403 = vperm.xlu1 %4613, %v4960_v26   ;;  %398 = vperm.xlu0 %4612, %v4965_v27  }
  0x55   : > { %423 = vperm.xlu2 %4614, %v4973_v28  }
  0x56   : > { %418 = vperm.xlu1 %4613, %v4978_v29   ;;  %413 = vperm.xlu0 %4612, %v4983_v30  }
  0x5d   : > { %4615 = vset.pattern.permute.xlu2 %v4773_v33 }
  0x5e   : > { %433 = vperm.xlu1 %4613, %v4991_v31   ;;  %428 = vperm.xlu0 %4612, %v4996_v32  }
  0x5f   : > { %486 = vperm.xlu2 %4615, %v4821_v2  }
  0x66   : > { %4617 = vset.pattern.permute.xlu1 %v4773_v33  ;;  %4616 = vset.pattern.permute.xlu0 %v4773_v33  ;;  %v4349_v33 = vld [vmem:[%s8179_s1 + $0x2] sm:$0x3] }
  0x67   : > { %492 = vperm.xlu1 %4617, %v4816_v1   ;;  %495 = vperm.xlu2 %4615, %v4834_v5   ;;  %v5003_v34 = vpop.permute.xlu2 %298 }
  0x68   : > { %8356 = vst [vmem:[#allocation4_spill] sm:$0xff] %v5003_v34  ;;  %489 = vperm.xlu0 %4616, %v4839_v6  }
  0x6f   : > { %498 = vperm.xlu1 %4617, %v4811_v0   ;;  %501 = vperm.xlu2 %4615, %v4829_v4   ;;  %v5008_v35 = vpop.permute.xlu2 %303 }
  0x70   : > { %8357 = vst [vmem:[#allocation5_spill] sm:$0xff] %v5008_v35  ;;  %504 = vperm.xlu0 %4616, %v4857_v9  }
  0x77   : > { %507 = vperm.xlu1 %4617, %v4852_v8   ;;  %510 = vperm.xlu2 %4615, %v4847_v7   ;;  %v5013_v36 = vpop.permute.xlu2 %318 }
  0x78   : > { %8358 = vst [vmem:[#allocation6_spill] sm:$0xff] %v5013_v36  ;;  %513 = vperm.xlu0 %4616, %v4875_v12   ;;  %v5164_v36 = vld [vmem:[%s5127_s6 + $0x10] sm:$0xff]  }
  0x79   : > { %8389 = vst [vmem:[#allocation37_spill] sm:$0xff] %v5164_v36 }
  0x7f   : > { %516 = vperm.xlu1 %4617, %v4870_v11   ;;  %519 = vperm.xlu2 %4615, %v4865_v10   ;;  %v5018_v37 = vpop.permute.xlu2 %333 }
  0x80   : > { %8359 = vst [vmem:[#allocation7_spill] sm:$0xff] %v5018_v37  ;;  %522 = vperm.xlu0 %4616, %v4893_v15   ;;  %v5021_v38 = vpop.permute.xlu1 %288  ;;  %v5023_v39 = vpop.permute.xlu0 %278 }
  0x81   : > { %8360 = vst [vmem:[#allocation8_spill] sm:$0xff] %v5021_v38 }
  0x87   : > { %525 = vperm.xlu1 %4617, %v4888_v14   ;;  %528 = vperm.xlu2 %4615, %v4883_v13   ;;  %v5027_v40 = vpop.permute.xlu2 %348 }
  0x88   : > { %8361 = vst [vmem:[#allocation9_spill] sm:$0xff] %v5027_v40  ;;  %531 = vperm.xlu0 %4616, %v4911_v18   ;;  %v5030_v41 = vpop.permute.xlu1 %293  ;;  %v5032_v42 = vpop.permute.xlu0 %283 }
  0x89   : > { %8362 = vst [vmem:[#allocation10_spill] sm:$0xff] %v5030_v41 }
  0x8f   : > { %534 = vperm.xlu1 %4617, %v4906_v17   ;;  %537 = vperm.xlu2 %4615, %v4901_v16   ;;  %v5036_v43 = vpop.permute.xlu2 %363 }
  0x90   : > { %8363 = vst [vmem:[#allocation11_spill] sm:$0xff] %v5036_v43  ;;  %540 = vperm.xlu0 %4616, %v4929_v21   ;;  %v5039_v44 = vpop.permute.xlu1 %313  ;;  %v5041_v45 = vpop.permute.xlu0 %308 }
  0x91   : > { %8364 = vst [vmem:[#allocation12_spill] sm:$0xff] %v5039_v44 }
  0x92   : > { %8365 = vst [vmem:[#allocation13_spill] sm:$0xff] %v5041_v45  ;;  %v5174_v45 = vunpack.c.h.bf16 %v5164_v36 }
  0x94   : > { %8391 = vst [vmem:[#allocation39_spill] sm:$0xff] %v5174_v45 }
  0x97   : > { %543 = vperm.xlu1 %4617, %v4924_v20   ;;  %546 = vperm.xlu2 %4615, %v4919_v19   ;;  %v5045_v46 = vpop.permute.xlu2 %378 }
  0x98   : > { %8366 = vst [vmem:[#allocation14_spill] sm:$0xff] %v5045_v46  ;;  %549 = vperm.xlu0 %4616, %v4947_v24   ;;  %v5048_v47 = vpop.permute.xlu1 %328  ;;  %v5050_v48 = vpop.permute.xlu0 %323 }
  0x99   : > { %8367 = vst [vmem:[#allocation15_spill] sm:$0xff] %v5048_v47 }
  0x9a   : > { %8368 = vst [vmem:[#allocation16_spill] sm:$0xff] %v5050_v48 }
  0x9f   : > { %552 = vperm.xlu1 %4617, %v4942_v23   ;;  %555 = vperm.xlu2 %4615, %v4937_v22   ;;  %v5054_v49 = vpop.permute.xlu2 %393 }
  0xa0   : > { %8369 = vst [vmem:[#allocation17_spill] sm:$0xff] %v5054_v49  ;;  %558 = vperm.xlu0 %4616, %v4965_v27   ;;  %v5057_v50 = vpop.permute.xlu1 %343  ;;  %v5059_v51 = vpop.permute.xlu0 %338 }
  0xa1   : > { %8370 = vst [vmem:[#allocation18_spill] sm:$0xff] %v5057_v50 }
  0xa2   : > { %8371 = vst [vmem:[#allocation19_spill] sm:$0xff] %v5059_v51 }
  0xa7   : > { %561 = vperm.xlu1 %4617, %v4960_v26   ;;  %564 = vperm.xlu2 %4615, %v4955_v25   ;;  %v5063_v52 = vpop.permute.xlu2 %408 }
  0xa8   : > { %8372 = vst [vmem:[#allocation20_spill] sm:$0xff] %v5063_v52  ;;  %567 = vperm.xlu0 %4616, %v4983_v30   ;;  %v5066_v53 = vpop.permute.xlu1 %358  ;;  %v5068_v54 = vpop.permute.xlu0 %353 }
  0xa9   : > { %8373 = vst [vmem:[#allocation21_spill] sm:$0xff] %v5066_v53 }
  0xaa   : > { %8374 = vst [vmem:[#allocation22_spill] sm:$0xff] %v5068_v54 }
  0xaf   : > { %570 = vperm.xlu1 %4617, %v4978_v29   ;;  %573 = vperm.xlu2 %4615, %v4973_v28   ;;  %v5072_v55 = vpop.permute.xlu2 %423 }
  0xb0   : > { %8375 = vst [vmem:[#allocation23_spill] sm:$0xff] %v5072_v55  ;;  %576 = vperm.xlu0 %4616, %v4996_v32   ;;  %v5075_v56 = vpop.permute.xlu1 %373  ;;  %v5077_v57 = vpop.permute.xlu0 %368 }
  0xb1   : > { %8376 = vst [vmem:[#allocation24_spill] sm:$0xff] %v5075_v56 }
  0xb2   : > { %8377 = vst [vmem:[#allocation25_spill] sm:$0xff] %v5077_v57 }
  0xb7   : > { %579 = vperm.xlu1 %4617, %v4991_v31   ;;  %4618 = vset.pattern.permute.xlu2 %v4774_v58 }
  0xb8   : > { %4619 = vset.pattern.permute.xlu0 %v4774_v58  ;;  %v5080_v59 = vpop.permute.xlu1 %388  ;;  %1146 = vperm.xlu2 %4618, %v4821_v2   ;;  %v5083_v60 = vpop.permute.xlu0 %383 }
  0xb9   : > { %8378 = vst [vmem:[#allocation26_spill] sm:$0xff] %v5080_v59  ;;  %1149 = vperm.xlu0 %4619, %v4839_v6   ;;  %v487_v61 = vpop.permute.xlu2 %486 }
  0xba   : > { %8379 = vst [vmem:[#allocation27_spill] sm:$0xff] %v5083_v60  ;;  %v582_v49 = vrot.slane %v487_v61, 7 }
  0xbf   : > { %4620 = vset.pattern.permute.xlu1 %v4774_v58  ;;  %v914_v58 = vsel %vm912_vm0, %v4349_v33, 0 }
  0xc0   : > { %1152 = vperm.xlu1 %4620, %v4816_v1   ;;  %v5087_v62 = vpop.permute.xlu1 %403  ;;  %1155 = vperm.xlu2 %4618, %v4834_v5   ;;  %v5090_v63 = vpop.permute.xlu0 %398 }
  0xc1   : > { %8380 = vst [vmem:[#allocation28_spill] sm:$0xff] %v5087_v62  ;;  %1164 = vperm.xlu0 %4619, %v4857_v9   ;;  %v5093_v3 = vpop.permute.xlu2 %495  ;;  %923 = vmatpush.bf16.msra.mxu0 %v914_v58 }
  0xc2   : > { %8381 = vst [vmem:[#allocation29_spill] sm:$0xff] %v5090_v63  ;;  %4592 = vmatpush.bf16.msra.mxu1 %v914_v58  ;;  %4593 = vmatpush.bf16.msra.mxu2 %v914_v58  ;;  %v587_v59 = vrot.slane %v5093_v3, 7 }
  0xc3   : > { %4594 = vmatpush.bf16.msra.mxu3 %v914_v58 }
  0xc8   : > { %1158 = vperm.xlu1 %4620, %v4811_v0   ;;  %v5100_v55 = vpop.permute.xlu1 %418  ;;  %1161 = vperm.xlu2 %4618, %v4829_v4   ;;  %v5103_v52 = vpop.permute.xlu0 %413 }
  0xc9   : > { %8382 = vst [vmem:[#allocation30_spill] sm:$0xff] %v5100_v55  ;;  %1173 = vperm.xlu0 %4619, %v4875_v12   ;;  %v5106_v63 = vpop.permute.xlu2 %501 }
  0xca   : > { %8383 = vst [vmem:[#allocation31_spill] sm:$0xff] %v5103_v52  ;;  %v4504_v52 = vld [vmem:[%s5127_s6] sm:$0xff]  }
  0xcb   : > { %v5145_v53 = vunpack.c.l.bf16 %v4504_v52  ;;  %v5147_v40 = vunpack.c.h.bf16 %v4504_v52 }
  0xcd   : > { %v678_v51 = vmul.f32 %v5145_v53, %v582_v49 }
  0xd0   : > { %1167 = vperm.xlu1 %4620, %v4852_v8   ;;  %v5115_v33 = vpop.permute.xlu1 %433  ;;  %1170 = vperm.xlu2 %4618, %v4847_v7   ;;  %v5118_v58 = vpop.permute.xlu0 %428 }
  0xd1   : > { %8384 = vst [vmem:[#allocation32_spill] sm:$0xff] %v5115_v33  ;;  %1182 = vperm.xlu0 %4619, %v4893_v15   ;;  %v5121_v55 = vpop.permute.xlu2 %510  ;;  %v5132_v33 = vld [vmem:[%s5127_s6 + $0x8] sm:$0xff]  }
  0xd2   : > { %8385 = vst [vmem:[#allocation33_spill] sm:$0xff] %v5118_v58  ;;  %v5140_v57 = vunpack.c.h.bf16 %v5132_v33  ;;  %v5143_v43 = vunpack.c.l.bf16 %v5132_v33 }
  0xd3   : > { %8386 = vst [vmem:[#allocation34_spill] sm:$0xff] %v5132_v33  ;;  %v5177_v33 = vld [vmem:[%s5127_s6 + $0x20] sm:$0xff]  }
  0xd4   : > { %8387 = vst [vmem:[#allocation35_spill] sm:$0xff] %v5140_v57 }
  0xd5   : > { %8388 = vst [vmem:[#allocation36_spill] sm:$0xff] %v5143_v43 }
  0xd6   : > { %8392 = vst [vmem:[#allocation40_spill] sm:$0xff] %v5177_v33 }
  0xd8   : > { %1176 = vperm.xlu1 %4620, %v4870_v11   ;;  %1179 = vperm.xlu2 %4618, %v4865_v10  }
  0xd9   : > { %1191 = vperm.xlu0 %4619, %v4911_v18   ;;  %v493_v58 = vpop.permute.xlu1 %492  ;;  %v5136_v62 = vpop.permute.xlu2 %519 }
  0xda   : > { %v585_v46 = vrot.slane %v493_v58, 7  ;;  %v490_v60 = vpop.permute.xlu0 %489 }
  0xdb   : > { %v583_v56 = vrot.slane %v490_v60, 7 }
  0xdc   : > { %v588_v54 = vsel %vm581_vm1, %v585_v46, %v587_v59 }
  0xdd   : > { %v681_v61 = vmul.f32 %v5140_v57, %v588_v54  ;;  %v584_v3 = vsel %vm581_vm1, %v582_v49, %v583_v56  ;;  %v586_v58 = vsel %vm581_vm1, %v583_v56, %v585_v46 }
  0xde   : > { %v679_v60 = vmul.f32 %v5147_v40, %v584_v3  ;;  %v680_v50 = vmul.f32 %v5143_v43, %v586_v58  ;;  %v591_v3 = vrot.slane %v5106_v63, 7 }
  0xe0   : > { %v711_v37 = vpack.c.bf16 %v679_v60, %v678_v51  ;;  %1185 = vperm.xlu1 %4620, %v4888_v14   ;;  %1188 = vperm.xlu2 %4618, %v4883_v13   ;;  %v5158_v52 = vpack.c.bf16 %v681_v61, %v680_v50  ;;  %v5169_v50 = vunpack.c.l.bf16 %v5164_v36  ;;  %v5193_v36 = vunpack.c.h.bf16 %v5177_v33 }
  0xe1   : > { %1200 = vperm.xlu0 %4619, %v4929_v21   ;;  %v499_v54 = vpop.permute.xlu1 %498  ;;  %v5161_v47 = vpop.permute.xlu2 %528 }
  0xe2   : > { %v589_v46 = vrot.slane %v499_v54, 7  ;;  %v505_v49 = vpop.permute.xlu0 %504  ;;  %v734_v56 = vshll.u32 %v711_v37, 16  ;;  %v739_v51 = vshll.u32 %v5158_v52, 16  ;;  %v732_v58 = vshrl.u32 %v711_v37, 16  ;;  %8390 = vst [vmem:[#allocation38_spill] sm:$0xff] %v5169_v50 }
  0xe3   : > { %8394 = vst [vmem:[#allocation42_spill] sm:$0xff] %v5193_v36  ;;  %v743_v43 = vshrl.u32 %v5158_v52, 16  ;;  %v4580_v52 = vld [vmem:[%s5127_s6 + $0x30] sm:$0xff]  }
  0xe4   : > { %v736_v60 = vrot.slane %v734_v56, 1  ;;  %v590_v61 = vsel %vm581_vm1, %v587_v59, %v589_v46  ;;  %v592_v48 = vsel %vm581_vm1, %v589_v46, %v591_v3  ;;  %v741_v44 = vrot.slane %v739_v51, 1 }
  0xe5   : > { %v682_v63 = vmul.f32 %v5169_v50, %v590_v61  ;;  %v683_v37 = vmul.f32 %v5174_v45, %v592_v48  ;;  %v597_v51 = vrot.slane %v5121_v55, 7  ;;  %v5190_v48 = vunpack.c.l.bf16 %v5177_v33 }
  0xe6   : > { %v737_v54 = vor.u32 %v736_v60, %v732_v58 }
  0xe7   : > { %8393 = vst [vmem:[#allocation41_spill] sm:$0xff] %v5190_v48  ;;  %v5196_v45 = vpack.c.bf16 %v683_v37, %v682_v63  ;;  %v603_v37 = vrot.slane %v5136_v62, 7 }
  0xe8   : > { %1194 = vperm.xlu1 %4620, %v4906_v17   ;;  %1197 = vperm.xlu2 %4618, %v4901_v16   ;;  %v742_v59 = vsel %vm730_vm2, %v737_v54, %v741_v44 }
  0xe9   : > { %1209 = vperm.xlu0 %4619, %v4947_v24   ;;  %4350 = vmatmul.msk.bf16.vlgmr.msra.gmra.mxu0 %vm863_vm3, %v742_v59  ;;  %v508_v46 = vpop.permute.xlu1 %507  ;;  %v5186_v56 = vpop.permute.xlu2 %537 }
  0xea   : > { %v595_v58 = vrot.slane %v508_v46, 7  ;;  %v514_v60 = vpop.permute.xlu0 %513  ;;  %v4579_v46 = vld [vmem:[%s5127_s6 + $0x28] sm:$0xff]  }
  0xeb   : > { %v599_v61 = vrot.slane %v514_v60, 7  ;;  %v747_v60 = vshll.u32 %v5196_v45, 16 }
  0xec   : > { %v598_v54 = vsel %vm581_vm1, %v595_v58, %v597_v51 }
  0xed   : > { %v686_v59 = vmul.f32 %v5190_v48, %v598_v54  ;;  %v600_v35 = vsel %vm581_vm1, %v597_v51, %v599_v61  ;;  %v5209_v51 = vunpack.c.h.bf16 %v4579_v46  ;;  %v749_v38 = vrot.slane %v747_v60, 1 }
  0xee   : > { %v687_v55 = vmul.f32 %v5193_v36, %v600_v35  ;;  %v5212_v35 = vld [vmem:[%s5127_s6 + $0x18] sm:$0xff]  }
  0xef   : > { %8395 = vst [vmem:[#allocation43_spill] sm:$0xff] %v5209_v51  ;;  %v5223_v57 = vunpack.c.h.bf16 %v5212_v35 }
  0xf0   : > { %v715_v50 = vpack.c.bf16 %v687_v55, %v686_v59  ;;  %1203 = vperm.xlu1 %4620, %v4924_v20   ;;  %1206 = vperm.xlu2 %4618, %v4919_v19   ;;  %8396 = vst [vmem:[#allocation44_spill] sm:$0xff] %v5212_v35  ;;  %v5214_v59 = vunpack.c.l.bf16 %v4579_v46  ;;  %v593_v55 = vrot.slane %v505_v49, 7  ;;  %v745_v46 = vor.u32 %v743_v43, %v741_v44 }
  0xf1   : > { %1218 = vperm.xlu0 %4619, %v4965_v27   ;;  %v517_v33 = vpop.permute.xlu1 %516  ;;  %v5206_v63 = vpop.permute.xlu2 %546  ;;  %8398 = vst [vmem:[#allocation46_spill] sm:$0xff] %v5223_v57 }
  0xf2   : > { %v601_v54 = vrot.slane %v517_v33, 7  ;;  %v523_v48 = vpop.permute.xlu0 %522  ;;  %8397 = vst [vmem:[#allocation45_spill] sm:$0xff] %v5214_v59  ;;  %v763_v36 = vshll.u32 %v715_v50, 16  ;;  %v596_v62 = vsel %vm581_vm1, %v593_v55, %v595_v58  ;;  %v594_v49 = vsel %vm581_vm1, %v591_v3, %v593_v55 }
  0xf3   : > { %v685_v58 = vmul.f32 %v5223_v57, %v596_v62  ;;  %v605_v60 = vrot.slane %v523_v48, 7  ;;  %v5244_v55 = vunpack.c.h.bf16 %v4580_v52 }
  0xf4   : > { %v602_v34 = vsel %vm581_vm1, %v599_v61, %v601_v54  ;;  %v604_v19 = vsel %vm581_vm1, %v601_v54, %v603_v37  ;;  %v5228_v61 = vrot.slane %v763_v36, 1  ;;  %v5231_v54 = vunpack.c.l.bf16 %v5212_v35 }
  0xf5   : > { %v688_v33 = vmul.f32 %v5214_v59, %v602_v34  ;;  %v689_v20 = vmul.f32 %v5209_v51, %v604_v19  ;;  %v750_v19 = vsel %vm730_vm2, %v745_v46, %v749_v38  ;;  %v767_v36 = vshrl.u32 %v715_v50, 16  ;;  %8400 = vst [vmem:[#allocation48_spill] sm:$0xff] %v5244_v55 }
  0xf6   : > { %8399 = vst [vmem:[#allocation47_spill] sm:$0xff] %v5231_v54  ;;  %v684_v44 = vmul.f32 %v5231_v54, %v594_v49  ;;  %v606_v46 = vsel %vm581_vm1, %v603_v37, %v605_v60  ;;  %v5251_v59 = vunpack.c.l.bf16 %v4580_v52  ;;  %v609_v54 = vrot.slane %v5161_v47, 7 }
  0xf7   : > { %v5226_v41 = vpack.c.bf16 %v689_v20, %v688_v33  ;;  %v769_v62 = vor.u32 %v767_v36, %v5228_v61  ;;  %v615_v36 = vrot.slane %v5186_v56, 7 }
  0xf8   : > { %1212 = vperm.xlu1 %4620, %v4942_v23   ;;  %1215 = vperm.xlu2 %4618, %v4937_v22   ;;  %v5249_v51 = vpack.c.bf16 %v685_v58, %v684_v44  ;;  %8401 = vst [vmem:[#allocation49_spill] sm:$0xff] %v5251_v59  ;;  %v690_v49 = vmul.f32 %v5251_v59, %v606_v46 }
  0xf9   : > { %1227 = vperm.xlu0 %4619, %v4983_v30   ;;  %4351 = vmatmul.msk.bf16.gmra.mxu0 %vm863_vm3, %v750_v19  ;;  %v526_v20 = vpop.permute.xlu1 %525  ;;  %v5240_v34 = vpop.permute.xlu2 %555  ;;  %v771_v43 = vshll.u32 %v5226_v41, 16 }
  0xfa   : > { %v607_v3 = vrot.slane %v526_v20, 7  ;;  %v532_v48 = vpop.permute.xlu0 %531  ;;  %v4582_v20 = vld [vmem:[%s5127_s6 + $0x40] sm:$0xff]   ;;  %v755_v37 = vshll.u32 %v5249_v51, 16 }
  0xfb   : > { %v773_v33 = vrot.slane %v771_v43, 1 }
  0xfc   : > { %v608_v19 = vsel %vm581_vm1, %v605_v60, %v607_v3  ;;  %v757_v59 = vrot.slane %v755_v37, 1  ;;  %v610_v37 = vsel %vm581_vm1, %v607_v3, %v609_v54 }
  0xfd   : > { %v691_v50 = vmul.f32 %v5244_v55, %v608_v19  ;;  %v774_v35 = vsel %vm730_vm2, %v769_v62, %v773_v33  ;;  %v5267_v62 = vunpack.c.h.bf16 %v4582_v20  ;;  %v751_v19 = vshrl.u32 %v5196_v45, 16  ;;  %v4581_v55 = vld [vmem:[%s5127_s6 + $0x38] sm:$0xff]  }
  0xfe   : > { %4354 = vmatmul.msk.bf16.vlgmr.msra.gmra.mxu1 %vm863_vm3, %v774_v35  ;;  %v611_v35 = vrot.slane %v532_v48, 7 }
  0xff   : > { %v5264_v60 = vpack.c.bf16 %v691_v50, %v690_v49  ;;  %8402 = vst [vmem:[#allocation50_spill] sm:$0xff] %v5267_v62 }
 0x100   : > { %1221 = vperm.xlu1 %4620, %v4960_v26   ;;  %1224 = vperm.xlu2 %4618, %v4955_v25   ;;  %v5269_v26 = vunpack.c.l.bf16 %v4582_v20  ;;  %v4583_v20 = vld [vmem:[%s5127_s6 + $0x48] sm:$0xff]  }
 0x101   : > { %1236 = vperm.xlu0 %4619, %v4996_v32   ;;  %v535_v58 = vpop.permute.xlu1 %534  ;;  %v5262_v52 = vpop.permute.xlu2 %564  ;;  %v779_v56 = vshll.u32 %v5264_v60, 16 }
 0x102   : > { %v613_v43 = vrot.slane %v535_v58, 7  ;;  %v541_v44 = vpop.permute.xlu0 %540  ;;  %v753_v58 = vor.u32 %v751_v19, %v749_v38  ;;  %v775_v38 = vshrl.u32 %v5226_v41, 16 }
 0x103   : > { %v617_v48 = vrot.slane %v541_v44, 7  ;;  %v781_v47 = vrot.slane %v779_v56, 1 }
 0x104   : > { %v614_v25 = vsel %vm581_vm1, %v611_v35, %v613_v43  ;;  %v616_v46 = vsel %vm581_vm1, %v613_v43, %v615_v36  ;;  %v758_v45 = vsel %vm730_vm2, %v753_v58, %v757_v59  ;;  %v4775_v43 = vmov 3  }
 0x105   : > { %v694_v50 = vmul.f32 %v5269_v26, %v614_v25  ;;  %v695_v49 = vmul.f32 %v5267_v62, %v616_v46  ;;  %v5288_v46 = vunpack.c.l.bf16 %v4581_v55  ;;  %v5299_v58 = vunpack.c.l.bf16 %v4583_v20 }
 0x107   : > { %v719_v57 = vpack.c.bf16 %v695_v49, %v694_v50  ;;  %v5295_v50 = vunpack.c.h.bf16 %v4581_v55  ;;  %v5297_v49 = vunpack.c.h.bf16 %v4583_v20  ;;  %8404 = vst [vmem:[#allocation52_spill] sm:$0xff] %v5299_v58  ;;  %v692_v41 = vmul.f32 %v5288_v46, %v610_v37 }
 0x108   : > { %1230 = vperm.xlu1 %4620, %v4978_v29   ;;  %1233 = vperm.xlu2 %4618, %v4973_v28   ;;  %v612_v29 = vsel %vm581_vm1, %v609_v54, %v611_v35  ;;  %v618_v28 = vsel %vm581_vm1, %v615_v36, %v617_v48 }
 0x109   : > { %4622 = vset.pattern.permute.xlu0 %v4775_v43  ;;  %4352 = vmatmul.msk.bf16.gmra.mxu0 %vm863_vm3, %v758_v45  ;;  %v544_v25 = vpop.permute.xlu1 %543  ;;  %v5285_v44 = vpop.permute.xlu2 %573  ;;  %8403 = vst [vmem:[#allocation51_spill] sm:$0xff] %v5297_v49  ;;  %v777_v45 = vor.u32 %v775_v38, %v773_v33  ;;  %v795_v62 = vshll.u32 %v719_v57, 16  ;;  %v693_v54 = vmul.f32 %v5295_v50, %v612_v29 }
 0x10a   : > { %v619_v19 = vrot.slane %v544_v25, 7  ;;  %1617 = vperm.xlu0 %4622, %v4839_v6   ;;  %v5293_v3 = vpop.permute.xlu0 %549  ;;  %v696_v36 = vmul.f32 %v5299_v58, %v618_v28  ;;  %v4584_v28 = vld [vmem:[%s5127_s6 + $0x50] sm:$0xff]  }
 0x10b   : > { %v782_v35 = vsel %vm730_vm2, %v777_v45, %v781_v47  ;;  %v5311_v33 = vrot.slane %v795_v62, 1  ;;  %v5318_v25 = vpack.c.bf16 %v693_v54, %v692_v41  ;;  %v759_v62 = vshrl.u32 %v5249_v51, 16  ;;  %v4587_v51 = vld [vmem:[%s5127_s6 + $0x68] sm:$0xff]  }
 0x10c   : > { %v620_v56 = vsel %vm581_vm1, %v617_v48, %v619_v19  ;;  %v8217_v48 = vrot.slane %v5293_v3, 7  ;;  %v621_v45 = vrot.slane %v5206_v63, 7  ;;  %v783_v54 = vshrl.u32 %v5264_v60, 16 }
 0x10d   : > { %v697_v6 = vmul.f32 %v5297_v49, %v620_v56 }
 0x10e   : > { %4355 = vmatmul.msk.bf16.gmra.mxu1 %vm863_vm3, %v782_v35  ;;  %v622_v41 = vsel %vm581_vm1, %v619_v19, %v621_v45  ;;  %v5338_v35 = vunpack.c.h.bf16 %v4584_v28  ;;  %v785_v19 = vor.u32 %v783_v54, %v781_v47 }
 0x10f   : > { %v5308_v55 = vpack.c.bf16 %v697_v6, %v696_v36  ;;  %v761_v36 = vor.u32 %v759_v62, %v757_v59  ;;  %v5335_v6 = vunpack.c.l.bf16 %v4584_v28  ;;  %v4586_v59 = vld [vmem:[%s5127_s6 + $0x60] sm:$0xff]   ;;  %v5349_v28 = vunpack.c.l.bf16 %v4587_v51 }
 0x110   : > { %1239 = vperm.xlu1 %4620, %v4991_v31   ;;  %4621 = vset.pattern.permute.xlu2 %v4775_v43  ;;  %v799_v31 = vshrl.u32 %v719_v57, 16  ;;  %v787_v57 = vshll.u32 %v5318_v25, 16  ;;  %8406 = vst [vmem:[#allocation54_spill] sm:$0xff] %v5338_v35  ;;  %v5355_v47 = vunpack.c.h.bf16 %v4586_v59 }
 0x111   : > { %v5314_v20 = vpop.permute.xlu1 %552  ;;  %1613 = vperm.xlu2 %4621, %v4821_v2   ;;  %v803_v37 = vshll.u32 %v5308_v55, 16  ;;  %8405 = vst [vmem:[#allocation53_spill] sm:$0xff] %v5335_v6  ;;  %v698_v62 = vmul.f32 %v5335_v6, %v622_v41 }
 0x112   : > { %1637 = vperm.xlu0 %4622, %v4857_v9   ;;  %v559_v38 = vpop.permute.xlu0 %558  ;;  %v5321_v29 = vpop.permute.xlu2 %1146  ;;  %v801_v2 = vor.u32 %v799_v31, %v5311_v33  ;;  %v624_v9 = vsel %vm581_vm1, %v621_v45, %v8217_v48  ;;  %v627_v31 = vrot.slane %v5240_v34, 7  ;;  %v766_v45 = vsel %vm730_vm2, %v761_v36, %v5228_v61  ;;  %8407 = vst [vmem:[#allocation55_spill] sm:$0xff] %v5349_v28 }
 0x113   : > { %v5326_v56 = vrot.slane %v803_v37, 1  ;;  %v629_v63 = vrot.slane %v559_v38, 7  ;;  %v699_v60 = vmul.f32 %v5338_v35, %v624_v9  ;;  %8408 = vst [vmem:[#allocation56_spill] sm:$0xff] %v5355_v47  ;;  %v633_v34 = vrot.slane %v5262_v52, 7  ;;  %v484_v52 = vld [vmem:[%s8179_s1] sm:$0x3] }
 0x114   : > { %v5363_v36 = vunpack.c.l.bf16 %v4586_v59 }
 0x115   : > { %v806_v37 = vsel %vm730_vm2, %v801_v2, %v5326_v56  ;;  %v5353_v2 = vrot.slane %v787_v57, 1  ;;  %v630_v41 = vsel %vm581_vm1, %v627_v31, %v629_v63 }
 0x116   : > { %4358 = vmatmul.msk.bf16.vlgmr.msra.gmra.mxu2 %vm863_vm3, %v806_v37  ;;  %8409 = vst [vmem:[#allocation57_spill] sm:$0xff] %v5363_v36  ;;  %v5374_v37 = vpack.c.bf16 %v699_v60, %v698_v62  ;;  %v702_v59 = vmul.f32 %v5363_v36, %v630_v41  ;;  %v807_v60 = vshrl.u32 %v5308_v55, 16 }
 0x117   : > { %v790_v57 = vsel %vm730_vm2, %v785_v19, %v5353_v2 }
 0x118   : > { %4623 = vset.pattern.permute.xlu1 %v4775_v43  ;;  %v811_v41 = vshll.u32 %v5374_v37, 16 }
 0x119   : > { %4353 = vmatmul.msk.bf16.gmra.mxu0 %vm863_vm3, %v766_v45  ;;  %1621 = vperm.xlu1 %4623, %v4816_v1   ;;  %v562_v38 = vpop.permute.xlu1 %561  ;;  %v5365_v1 = vunpack.c.h.bf16 %v4587_v51  ;;  %v1054_v45 = vsel %vm912_vm0, %v484_v52, 0 }
 0x11a   : > { %v631_v9 = vrot.slane %v562_v38, 7  ;;  %1625 = vperm.xlu2 %4621, %v4834_v5   ;;  %1649 = vperm.xlu0 %4622, %v4875_v12   ;;  %v568_v61 = vpop.permute.xlu0 %567  ;;  %v5361_v43 = vpop.permute.xlu2 %1155 }
 0x11b   : > { %8410 = vst [vmem:[#allocation58_spill] sm:$0xff] %v5365_v1  ;;  %v635_v54 = vrot.slane %v568_v61, 7  ;;  %1063 = vmatpush.bf16.msrb.mxu1 %v1054_v45  ;;  %v4585_v61 = vld [vmem:[%s5127_s6 + $0x58] sm:$0xff]   ;;  %v639_v45 = vrot.slane %v5285_v44, 7  ;;  %v437_v44 = vmul.f32 %v5147_v40, %v5032_v42 }
 0x11c   : > { %v632_v5 = vsel %vm581_vm1, %v629_v63, %v631_v9  ;;  %v634_v12 = vsel %vm581_vm1, %v631_v9, %v633_v34  ;;  %v625_v63 = vrot.slane %v5314_v20, 7  ;;  %v5389_v52 = vunpack.c.h.bf16 %v4585_v61 }
 0x11d   : > { %v703_v51 = vmul.f32 %v5355_v47, %v632_v5  ;;  %v704_v38 = vmul.f32 %v5349_v28, %v634_v12  ;;  %v636_v19 = vsel %vm581_vm1, %v633_v34, %v635_v54  ;;  %v4588_v12 = vld [vmem:[%s5127_s6 + $0x70] sm:$0xff]  }
 0x11e   : > { %v705_v48 = vmul.f32 %v5365_v1, %v636_v19  ;;  %4356 = vmatmul.msk.bf16.gmra.mxu1 %vm863_vm3, %v790_v57  ;;  %8411 = vst [vmem:[#allocation59_spill] sm:$0xff] %v5389_v52  ;;  %v5416_v35 = vunpack.c.l.bf16 %v4588_v12 }
 0x11f   : > { %v723_v62 = vpack.c.bf16 %v703_v51, %v702_v59  ;;  %v628_v51 = vsel %vm581_vm1, %v625_v63, %v627_v31 }
 0x120   : > { %v5387_v9 = vpack.c.bf16 %v705_v48, %v704_v38  ;;  %v809_v48 = vor.u32 %v807_v60, %v5326_v56  ;;  %v813_v56 = vrot.slane %v811_v41, 1  ;;  %v5414_v60 = vunpack.c.h.bf16 %v4588_v12  ;;  %8415 = vst [vmem:[#allocation62_spill] sm:$0xff] %v5416_v35 }
 0x121   : > { %1629 = vperm.xlu1 %4623, %v4811_v0   ;;  %v571_v34 = vpop.permute.xlu1 %570  ;;  %v827_v5 = vshll.u32 %v723_v62, 16  ;;  %v8412_v0 = vrot.slane %v5293_v3, 7  ;;  %v791_v12 = vshrl.u32 %v5318_v25, 16  ;;  %v4382_v25 = vld [vmem:[%s8179_s1 + $0x4] sm:$0x3] }
 0x122   : > { %v637_v19 = vrot.slane %v571_v34, 7  ;;  %1633 = vperm.xlu2 %4621, %v4829_v4   ;;  %1661 = vperm.xlu0 %4622, %v4893_v15   ;;  %v5396_v20 = vpop.permute.xlu0 %576  ;;  %v5398_v55 = vpop.permute.xlu2 %1161  ;;  %v835_v57 = vshll.u32 %v5387_v9, 16  ;;  %v831_v34 = vshrl.u32 %v723_v62, 16  ;;  %v5408_v4 = vunpack.c.l.bf16 %v4585_v61  ;;  %8414 = vst [vmem:[#allocation61_spill] sm:$0xff] %v5414_v60 }
 0x123   : > { %v626_v59 = vsel %vm581_vm1, %v8412_v0, %v625_v63  ;;  %v5406_v38 = vrot.slane %v827_v5, 1  ;;  %v701_v63 = vmul.f32 %v5389_v52, %v628_v51  ;;  %v814_v61 = vsel %vm730_vm2, %v809_v48, %v813_v56  ;;  %v4399_v51 = vld [vmem:[%s8179_s1 + $0x6] sm:$0x3] }
 0x124   : > { %8413 = vst [vmem:[#allocation60_spill] sm:$0xff] %v5408_v4  ;;  %v638_v15 = vsel %vm581_vm1, %v635_v54, %v637_v19  ;;  %v640_v6 = vsel %vm581_vm1, %v637_v19, %v639_v45  ;;  %v837_v0 = vrot.slane %v835_v57, 1  ;;  %v700_v31 = vmul.f32 %v5408_v4, %v626_v59 }
 0x125   : > { %v833_v3 = vor.u32 %v831_v34, %v5406_v38  ;;  %v706_v54 = vmul.f32 %v5416_v35, %v638_v15  ;;  %v707_v62 = vmul.f32 %v5414_v60, %v640_v6  ;;  %v793_v57 = vor.u32 %v791_v12, %v5353_v2  ;;  %v4589_v15 = vld [vmem:[%s5127_s6 + $0x78] sm:$0xff]  }
 0x126   : > { %4359 = vmatmul.msk.bf16.gmra.mxu2 %vm863_vm3, %v814_v61  ;;  %v5435_v6 = vpack.c.bf16 %v701_v63, %v700_v31  ;;  %v1489_v34 = vsel %vm912_vm0, %v4382_v25, 0  ;;  %v815_v61 = vshrl.u32 %v5374_v37, 16 }
 0x127   : > { %v838_v41 = vsel %vm730_vm2, %v833_v3, %v837_v0  ;;  %v5440_v59 = vpack.c.bf16 %v707_v62, %v706_v54  ;;  %1498 = vmatpush.bf16.msrb.mxu2 %v1489_v34  ;;  %v641_v3 = vrot.slane %v5396_v20, 7 }
 0x128   : > { %4362 = vmatmul.msk.bf16.vlgmr.msra.gmra.mxu3 %vm863_vm3, %v838_v41  ;;  %v839_v41 = vshrl.u32 %v5387_v9, 16  ;;  %v817_v20 = vor.u32 %v815_v61, %v813_v56  ;;  %v4416_v56 = vld [vmem:[%s8179_s1 + $0x8] sm:$0x3] }
 0x129   : > { %1641 = vperm.xlu1 %4623, %v4852_v8   ;;  %v5428_v5 = vpop.permute.xlu1 %579  ;;  %v798_v8 = vsel %vm730_vm2, %v793_v57, %v5311_v33  ;;  %v1839_v33 = vsel %vm912_vm0, %v4399_v51, 0  ;;  %v642_v57 = vsel %vm581_vm1, %v639_v45, %v641_v3  ;;  %v2162_v45 = vsel %vm912_vm0, %v4416_v56, 0 }
 0x12a   : > { %1645 = vperm.xlu2 %4621, %v4847_v7   ;;  %1673 = vperm.xlu0 %4622, %v4911_v18   ;;  %v5433_v19 = vpop.permute.xlu2 %1170  ;;  %v819_v7 = vshll.u32 %v5435_v6, 16  ;;  %v843_v18 = vshll.u32 %v5440_v59, 16  ;;  %v643_v2 = vrot.slane %v5428_v5, 7 }
 0x12b   : > { %v5437_v48 = vpop.permute.xlu0 %1149  ;;  %1848 = vmatpush.bf16.msrb.mxu3 %v1839_v33  ;;  %2171 = vmatpush.bf16.msrb.mxu0 %v2162_v45  ;;  %v8425_v45 = vld [vmem:[#allocation2_spill] sm:$0xff] }
 0x12c   : > { %v821_v54 = vrot.slane %v819_v7, 1  ;;  %v845_v12 = vrot.slane %v843_v18, 1 }
 0x12e   : > { %4357 = vmatmul.msk.bf16.gmra.mxu1 %vm863_vm3, %v798_v8  ;;  %v822_v37 = vsel %vm730_vm2, %v817_v20, %v821_v54  ;;  %v5476_v8 = vunpack.c.l.bf16 %v4589_v15 }
 0x130   : > { %8417 = vst [vmem:[#allocation64_spill] sm:$0xff] %v5476_v8  ;;  %v708_v18 = vmul.f32 %v5476_v8, %v642_v57 }
 0x131   : > { %1653 = vperm.xlu1 %4623, %v4870_v11   ;;  %v644_v11 = vsel %vm581_vm1, %v641_v3, %v643_v2 }
 0x132   : > { %1657 = vperm.xlu2 %4621, %v4865_v10   ;;  %1685 = vperm.xlu0 %4622, %v4929_v21   ;;  %v1153_v31 = vpop.permute.xlu1 %1152  ;;  %v5461_v63 = vpop.permute.xlu2 %1179  ;;  %v5470_v10 = vunpack.c.h.bf16 %v4589_v15  ;;  %v841_v21 = vor.u32 %v839_v41, %v837_v0  ;;  %v436_v0 = vmul.f32 %v5145_v53, %v5023_v39  ;;  %v5502_v15 = vld [vmem:[%s5127_s6 + $0x80] sm:$0xff]   ;;  %v847_v41 = vshrl.u32 %v5440_v59, 16 }
 0x133   : > { %v5464_v62 = vpop.permute.xlu0 %1164  ;;  %8418 = vst [vmem:[#allocation65_spill] sm:$0xff] %v5502_v15  ;;  %v1244_v3 = vrot.slane %v1153_v31, 6  ;;  %v5516_v20 = vunpack.c.l.bf16 %v5502_v15  ;;  %v8438_v15 = vld [vmem:[#allocation47_spill] sm:$0xff] }
 0x134   : > { %8416 = vst [vmem:[#allocation63_spill] sm:$0xff] %v5470_v10  ;;  %v709_v9 = vmul.f32 %v5470_v10, %v644_v11  ;;  %v846_v7 = vsel %vm730_vm2, %v841_v21, %v845_v12  ;;  %v468_v34 = vpack.c.bf16 %v437_v44, %v436_v0  ;;  %v1242_v21 = vrot.slane %v5437_v48, 6  ;;  %v8423_v48 = vld [vmem:[#allocation8_spill] sm:$0xff] }
 0x135   : > { %8419 = vst [vmem:[#allocation66_spill] sm:$0xff] %v5516_v20  ;;  %v849_v57 = vor.u32 %v847_v41, %v845_v12  ;;  %v8424_v12 = vld [vmem:[#allocation36_spill] sm:$0xff] }
 0x136   : > { %4360 = vmatmul.msk.bf16.gmra.mxu2 %vm863_vm3, %v822_v37  ;;  %v726_v42 = vpack.c.bf16 %v709_v9, %v708_v18  ;;  %v1245_v31 = vsel %vm912_vm0, %v1242_v21, %v1244_v3  ;;  %v8420_v9 = vld [vmem:[#allocation10_spill] sm:$0xff]  ;;  %v438_v56 = vmul.f32 %v8424_v12, %v8423_v48 }
 0x137   : > { %v1339_v0 = vmul.f32 %v8424_v12, %v1245_v31 }
 0x138   : > { %4363 = vmatmul.msk.bf16.gmra.mxu3 %vm863_vm3, %v846_v7  ;;  %v851_v33 = vshll.u32 %v726_v42, 16 }
 0x139   : > { %1665 = vperm.xlu1 %4623, %v4888_v14  }
 0x13a   : > { %1669 = vperm.xlu2 %4621, %v4883_v13   ;;  %1697 = vperm.xlu0 %4622, %v4947_v24   ;;  %v5494_v25 = vpop.permute.xlu1 %1158  ;;  %v5496_v39 = vpop.permute.xlu2 %1188  ;;  %v823_v24 = vshrl.u32 %v5435_v6, 16  ;;  %v853_v11 = vrot.slane %v851_v33, 1 }
 0x13b   : > { %v5498_v51 = vpop.permute.xlu0 %1173 }
 0x13c   : > { %v854_v59 = vsel %vm730_vm2, %v849_v57, %v853_v11 }
 0x13e   : > { %4366 = vmatmul.msk.bf16.vlgmr.msrb.gmra.mxu1 %vm863_vm3, %v468_v34 }
 0x141   : > { %1677 = vperm.xlu1 %4623, %v4906_v17   ;;  %v825_v17 = vor.u32 %v823_v24, %v821_v54  ;;  %v8421_v54 = vld [vmem:[#allocation35_spill] sm:$0xff] }
 0x142   : > { %1681 = vperm.xlu2 %4621, %v4901_v16   ;;  %1709 = vperm.xlu0 %4622, %v4965_v27   ;;  %v5507_v13 = vpop.permute.xlu1 %1167  ;;  %v5509_v14 = vpop.permute.xlu2 %1197  ;;  %v1241_v16 = vrot.slane %v5321_v29, 6  ;;  %v1246_v27 = vrot.slane %v5361_v43, 6  ;;  %v439_v7 = vmul.f32 %v8421_v54, %v8420_v9  ;;  %v710_v29 = vmul.f32 %v5516_v20, %v643_v2  ;;  %v8437_v20 = vld [vmem:[#allocation13_spill] sm:$0xff] }
 0x143   : > { %v5512_v61 = vpop.permute.xlu0 %1182  ;;  %v830_v6 = vsel %vm730_vm2, %v825_v17, %v5406_v38  ;;  %v8422_v38 = vld [vmem:[#allocation3_spill] sm:$0xff] }
 0x144   : > { %v1247_v37 = vsel %vm912_vm0, %v1244_v3, %v1246_v27  ;;  %v1243_v43 = vsel %vm912_vm0, %v1241_v16, %v1242_v21  ;;  %v469_v34 = vpack.c.bf16 %v439_v7, %v438_v56  ;;  %v1337_v33 = vmul.f32 %v5145_v53, %v1241_v16  ;;  %v8428_v7 = vld [vmem:[#allocation4_spill] sm:$0xff] }
 0x145   : > { %v1340_v44 = vmul.f32 %v8421_v54, %v1247_v37  ;;  %v1338_v24 = vmul.f32 %v5147_v40, %v1243_v43  ;;  %v727_v3 = vpack.c.bf16 %v710_v29, %v710_v29  ;;  %v1248_v40 = vrot.slane %v5494_v25, 6  ;;  %v8429_v25 = vld [vmem:[#allocation38_spill] sm:$0xff]  ;;  %v8430_v43 = vld [vmem:[#allocation5_spill] sm:$0xff]  ;;  %v5582_v56 = vld [vmem:[%s8180_s2 + $0xd0] sm:$0xff] }
 0x146   : > { %4361 = vmatmul.msk.bf16.gmra.mxu2 %vm863_vm3, %v830_v6  ;;  %v440_v29 = vmul.f32 %v8429_v25, %v8428_v7 }
 0x147   : > { %v1371_v41 = vpack.c.bf16 %v1340_v44, %v1339_v0  ;;  %v1370_v17 = vpack.c.bf16 %v1338_v24, %v1337_v33  ;;  %v859_v21 = vshll.u32 %v727_v3, 16  ;;  %v8222_v0 = vmov 5  }
 0x148   : > { %4364 = vmatmul.msk.bf16.gmra.mxu3 %vm863_vm3, %v854_v59  ;;  %v1250_v59 = vrot.slane %v5398_v55, 6  ;;  %v5574_v55 = vld [vmem:[%s8180_s2 + $0xc8] sm:$0xff] }
 0x149   : > { %1689 = vperm.xlu1 %4623, %v8422_v38   ;;  %v1408_v53 = vrot.slane %v1371_v41, 1  ;;  %v1407_v37 = vrot.slane %v1370_v17, 1  ;;  %v8431_v38 = vld [vmem:[#allocation39_spill] sm:$0xff]  ;;  %v8227_v41 = vrot.slane %v5507_v13, 6  ;;  %v5603_v17 = vld [vmem:[%s8180_s2 + $0xe0] sm:$0xff] }
 0x14a   : > { %1693 = vperm.xlu2 %4621, %v8425_v45   ;;  %1721 = vperm.xlu0 %4622, %v4983_v30   ;;  %v5541_v18 = vpop.permute.xlu1 %1176  ;;  %v5543_v5 = vpop.permute.xlu2 %1206  ;;  %v855_v30 = vshrl.u32 %v726_v42, 16 }
 0x14b   : > { %8426 = vst [vmem:[#allocation10_spill] sm:$0xff] %v5543_v5  ;;  %v5545_v2 = vpop.permute.xlu0 %1191  ;;  %v1409_v42 = vsel %vm1406_vm4, %v1407_v37, %v1408_v53  ;;  %v1252_v37 = vrot.slane %v5464_v62, 6  ;;  %v442_v5 = vmul.f32 %v8438_v15, %v8437_v20 }
 0x14c   : > { %v857_v31 = vor.u32 %v855_v30, %v853_v11  ;;  %v441_v11 = vmul.f32 %v8431_v38, %v8430_v43  ;;  %v8434_v43 = vld [vmem:[#allocation37_spill] sm:$0xff] }
 0x14e   : > { %4367 = vmatmul.msk.bf16.gmra.mxu1 %vm863_vm3, %v469_v34  ;;  %v5593_v34 = vld [vmem:[%s8180_s2 + $0x8] sm:$0xff]  ;;  %v470_v24 = vpack.c.bf16 %v441_v11, %v440_v29  ;;  %v1989_v11 = vshll.u32 %v8434_v43, 16 }
 0x151   : > { %1701 = vperm.xlu1 %4623, %v4942_v23   ;;  %v861_v23 = vrot.slane %v859_v21, 1  ;;  %v5609_v21 = vld [vmem:[%s8180_s2 + $0xe8] sm:$0xff] }
 0x152   : > { %1705 = vperm.xlu2 %4621, %v4937_v22   ;;  %1733 = vperm.xlu0 %4622, %v4996_v32   ;;  %v5553_v57 = vpop.permute.xlu1 %1185  ;;  %v5555_v6 = vpop.permute.xlu2 %1215  ;;  %v1249_v22 = vsel %vm912_vm0, %v1246_v27, %v1248_v40  ;;  %v1251_v32 = vsel %vm912_vm0, %v1248_v40, %v1250_v59 }
 0x153   : > { %v5558_v16 = vpop.permute.xlu0 %1200  ;;  %v862_v9 = vsel %vm730_vm2, %v857_v31, %v861_v23  ;;  %v1341_v27 = vmul.f32 %v8429_v25, %v1249_v22  ;;  %v1342_v48 = vmul.f32 %v8431_v38, %v1251_v32  ;;  %v5622_v23 = vld [vmem:[%s8180_s2 + $0x30] sm:$0xff]  ;;  %v8433_v22 = vld [vmem:[#allocation34_spill] sm:$0xff] }
 0x154   : > { %8427 = vst [vmem:[#allocation3_spill] sm:$0xff] %v5558_v16  ;;  %v1984_v32 = vshll.u32 %v8433_v22, 16  ;;  %v1982_v7 = vshrl.u32 %v8433_v22, 16  ;;  %v5642_v22 = vrot.slane %v1989_v11, 1 }
 0x155   : > { %v1372_v3 = vpack.c.bf16 %v1342_v48, %v1341_v27  ;;  %v1253_v27 = vsel %vm912_vm0, %v1250_v59, %v1252_v37 }
 0x156   : > { %4383 = vmatmul.msk.bf16.vlgmr.msrb.gmra.mxu2 %vm863_vm3, %v1409_v42  ;;  %v1986_v29 = vrot.slane %v1984_v32, 1  ;;  %v1343_v59 = vmul.f32 %v8438_v15, %v1253_v27 }
 0x157   : > { %v5616_v31 = vrot.slane %v1372_v3, 1  ;;  %v8436_v3 = vld [vmem:[#allocation46_spill] sm:$0xff] }
 0x158   : > { %4365 = vmatmul.msk.bf16.gmra.mxu3 %vm863_vm3, %v862_v9  ;;  %v1255_v9 = vsel %vm912_vm0, %v1252_v37, %v8227_v41  ;;  %v1987_v48 = vor.u32 %v1986_v29, %v1982_v7  ;;  %v8439_v37 = vmov 5   ;;  %v5663_v29 = vld [vmem:[%s8180_s2 + $0x48] sm:$0xff] }
 0x159   : > { %1713 = vperm.xlu1 %4623, %v5574_v55   ;;  %v1411_v62 = vsel %vm1406_vm4, %v1408_v53, %v5616_v31  ;;  %v1344_v41 = vmul.f32 %v8436_v3, %v1255_v9  ;;  %v5647_v53 = vld [vmem:[%s8180_s2 + $0xf8] sm:$0xff]  ;;  %v5657_v9 = vld [vmem:[%s8180_s2] sm:$0xff] }
 0x15a   : > { %1717 = vperm.xlu2 %4621, %v5582_v56   ;;  %4625 = vset.pattern.permute.xlu0 %v8222_v0  ;;  %v5586_v44 = vpop.permute.xlu1 %1194  ;;  %v5588_v45 = vpop.permute.xlu2 %1224  ;;  %v1992_v7 = vsel %vm730_vm2, %v1987_v48, %v5642_v22  ;;  %8440 = vst [vmem:[#allocation2_spill] sm:$0xff] %v5657_v9 }
 0x15b   : > { %2289 = vperm.xlu0 %4625, %v5593_v34   ;;  %v5596_v33 = vpop.permute.xlu0 %1209  ;;  %v1373_v48 = vpack.c.bf16 %v1344_v41, %v1343_v59  ;;  %4417 = vmatmul.msk.bf16.vlgmr.msrb.gmra.mxu0 %vm863_vm3, %v1992_v7  ;;  %v1292_v41 = vrot.slane %v5588_v45, 6 }
 0x15c   : > { %8432 = vst [vmem:[#allocation8_spill] sm:$0xff] %v5596_v33 }
 0x15e   : > { %4368 = vmatmul.msk.bf16.gmra.mxu1 %vm863_vm3, %v470_v24  ;;  %v8435_v24 = vld [vmem:[#allocation12_spill] sm:$0xff] }
 0x15f   : > { %v443_v0 = vmul.f32 %v8436_v3, %v8435_v24  ;;  %v1286_v24 = vrot.slane %v5555_v6, 6  ;;  %v4467_v6 = vld [vmem:[%s8179_s1 + $0xe] sm:$0x3] }
 0x160   : > { %v3526_v7 = vsel %vm912_vm0, %v4467_v6, 0  ;;  %v1993_v6 = vshrl.u32 %v8434_v43, 16 }
 0x161   : > { %1725 = vperm.xlu1 %4623, %v5603_v17   ;;  %v471_v27 = vpack.c.bf16 %v443_v0, %v442_v5  ;;  %v4450_v5 = vld [vmem:[%s8179_s1 + $0xc] sm:$0x3]  ;;  %v4433_v0 = vld [vmem:[%s8179_s1 + $0xa] sm:$0x3]  ;;  %3535 = vmatpush.bf16.msra.mxu3 %v3526_v7 }
 0x162   : > { %1729 = vperm.xlu2 %4621, %v5609_v21   ;;  %v5612_v30 = vpop.permute.xlu1 %1203  ;;  %v5614_v40 = vpop.permute.xlu2 %1233  ;;  %v2978_v59 = vsel %vm912_vm0, %v4450_v5, 0  ;;  %v5706_v5 = vld [vmem:[%s8180_s2 + $0x10] sm:$0xff]  ;;  %v1995_v43 = vor.u32 %v1993_v6, %v5642_v22 }
 0x163   : > { %2304 = vperm.xlu0 %4625, %v5622_v23   ;;  %v5625_v42 = vpop.permute.xlu0 %1218  ;;  %2987 = vmatpush.bf16.msra.mxu2 %v2978_v59  ;;  %8442 = vst [vmem:[#allocation4_spill] sm:$0xff] %v5706_v5 }
 0x164   : > { %v1288_v58 = vrot.slane %v5625_v42, 6  ;;  %v5690_v42 = vrot.slane %v1373_v48, 1 }
 0x166   : > { %4384 = vmatmul.msk.bf16.gmra.mxu2 %vm863_vm3, %v1411_v62 }
 0x169   : > { %1737 = vperm.xlu1 %4623, %v5647_v53  }
 0x16a   : > { %4624 = vset.pattern.permute.xlu2 %v8439_v37  ;;  %v1213_v32 = vpop.permute.xlu1 %1212 }
 0x16b   : > { %v1284_v20 = vrot.slane %v1213_v32, 6  ;;  %2286 = vperm.xlu2 %4624, %v5657_v9   ;;  %2313 = vperm.xlu0 %4625, %v5663_v29   ;;  %v5666_v62 = vpop.permute.xlu0 %1227  ;;  %v5668_v11 = vpop.permute.xlu2 %1613  ;;  %v8234_v32 = vrot.slane %v5596_v33, 6 }
 0x16c   : > { %v8441_v45 = vrot.slane %v5666_v62, 6 }
 0x16d   : > { %v1285_v16 = vsel %vm912_vm0, %v8234_v32, %v1284_v20  ;;  %v1287_v9 = vsel %vm912_vm0, %v1284_v20, %v1286_v24  ;;  %v1289_v20 = vsel %vm912_vm0, %v1286_v24, %v1288_v58  ;;  %v1256_v32 = vrot.slane %v5433_v19, 6  ;;  %v5712_v19 = vld [vmem:[%s8180_s2 + $0x18] sm:$0xff] }
 0x16e   : > { %4369 = vmatmul.msk.bf16.gmra.mxu1 %vm863_vm3, %v471_v27  ;;  %v2628_v27 = vsel %vm912_vm0, %v4433_v0, 0  ;;  %v1359_v49 = vmul.f32 %v5408_v4, %v1285_v16  ;;  %v1360_v33 = vmul.f32 %v5389_v52, %v1287_v9  ;;  %v1295_v48 = vsel %vm912_vm0, %v1292_v41, %v8441_v45  ;;  %8443 = vst [vmem:[#allocation5_spill] sm:$0xff] %v5712_v19  ;;  %v5718_v16 = vld [vmem:[%s8180_s2 + $0x60] sm:$0xff] }
 0x16f   : > { %8444 = vst [vmem:[#allocation34_spill] sm:$0xff] %v5718_v16  ;;  %v8445_v0 = vrot.slane %v5507_v13, 6  ;;  %v1361_v7 = vmul.f32 %v5363_v36, %v1289_v20  ;;  %2637 = vmatpush.bf16.msra.mxu1 %v2628_v27  ;;  %v1364_v52 = vmul.f32 %v5365_v1, %v1295_v48  ;;  %v4484_v20 = vld [vmem:[%s8179_s1 + $0x10] sm:$0x3]  ;;  %v8450_v1 = vld [vmem:[#allocation6_spill] sm:$0xff] }
 0x170   : > { %v8446_v36 = vld [vmem:[#allocation44_spill] sm:$0xff] }
 0x171   : > { %4626 = vset.pattern.permute.xlu1 %v8439_v37  ;;  %v1257_v59 = vsel %vm912_vm0, %v8445_v0, %v1256_v32  ;;  %v8447_v27 = vld [vmem:[#allocation16_spill] sm:$0xff] }
 0x172   : > { %2292 = vperm.xlu1 %4626, %v5706_v5   ;;  %v1222_v37 = vpop.permute.xlu1 %1221  ;;  %v1997_v5 = vshll.u32 %v8446_v36, 16 }
 0x173   : > { %v1290_v24 = vrot.slane %v1222_v37, 6  ;;  %2295 = vperm.xlu2 %4624, %v5712_v19   ;;  %2322 = vperm.xlu0 %4625, %v5718_v16   ;;  %v5721_v9 = vpop.permute.xlu0 %1236  ;;  %v1413_v37 = vsel %vm1406_vm4, %v5616_v31, %v5690_v42  ;;  %v1381_v31 = vpack.c.bf16 %v1360_v33, %v1359_v49  ;;  %v8448_v16 = vld [vmem:[#allocation42_spill] sm:$0xff]  ;;  %v8451_v49 = vld [vmem:[#allocation41_spill] sm:$0xff] }
 0x174   : > { %v5728_v45 = vpop.permute.xlu2 %1625  ;;  %v445_v48 = vmul.f32 %v8448_v16, %v8447_v27  ;;  %v444_v33 = vmul.f32 %v8451_v49, %v8450_v1  ;;  %v1345_v27 = vmul.f32 %v8451_v49, %v1257_v59  ;;  %v1740_v59 = vmul.f32 %v8424_v12, %v5668_v11  ;;  %v8466_v12 = vld [vmem:[#allocation7_spill] sm:$0xff] }
 0x175   : > { %v1291_v4 = vsel %vm912_vm0, %v1288_v58, %v1290_v24  ;;  %v1293_v19 = vsel %vm912_vm0, %v1290_v24, %v1292_v41  ;;  %v3992_v58 = vsel %vm912_vm0, %v4484_v20, 0  ;;  %v5751_v24 = vrot.slane %v1997_v5, 1 }
 0x176   : > { %v1362_v13 = vmul.f32 %v5355_v47, %v1291_v4  ;;  %v1363_v0 = vmul.f32 %v5349_v28, %v1293_v19  ;;  %4385 = vmatmul.msk.bf16.gmra.mxu2 %vm863_vm3, %v1413_v37  ;;  %v8449_v4 = vrot.slane %v5498_v51, 6  ;;  %4001 = vmatpush.bf16.msra.mxu0 %v3992_v58  ;;  %v5759_v37 = vld [vmem:[%s8180_s2 + $0x20] sm:$0xff]  ;;  %v5764_v5 = vrot.slane %v1381_v31, 1 }
 0x177   : > { %v472_v20 = vpack.c.bf16 %v445_v48, %v444_v33  ;;  %v1300_v48 = vrot.slane %v5721_v9, 6  ;;  %v8457_v33 = vrot.slane %v5666_v62, 6  ;;  %v5814_v62 = vld [vmem:[%s8180_s2 + $0x38] sm:$0xff] }
 0x178   : > { %v1259_v41 = vsel %vm912_vm0, %v1256_v32, %v8449_v4  ;;  %v1382_v19 = vpack.c.bf16 %v1362_v13, %v1361_v7  ;;  %v1383_v47 = vpack.c.bf16 %v1364_v52, %v1363_v0  ;;  %v2000_v32 = vsel %vm730_vm2, %v1995_v43, %v5751_v24  ;;  %8452 = vst [vmem:[#allocation37_spill] sm:$0xff] %v5764_v5  ;;  %v5774_v13 = vld [vmem:[%s8180_s2 + $0x28] sm:$0xff]  ;;  %v5780_v0 = vld [vmem:[%s8180_s2 + $0x78] sm:$0xff] }
 0x179   : > { %v1346_v1 = vmul.f32 %v8448_v16, %v1259_v41  ;;  %4418 = vmatmul.msk.bf16.gmra.mxu0 %vm863_vm3, %v2000_v32  ;;  %v1298_v4 = vrot.slane %v5614_v40, 6 }
 0x17a   : > { %2298 = vperm.xlu1 %4626, %v5759_v37   ;;  %v1231_v22 = vpop.permute.xlu1 %1230  ;;  %v1430_v6 = vrot.slane %v1382_v19, 1  ;;  %v5766_v52 = vrot.slane %v1383_v47, 1 }
 0x17b   : > { %v1296_v7 = vrot.slane %v1231_v22, 6  ;;  %2301 = vperm.xlu2 %4624, %v5774_v13   ;;  %2331 = vperm.xlu0 %4625, %v5780_v0   ;;  %v5783_v47 = vpop.f32.mrf.mxu1  ;;  %v1374_v19 = vpack.c.bf16 %v1346_v1, %v1345_v27  ;;  %v1301_v40 = vsel %vm912_vm0, %v1298_v4, %v1300_v48 }
 0x17c   : > { %8453 = vst [vmem:[#allocation12_spill] sm:$0xff] %v5766_v52  ;;  %v5785_v31 = vpop.permute.xlu2 %1633  ;;  %v1618_v11 = vpop.permute.xlu0 %1617  ;;  %v5790_v58 = vsel %vm1406_vm4, %v5764_v5, %v1430_v6  ;;  %v5794_v43 = vsel %vm1406_vm4, %v1430_v6, %v5766_v52  ;;  %v2001_v52 = vshrl.u32 %v8446_v36, 16 }
 0x17d   : > { %8454 = vst [vmem:[#allocation13_spill] sm:$0xff] %v5783_v47  ;;  %v1741_v41 = vmul.f32 %v8421_v54, %v1618_v11  ;;  %v1297_v22 = vsel %vm912_vm0, %v8457_v33, %v1296_v7  ;;  %v1299_v32 = vsel %vm912_vm0, %v1296_v7, %v1298_v4  ;;  %v5806_v6 = vrot.slane %v1374_v19, 1  ;;  %v5829_v7 = vld [vmem:[%s8180_s2 + $0x90] sm:$0xff] }
 0x17e   : > { %8455 = vst [vmem:[#allocation44_spill] sm:$0xff] %v5790_v58  ;;  %4370 = vmatmul.msk.bf16.gmra.mxu1 %vm863_vm3, %v472_v20  ;;  %v1260_v58 = vrot.slane %v5541_v18, 6  ;;  %v1365_v27 = vmul.f32 %v5416_v35, %v1297_v22  ;;  %v1366_v9 = vmul.f32 %v5414_v60, %v1299_v32  ;;  %v1367_v33 = vmul.f32 %v5476_v8, %v1301_v40  ;;  %v8464_v40 = vld [vmem:[#allocation15_spill] sm:$0xff] }
 0x17f   : > { %8456 = vst [vmem:[#allocation16_spill] sm:$0xff] %v5794_v43  ;;  %v1772_v47 = vpack.c.bf16 %v1741_v41, %v1740_v59  ;;  %v5823_v59 = vld [vmem:[%s8180_s2 + $0x40] sm:$0xff]  ;;  %v8461_v41 = vrot.slane %v5498_v51, 6  ;;  %v1415_v32 = vsel %vm1406_vm4, %v5690_v42, %v5806_v6  ;;  %v8463_v51 = vrot.slane %v5461_v63, 6 }
 0x180   : > { %8459 = vst [vmem:[#allocation67_spill] sm:$0xff] %v5823_v59  ;;  %v1384_v5 = vpack.c.bf16 %v1366_v9, %v1365_v27 }
 0x181   : > { %4400 = vmatmul.msk.bf16.vlgmr.msrb.gmra.mxu3 %vm863_vm3, %v1772_v47  ;;  %v1261_v19 = vsel %vm912_vm0, %v8461_v41, %v1260_v58  ;;  %v1263_v41 = vsel %vm912_vm0, %v1260_v58, %v8463_v51  ;;  %v5866_v58 = vld [vmem:[%s8180_s2 + $0x50] sm:$0xff] }
 0x182   : > { %2307 = vperm.xlu1 %4626, %v5814_v62   ;;  %v5817_v1 = vpop.permute.xlu1 %1239 }
 0x183   : > { %8458 = vst [vmem:[#allocation6_spill] sm:$0xff] %v5817_v1  ;;  %v8253_v18 = vrot.slane %v5817_v1, 6  ;;  %2310 = vperm.xlu2 %4624, %v5823_v59   ;;  %2340 = vperm.xlu0 %4625, %v5829_v7   ;;  %v5832_v47 = vpop.f32.mrf.mxu1  ;;  %v8465_v1 = vld [vmem:[#allocation45_spill] sm:$0xff] }
 0x184   : > { %8460 = vst [vmem:[#allocation68_spill] sm:$0xff] %v5832_v47  ;;  %v5835_v11 = vpop.permute.xlu2 %1645  ;;  %v5837_v4 = vpop.permute.xlu0 %1637  ;;  %v8462_v47 = vld [vmem:[#allocation40_spill] sm:$0xff]  ;;  %v1347_v36 = vmul.f32 %v8465_v1, %v1261_v19 }
 0x185   : > { %v1303_v22 = vsel %vm912_vm0, %v1300_v48, %v8253_v18  ;;  %v2005_v43 = vshll.u32 %v8462_v47, 16  ;;  %v446_v48 = vmul.f32 %v8465_v1, %v8464_v40  ;;  %v2003_v18 = vor.u32 %v2001_v52, %v5751_v24  ;;  %v4706_v52 = vld [vmem:[%s8180_s2 + $0xa8] sm:$0xff] }
 0x186   : > { %v1368_v20 = vmul.f32 %v5470_v10, %v1303_v22  ;;  %4386 = vmatmul.msk.bf16.gmra.mxu2 %vm863_vm3, %v1415_v32  ;;  %v8467_v22 = vld [vmem:[#allocation43_spill] sm:$0xff]  ;;  %v5870_v47 = vrot.slane %v1384_v5, 1  ;;  %v1743_v5 = vmul.f32 %v8431_v38, %v5728_v45  ;;  %v8482_v38 = vrot.slane %v5461_v63, 6 }
 0x187   : > { %v2007_v54 = vrot.slane %v2005_v43, 1  ;;  %v447_v59 = vmul.f32 %v8467_v22, %v8466_v12  ;;  %v1348_v27 = vmul.f32 %v8467_v22, %v1263_v41  ;;  %v5877_v12 = vld [vmem:[%s8180_s2 + $0x58] sm:$0xff]  ;;  %v5903_v45 = vld [vmem:[%s8180_s2 + $0x68] sm:$0xff] }
 0x188   : > { %v1385_v42 = vpack.c.bf16 %v1368_v20, %v1367_v33  ;;  %8468 = vst [vmem:[#allocation40_spill] sm:$0xff] %v5870_v47  ;;  %v5957_v63 = vld [vmem:[%s8180_s2 + $0x88] sm:$0xff] }
 0x189   : > { %v2008_v9 = vsel %vm730_vm2, %v2003_v18, %v2007_v54  ;;  %8470 = vst [vmem:[#allocation7_spill] sm:$0xff] %v5877_v12  ;;  %v473_v18 = vpack.c.bf16 %v447_v59, %v446_v48  ;;  %v1375_v59 = vpack.c.bf16 %v1348_v27, %v1347_v36  ;;  %v4709_v36 = vld [vmem:[%s8180_s2 + $0xc0] sm:$0xff] }
 0x18a   : > { %2316 = vperm.xlu1 %4626, %v5866_v58   ;;  %v5872_v24 = vrot.slane %v1385_v42, 1  ;;  %4419 = vmatmul.msk.bf16.gmra.mxu0 %vm863_vm3, %v2008_v9  ;;  %8473 = vst [vmem:[#allocation71_spill] sm:$0xff] %v5903_v45  ;;  %v5912_v42 = vld [vmem:[%s8180_s2 + $0x70] sm:$0xff] }
 0x18b   : > { %2319 = vperm.xlu2 %4624, %v5877_v12   ;;  %2349 = vperm.xlu0 %4625, %v4706_v52   ;;  %v1622_v43 = vpop.permute.xlu1 %1621  ;;  %v5883_v20 = vpop.f32.mrf.mxu1  ;;  %v5906_v40 = vrot.slane %v1375_v59, 1  ;;  %8474 = vst [vmem:[#allocation72_spill] sm:$0xff] %v5912_v42 }
 0x18c   : > { %8469 = vst [vmem:[#allocation15_spill] sm:$0xff] %v5872_v24  ;;  %v1742_v19 = vmul.f32 %v8429_v25, %v1622_v43  ;;  %v5888_v33 = vpop.permute.xlu2 %1657  ;;  %v5890_v32 = vpop.permute.xlu0 %1649  ;;  %v5896_v51 = vsel %vm1406_vm4, %v5870_v47, %v5872_v24  ;;  %v8477_v24 = vrot.slane %v5553_v57, 6  ;;  %v8479_v47 = vld [vmem:[#allocation48_spill] sm:$0xff] }
 0x18d   : > { %8471 = vst [vmem:[#allocation69_spill] sm:$0xff] %v5883_v20  ;;  %v1417_v48 = vsel %vm1406_vm4, %v5806_v6, %v5906_v40  ;;  %v8478_v20 = vld [vmem:[#allocation18_spill] sm:$0xff] }
 0x18e   : > { %8472 = vst [vmem:[#allocation70_spill] sm:$0xff] %v5896_v51  ;;  %v1773_v41 = vpack.c.bf16 %v1743_v5, %v1742_v19  ;;  %4371 = vmatmul.msk.bf16.gmra.mxu1 %vm863_vm3, %v473_v18  ;;  %v1264_v18 = vrot.slane %v5512_v61, 6  ;;  %v4710_v5 = vld [vmem:[%s5127_s6 + $0x20] sm:$0xff]   ;;  %v8480_v61 = vld [vmem:[#allocation19_spill] sm:$0xff] }
 0x18f   : > { %v2009_v19 = vshrl.u32 %v4710_v5, 16  ;;  %8485 = vst [vmem:[#allocation75_spill] sm:$0xff] %v5957_v63 }
 0x190   : > { %v1265_v6 = vsel %vm912_vm0, %v8482_v38, %v1264_v18  ;;  %v4714_v38 = vld [vmem:[%s8180_s2 + $0xd8] sm:$0xff] }
 0x191   : > { %4401 = vmatmul.msk.bf16.gmra.mxu3 %vm863_vm3, %v1773_v41  ;;  %v4711_v41 = vld [vmem:[%s5127_s6 + $0x28] sm:$0xff]   ;;  %v2011_v51 = vor.u32 %v2009_v19, %v2007_v54  ;;  %v5950_v54 = vld [vmem:[%s8180_s2 + $0x80] sm:$0xff] }
 0x192   : > { %2325 = vperm.xlu1 %4626, %v5903_v45   ;;  %v2013_v59 = vshll.u32 %v4711_v41, 16  ;;  %v5938_v45 = vpop.f32.mrf.mxu0  ;;  %8484 = vst [vmem:[#allocation19_spill] sm:$0xff] %v5950_v54 }
 0x193   : > { %2328 = vperm.xlu2 %4624, %v5912_v42   ;;  %2358 = vperm.xlu0 %4625, %v4709_v36   ;;  %v1630_v27 = vpop.permute.xlu1 %1629  ;;  %v5918_v9 = vpop.f32.mrf.mxu1  ;;  %v1267_v36 = vsel %vm912_vm0, %v1264_v18, %v8477_v24  ;;  %v8481_v42 = vld [vmem:[#allocation49_spill] sm:$0xff] }
 0x194   : > { %8475 = vst [vmem:[#allocation73_spill] sm:$0xff] %v5918_v9  ;;  %v5920_v52 = vpop.permute.xlu2 %1669  ;;  %v5922_v43 = vpop.permute.xlu0 %1661  ;;  %v2015_v9 = vrot.slane %v2013_v59, 1  ;;  %v448_v5 = vmul.f32 %v8481_v42, %v8480_v61  ;;  %v1350_v24 = vmul.f32 %v8479_v47, %v1267_v36  ;;  %v1349_v19 = vmul.f32 %v8481_v42, %v1265_v6 }
 0x195   : > { %8476 = vst [vmem:[#allocation74_spill] sm:$0xff] %v5920_v52  ;;  %v449_v52 = vmul.f32 %v8479_v47, %v8478_v20  ;;  %v1744_v20 = vmul.f32 %v8438_v15, %v1630_v27  ;;  %v1745_v36 = vmul.f32 %v8436_v3, %v5785_v31  ;;  %v5988_v31 = vld [vmem:[%s8180_s2 + $0xa0] sm:$0xff] }
 0x196   : > { %4387 = vmatmul.msk.bf16.gmra.mxu2 %vm863_vm3, %v1417_v48  ;;  %v2016_v25 = vsel %vm730_vm2, %v2011_v51, %v2015_v9  ;;  %v1376_v61 = vpack.c.bf16 %v1350_v24, %v1349_v19  ;;  %8490 = vst [vmem:[#allocation80_spill] sm:$0xff] %v5988_v31  ;;  %v1268_v19 = vrot.slane %v5496_v39, 6 }
 0x197   : > { %v474_v18 = vpack.c.bf16 %v449_v52, %v448_v5  ;;  %v5982_v5 = vld [vmem:[%s8180_s2 + $0x98] sm:$0xff] }
 0x198   : > { %8489 = vst [vmem:[#allocation79_spill] sm:$0xff] %v5982_v5 }
 0x199   : > { %v5945_v12 = vpop.f32.mrf.mxu2 }
 0x19a   : > { %8483 = vst [vmem:[#allocation18_spill] sm:$0xff] %v5945_v12  ;;  %2334 = vperm.xlu1 %4626, %v5950_v54   ;;  %4420 = vmatmul.msk.bf16.gmra.mxu0 %vm863_vm3, %v2016_v25  ;;  %v1774_v12 = vpack.c.bf16 %v1745_v36, %v1744_v20  ;;  %v1418_v25 = vrot.slane %v1376_v61, 1  ;;  %v1270_v36 = vrot.slane %v5545_v2, 6  ;;  %v2017_v61 = vshrl.u32 %v4711_v41, 16  ;;  %v8496_v41 = vld [vmem:[#allocation9_spill] sm:$0xff] }
 0x19b   : > { %2337 = vperm.xlu2 %4624, %v5957_v63   ;;  %2367 = vperm.xlu0 %4625, %v4714_v38   ;;  %v1642_v51 = vpop.permute.xlu1 %1641  ;;  %v5963_v48 = vpop.f32.mrf.mxu1  ;;  %v450_v63 = vmul.f32 %v5288_v46, %v8496_v41 }
 0x19c   : > { %8486 = vst [vmem:[#allocation76_spill] sm:$0xff] %v5963_v48  ;;  %v5966_v59 = vpop.permute.xlu2 %1681  ;;  %v5968_v27 = vpop.permute.xlu0 %1673  ;;  %v1271_v39 = vsel %vm912_vm0, %v1268_v19, %v1270_v36 }
 0x19d   : > { %8487 = vst [vmem:[#allocation77_spill] sm:$0xff] %v5966_v59  ;;  %v5975_v38 = vpop.f32.mrf.mxu0  ;;  %v1419_v59 = vsel %vm1406_vm4, %v5906_v40, %v1418_v25 }
 0x19e   : > { %4372 = vmatmul.msk.bf16.gmra.mxu1 %vm863_vm3, %v474_v18 }
 0x1a1   : > { %4402 = vmatmul.msk.bf16.gmra.mxu3 %vm863_vm3, %v1774_v12  ;;  %v5977_v52 = vpop.f32.mrf.mxu2  ;;  %v4717_v12 = vld [vmem:[%s8180_s2 + $0xf0] sm:$0xff] }
 0x1a2   : > { %8488 = vst [vmem:[#allocation78_spill] sm:$0xff] %v5977_v52  ;;  %2343 = vperm.xlu1 %4626, %v5982_v5   ;;  %v4718_v52 = vld [vmem:[%s5127_s6 + $0x30] sm:$0xff]   ;;  %v8495_v5 = vld [vmem:[#allocation22_spill] sm:$0xff] }
 0x1a3   : > { %2346 = vperm.xlu2 %4624, %v5988_v31   ;;  %2376 = vperm.xlu0 %4625, %v4717_v12   ;;  %v5994_v6 = vpop.permute.xlu1 %1653  ;;  %v5996_v24 = vpop.f32.mrf.mxu1  ;;  %v2021_v48 = vshll.u32 %v4718_v52, 16  ;;  %v8494_v12 = vrot.slane %v5553_v57, 6  ;;  %v4719_v57 = vld [vmem:[%s8180_s2 + $0xb0] sm:$0xff] }
 0x1a4   : > { %8491 = vst [vmem:[#allocation81_spill] sm:$0xff] %v5996_v24  ;;  %v5998_v20 = vpop.permute.xlu2 %1693  ;;  %v6000_v18 = vpop.permute.xlu0 %1685  ;;  %v2019_v24 = vor.u32 %v2017_v61, %v2015_v9  ;;  %v1747_v9 = vmul.f32 %v8448_v16, %v1642_v51  ;;  %v1746_v51 = vmul.f32 %v8451_v49, %v5837_v4 }
 0x1a5   : > { %8492 = vst [vmem:[#allocation82_spill] sm:$0xff] %v5998_v20  ;;  %v1269_v31 = vsel %vm912_vm0, %v8494_v12, %v1268_v19  ;;  %v2023_v20 = vrot.slane %v2021_v48, 1  ;;  %v4720_v48 = vld [vmem:[%s8180_s2 + $0xb8] sm:$0xff]  ;;  %v1352_v19 = vmul.f32 %v5295_v50, %v1271_v39  ;;  %v6041_v41 = vpop.f32.mrf.mxu0 }
 0x1a6   : > { %8493 = vst [vmem:[#allocation83_spill] sm:$0xff] %v6000_v18  ;;  %4388 = vmatmul.msk.bf16.gmra.mxu2 %vm863_vm3, %v1419_v59  ;;  %v451_v18 = vmul.f32 %v5295_v50, %v8495_v5  ;;  %v1351_v40 = vmul.f32 %v5288_v46, %v1269_v31 }
 0x1a7   : > { %v2024_v2 = vsel %vm730_vm2, %v2019_v24, %v2023_v20  ;;  %v8271_v24 = vmov 6  }
 0x1a8   : > { %v475_v31 = vpack.c.bf16 %v451_v18, %v450_v63  ;;  %v1775_v63 = vpack.c.bf16 %v1747_v9, %v1746_v51  ;;  %v2025_v9 = vshrl.u32 %v4718_v52, 16 }
 0x1a9   : > { %v6018_v54 = vpop.f32.mrf.mxu2 }
 0x1aa   : > { %8497 = vst [vmem:[#allocation22_spill] sm:$0xff] %v6018_v54  ;;  %2352 = vperm.xlu1 %4626, %v4719_v57   ;;  %4421 = vmatmul.msk.bf16.gmra.mxu0 %vm863_vm3, %v2024_v2  ;;  %v1377_v57 = vpack.c.bf16 %v1352_v19, %v1351_v40  ;;  %v1272_v2 = vrot.slane %v5586_v44, 6  ;;  %v1274_v40 = vrot.slane %v5509_v14, 6  ;;  %v4721_v19 = vld [vmem:[%s5127_s6 + $0x38] sm:$0xff]  }
 0x1ab   : > { %2355 = vperm.xlu2 %4624, %v4720_v48   ;;  %v6027_v59 = vpop.permute.xlu1 %1665  ;;  %v6029_v5 = vpop.f32.mrf.mxu1  ;;  %4628 = vset.pattern.permute.xlu0 %v8271_v24  ;;  %v8505_v54 = vld [vmem:[#allocation21_spill] sm:$0xff] }
 0x1ac   : > { %8498 = vst [vmem:[#allocation9_spill] sm:$0xff] %v6029_v5  ;;  %v6033_v61 = vpop.permute.xlu2 %1705  ;;  %v6035_v12 = vpop.permute.xlu0 %1697  ;;  %2756 = vperm.xlu0 %4628, %v5593_v34   ;;  %v6048_v39 = vrot.slane %v1377_v57, 1  ;;  %v1275_v57 = vsel %vm912_vm0, %v1272_v2, %v1274_v40 }
 0x1ad   : > { %8499 = vst [vmem:[#allocation84_spill] sm:$0xff] %v6033_v61  ;;  %v6061_v51 = vpop.f32.mrf.mxu3  ;;  %v6070_v14 = vpop.f32.mrf.mxu0 }
 0x1ae   : > { %8500 = vst [vmem:[#allocation85_spill] sm:$0xff] %v6035_v12  ;;  %4373 = vmatmul.msk.bf16.gmra.mxu1 %vm863_vm3, %v475_v31  ;;  %v1421_v44 = vsel %vm1406_vm4, %v1418_v25, %v6048_v39  ;;  %v8523_v12 = vrot.slane %v5612_v30, 6 }
 0x1af   : > { %8504 = vst [vmem:[#allocation89_spill] sm:$0xff] %v6061_v51  ;;  %v8507_v51 = vld [vmem:[#allocation50_spill] sm:$0xff] }
 0x1b1   : > { %4403 = vmatmul.msk.bf16.gmra.mxu3 %vm863_vm3, %v1775_v63  ;;  %v6045_v18 = vpop.f32.mrf.mxu2  ;;  %v2027_v63 = vor.u32 %v2025_v9, %v2023_v20  ;;  %v1749_v20 = vmul.f32 %v8467_v22, %v5890_v32 }
 0x1b2   : > { %8501 = vst [vmem:[#allocation86_spill] sm:$0xff] %v6045_v18  ;;  %2361 = vperm.xlu1 %4626, %v5574_v55   ;;  %v2029_v55 = vshll.u32 %v4721_v19, 16 }
 0x1b3   : > { %2364 = vperm.xlu2 %4624, %v5582_v56   ;;  %v6052_v4 = vpop.permute.xlu1 %1677  ;;  %v6054_v48 = vpop.f32.mrf.mxu1  ;;  %v1273_v56 = vsel %vm912_vm0, %v1270_v36, %v1272_v2  ;;  %v1354_v36 = vmul.f32 %v8507_v51, %v1275_v57 }
 0x1b4   : > { %8502 = vst [vmem:[#allocation87_spill] sm:$0xff] %v6052_v4  ;;  %v1718_v31 = vpop.permute.xlu2 %1717  ;;  %v6056_v24 = vpop.permute.xlu0 %1709  ;;  %2776 = vperm.xlu0 %4628, %v5622_v23   ;;  %v2031_v18 = vrot.slane %v2029_v55, 1  ;;  %v452_v23 = vmul.f32 %v5269_v26, %v8505_v54  ;;  %v1353_v25 = vmul.f32 %v5269_v26, %v1273_v56  ;;  %v8526_v4 = vld [vmem:[#allocation4_spill] sm:$0xff] }
 0x1b5   : > { %8503 = vst [vmem:[#allocation88_spill] sm:$0xff] %v6054_v48  ;;  %v8506_v48 = vld [vmem:[#allocation11_spill] sm:$0xff]  ;;  %v6102_v57 = vpop.f32.mrf.mxu3 }
 0x1b6   : > { %4389 = vmatmul.msk.bf16.gmra.mxu2 %vm863_vm3, %v1421_v44  ;;  %v2032_v52 = vsel %vm730_vm2, %v2027_v63, %v2031_v18  ;;  %v453_v5 = vmul.f32 %v8507_v51, %v8506_v48  ;;  %v6094_v44 = vmul.f32 %v5416_v35, %v1718_v31  ;;  %v1378_v32 = vpack.c.bf16 %v1354_v36, %v1353_v25  ;;  %v8516_v36 = vld [vmem:[#allocation2_spill] sm:$0xff]  ;;  %v8519_v63 = vld [vmem:[#allocation24_spill] sm:$0xff] }
 0x1b7   : > { %8512 = vst [vmem:[#allocation92_spill] sm:$0xff] %v6102_v57  ;;  %v8520_v57 = vld [vmem:[#allocation51_spill] sm:$0xff] }
 0x1b8   : > { %v476_v9 = vpack.c.bf16 %v453_v5, %v452_v23  ;;  %8510 = vst [vmem:[#allocation90_spill] sm:$0xff] %v6094_v44  ;;  %v6110_v31 = vrot.slane %v1378_v32, 1  ;;  %v8514_v23 = vmov 6   ;;  %v4722_v32 = vld [vmem:[%s5127_s6 + $0x40] sm:$0xff]   ;;  %v8521_v44 = vld [vmem:[#allocation25_spill] sm:$0xff] }
 0x1b9   : > { %v6077_v61 = vpop.f32.mrf.mxu2  ;;  %v2037_v56 = vshll.u32 %v4722_v32, 16 }
 0x1ba   : > { %8508 = vst [vmem:[#allocation21_spill] sm:$0xff] %v6077_v61  ;;  %2370 = vperm.xlu1 %4626, %v5603_v17   ;;  %4422 = vmatmul.msk.bf16.gmra.mxu0 %vm863_vm3, %v2032_v52  ;;  %v1748_v17 = vmul.f32 %v8465_v1, %v5835_v11  ;;  %v1423_v61 = vsel %vm1406_vm4, %v6048_v39, %v6110_v31 }
 0x1bb   : > { %2373 = vperm.xlu2 %4624, %v5609_v21   ;;  %v6083_v54 = vpop.permute.xlu1 %1689  ;;  %v6085_v2 = vpop.f32.mrf.mxu1 }
 0x1bc   : > { %8509 = vst [vmem:[#allocation11_spill] sm:$0xff] %v6083_v54  ;;  %v6087_v55 = vpop.permute.xlu2 %1729  ;;  %v1722_v48 = vpop.permute.xlu0 %1721  ;;  %2788 = vperm.xlu0 %4628, %v5663_v29   ;;  %v1776_v5 = vpack.c.bf16 %v1749_v20, %v1748_v17 }
 0x1bd   : > { %v6097_v21 = vmul.f32 %v5414_v60, %v1722_v48  ;;  %v6105_v29 = vpop.f32.mrf.mxu0  ;;  %v8518_v48 = vld [vmem:[#allocation3_spill] sm:$0xff] }
 0x1be   : > { %4374 = vmatmul.msk.bf16.gmra.mxu1 %vm863_vm3, %v476_v9  ;;  %v8517_v9 = vld [vmem:[#allocation34_spill] sm:$0xff]  ;;  %v1276_v17 = vrot.slane %v8518_v48, 6 }
 0x1bf   : > { %8511 = vst [vmem:[#allocation91_spill] sm:$0xff] %v6097_v21  ;;  %v8522_v21 = vld [vmem:[#allocation52_spill] sm:$0xff] }
 0x1c0   : > { %v1277_v60 = vsel %vm912_vm0, %v1274_v40, %v1276_v17 }
 0x1c1   : > { %4404 = vmatmul.msk.bf16.gmra.mxu3 %vm863_vm3, %v1776_v5  ;;  %v6107_v11 = vpop.f32.mrf.mxu2  ;;  %v1355_v40 = vmul.f32 %v8522_v21, %v1277_v60  ;;  %v6182_v60 = vmul.f32 %v5470_v10, %v6087_v55  ;;  %v8536_v55 = vld [vmem:[#allocation27_spill] sm:$0xff] }
 0x1c2   : > { %8513 = vst [vmem:[#allocation93_spill] sm:$0xff] %v6107_v11  ;;  %2379 = vperm.xlu1 %4626, %v5647_v53   ;;  %v2033_v53 = vshrl.u32 %v4721_v19, 16  ;;  %v455_v11 = vmul.f32 %v8520_v57, %v8519_v63  ;;  %v2039_v19 = vrot.slane %v2037_v56, 1  ;;  %v6139_v63 = vpop.f32.mrf.mxu3  ;;  %v6153_v56 = vmul.f32 %v5349_v28, %v6056_v24 }
 0x1c3   : > { %4627 = vset.pattern.permute.xlu2 %v8514_v23  ;;  %v6114_v52 = vpop.permute.xlu1 %1701  ;;  %v6116_v25 = vpop.f32.mrf.mxu1  ;;  %8524 = vst [vmem:[#allocation2_spill] sm:$0xff] %v6139_v63 }
 0x1c4   : > { %8515 = vst [vmem:[#allocation94_spill] sm:$0xff] %v6114_v52  ;;  %2752 = vperm.xlu2 %4627, %v8516_v36   ;;  %v6119_v20 = vpop.permute.xlu0 %1733  ;;  %2800 = vperm.xlu0 %4628, %v8517_v9   ;;  %v454_v52 = vmul.f32 %v8522_v21, %v8521_v44  ;;  %v1279_v9 = vsel %vm912_vm0, %v1276_v17, %v8523_v12  ;;  %v8528_v17 = vld [vmem:[#allocation58_spill] sm:$0xff] }
 0x1c5   : > { %v6123_v5 = vpop.permute.xlu2 %2286  ;;  %v2035_v48 = vor.u32 %v2033_v53, %v2031_v18  ;;  %v1356_v35 = vmul.f32 %v8520_v57, %v1279_v9  ;;  %v1750_v12 = vmul.f32 %v8481_v42, %v5994_v6  ;;  %8527 = vst [vmem:[#allocation3_spill] sm:$0xff] %v6153_v56  ;;  %v8530_v9 = vld [vmem:[#allocation5_spill] sm:$0xff]  ;;  %v1751_v6 = vmul.f32 %v8479_v47, %v5888_v33 }
 0x1c6   : > { %4390 = vmatmul.msk.bf16.gmra.mxu2 %vm863_vm3, %v1423_v61  ;;  %v477_v44 = vpack.c.bf16 %v455_v11, %v454_v52  ;;  %v6162_v11 = vpop.f32.mrf.mxu0  ;;  %8532 = vst [vmem:[#allocation4_spill] sm:$0xff] %v6182_v60  ;;  %v8542_v60 = vld [vmem:[#allocation14_spill] sm:$0xff] }
 0x1c7   : > { %v2040_v39 = vsel %vm730_vm2, %v2035_v48, %v2039_v19  ;;  %v1379_v48 = vpack.c.bf16 %v1356_v35, %v1355_v40 }
 0x1c9   : > { %v6141_v54 = vpop.f32.mrf.mxu2  ;;  %v6175_v33 = vrot.slane %v1379_v48, 1  ;;  %v6195_v48 = vld [vmem:[%s5127_s6 + $0x48] sm:$0xff]  }
 0x1ca   : > { %8525 = vst [vmem:[#allocation34_spill] sm:$0xff] %v6141_v54  ;;  %4629 = vset.pattern.permute.xlu1 %v8514_v23  ;;  %4423 = vmatmul.msk.bf16.gmra.mxu0 %vm863_vm3, %v2040_v39  ;;  %v6184_v63 = vpop.f32.mrf.mxu3 }
 0x1cb   : > { %2760 = vperm.xlu1 %4629, %v8526_v4   ;;  %v1714_v61 = vpop.permute.xlu1 %1713  ;;  %v6148_v18 = vpop.f32.mrf.mxu1  ;;  %8533 = vst [vmem:[#allocation5_spill] sm:$0xff] %v6184_v63  ;;  %v8540_v63 = vld [vmem:[#allocation65_spill] sm:$0xff] }
 0x1cc   : > { %v6156_v53 = vmul.f32 %v8528_v17, %v1714_v61  ;;  %2764 = vperm.xlu2 %4627, %v8530_v9   ;;  %2812 = vperm.xlu0 %4628, %v5780_v0   ;;  %v1777_v61 = vpack.c.bf16 %v1751_v6, %v1750_v12  ;;  %v2041_v6 = vshrl.u32 %v4722_v32, 16  ;;  %v8538_v32 = vrot.slane %v5612_v30, 6 }
 0x1cd   : > { %v6164_v52 = vpop.permute.xlu2 %2295  ;;  %v6169_v24 = vpop.permute.xlu0 %2289 }
 0x1ce   : > { %8529 = vst [vmem:[#allocation24_spill] sm:$0xff] %v6156_v53  ;;  %4375 = vmatmul.msk.bf16.gmra.mxu1 %vm863_vm3, %v477_v44  ;;  %v8535_v44 = vld [vmem:[#allocation10_spill] sm:$0xff]  ;;  %v6211_v23 = vpop.f32.mrf.mxu0  ;;  %v8543_v53 = vld [vmem:[#allocation53_spill] sm:$0xff] }
 0x1cf   : > { %v1280_v12 = vrot.slane %v8535_v44, 6  ;;  %8539 = vst [vmem:[#allocation10_spill] sm:$0xff] %v6211_v23 }
 0x1d1   : > { %4405 = vmatmul.msk.bf16.gmra.mxu3 %vm863_vm3, %v1777_v61  ;;  %v6173_v0 = vpop.f32.mrf.mxu2  ;;  %v2045_v61 = vshll.u32 %v6195_v48, 16  ;;  %v1281_v44 = vsel %vm912_vm0, %v8538_v32, %v1280_v12  ;;  %v1066_v32 = vadd.f32 %v6085_v2, %v5938_v45 }
 0x1d2   : > { %8531 = vst [vmem:[#allocation25_spill] sm:$0xff] %v6173_v0  ;;  %v8537_v0 = vld [vmem:[#allocation54_spill] sm:$0xff] }
 0x1d3   : > { %2768 = vperm.xlu1 %4629, %v5759_v37   ;;  %v1726_v9 = vpop.permute.xlu1 %1725  ;;  %v6178_v39 = vpop.f32.mrf.mxu1  ;;  %v457_v54 = vmul.f32 %v8537_v0, %v8536_v55  ;;  %v2043_v55 = vor.u32 %v2041_v6, %v2039_v19 }
 0x1d4   : > { %v6187_v35 = vmul.f32 %v5476_v8, %v1726_v9  ;;  %2772 = vperm.xlu2 %4627, %v5774_v13   ;;  %2824 = vperm.xlu0 %4628, %v5829_v7   ;;  %v1425_v7 = vsel %vm1406_vm4, %v6110_v31, %v6175_v33  ;;  %v6215_v9 = vrot.slane %v2045_v61, 1  ;;  %v456_v8 = vmul.f32 %v8543_v53, %v8542_v60  ;;  %v8544_v31 = vld [vmem:[#allocation8_spill] sm:$0xff] }
 0x1d5   : > { %v6192_v40 = vpop.permute.xlu2 %2301  ;;  %v6203_v13 = vpop.permute.xlu0 %2304  ;;  %v8545_v10 = vrot.slane %v8544_v31, 6 }
 0x1d6   : > { %8534 = vst [vmem:[#allocation95_spill] sm:$0xff] %v6187_v35  ;;  %v8288_v56 = vrot.slane %v6203_v13, 6  ;;  %4391 = vmatmul.msk.bf16.gmra.mxu2 %vm863_vm3, %v1425_v7  ;;  %v6218_v35 = vunpack.c.h.bf16 %v8540_v63  ;;  %v8546_v7 = vrot.slane %v6192_v40, 6  ;;  %v1357_v63 = vmul.f32 %v8543_v53, %v1281_v44  ;;  %v8559_v53 = vld [vmem:[#allocation38_spill] sm:$0xff] }
 0x1d7   : > { %v1283_v30 = vsel %vm912_vm0, %v1280_v12, %v8545_v10  ;;  %v2048_v60 = vsel %vm730_vm2, %v2043_v55, %v6215_v9  ;;  %v478_v61 = vpack.c.bf16 %v457_v54, %v456_v8  ;;  %v1753_v10 = vmul.f32 %v5295_v50, %v6027_v59  ;;  %v8550_v8 = vld [vmem:[#allocation67_spill] sm:$0xff] }
 0x1d8   : > { %8541 = vst [vmem:[#allocation27_spill] sm:$0xff] %v6218_v35  ;;  %v6232_v19 = vsel %vm912_vm0, %v8546_v7, %v8288_v56  ;;  %v1358_v31 = vmul.f32 %v8537_v0, %v1283_v30  ;;  %v8547_v7 = vld [vmem:[#allocation66_spill] sm:$0xff]  ;;  %v1752_v59 = vmul.f32 %v5288_v46, %v5922_v43  ;;  %v2381_v54 = vrot.slane %v6123_v5, 6  ;;  %v8560_v0 = vld [vmem:[#allocation39_spill] sm:$0xff] }
 0x1d9   : > { %v1500_v6 = vpop.f32.mrf.mxu2  ;;  %v6247_v44 = vmul.f32 %v8547_v7, %v6119_v20  ;;  %v2382_v55 = vrot.slane %v6169_v24, 6  ;;  %v8291_v30 = vmov 7   ;;  %v6261_v20 = vpop.f32.mrf.mxu3  ;;  %v8557_v7 = vld [vmem:[#allocation60_spill] sm:$0xff] }
 0x1da   : > { %v6239_v12 = vadd.f32 %v1500_v6, %v1066_v32  ;;  %4424 = vmatmul.msk.bf16.gmra.mxu0 %vm863_vm3, %v2048_v60  ;;  %8551 = vst [vmem:[#allocation8_spill] sm:$0xff] %v6261_v20  ;;  %v1380_v43 = vpack.c.bf16 %v1358_v31, %v1357_v63  ;;  %v1778_v5 = vpack.c.bf16 %v1753_v10, %v1752_v59  ;;  %v6271_v60 = vpop.f32.mrf.mxu0  ;;  %v2386_v59 = vrot.slane %v6164_v52, 6  ;;  %v8554_v6 = vld [vmem:[#allocation35_spill] sm:$0xff] }
 0x1db   : > { %2780 = vperm.xlu1 %4629, %v5814_v62   ;;  %v1738_v45 = vpop.permute.xlu1 %1737  ;;  %v6242_v2 = vpop.f32.mrf.mxu1  ;;  %8548 = vst [vmem:[#allocation65_spill] sm:$0xff] %v6247_v44  ;;  %v2383_v20 = vsel %vm912_vm0, %v2381_v54, %v2382_v55 }
 0x1dc   : > { %v6250_v56 = vmul.f32 %v6218_v35, %v1738_v45  ;;  %2784 = vperm.xlu2 %4627, %v8550_v8   ;;  %4630 = vset.pattern.permute.xlu0 %v8291_v30  ;;  %v1068_v30 = vadd.f32 %v6116_v25, %v5975_v38  ;;  %v6284_v63 = vrot.slane %v1380_v43, 1  ;;  %v8553_v25 = vld [vmem:[#allocation36_spill] sm:$0xff]  ;;  %v2478_v44 = vmul.f32 %v8554_v6, %v2383_v20 }
 0x1dd   : > { %v6257_v32 = vpop.permute.xlu2 %2310  ;;  %v6266_v35 = vpop.permute.xlu0 %2313  ;;  %3102 = vperm.xlu0 %4630, %v8516_v36   ;;  %v2477_v31 = vmul.f32 %v8553_v25, %v2381_v54  ;;  %v2049_v43 = vshrl.u32 %v6195_v48, 16  ;;  %v8299_v6 = vmov 8  }
 0x1de   : > { %8549 = vst [vmem:[#allocation14_spill] sm:$0xff] %v6250_v56  ;;  %v8296_v45 = vrot.slane %v6257_v32, 6  ;;  %4376 = vmatmul.msk.bf16.gmra.mxu1 %vm863_vm3, %v478_v61  ;;  %v8295_v24 = vrot.slane %v6266_v35, 6  ;;  %v8555_v56 = vld [vmem:[#allocation7_spill] sm:$0xff]  ;;  %v1427_v20 = vsel %vm1406_vm4, %v6175_v33, %v6284_v63 }
 0x1df   : > { %v2510_v54 = vpack.c.bf16 %v2478_v44, %v2477_v31  ;;  %v8563_v44 = vld [vmem:[#allocation59_spill] sm:$0xff] }
 0x1e0   : > { %v6281_v61 = vsel %vm912_vm0, %v8296_v45, %v8295_v24 }
 0x1e1   : > { %4406 = vmatmul.msk.bf16.gmra.mxu3 %vm863_vm3, %v1778_v5  ;;  %v1502_v36 = vpop.f32.mrf.mxu2 }
 0x1e2   : > { %v6286_v10 = vadd.f32 %v1502_v36, %v1068_v30  ;;  %v6299_v30 = vld [vmem:[%s5127_s6 + $0x50] sm:$0xff]   ;;  %v8556_v36 = vld [vmem:[#allocation26_spill] sm:$0xff] }
 0x1e3   : > { %2792 = vperm.xlu1 %4629, %v5866_v58   ;;  %v6289_v38 = vpop.f32.mrf.mxu1  ;;  %v2053_v58 = vshll.u32 %v6299_v30, 16 }
 0x1e4   : > { %8552 = vst [vmem:[#allocation67_spill] sm:$0xff] %v6286_v10  ;;  %2796 = vperm.xlu2 %4627, %v8555_v56   ;;  %v2293_v24 = vpop.permute.xlu1 %2292  ;;  %v458_v10 = vmul.f32 %v8557_v7, %v8556_v36  ;;  %v2051_v36 = vor.u32 %v2049_v43, %v6215_v9  ;;  %v6317_v7 = vpop.f32.mrf.mxu3  ;;  %v8562_v9 = vld [vmem:[#allocation17_spill] sm:$0xff] }
 0x1e5   : > { %v2384_v45 = vrot.slane %v2293_v24, 6  ;;  %v6295_v5 = vpop.permute.xlu2 %2319  ;;  %v6305_v52 = vpop.permute.xlu0 %2322  ;;  %4634 = vset.pattern.permute.xlu0 %v8299_v6  ;;  %8558 = vst [vmem:[#allocation36_spill] sm:$0xff] %v6317_v7  ;;  %v2055_v6 = vrot.slane %v2053_v58, 1  ;;  %v459_v31 = vmul.f32 %v8563_v44, %v8562_v9  ;;  %v1755_v58 = vmul.f32 %v8507_v51, %v5968_v27  ;;  %v8566_v9 = vld [vmem:[#allocation74_spill] sm:$0xff] }
 0x1e6   : > { %v8301_v25 = vrot.slane %v6305_v52, 6  ;;  %4392 = vmatmul.msk.bf16.gmra.mxu2 %vm863_vm3, %v1427_v20  ;;  %3653 = vperm.xlu0 %4634, %v5593_v34   ;;  %v6330_v34 = vpop.f32.mrf.mxu0 }
 0x1e7   : > { %v2385_v48 = vsel %vm912_vm0, %v2382_v55, %v2384_v45  ;;  %v2387_v24 = vsel %vm912_vm0, %v2384_v45, %v2386_v59  ;;  %v1071_v55 = vadd.f32 %v6148_v18, %v6041_v41  ;;  %v8561_v45 = vrot.slane %v6295_v5, 6  ;;  %v8564_v18 = vld [vmem:[#allocation71_spill] sm:$0xff] }
 0x1e8   : > { %v2479_v33 = vmul.f32 %v8559_v53, %v2385_v48  ;;  %v2480_v56 = vmul.f32 %v8560_v0, %v2387_v24  ;;  %v2056_v24 = vsel %vm730_vm2, %v2051_v36, %v2055_v6  ;;  %v8565_v53 = vld [vmem:[#allocation72_spill] sm:$0xff] }
 0x1e9   : > { %v6328_v20 = vsel %vm912_vm0, %v8561_v45, %v8301_v25  ;;  %v1505_v48 = vpop.f32.mrf.mxu2  ;;  %v479_v45 = vpack.c.bf16 %v459_v31, %v458_v10  ;;  %v2546_v25 = vrot.slane %v2510_v54, 1  ;;  %v8568_v31 = vrot.slane %v6192_v40, 6 }
 0x1ea   : > { %v2511_v43 = vpack.c.bf16 %v2480_v56, %v2479_v33  ;;  %v6337_v41 = vadd.f32 %v1505_v48, %v1071_v55  ;;  %v1754_v56 = vmul.f32 %v5269_v26, %v8566_v9  ;;  %4425 = vmatmul.msk.bf16.gmra.mxu0 %vm863_vm3, %v2056_v24  ;;  %v8570_v9 = vld [vmem:[#allocation19_spill] sm:$0xff] }
 0x1eb   : > { %2804 = vperm.xlu1 %4629, %v8564_v18   ;;  %v6340_v7 = vpop.f32.mrf.mxu1  ;;  %v1073_v18 = vadd.f32 %v6178_v39, %v6070_v14  ;;  %v8571_v39 = vld [vmem:[#allocation28_spill] sm:$0xff] }
 0x1ec   : > { %v2547_v0 = vrot.slane %v2511_v43, 1  ;;  %2808 = vperm.xlu2 %4627, %v8565_v53   ;;  %v2299_v23 = vpop.permute.xlu1 %2298  ;;  %v1779_v54 = vpack.c.bf16 %v1755_v58, %v1754_v56  ;;  %v8572_v56 = vld [vmem:[#allocation56_spill] sm:$0xff] }
 0x1ed   : > { %v2388_v33 = vrot.slane %v2299_v23, 6  ;;  %v6345_v36 = vpop.permute.xlu2 %2328  ;;  %v6349_v55 = vpop.permute.xlu0 %2331 }
 0x1ee   : > { %v8303_v27 = vrot.slane %v6345_v36, 6  ;;  %4377 = vmatmul.msk.bf16.gmra.mxu1 %vm863_vm3, %v479_v45  ;;  %v6353_v10 = vsel %vm1406_vm4, %v2546_v25, %v2547_v0  ;;  %v8302_v43 = vrot.slane %v6349_v55, 6  ;;  %3662 = vperm.xlu0 %4634, %v5759_v37   ;;  %v6373_v40 = vpop.f32.mrf.mxu0  ;;  %v6375_v37 = vpop.f32.mrf.mxu3 }
 0x1ef   : > { %8567 = vst [vmem:[#allocation35_spill] sm:$0xff] %v6353_v10  ;;  %v2389_v53 = vsel %vm912_vm0, %v2386_v59, %v2388_v33  ;;  %v2391_v23 = vsel %vm912_vm0, %v2388_v33, %v8568_v31  ;;  %v461_v33 = vmul.f32 %v8572_v56, %v8571_v39  ;;  %v2483_v39 = vmul.f32 %v8451_v49, %v6232_v19 }
 0x1f0   : > { %v2481_v48 = vmul.f32 %v8438_v15, %v2389_v53  ;;  %v2482_v24 = vmul.f32 %v8436_v3, %v2391_v23  ;;  %v6370_v59 = vsel %vm912_vm0, %v8303_v27, %v8302_v43  ;;  %8569 = vst [vmem:[#allocation26_spill] sm:$0xff] %v6375_v37  ;;  %v8573_v53 = vld [vmem:[#allocation75_spill] sm:$0xff]  ;;  %v8574_v43 = vld [vmem:[#allocation29_spill] sm:$0xff]  ;;  %v8578_v15 = vrot.slane %v6257_v32, 6 }
 0x1f1   : > { %4407 = vmatmul.msk.bf16.gmra.mxu3 %vm863_vm3, %v1779_v54  ;;  %v1507_v58 = vpop.f32.mrf.mxu2  ;;  %v8575_v27 = vld [vmem:[#allocation57_spill] sm:$0xff]  ;;  %v8579_v49 = vmov 7  }
 0x1f2   : > { %v2512_v25 = vpack.c.bf16 %v2482_v24, %v2481_v48  ;;  %v6377_v45 = vadd.f32 %v1507_v58, %v1073_v18  ;;  %v460_v37 = vmul.f32 %v8575_v27, %v8574_v43  ;;  %v2057_v18 = vshrl.u32 %v6299_v30, 16  ;;  %v6392_v58 = vld [vmem:[%s5127_s6 + $0x58] sm:$0xff]  }
 0x1f3   : > { %2816 = vperm.xlu1 %4629, %v8570_v9   ;;  %v1082_v14 = vpop.f32.mrf.mxu1  ;;  %v2061_v3 = vshll.u32 %v6392_v58, 16  ;;  %v8577_v30 = vrot.slane %v6203_v13, 6 }
 0x1f4   : > { %2820 = vperm.xlu2 %4627, %v8573_v53   ;;  %v6384_v31 = vadd.f32 %v1082_v14, %v6271_v60  ;;  %v2308_v54 = vpop.permute.xlu1 %2307  ;;  %v2549_v23 = vrot.slane %v2512_v25, 1  ;;  %v8576_v25 = vld [vmem:[#allocation37_spill] sm:$0xff]  ;;  %v2059_v60 = vor.u32 %v2057_v18, %v2055_v6 }
 0x1f5   : > { %v2394_v48 = vrot.slane %v2308_v54, 6  ;;  %v6388_v24 = vpop.permute.xlu2 %2337  ;;  %v6398_v14 = vpop.permute.xlu0 %2340  ;;  %v1429_v43 = vsel %vm1406_vm4, %v6284_v63, %v8576_v25  ;;  %v2486_v63 = vmul.f32 %v8467_v22, %v6281_v61  ;;  %v6419_v25 = vrot.slane %v2061_v3, 1 }
 0x1f6   : > { %v6404_v53 = vsel %vm1406_vm4, %v2547_v0, %v2549_v23  ;;  %v8307_v19 = vrot.slane %v6398_v14, 6  ;;  %4393 = vmatmul.msk.bf16.gmra.mxu2 %vm863_vm3, %v1429_v43  ;;  %4639 = vset.pattern.permute.xlu0 %v8579_v49  ;;  %v8580_v32 = vrot.slane %v6388_v24, 6 }
 0x1f7   : > { %v2395_v54 = vsel %vm912_vm0, %v8577_v30, %v2394_v48  ;;  %v2397_v10 = vsel %vm912_vm0, %v2394_v48, %v8578_v15  ;;  %3123 = vperm.xlu0 %4639, %v5814_v62   ;;  %v1076_v15 = vadd.f32 %v6242_v2, %v6105_v29  ;;  %v6431_v48 = vpop.f32.mrf.mxu0  ;;  %v2064_v3 = vsel %vm730_vm2, %v2059_v60, %v6419_v25  ;;  %v8582_v29 = vld [vmem:[#allocation79_spill] sm:$0xff] }
 0x1f8   : > { %v2484_v0 = vmul.f32 %v8448_v16, %v2395_v54  ;;  %v2485_v13 = vmul.f32 %v8465_v1, %v2397_v10  ;;  %v6429_v6 = vsel %vm912_vm0, %v8580_v32, %v8307_v19  ;;  %v8581_v10 = vld [vmem:[#allocation87_spill] sm:$0xff]  ;;  %v480_v54 = vpack.c.bf16 %v461_v33, %v460_v37  ;;  %v6442_v32 = vpop.f32.mrf.mxu3  ;;  %v8584_v19 = vld [vmem:[#allocation80_spill] sm:$0xff] }
 0x1f9   : > { %v1510_v43 = vpop.f32.mrf.mxu2  ;;  %v1756_v62 = vmul.f32 %v8522_v21, %v8581_v10  ;;  %8583 = vst [vmem:[#allocation17_spill] sm:$0xff] %v6442_v32  ;;  %v8589_v10 = vrot.slane %v6295_v5, 6 }
 0x1fa   : > { %v2513_v61 = vpack.c.bf16 %v2484_v0, %v2483_v39  ;;  %v2514_v18 = vpack.c.bf16 %v2486_v63, %v2485_v13  ;;  %v6437_v30 = vadd.f32 %v1510_v43, %v1076_v15  ;;  %v8585_v13 = vld [vmem:[#allocation77_spill] sm:$0xff]  ;;  %4426 = vmatmul.msk.bf16.gmra.mxu0 %vm863_vm3, %v2064_v3 }
 0x1fb   : > { %2828 = vperm.xlu1 %4629, %v8582_v29   ;;  %v6440_v2 = vpop.f32.mrf.mxu1  ;;  %v1757_v60 = vmul.f32 %v8520_v57, %v8585_v13 }
 0x1fc   : > { %2832 = vperm.xlu2 %4627, %v8584_v19   ;;  %v2317_v39 = vpop.permute.xlu1 %2316  ;;  %v2551_v63 = vrot.slane %v2513_v61, 1  ;;  %v2553_v0 = vrot.slane %v2514_v18, 1  ;;  %v8588_v61 = vrot.slane %v6266_v35, 6 }
 0x1fd   : > { %v2400_v22 = vrot.slane %v2317_v39, 6  ;;  %v6447_v1 = vpop.permute.xlu2 %2346  ;;  %v6451_v43 = vpop.permute.xlu0 %2349  ;;  %v1780_v19 = vpack.c.bf16 %v1757_v60, %v1756_v62 }
 0x1fe   : > { %v8311_v15 = vrot.slane %v6447_v1, 6  ;;  %4378 = vmatmul.msk.bf16.gmra.mxu1 %vm863_vm3, %v480_v54  ;;  %v6455_v37 = vsel %vm1406_vm4, %v2549_v23, %v2551_v63  ;;  %v6458_v33 = vsel %vm1406_vm4, %v2551_v63, %v2553_v0  ;;  %v8310_v29 = vrot.slane %v6451_v43, 6 }
 0x1ff   : > { %8586 = vst [vmem:[#allocation71_spill] sm:$0xff] %v6455_v37  ;;  %v2401_v18 = vsel %vm912_vm0, %v8588_v61, %v2400_v22  ;;  %v2403_v3 = vsel %vm912_vm0, %v2400_v22, %v8589_v10  ;;  %v8590_v23 = vmov 8   ;;  %v1078_v63 = vadd.f32 %v6289_v38, %v6162_v11  ;;  %v6480_v22 = vpop.f32.mrf.mxu0  ;;  %v8591_v38 = vld [vmem:[#allocation31_spill] sm:$0xff] }
 0x200   : > { %8587 = vst [vmem:[#allocation72_spill] sm:$0xff] %v6458_v33  ;;  %v2487_v39 = vmul.f32 %v8481_v42, %v2401_v18  ;;  %v2488_v54 = vmul.f32 %v8479_v47, %v2403_v3  ;;  %4643 = vset.pattern.permute.xlu0 %v8590_v23  ;;  %v6477_v35 = vsel %vm912_vm0, %v8311_v15, %v8310_v29 }
 0x201   : > { %4408 = vmatmul.msk.bf16.gmra.mxu3 %vm863_vm3, %v1780_v19  ;;  %3674 = vperm.xlu0 %4643, %v8550_v8   ;;  %v1512_v62 = vpop.f32.mrf.mxu2  ;;  %v463_v60 = vmul.f32 %v8528_v17, %v8591_v38  ;;  %v4726_v19 = vld [vmem:[%s8180_s2 + $0x8] sm:$0xff]  ;;  %v2489_v38 = vmul.f32 %v5288_v46, %v6328_v20 }
 0x202   : > { %v2515_v5 = vpack.c.bf16 %v2488_v54, %v2487_v39  ;;  %v6483_v13 = vadd.f32 %v1512_v62, %v1078_v63  ;;  %v2065_v54 = vshrl.u32 %v6392_v58, 16  ;;  %v6500_v63 = vld [vmem:[%s5127_s6 + $0x60] sm:$0xff]  }
 0x203   : > { %4631 = vset.pattern.permute.xlu1 %v8579_v49  ;;  %v6486_v11 = vpop.f32.mrf.mxu1  ;;  %v2069_v62 = vshll.u32 %v6500_v63, 16 }
 0x204   : > { %v1850_v61 = vpop.f32.mrf.mxu3  ;;  %v2326_v18 = vpop.permute.xlu1 %2325  ;;  %3105 = vperm.xlu1 %4631, %v4726_v19   ;;  %4632 = vset.pattern.permute.xlu2 %v8579_v49  ;;  %v2555_v8 = vrot.slane %v2515_v5, 1  ;;  %v2492_v19 = vmul.f32 %v8507_v51, %v6370_v59  ;;  %v8596_v59 = vld [vmem:[#allocation44_spill] sm:$0xff] }
 0x205   : > { %v1930_v10 = vadd.f32 %v1850_v61, %v6239_v12  ;;  %v2406_v3 = vrot.slane %v2326_v18, 6  ;;  %v6495_v39 = vpop.permute.xlu2 %2355  ;;  %3108 = vperm.xlu2 %4632, %v8526_v4   ;;  %v6508_v12 = vpop.permute.xlu0 %2358  ;;  %v8593_v4 = vrot.slane %v6305_v52, 6  ;;  %v8594_v18 = vrot.slane %v6345_v36, 6 }
 0x206   : > { %v6511_v61 = vsel %vm1406_vm4, %v2553_v0, %v2555_v8  ;;  %v8314_v20 = vrot.slane %v6508_v12, 6  ;;  %4394 = vmatmul.msk.bf16.gmra.mxu2 %vm863_vm3, %v8596_v59  ;;  %v2067_v52 = vor.u32 %v2065_v54, %v6419_v25  ;;  %v6528_v32 = vrot.slane %v2069_v62, 1  ;;  %v8601_v25 = vld [vmem:[#allocation11_spill] sm:$0xff]  ;;  %v8602_v54 = vld [vmem:[#allocation54_spill] sm:$0xff] }
 0x207   : > { %8592 = vst [vmem:[#allocation74_spill] sm:$0xff] %v6511_v61  ;;  %v2407_v58 = vsel %vm912_vm0, %v8593_v4, %v2406_v3  ;;  %v2409_v29 = vsel %vm912_vm0, %v2406_v3, %v8594_v18  ;;  %v6521_v15 = vadd.f32 %v6330_v34, %v1930_v10  ;;  %v8597_v4 = vld [vmem:[#allocation20_spill] sm:$0xff]  ;;  %v8598_v3 = vld [vmem:[#allocation10_spill] sm:$0xff]  ;;  %v8599_v34 = vrot.slane %v6495_v39, 6 }
 0x208   : > { %v2490_v5 = vmul.f32 %v5295_v50, %v2407_v58  ;;  %v2491_v0 = vmul.f32 %v5269_v26, %v2409_v29  ;;  %v462_v36 = vmul.f32 %v5349_v28, %v8597_v4  ;;  %v1081_v18 = vadd.f32 %v6340_v7, %v8598_v3  ;;  %v6541_v58 = vpop.f32.mrf.mxu0  ;;  %v8600_v29 = vld [vmem:[#allocation7_spill] sm:$0xff] }
 0x209   : > { %8595 = vst [vmem:[#allocation19_spill] sm:$0xff] %v6521_v15  ;;  %v6539_v10 = vsel %vm912_vm0, %v8599_v34, %v8314_v20  ;;  %3683 = vperm.xlu0 %4643, %v8600_v29   ;;  %v1759_v62 = vmul.f32 %v8602_v54, %v8601_v25  ;;  %v1515_v4 = vpop.f32.mrf.mxu2  ;;  %v2072_v7 = vsel %vm730_vm2, %v2067_v52, %v6528_v32  ;;  %v8603_v34 = vld [vmem:[#allocation83_spill] sm:$0xff]  ;;  %v8604_v20 = vld [vmem:[#allocation53_spill] sm:$0xff] }
 0x20a   : > { %v2516_v59 = vpack.c.bf16 %v2490_v5, %v2489_v38  ;;  %v2517_v15 = vpack.c.bf16 %v2492_v19, %v2491_v0  ;;  %v6548_v3 = vadd.f32 %v1515_v4, %v1081_v18  ;;  %v481_v42 = vpack.c.bf16 %v463_v60, %v462_v36  ;;  %v4728_v29 = vld [vmem:[%s8180_s2 + $0x18] sm:$0xff]  ;;  %v8605_v5 = vld [vmem:[#allocation67_spill] sm:$0xff]  ;;  %4427 = vmatmul.msk.bf16.gmra.mxu0 %vm863_vm3, %v2072_v7 }
 0x20b   : > { %v6550_v47 = vpop.f32.mrf.mxu1  ;;  %v1758_v61 = vmul.f32 %v8604_v20, %v8603_v34 }
 0x20c   : > { %v1852_v16 = vpop.f32.mrf.mxu3  ;;  %v2335_v33 = vpop.permute.xlu1 %2334  ;;  %3111 = vperm.xlu1 %4631, %v4728_v29   ;;  %v2557_v38 = vrot.slane %v2516_v59, 1  ;;  %v2559_v19 = vrot.slane %v2517_v15, 1  ;;  %v4729_v15 = vld [vmem:[%s8180_s2] sm:$0xff]  ;;  %v8608_v59 = vrot.slane %v6349_v55, 6 }
 0x20d   : > { %v1931_v0 = vadd.f32 %v1852_v16, %v8605_v5  ;;  %v2412_v52 = vrot.slane %v2335_v33, 6  ;;  %v6558_v18 = vpop.permute.xlu2 %2364  ;;  %4633 = vset.pattern.permute.xlu2 %v8590_v23  ;;  %v1781_v60 = vpack.c.bf16 %v1759_v62, %v1758_v61  ;;  %v6563_v25 = vpop.permute.xlu0 %2367  ;;  %v8609_v62 = vrot.slane %v6388_v24, 6 }
 0x20e   : > { %v8317_v36 = vrot.slane %v6558_v18, 6  ;;  %4379 = vmatmul.msk.bf16.gmra.mxu1 %vm863_vm3, %v481_v42  ;;  %3650 = vperm.xlu2 %4633, %v4729_v15   ;;  %v6570_v16 = vsel %vm1406_vm4, %v2555_v8, %v2557_v38  ;;  %v6573_v33 = vsel %vm1406_vm4, %v2557_v38, %v2559_v19  ;;  %v8316_v42 = vrot.slane %v6563_v25, 6  ;;  %v8611_v15 = vld [vmem:[#allocation30_spill] sm:$0xff] }
 0x20f   : > { %8606 = vst [vmem:[#allocation28_spill] sm:$0xff] %v6570_v16  ;;  %v2413_v61 = vsel %vm912_vm0, %v8608_v59, %v2412_v52  ;;  %v2415_v4 = vsel %vm912_vm0, %v2412_v52, %v8609_v62  ;;  %v6583_v7 = vadd.f32 %v6373_v40, %v1931_v0  ;;  %v6600_v40 = vld [vmem:[%s8180_s2 + $0x60] sm:$0xff] }
 0x210   : > { %8607 = vst [vmem:[#allocation75_spill] sm:$0xff] %v6573_v33  ;;  %v2493_v34 = vmul.f32 %v8522_v21, %v2413_v61  ;;  %v2494_v8 = vmul.f32 %v8520_v57, %v2415_v4  ;;  %v6592_v55 = vsel %vm912_vm0, %v8317_v36, %v8316_v42  ;;  %v6595_v24 = vpop.f32.mrf.mxu0  ;;  %v8612_v59 = vld [vmem:[#allocation62_spill] sm:$0xff]  ;;  %v8615_v33 = vrot.slane %v6447_v1, 6 }
 0x211   : > { %8610 = vst [vmem:[#allocation29_spill] sm:$0xff] %v6583_v7  ;;  %4409 = vmatmul.msk.bf16.gmra.mxu3 %vm863_vm3, %v1781_v60  ;;  %3686 = vperm.xlu0 %4643, %v6600_v40   ;;  %v1517_v5 = vpop.f32.mrf.mxu2  ;;  %v464_v60 = vmul.f32 %v8612_v59, %v8611_v15  ;;  %v2495_v15 = vmul.f32 %v8604_v20, %v6429_v6 }
 0x212   : > { %v2518_v38 = vpack.c.bf16 %v2494_v8, %v2493_v34  ;;  %v6604_v0 = vadd.f32 %v1517_v5, %v6384_v31  ;;  %v4731_v31 = vld [vmem:[%s8180_s2 + $0x10] sm:$0xff]  ;;  %v2073_v34 = vshrl.u32 %v6500_v63, 16  ;;  %v6619_v8 = vld [vmem:[%s5127_s6 + $0x68] sm:$0xff]   ;;  %v8614_v63 = vrot.slane %v6398_v14, 6 }
 0x213   : > { %v6606_v52 = vpop.f32.mrf.mxu1  ;;  %v2077_v5 = vshll.u32 %v6619_v8, 16 }
 0x214   : > { %v1855_v61 = vpop.f32.mrf.mxu3  ;;  %v2344_v62 = vpop.permute.xlu1 %2343  ;;  %4635 = vset.pattern.permute.xlu1 %v8590_v23  ;;  %v2561_v4 = vrot.slane %v2518_v38, 1  ;;  %v8617_v38 = vld [vmem:[#allocation16_spill] sm:$0xff]  ;;  %v2075_v14 = vor.u32 %v2073_v34, %v6528_v32 }
 0x215   : > { %v1932_v42 = vadd.f32 %v1855_v61, %v6337_v41  ;;  %v2418_v36 = vrot.slane %v2344_v62, 6  ;;  %v6612_v7 = vpop.permute.xlu2 %2373  ;;  %3656 = vperm.xlu1 %4635, %v4731_v31   ;;  %v2498_v41 = vmul.f32 %v8563_v44, %v6477_v35  ;;  %v6627_v61 = vpop.permute.xlu0 %2376  ;;  %v6647_v20 = vrot.slane %v2077_v5, 1 }
 0x216   : > { %3659 = vperm.xlu2 %4633, %v4728_v29   ;;  %v6630_v62 = vsel %vm1406_vm4, %v2559_v19, %v2561_v4  ;;  %v8319_v6 = vrot.slane %v6627_v61, 6  ;;  %4395 = vmatmul.msk.bf16.gmra.mxu2 %vm863_vm3, %v8617_v38  ;;  %v8618_v19 = vld [vmem:[#allocation60_spill] sm:$0xff] }
 0x217   : > { %8613 = vst [vmem:[#allocation37_spill] sm:$0xff] %v6630_v62  ;;  %v2419_v31 = vsel %vm912_vm0, %v8614_v63, %v2418_v36  ;;  %v2421_v16 = vsel %vm912_vm0, %v2418_v36, %v8615_v33  ;;  %v6640_v35 = vadd.f32 %v6431_v48, %v1932_v42  ;;  %v8619_v63 = vld [vmem:[#allocation13_spill] sm:$0xff]  ;;  %v8620_v36 = vrot.slane %v6612_v7, 6  ;;  %v8621_v42 = vld [vmem:[#allocation23_spill] sm:$0xff] }
 0x218   : > { %v2496_v29 = vmul.f32 %v8602_v54, %v2419_v31  ;;  %v2497_v62 = vmul.f32 %v8618_v19, %v2421_v16  ;;  %v1086_v1 = vadd.f32 %v6440_v2, %v8619_v63  ;;  %v6658_v33 = vpop.f32.mrf.mxu0  ;;  %v8622_v16 = vld [vmem:[#allocation61_spill] sm:$0xff]  ;;  %v2080_v2 = vsel %vm730_vm2, %v2075_v14, %v6647_v20  ;;  %v8624_v14 = vld [vmem:[#allocation82_spill] sm:$0xff] }
 0x219   : > { %8616 = vst [vmem:[#allocation87_spill] sm:$0xff] %v6640_v35  ;;  %v6656_v48 = vsel %vm912_vm0, %v8620_v36, %v8319_v6  ;;  %4649 = vset.pattern.permute.xlu0 %v8579_v49  ;;  %v465_v38 = vmul.f32 %v8622_v16, %v8621_v42  ;;  %v1520_v5 = vpop.f32.mrf.mxu2  ;;  %v6668_v31 = vld [vmem:[%s8180_s2 + $0x78] sm:$0xff]  ;;  %v1760_v54 = vmul.f32 %v8618_v19, %v8624_v14 }
 0x21a   : > { %v2519_v32 = vpack.c.bf16 %v2496_v29, %v2495_v15  ;;  %v2520_v34 = vpack.c.bf16 %v2498_v41, %v2497_v62  ;;  %3147 = vperm.xlu0 %4649, %v6668_v31   ;;  %v8623_v63 = vld [vmem:[#allocation85_spill] sm:$0xff]  ;;  %v6673_v6 = vadd.f32 %v1520_v5, %v1086_v1  ;;  %4428 = vmatmul.msk.bf16.gmra.mxu0 %vm863_vm3, %v2080_v2  ;;  %v8628_v2 = vrot.slane %v6495_v39, 6 }
 0x21b   : > { %v1761_v36 = vmul.f32 %v8563_v44, %v8623_v63  ;;  %v6675_v35 = vpop.f32.mrf.mxu1  ;;  %v482_v15 = vpack.c.bf16 %v465_v38, %v464_v60  ;;  %v4734_v60 = vld [vmem:[%s8180_s2 + $0x20] sm:$0xff] }
 0x21c   : > { %v1857_v41 = vpop.f32.mrf.mxu3  ;;  %v2353_v62 = vpop.permute.xlu1 %2352  ;;  %v2563_v29 = vrot.slane %v2519_v32, 1  ;;  %v2565_v42 = vrot.slane %v2520_v34, 1  ;;  %v8627_v34 = vrot.slane %v6451_v43, 6  ;;  %v8630_v43 = vld [vmem:[#allocation68_spill] sm:$0xff] }
 0x21d   : > { %v1933_v37 = vadd.f32 %v1857_v41, %v6377_v45  ;;  %v2424_v51 = vrot.slane %v2353_v62, 6  ;;  %4636 = vset.pattern.permute.xlu1 %v8579_v49  ;;  %v1782_v32 = vpack.c.bf16 %v1761_v36, %v1760_v54  ;;  %v4735_v54 = vld [vmem:[%s8180_s2 + $0x28] sm:$0xff]  ;;  %v1088_v39 = vadd.f32 %v6486_v11, %v8630_v43 }
 0x21e   : > { %v6682_v63 = vpop.permute.xlu2 %2752  ;;  %3114 = vperm.xlu1 %4636, %v4734_v60   ;;  %4380 = vmatmul.msk.bf16.gmra.mxu1 %vm863_vm3, %v482_v15  ;;  %v6688_v1 = vpop.permute.xlu0 %2756  ;;  %v6691_v38 = vsel %vm1406_vm4, %v2561_v4, %v2563_v29  ;;  %v6694_v45 = vsel %vm1406_vm4, %v2563_v29, %v2565_v42 }
 0x21f   : > { %8625 = vst [vmem:[#allocation79_spill] sm:$0xff] %v6691_v38  ;;  %v2425_v5 = vsel %vm912_vm0, %v8627_v34, %v2424_v51  ;;  %v2427_v41 = vsel %vm912_vm0, %v2424_v51, %v8628_v2  ;;  %v6703_v62 = vadd.f32 %v6480_v22, %v1933_v37  ;;  %4637 = vset.pattern.permute.xlu2 %v8579_v49  ;;  %v6725_v2 = vld [vmem:[%s5127_s6 + $0x70] sm:$0xff]   ;;  %v8639_v38 = vrot.slane %v6558_v18, 6 }
 0x220   : > { %8626 = vst [vmem:[#allocation80_spill] sm:$0xff] %v6694_v45  ;;  %v2499_v4 = vmul.f32 %v8575_v27, %v2425_v5  ;;  %v2500_v15 = vmul.f32 %v8572_v56, %v2427_v41  ;;  %3117 = vperm.xlu2 %4637, %v4735_v54   ;;  %v6714_v51 = vpop.f32.mrf.mxu0  ;;  %v2085_v41 = vshll.u32 %v6725_v2, 16 }
 0x221   : > { %8629 = vst [vmem:[#allocation77_spill] sm:$0xff] %v6703_v62  ;;  %4410 = vmatmul.msk.bf16.gmra.mxu3 %vm863_vm3, %v1782_v32  ;;  %v1522_v22 = vpop.f32.mrf.mxu2  ;;  %v2081_v32 = vshrl.u32 %v6619_v8, 16 }
 0x222   : > { %v2521_v37 = vpack.c.bf16 %v2500_v15, %v2499_v4  ;;  %4653 = vset.pattern.permute.xlu0 %v8590_v23  ;;  %v6717_v36 = vadd.f32 %v1522_v22, %v1088_v39  ;;  %v8631_v4 = vld [vmem:[#allocation32_spill] sm:$0xff]  ;;  %v8632_v15 = vld [vmem:[#allocation63_spill] sm:$0xff]  ;;  %v8633_v39 = vld [vmem:[#allocation33_spill] sm:$0xff]  ;;  %v6762_v18 = vrot.slane %v2085_v41, 1 }
 0x223   : > { %v6719_v29 = vpop.f32.mrf.mxu1  ;;  %3698 = vperm.xlu0 %4653, %v8570_v9   ;;  %v467_v43 = vmul.f32 %v8632_v15, %v8631_v4  ;;  %v8634_v22 = vld [vmem:[#allocation64_spill] sm:$0xff]  ;;  %v8638_v4 = vrot.slane %v6508_v12, 6 }
 0x224   : > { %v1860_v14 = vpop.f32.mrf.mxu3  ;;  %v2362_v60 = vpop.permute.xlu1 %2361  ;;  %v2567_v34 = vrot.slane %v2521_v37, 1  ;;  %v466_v62 = vmul.f32 %v8634_v22, %v8633_v39  ;;  %v8635_v9 = vld [vmem:[#allocation40_spill] sm:$0xff] }
 0x225   : > { %v1934_v5 = vadd.f32 %v1860_v14, %v6437_v30  ;;  %v2430_v11 = vrot.slane %v2362_v60, 6  ;;  %v8636_v37 = vld [vmem:[#allocation12_spill] sm:$0xff]  ;;  %v2501_v60 = vmul.f32 %v5349_v28, %v6539_v10 }
 0x226   : > { %v6732_v45 = vpop.permute.xlu2 %2764  ;;  %4638 = vset.pattern.permute.xlu1 %v8590_v23  ;;  %v1435_v30 = vsel %vm1406_vm4, %v8636_v37, %v8635_v9  ;;  %v6738_v14 = vpop.permute.xlu0 %2776  ;;  %v6741_v8 = vsel %vm1406_vm4, %v2565_v42, %v2567_v34  ;;  %v2504_v42 = vmul.f32 %v8622_v16, %v6592_v55  ;;  %v4737_v12 = vld [vmem:[%s8180_s2 + $0x30] sm:$0xff] }
 0x227   : > { %8637 = vst [vmem:[#allocation31_spill] sm:$0xff] %v6741_v8  ;;  %v2431_v39 = vsel %vm912_vm0, %v8638_v4, %v2430_v11  ;;  %v2433_v44 = vsel %vm912_vm0, %v2430_v11, %v8639_v38  ;;  %v6752_v19 = vadd.f32 %v6541_v58, %v1934_v5  ;;  %4396 = vmatmul.msk.bf16.gmra.mxu2 %vm863_vm3, %v1435_v30  ;;  %v8641_v38 = vld [vmem:[#allocation69_spill] sm:$0xff]  ;;  %v8642_v4 = vld [vmem:[#allocation94_spill] sm:$0xff]  ;;  %v8658_v16 = vld [vmem:[#allocation76_spill] sm:$0xff] }
 0x228   : > { %v2502_v9 = vmul.f32 %v8528_v17, %v2431_v39  ;;  %v2503_v10 = vmul.f32 %v8612_v59, %v2433_v44  ;;  %3665 = vperm.xlu1 %4638, %v4735_v54   ;;  %3120 = vperm.xlu2 %4637, %v4737_v12   ;;  %v1091_v58 = vadd.f32 %v6550_v47, %v8641_v38  ;;  %v6766_v5 = vpop.f32.mrf.mxu0  ;;  %v6780_v47 = vld [vmem:[%s8180_s2 + $0x98] sm:$0xff] }
 0x229   : > { %8640 = vst [vmem:[#allocation44_spill] sm:$0xff] %v6752_v19  ;;  %v2083_v11 = vor.u32 %v2081_v32, %v6647_v20  ;;  %v1525_v30 = vpop.f32.mrf.mxu2  ;;  %v1762_v44 = vmul.f32 %v8575_v27, %v8642_v4  ;;  %v483_v20 = vpack.c.bf16 %v467_v43, %v466_v62 }
 0x22a   : > { %v2522_v55 = vpack.c.bf16 %v2502_v9, %v2501_v60  ;;  %v2523_v37 = vpack.c.bf16 %v2504_v42, %v2503_v10  ;;  %v6771_v54 = vadd.f32 %v1525_v30, %v1091_v58  ;;  %v8643_v10 = vld [vmem:[#allocation84_spill] sm:$0xff] }
 0x22b   : > { %v6773_v39 = vpop.f32.mrf.mxu1  ;;  %v2088_v41 = vsel %vm730_vm2, %v2083_v11, %v6762_v18  ;;  %3707 = vperm.xlu0 %4653, %v6780_v47   ;;  %v1763_v38 = vmul.f32 %v8572_v56, %v8643_v10  ;;  %v4591_v10 = vld [vmem:[%s5127_s6 + $0x88] sm:$0xff]  }
 0x22c   : > { %v1862_v32 = vpop.f32.mrf.mxu3  ;;  %v2371_v60 = vpop.permute.xlu1 %2370  ;;  %v2569_v42 = vrot.slane %v2522_v55, 1  ;;  %v2571_v9 = vrot.slane %v2523_v37, 1  ;;  %4429 = vmatmul.msk.bf16.gmra.mxu0 %vm863_vm3, %v2088_v41  ;;  %v8646_v37 = vrot.slane %v6563_v25, 6 }
 0x22d   : > { %v1935_v58 = vadd.f32 %v1862_v32, %v6483_v13  ;;  %v2436_v30 = vrot.slane %v2371_v60, 6  ;;  %v1783_v55 = vpack.c.bf16 %v1763_v38, %v1762_v44  ;;  %v8647_v32 = vrot.slane %v6612_v7, 6  ;;  %v8649_v44 = vld [vmem:[#allocation73_spill] sm:$0xff] }
 0x22e   : > { %v6787_v11 = vpop.permute.xlu2 %2772  ;;  %4381 = vmatmul.msk.bf16.gmra.mxu1 %vm863_vm3, %v483_v20  ;;  %v6790_v4 = vpop.permute.xlu0 %2788  ;;  %v6793_v62 = vsel %vm1406_vm4, %v2567_v34, %v2569_v42  ;;  %v6796_v43 = vsel %vm1406_vm4, %v2569_v42, %v2571_v9  ;;  %v1093_v25 = vadd.f32 %v6606_v52, %v8649_v44  ;;  %v4739_v7 = vld [vmem:[%s8180_s2 + $0x38] sm:$0xff]  ;;  %v6828_v52 = vld [vmem:[%s8180_s2 + $0xa0] sm:$0xff] }
 0x22f   : > { %8644 = vst [vmem:[#allocation20_spill] sm:$0xff] %v6793_v62  ;;  %v2437_v13 = vsel %vm912_vm0, %v8646_v37, %v2436_v30  ;;  %v2439_v41 = vsel %vm912_vm0, %v2436_v30, %v8647_v32  ;;  %v6805_v60 = vadd.f32 %v6595_v24, %v1935_v58  ;;  %v6823_v30 = vunpack.c.l.bf16 %v4591_v10  ;;  %v8707_v62 = vld [vmem:[#allocation72_spill] sm:$0xff] }
 0x230   : > { %8645 = vst [vmem:[#allocation10_spill] sm:$0xff] %v6796_v43  ;;  %v2505_v20 = vmul.f32 %v8634_v22, %v2437_v13  ;;  %v2506_v34 = vmul.f32 %v8632_v15, %v2439_v41  ;;  %3668 = vperm.xlu1 %4638, %v4737_v12   ;;  %4640 = vset.pattern.permute.xlu2 %v8590_v23  ;;  %v6817_v24 = vpop.f32.mrf.mxu0  ;;  %v8657_v22 = vld [vmem:[#allocation27_spill] sm:$0xff] }
 0x231   : > { %8648 = vst [vmem:[#allocation7_spill] sm:$0xff] %v6805_v60  ;;  %4411 = vmatmul.msk.bf16.gmra.mxu3 %vm863_vm3, %v1783_v55  ;;  %3671 = vperm.xlu2 %4640, %v4739_v7   ;;  %v1527_v38 = vpop.f32.mrf.mxu2  ;;  %v8653_v7 = vrot.slane %v6627_v61, 6 }
 0x232   : > { %8650 = vst [vmem:[#allocation11_spill] sm:$0xff] %v6817_v24  ;;  %v2524_v42 = vpack.c.bf16 %v2506_v34, %v2505_v20  ;;  %v6819_v58 = vadd.f32 %v1527_v38, %v1093_v25  ;;  %v2089_v20 = vshrl.u32 %v6725_v2, 16  ;;  %v6834_v34 = vld [vmem:[%s5127_s6 + $0x78] sm:$0xff]   ;;  %v8656_v2 = vld [vmem:[#allocation66_spill] sm:$0xff] }
 0x233   : > { %v6821_v12 = vpop.f32.mrf.mxu1  ;;  %8651 = vst [vmem:[#allocation83_spill] sm:$0xff] %v6823_v30  ;;  %3710 = vperm.xlu0 %4653, %v6828_v52   ;;  %v2093_v10 = vshll.u32 %v6834_v34, 16 }
 0x234   : > { %v1865_v55 = vpop.f32.mrf.mxu3  ;;  %v2380_v37 = vpop.permute.xlu1 %2379  ;;  %v2573_v13 = vrot.slane %v2524_v42, 1  ;;  %v2091_v61 = vor.u32 %v2089_v20, %v6762_v18 }
 0x235   : > { %v1936_v32 = vadd.f32 %v1865_v55, %v6548_v3  ;;  %v2442_v41 = vrot.slane %v2380_v37, 6  ;;  %v8655_v55 = vld [vmem:[#allocation70_spill] sm:$0xff]  ;;  %v2507_v37 = vmul.f32 %v8656_v2, %v6656_v48 }
 0x236   : > { %v6837_v44 = vpop.permute.xlu2 %2784  ;;  %v6840_v25 = vsel %vm1406_vm4, %v2571_v9, %v2573_v13  ;;  %v6855_v9 = vpop.permute.xlu0 %2800 }
 0x237   : > { %8652 = vst [vmem:[#allocation67_spill] sm:$0xff] %v6840_v25  ;;  %v2443_v38 = vsel %vm912_vm0, %v8653_v7, %v2442_v41  ;;  %v2509_v42 = vmul.f32 %v6823_v30, %v2442_v41  ;;  %v6847_v3 = vadd.f32 %v6658_v33, %v1936_v32  ;;  %4397 = vmatmul.msk.bf16.gmra.mxu2 %vm863_vm3, %v8655_v55  ;;  %v2095_v7 = vrot.slane %v2093_v10, 1  ;;  %v4742_v32 = vld [vmem:[%s8180_s2 + $0x40] sm:$0xff] }
 0x238   : > { %v2508_v15 = vmul.f32 %v8657_v22, %v2443_v38  ;;  %4641 = vset.pattern.permute.xlu1 %v8579_v49  ;;  %v1096_v41 = vadd.f32 %v6675_v35, %v8658_v16  ;;  %v6864_v48 = vpop.f32.mrf.mxu0  ;;  %v8659_v38 = vld [vmem:[#allocation6_spill] sm:$0xff]  ;;  %v4743_v35 = vld [vmem:[%s8180_s2 + $0x48] sm:$0xff] }
 0x239   : > { %8654 = vst [vmem:[#allocation30_spill] sm:$0xff] %v6847_v3  ;;  %v2526_v33 = vpack.c.bf16 %v2509_v42, %v2509_v42  ;;  %3126 = vperm.xlu1 %4641, %v4742_v32   ;;  %4642 = vset.pattern.permute.xlu2 %v8579_v49  ;;  %v8660_v55 = vrot.slane %v8659_v38, 6  ;;  %v1530_v18 = vpop.f32.mrf.mxu2  ;;  %v2096_v16 = vsel %vm730_vm2, %v2091_v61, %v2095_v7  ;;  %v8712_v3 = vld [vmem:[#allocation65_spill] sm:$0xff] }
 0x23a   : > { %v2525_v59 = vpack.c.bf16 %v2508_v15, %v2507_v37  ;;  %3129 = vperm.xlu2 %4642, %v4743_v35   ;;  %v6873_v10 = vadd.f32 %v1530_v18, %v1096_v41  ;;  %v6881_v15 = vld [vmem:[%s8180_s2 + $0xb8] sm:$0xff] }
 0x23b   : > { %v1369_v22 = vmul.f32 %v8656_v2, %v8660_v55  ;;  %v2577_v20 = vrot.slane %v2526_v33, 1  ;;  %v6875_v42 = vpop.f32.mrf.mxu1  ;;  %4659 = vset.pattern.permute.xlu0 %v8579_v49  ;;  %v8661_v33 = vld [vmem:[#allocation35_spill] sm:$0xff] }
 0x23c   : > { %v1867_v32 = vpop.f32.mrf.mxu3  ;;  %3171 = vperm.xlu0 %4659, %v6881_v15   ;;  %v2575_v37 = vrot.slane %v2525_v59, 1  ;;  %4430 = vmatmul.msk.bf16.gmra.mxu0 %vm863_vm3, %v2096_v16  ;;  %v8667_v16 = vld [vmem:[#allocation3_spill] sm:$0xff] }
 0x23d   : > { %v1937_v38 = vadd.f32 %v1867_v32, %v6604_v0  ;;  %v6885_v55 = vpop.permute.xlu1 %2760  ;;  %v1386_v61 = vpack.c.bf16 %v1369_v22, %v1369_v22  ;;  %v8665_v0 = vld [vmem:[#allocation81_spill] sm:$0xff]  ;;  %v8666_v22 = vld [vmem:[#allocation24_spill] sm:$0xff] }
 0x23e   : > { %v6888_v41 = vpop.permute.xlu2 %2796  ;;  %4434 = vmatmul.msk.bf16.vlgmr.msra.gmra.mxu1 %vm863_vm3, %v8661_v33  ;;  %v6893_v18 = vsel %vm1406_vm4, %v2573_v13, %v2575_v37  ;;  %v6896_v2 = vsel %vm1406_vm4, %v2575_v37, %v2577_v20  ;;  %v1098_v32 = vadd.f32 %v6719_v29, %v8665_v0  ;;  %v8668_v17 = vpack.c.bf16 %v8666_v22, %v8667_v16  ;;  %v2813_v37 = vpop.permute.xlu0 %2812  ;;  %v4747_v16 = vld [vmem:[%s5127_s6 + $0x80] sm:$0xff]  }
 0x23f   : > { %8662 = vst [vmem:[#allocation16_spill] sm:$0xff] %v6893_v18  ;;  %v6899_v59 = vadd.f32 %v6714_v51, %v1937_v38  ;;  %v1438_v13 = vrot.slane %v1386_v61, 1  ;;  %v4745_v51 = vld [vmem:[%s8180_s2 + $0x50] sm:$0xff]  ;;  %v6927_v22 = vmul.f32 %v8520_v57, %v2813_v37  ;;  %v8670_v18 = vld [vmem:[#allocation15_spill] sm:$0xff]  ;;  %v8672_v37 = vld [vmem:[#allocation9_spill] sm:$0xff] }
 0x240   : > { %8663 = vst [vmem:[#allocation13_spill] sm:$0xff] %v6896_v2  ;;  %v6908_v33 = vpop.f32.mrf.mxu0  ;;  %v1101_v56 = vadd.f32 %v6773_v39, %v8672_v37 }
 0x241   : > { %8664 = vst [vmem:[#allocation23_spill] sm:$0xff] %v6899_v59  ;;  %4644 = vset.pattern.permute.xlu1 %v8590_v23  ;;  %4412 = vmatmul.msk.bf16.gmra.mxu3 %vm863_vm3, %v8668_v17  ;;  %v1532_v20 = vpop.f32.mrf.mxu2  ;;  %v6920_v17 = vld [vmem:[%s8180_s2 + $0xc8] sm:$0xff]  ;;  %v1439_v28 = vsel %vm1406_vm4, %v8670_v18, %v1438_v13 }
 0x242   : > { %8669 = vst [vmem:[#allocation85_spill] sm:$0xff] %v6908_v33  ;;  %3677 = vperm.xlu1 %4644, %v4743_v35   ;;  %3132 = vperm.xlu2 %4642, %v4745_v51   ;;  %v6913_v29 = vadd.f32 %v1532_v20, %v1098_v32  ;;  %v2097_v32 = vshrl.u32 %v6834_v34, 16  ;;  %v2101_v20 = vshll.u32 %v4747_v16, 16 }
 0x243   : > { %v6915_v38 = vpop.f32.mrf.mxu1 }
 0x244   : > { %v1870_v0 = vpop.f32.mrf.mxu3  ;;  %3177 = vperm.xlu0 %4659, %v6920_v17  }
 0x245   : > { %v1938_v35 = vadd.f32 %v1870_v0, %v6673_v6  ;;  %v6924_v61 = vpop.permute.xlu1 %2768  ;;  %v2099_v6 = vor.u32 %v2097_v32, %v2095_v7  ;;  %v2103_v0 = vrot.slane %v2101_v20, 1  ;;  %v8675_v32 = vld [vmem:[#allocation39_spill] sm:$0xff] }
 0x246   : > { %v2809_v2 = vpop.permute.xlu2 %2808  ;;  %v2880_v20 = vmul.f32 %v8675_v32, %v6688_v1 }
 0x247   : > { %v6934_v33 = vmul.f32 %v8522_v21, %v2809_v2  ;;  %v6937_v25 = vadd.f32 %v6766_v5, %v1938_v35  ;;  %4398 = vmatmul.msk.bf16.gmra.mxu2 %vm863_vm3, %v1439_v28  ;;  %v2104_v5 = vsel %vm730_vm2, %v2099_v6, %v2103_v0  ;;  %v4748_v28 = vld [vmem:[%s8180_s2 + $0x58] sm:$0xff]  ;;  %v8676_v6 = vld [vmem:[#allocation88_spill] sm:$0xff] }
 0x248   : > { %v6946_v2 = vpop.f32.mrf.mxu0  ;;  %v1103_v37 = vadd.f32 %v6821_v12, %v8676_v6  ;;  %v4750_v12 = vld [vmem:[%s8180_s2 + $0x68] sm:$0xff] }
 0x249   : > { %8671 = vst [vmem:[#allocation82_spill] sm:$0xff] %v6937_v25  ;;  %v1535_v27 = vpop.f32.mrf.mxu2 }
 0x24a   : > { %4645 = vset.pattern.permute.xlu1 %v8579_v49  ;;  %4646 = vset.pattern.permute.xlu2 %v8590_v23  ;;  %v6949_v18 = vadd.f32 %v1535_v27, %v1101_v56  ;;  %v6966_v27 = vld [vmem:[%s8180_s2 + $0xc0] sm:$0xff] }
 0x24b   : > { %3135 = vperm.xlu1 %4645, %v4748_v28   ;;  %v6954_v39 = vpop.f32.mrf.mxu1  ;;  %3680 = vperm.xlu2 %4646, %v4745_v51   ;;  %v8674_v51 = vld [vmem:[#allocation38_spill] sm:$0xff] }
 0x24c   : > { %v1872_v7 = vpop.f32.mrf.mxu3  ;;  %4666 = vset.pattern.permute.xlu0 %v8590_v23  ;;  %4431 = vmatmul.msk.bf16.gmra.mxu0 %vm863_vm3, %v2104_v5  ;;  %v8677_v5 = vld [vmem:[#allocation91_spill] sm:$0xff]  ;;  %v8678_v28 = vld [vmem:[#allocation90_spill] sm:$0xff] }
 0x24d   : > { %v6958_v13 = vadd.f32 %v1872_v7, %v6717_v36  ;;  %v6960_v35 = vpop.permute.xlu1 %2780  ;;  %3722 = vperm.xlu0 %4666, %v6966_v27   ;;  %v2879_v36 = vmul.f32 %v8674_v51, %v6682_v63  ;;  %v8679_v7 = vpack.c.bf16 %v8677_v5, %v8678_v28  ;;  %v1978_v63 = vpack.c.bf16 %v6823_v30, %v6823_v30 }
 0x24e   : > { %v6969_v56 = vpop.permute.xlu2 %2820  ;;  %4435 = vmatmul.msk.bf16.gmra.mxu1 %vm863_vm3, %v6404_v53 }
 0x24f   : > { %8673 = vst [vmem:[#allocation68_spill] sm:$0xff] %v6958_v13  ;;  %v2911_v6 = vpack.c.bf16 %v2880_v20, %v2879_v36  ;;  %v2109_v28 = vshll.u32 %v1978_v63, 16  ;;  %v8684_v63 = vld [vmem:[#allocation18_spill] sm:$0xff] }
 0x250   : > { %v6983_v24 = vpop.f32.mrf.mxu0 }
 0x251   : > { %4413 = vmatmul.msk.bf16.gmra.mxu3 %vm863_vm3, %v8679_v7  ;;  %v1537_v34 = vpop.f32.mrf.mxu2  ;;  %8680 = vst [vmem:[#allocation32_spill] sm:$0xff] %v6983_v24  ;;  %v7000_v7 = vmul.f32 %v5295_v50, %v6888_v41  ;;  %v1106_v41 = vadd.f32 %v6875_v42, %v8684_v63 }
 0x252   : > { %v6985_v13 = vadd.f32 %v1537_v34, %v1103_v37  ;;  %v2105_v37 = vshrl.u32 %v4747_v16, 16  ;;  %v2111_v16 = vrot.slane %v2109_v28, 1  ;;  %v8686_v28 = vld [vmem:[#allocation50_spill] sm:$0xff] }
 0x253   : > { %3138 = vperm.xlu1 %4645, %v6600_v40   ;;  %v6988_v53 = vpop.f32.mrf.mxu1  ;;  %4647 = vset.pattern.permute.xlu2 %v8579_v49  ;;  %v8681_v40 = vmov 6  }
 0x254   : > { %v1875_v1 = vpop.f32.mrf.mxu3  ;;  %3141 = vperm.xlu2 %4647, %v4750_v12  }
 0x255   : > { %v1940_v5 = vadd.f32 %v1875_v1, %v6771_v54  ;;  %v2793_v34 = vpop.permute.xlu1 %2792  ;;  %4671 = vset.pattern.permute.xlu0 %v8681_v40  ;;  %v2107_v54 = vor.u32 %v2105_v37, %v2103_v0  ;;  %v7033_v37 = vmul.f32 %v5269_v26, %v6855_v9  ;;  %v8688_v9 = vld [vmem:[#allocation47_spill] sm:$0xff] }
 0x256   : > { %v7003_v30 = vmul.f32 %v5288_v46, %v2793_v34  ;;  %2852 = vperm.xlu0 %4671, %v6920_v17   ;;  %v7006_v24 = vpop.permute.xlu2 %2832  ;;  %v2881_v63 = vmul.f32 %v8688_v9, %v6885_v55 }
 0x257   : > { %8682 = vst [vmem:[#allocation33_spill] sm:$0xff] %v7006_v24  ;;  %v7009_v36 = vadd.f32 %v6864_v48, %v1940_v5  ;;  %4451 = vmatmul.msk.bf16.vlgmr.msra.gmra.mxu2 %vm863_vm3, %v2911_v6  ;;  %v2112_v43 = vsel %vm730_vm2, %v2107_v54, %v2111_v16  ;;  %v4751_v6 = vld [vmem:[%s8180_s2 + $0x70] sm:$0xff] }
 0x258   : > { %v7016_v34 = vpop.f32.mrf.mxu0  ;;  %v7043_v16 = vld [vmem:[%s8180_s2 + $0xd0] sm:$0xff] }
 0x259   : > { %8683 = vst [vmem:[#allocation40_spill] sm:$0xff] %v7009_v36  ;;  %v1540_v1 = vpop.f32.mrf.mxu2  ;;  %v8694_v36 = vld [vmem:[#allocation46_spill] sm:$0xff] }
 0x25a   : > { %v7019_v25 = vadd.f32 %v1540_v1, %v1106_v41  ;;  %v8689_v41 = vld [vmem:[#allocation78_spill] sm:$0xff]  ;;  %v2882_v24 = vmul.f32 %v8694_v36, %v6732_v45 }
 0x25b   : > { %4648 = vset.pattern.permute.xlu1 %v8590_v23  ;;  %v7022_v48 = vpop.f32.mrf.mxu1  ;;  %v1108_v1 = vadd.f32 %v6915_v38, %v8689_v41 }
 0x25c   : > { %3689 = vperm.xlu1 %4648, %v4750_v12   ;;  %v1877_v0 = vpop.f32.mrf.mxu3  ;;  %3144 = vperm.xlu2 %4647, %v4751_v6   ;;  %v8687_v12 = vld [vmem:[#allocation71_spill] sm:$0xff]  ;;  %v2912_v38 = vpack.c.bf16 %v2882_v24, %v2881_v63 }
 0x25d   : > { %v7028_v42 = vadd.f32 %v1877_v0, %v6819_v58  ;;  %v2805_v5 = vpop.permute.xlu1 %2804  ;;  %4432 = vmatmul.msk.bf16.gmra.mxu0 %vm863_vm3, %v2112_v43  ;;  %v8690_v0 = vld [vmem:[#allocation4_spill] sm:$0xff]  ;;  %v7084_v24 = vld [vmem:[%s8180_s2 + $0xe8] sm:$0xff] }
 0x25e   : > { %v7036_v54 = vmul.f32 %v8686_v28, %v2805_v5  ;;  %4436 = vmatmul.msk.bf16.gmra.mxu1 %vm863_vm3, %v8687_v12  ;;  %2856 = vperm.xlu0 %4671, %v7043_v16   ;;  %v8691_v5 = vld [vmem:[#allocation95_spill] sm:$0xff]  ;;  %8700 = vst [vmem:[#allocation70_spill] sm:$0xff] %v7084_v24 }
 0x25f   : > { %8685 = vst [vmem:[#allocation12_spill] sm:$0xff] %v7028_v42  ;;  %v7046_v58 = vpop.permute.xlu2 %3108  ;;  %v8692_v12 = vpack.c.bf16 %v8690_v0, %v8691_v5  ;;  %v8695_v5 = vld [vmem:[#allocation54_spill] sm:$0xff] }
 0x260   : > { %v7058_v42 = vpop.f32.mrf.mxu0 }
 0x261   : > { %4414 = vmatmul.msk.bf16.gmra.mxu3 %vm863_vm3, %v8692_v12  ;;  %v1542_v20 = vpop.f32.mrf.mxu2  ;;  %8693 = vst [vmem:[#allocation69_spill] sm:$0xff] %v7058_v42  ;;  %v7071_v12 = vmul.f32 %v8695_v5, %v6969_v56  ;;  %v8697_v42 = vld [vmem:[#allocation53_spill] sm:$0xff]  ;;  %v8701_v56 = vld [vmem:[#allocation22_spill] sm:$0xff] }
 0x262   : > { %v7062_v59 = vadd.f32 %v1542_v20, %v1108_v1  ;;  %v2825_v1 = vpop.permute.xlu0 %2824 }
 0x263   : > { %v7064_v43 = vpop.f32.mrf.mxu1  ;;  %8696 = vst [vmem:[#allocation94_spill] sm:$0xff] %v7071_v12 }
 0x264   : > { %3692 = vperm.xlu1 %4648, %v4751_v6   ;;  %v1880_v55 = vpop.f32.mrf.mxu3  ;;  %4650 = vset.pattern.permute.xlu2 %v8590_v23  ;;  %v1111_v6 = vadd.f32 %v6954_v39, %v8701_v56  ;;  %v8703_v56 = vld [vmem:[#allocation60_spill] sm:$0xff] }
 0x265   : > { %v1942_v41 = vadd.f32 %v1880_v55, %v6873_v10  ;;  %v2817_v0 = vpop.permute.xlu1 %2816  ;;  %3695 = vperm.xlu2 %4650, %v6668_v31   ;;  %v4754_v31 = vld [vmem:[%s8180_s2 + $0x80] sm:$0xff] }
 0x266   : > { %v7074_v45 = vmul.f32 %v8697_v42, %v2817_v0  ;;  %4678 = vset.pattern.permute.xlu0 %v8590_v23 }
 0x267   : > { %v7078_v20 = vadd.f32 %v6946_v2, %v1942_v41  ;;  %4452 = vmatmul.msk.bf16.gmra.mxu2 %vm863_vm3, %v2912_v38  ;;  %3737 = vperm.xlu0 %4678, %v7084_v24  }
 0x268   : > { %8698 = vst [vmem:[#allocation84_spill] sm:$0xff] %v7074_v45  ;;  %v7089_v10 = vpop.permute.xlu2 %3650  ;;  %v7093_v2 = vpop.f32.mrf.mxu0 }
 0x269   : > { %8699 = vst [vmem:[#allocation73_spill] sm:$0xff] %v7078_v20  ;;  %v1545_v63 = vpop.f32.mrf.mxu2  ;;  %v7108_v20 = vmul.f32 %v8703_v56, %v2825_v1 }
 0x26a   : > { %v7095_v55 = vadd.f32 %v1545_v63, %v1111_v6  ;;  %v8705_v6 = vld [vmem:[#allocation59_spill] sm:$0xff]  ;;  %v3103_v1 = vpop.permute.xlu0 %3102 }
 0x26b   : > { %v7097_v38 = vpop.f32.mrf.mxu1  ;;  %8704 = vst [vmem:[#allocation6_spill] sm:$0xff] %v7108_v20 }
 0x26c   : > { %4651 = vset.pattern.permute.xlu1 %v8579_v49  ;;  %v1882_v41 = vpop.f32.mrf.mxu3 }
 0x26d   : > { %v7101_v0 = vadd.f32 %v1882_v41, %v6913_v29  ;;  %3150 = vperm.xlu1 %4651, %v4754_v31   ;;  %v2829_v39 = vpop.permute.xlu1 %2828  ;;  %4652 = vset.pattern.permute.xlu2 %v8579_v49  ;;  %v4755_v29 = vld [vmem:[%s8180_s2 + $0x88] sm:$0xff]  ;;  %v7121_v31 = vld [vmem:[%s8180_s2 + $0xf0] sm:$0xff] }
 0x26e   : > { %v7111_v63 = vmul.f32 %v8705_v6, %v2829_v39  ;;  %4437 = vmatmul.msk.bf16.gmra.mxu1 %vm863_vm3, %v8707_v62  ;;  %3153 = vperm.xlu2 %4652, %v4755_v29   ;;  %8708 = vst [vmem:[#allocation81_spill] sm:$0xff] %v7121_v31  ;;  %v8709_v39 = vld [vmem:[#allocation41_spill] sm:$0xff]  ;;  %v8711_v6 = vld [vmem:[#allocation14_spill] sm:$0xff] }
 0x26f   : > { %8702 = vst [vmem:[#allocation76_spill] sm:$0xff] %v7101_v0  ;;  %3740 = vperm.xlu0 %4678, %v7121_v31   ;;  %v2883_v62 = vmul.f32 %v8709_v39, %v6924_v61  ;;  %v8710_v0 = vld [vmem:[#allocation86_spill] sm:$0xff]  ;;  %v8713_v5 = vpack.c.bf16 %v8711_v6, %v8712_v3  ;;  %v3197_v61 = vrot.slane %v3103_v1, 7 }
 0x270   : > { %8706 = vst [vmem:[#allocation35_spill] sm:$0xff] %v7111_v63  ;;  %v7126_v41 = vpop.permute.xlu2 %3659  ;;  %v1113_v56 = vadd.f32 %v6988_v53, %v8710_v0  ;;  %v7136_v60 = vpop.f32.mrf.mxu0  ;;  %v8715_v31 = vld [vmem:[#allocation42_spill] sm:$0xff] }
 0x271   : > { %4415 = vmatmul.msk.bf16.gmra.mxu3 %vm863_vm3, %v8713_v5  ;;  %v1547_v42 = vpop.f32.mrf.mxu2  ;;  %8714 = vst [vmem:[#allocation24_spill] sm:$0xff] %v7136_v60  ;;  %v2884_v8 = vmul.f32 %v8715_v31, %v6787_v11  ;;  %v4757_v5 = vld [vmem:[%s8180_s2 + $0x90] sm:$0xff] }
 0x272   : > { %v7140_v20 = vadd.f32 %v1547_v42, %v1113_v56 }
 0x273   : > { %v7142_v63 = vpop.f32.mrf.mxu1  ;;  %v2913_v57 = vpack.c.bf16 %v2884_v8, %v2883_v62  ;;  %v3293_v8 = vmul.f32 %v8674_v51, %v3197_v61 }
 0x274   : > { %v1885_v19 = vpop.f32.mrf.mxu3 }
 0x275   : > { %v1944_v53 = vadd.f32 %v1885_v19, %v6949_v18  ;;  %4654 = vset.pattern.permute.xlu1 %v8590_v23  ;;  %v7158_v19 = vld [vmem:[%s8180_s2 + $0xf8] sm:$0xff] }
 0x276   : > { %3701 = vperm.xlu1 %4654, %v4755_v29   ;;  %v3106_v3 = vpop.permute.xlu1 %3105  ;;  %3156 = vperm.xlu2 %4652, %v4757_v5   ;;  %8717 = vst [vmem:[#allocation15_spill] sm:$0xff] %v7158_v19  ;;  %v8718_v18 = vld [vmem:[#allocation21_spill] sm:$0xff]  ;;  %v3200_v29 = vrot.slane %v7046_v58, 7 }
 0x277   : > { %v7150_v11 = vadd.f32 %v7016_v34, %v1944_v53  ;;  %v3198_v42 = vrot.slane %v3106_v3, 7  ;;  %4453 = vmatmul.msk.bf16.gmra.mxu2 %vm863_vm3, %v2913_v57  ;;  %4684 = vset.pattern.permute.xlu0 %v8681_v40  ;;  %v1116_v0 = vadd.f32 %v7022_v48, %v8718_v18  ;;  %v3654_v18 = vpop.permute.xlu0 %3653 }
 0x278   : > { %2876 = vperm.xlu0 %4684, %v7158_v19   ;;  %v7172_v53 = vpop.f32.mrf.mxu0 }
 0x279   : > { %8716 = vst [vmem:[#allocation3_spill] sm:$0xff] %v7150_v11  ;;  %v3199_v34 = vsel %vm581_vm1, %v3197_v61, %v3198_v42  ;;  %v1550_v6 = vpop.f32.mrf.mxu2  ;;  %v8720_v61 = vld [vmem:[#allocation74_spill] sm:$0xff]  ;;  %v3201_v58 = vsel %vm581_vm1, %v3198_v42, %v3200_v29 }
 0x27a   : > { %v3294_v56 = vmul.f32 %v8675_v32, %v3199_v34  ;;  %v7165_v57 = vpop.permute.xlu2 %3117  ;;  %v7168_v1 = vadd.f32 %v1550_v6, %v1116_v0  ;;  %v8721_v34 = vld [vmem:[#allocation45_spill] sm:$0xff]  ;;  %v8722_v6 = vld [vmem:[#allocation43_spill] sm:$0xff]  ;;  %v3295_v19 = vmul.f32 %v8688_v9, %v3201_v58 }
 0x27b   : > { %v7170_v62 = vpop.f32.mrf.mxu1  ;;  %v2886_v42 = vmul.f32 %v8722_v6, %v6960_v35 }
 0x27c   : > { %v3326_v3 = vpack.c.bf16 %v3294_v56, %v3293_v8  ;;  %v1887_v60 = vpop.f32.mrf.mxu3  ;;  %v2885_v56 = vmul.f32 %v8721_v34, %v6738_v14 }
 0x27d   : > { %v7175_v11 = vadd.f32 %v1887_v60, %v6985_v13  ;;  %v3745_v60 = vrot.slane %v7089_v10, 6  ;;  %v3746_v13 = vrot.slane %v3654_v18, 6 }
 0x27e   : > { %4655 = vset.pattern.permute.xlu1 %v8579_v49  ;;  %v7178_v48 = vpop.permute.xlu1 %3111  ;;  %4438 = vmatmul.msk.bf16.gmra.mxu1 %vm863_vm3, %v8720_v61  ;;  %v3348_v8 = vshll.u32 %v3326_v3, 16  ;;  %v8723_v61 = vld [vmem:[#allocation93_spill] sm:$0xff]  ;;  %v3346_v58 = vshrl.u32 %v3326_v3, 16 }
 0x27f   : > { %8719 = vst [vmem:[#allocation9_spill] sm:$0xff] %v7175_v11  ;;  %3159 = vperm.xlu1 %4655, %v6780_v47   ;;  %v8346_v0 = vrot.slane %v7178_v48, 7  ;;  %4656 = vset.pattern.permute.xlu2 %v8590_v23  ;;  %v1118_v47 = vadd.f32 %v7064_v43, %v8723_v61  ;;  %v3747_v35 = vsel %vm912_vm0, %v3745_v60, %v3746_v13 }
 0x280   : > { %3704 = vperm.xlu2 %4656, %v4757_v5   ;;  %4685 = vset.pattern.permute.xlu0 %v8590_v23  ;;  %v3350_v45 = vrot.slane %v3348_v8, 1  ;;  %v2914_v61 = vpack.c.bf16 %v2886_v42, %v2885_v56  ;;  %v8725_v42 = vld [vmem:[#allocation34_spill] sm:$0xff] }
 0x281   : > { %v3203_v11 = vsel %vm581_vm1, %v3200_v29, %v8346_v0  ;;  %v1552_v5 = vpop.f32.mrf.mxu2  ;;  %v7209_v0 = vpop.f32.mrf.mxu0 }
 0x282   : > { %v3296_v10 = vmul.f32 %v8694_v36, %v3203_v11  ;;  %v7199_v18 = vadd.f32 %v1552_v5, %v1118_v47  ;;  %v7203_v14 = vpop.permute.xlu2 %3120  ;;  %8724 = vst [vmem:[#allocation38_spill] sm:$0xff] %v7209_v0  ;;  %v3841_v47 = vmul.f32 %v8674_v51, %v3745_v60  ;;  %v3842_v5 = vmul.f32 %v8675_v32, %v3747_v35  ;;  %v4759_v32 = vld [vmem:[%s8180_s2 + $0xa8] sm:$0xff] }
 0x283   : > { %v7201_v21 = vpop.f32.mrf.mxu1  ;;  %v3351_v8 = vor.u32 %v3350_v45, %v3346_v58  ;;  %v1121_v51 = vadd.f32 %v7097_v38, %v8725_v42  ;;  %v8728_v42 = vld [vmem:[#allocation48_spill] sm:$0xff] }
 0x284   : > { %v7206_v12 = vpack.c.bf16 %v3296_v10, %v3295_v19  ;;  %v1890_v43 = vpop.f32.mrf.mxu3  ;;  %v3874_v35 = vpack.c.bf16 %v3842_v5, %v3841_v47  ;;  %v8727_v5 = vld [vmem:[#allocation49_spill] sm:$0xff] }
 0x285   : > { %v1946_v29 = vadd.f32 %v1890_v43, %v7019_v25  ;;  %v8349_v25 = vrot.slane %v7126_v41, 6 }
 0x286   : > { %v3353_v11 = vshll.u32 %v7206_v12, 16  ;;  %v3910_v47 = vrot.slane %v3874_v35, 1 }
 0x287   : > { %v7215_v24 = vadd.f32 %v7093_v2, %v1946_v29  ;;  %3162 = vperm.xlu1 %4655, %v6828_v52   ;;  %4454 = vmatmul.msk.bf16.gmra.mxu2 %vm863_vm3, %v2914_v61  ;;  %v3657_v19 = vpop.permute.xlu1 %3656  ;;  %v7228_v52 = vpop.permute.xlu0 %3662 }
 0x288   : > { %v7219_v56 = vrot.slane %v3353_v11, 1  ;;  %v3748_v3 = vrot.slane %v3657_v19, 6  ;;  %4657 = vset.pattern.permute.xlu2 %v8579_v49 }
 0x289   : > { %3165 = vperm.xlu2 %4657, %v4759_v32   ;;  %v1555_v60 = vpop.f32.mrf.mxu2 }
 0x28a   : > { %v3749_v2 = vsel %vm912_vm0, %v3746_v13, %v3748_v3  ;;  %v3751_v45 = vsel %vm912_vm0, %v3748_v3, %v8349_v25  ;;  %v3356_v10 = vsel %vm730_vm2, %v3351_v8, %v7219_v56  ;;  %v7238_v61 = vadd.f32 %v1555_v60, %v1121_v51  ;;  %v8726_v3 = vld [vmem:[#allocation28_spill] sm:$0xff] }
 0x28b   : > { %v3843_v38 = vmul.f32 %v8688_v9, %v3749_v2  ;;  %v3844_v43 = vmul.f32 %v8694_v36, %v3751_v45  ;;  %v7240_v29 = vpop.f32.mrf.mxu1  ;;  %4468 = vmatmul.msk.bf16.vlgmr.msra.gmra.mxu3 %vm863_vm3, %v3356_v10  ;;  %v7243_v13 = vpop.permute.xlu2 %3671  ;;  %v2887_v8 = vmul.f32 %v8727_v5, %v6837_v44  ;;  %v2888_v51 = vmul.f32 %v8728_v42, %v6790_v4 }
 0x28c   : > { %v1892_v58 = vpop.f32.mrf.mxu3  ;;  %v7253_v36 = vpop.f32.mrf.mxu0  ;;  %v3206_v60 = vrot.slane %v7165_v57, 7 }
 0x28d   : > { %v3875_v11 = vpack.c.bf16 %v3844_v43, %v3843_v38  ;;  %v7246_v19 = vadd.f32 %v1892_v58, %v7062_v59  ;;  %v8729_v59 = vld [vmem:[#allocation25_spill] sm:$0xff]  ;;  %v7267_v38 = vld [vmem:[%s8180_s2 + $0xb0] sm:$0xff] }
 0x28e   : > { %4439 = vmatmul.msk.bf16.gmra.mxu1 %vm863_vm3, %v8726_v3  ;;  %v1123_v45 = vadd.f32 %v7142_v63, %v8729_v59  ;;  %v8730_v63 = vrot.slane %v7178_v48, 7  ;;  %v3752_v48 = vrot.slane %v7228_v52, 6 }
 0x28f   : > { %v7250_v9 = vrot.slane %v3875_v11, 1  ;;  %4658 = vset.pattern.permute.xlu1 %v8590_v23  ;;  %v7271_v4 = vpop.permute.xlu0 %3123 }
 0x290   : > { %3713 = vperm.xlu1 %4658, %v4759_v32   ;;  %v3115_v2 = vpop.permute.xlu1 %3114 }
 0x291   : > { %v3204_v10 = vrot.slane %v3115_v2, 7  ;;  %v3912_v35 = vsel %vm1406_vm4, %v3910_v47, %v7250_v9  ;;  %3168 = vperm.xlu2 %4657, %v7267_v38   ;;  %v1557_v44 = vpop.f32.mrf.mxu2 }
 0x292   : > { %4485 = vmatmul.msk.bf16.vlgmr.msra.gmra.mxu0 %vm863_vm3, %v3912_v35  ;;  %v7277_v58 = vadd.f32 %v1557_v44, %v1123_v45  ;;  %v2915_v35 = vpack.c.bf16 %v2888_v51, %v2887_v8  ;;  %v3210_v45 = vrot.slane %v7271_v4, 7  ;;  %v8732_v51 = vrot.slane %v7126_v41, 6  ;;  %v8738_v4 = vld [vmem:[#allocation5_spill] sm:$0xff] }
 0x293   : > { %v3205_v57 = vsel %vm581_vm1, %v8730_v63, %v3204_v10  ;;  %v3207_v43 = vsel %vm581_vm1, %v3204_v10, %v3206_v60  ;;  %v7279_v11 = vpop.f32.mrf.mxu1  ;;  %v3208_v10 = vrot.slane %v7203_v14, 7  ;;  %v3357_v63 = vshrl.u32 %v7206_v12, 16 }
 0x294   : > { %v3297_v3 = vmul.f32 %v8709_v39, %v3205_v57  ;;  %v3298_v47 = vmul.f32 %v8715_v31, %v3207_v43  ;;  %v1895_v2 = vpop.f32.mrf.mxu3  ;;  %v7283_v59 = vpop.permute.xlu2 %3129 }
 0x295   : > { %v1948_v25 = vadd.f32 %v1895_v2, %v7095_v55  ;;  %v8731_v55 = vld [vmem:[#allocation89_spill] sm:$0xff]  ;;  %v7301_v14 = vpop.f32.mrf.mxu0  ;;  %v3359_v43 = vor.u32 %v3357_v63, %v7219_v56  ;;  %v3209_v12 = vsel %vm581_vm1, %v3206_v60, %v3208_v10 }
 0x296   : > { %v7287_v0 = vpack.c.bf16 %v3298_v47, %v3297_v3  ;;  %v1126_v52 = vadd.f32 %v7170_v62, %v8731_v55  ;;  %v3211_v62 = vsel %vm581_vm1, %v3208_v10, %v3210_v45  ;;  %v3299_v10 = vmul.f32 %v8721_v34, %v3209_v12 }
 0x297   : > { %v7292_v44 = vadd.f32 %v7172_v53, %v1948_v25  ;;  %4455 = vmatmul.msk.bf16.gmra.mxu2 %vm863_vm3, %v2915_v35  ;;  %v3753_v53 = vsel %vm912_vm0, %v8732_v51, %v3752_v48  ;;  %v8733_v51 = vld [vmem:[#allocation75_spill] sm:$0xff] }
 0x298   : > { %4660 = vset.pattern.permute.xlu1 %v8681_v40  ;;  %v3361_v8 = vshll.u32 %v7287_v0, 16  ;;  %v3845_v60 = vmul.f32 %v8709_v39, %v3753_v53 }
 0x299   : > { %2836 = vperm.xlu1 %4660, %v4759_v32   ;;  %4661 = vset.pattern.permute.xlu2 %v8590_v23  ;;  %v1560_v57 = vpop.f32.mrf.mxu2 }
 0x29a   : > { %v3666_v25 = vpop.permute.xlu1 %3665  ;;  %v3363_v3 = vrot.slane %v3361_v8, 1  ;;  %3716 = vperm.xlu2 %4661, %v7267_v38   ;;  %v7312_v47 = vadd.f32 %v1560_v57, %v1126_v52  ;;  %v3300_v8 = vmul.f32 %v8722_v6, %v3211_v62  ;;  %v8734_v57 = vld [vmem:[#allocation92_spill] sm:$0xff] }
 0x29b   : > { %v3754_v32 = vrot.slane %v3666_v25, 6  ;;  %v7314_v2 = vpop.f32.mrf.mxu1 }
 0x29c   : > { %v1897_v41 = vpop.f32.mrf.mxu3  ;;  %v3364_v35 = vsel %vm730_vm2, %v3359_v43, %v3363_v3  ;;  %v7317_v55 = vpop.permute.xlu2 %3132  ;;  %v7334_v43 = vpack.c.bf16 %v3300_v8, %v3299_v10 }
 0x29d   : > { %v3755_v56 = vsel %vm912_vm0, %v3752_v48, %v3754_v32  ;;  %v7321_v63 = vadd.f32 %v1897_v41, %v7140_v20  ;;  %4469 = vmatmul.msk.bf16.gmra.mxu3 %vm863_vm3, %v3364_v35  ;;  %v1128_v48 = vadd.f32 %v7201_v21, %v8734_v57  ;;  %v3758_v20 = vrot.slane %v7243_v13, 6 }
 0x29e   : > { %v3846_v52 = vmul.f32 %v8715_v31, %v3755_v56  ;;  %4440 = vmatmul.msk.bf16.gmra.mxu1 %vm863_vm3, %v8733_v51  ;;  %v2228_v56 = vpop.f32.mrf.mxu0  ;;  %v3369_v51 = vshll.u32 %v7334_v43, 16 }
 0x2a0   : > { %v3876_v25 = vpack.c.bf16 %v3846_v52, %v3845_v60  ;;  %v3365_v52 = vshrl.u32 %v7287_v0, 16 }
 0x2a1   : > { %4662 = vset.pattern.permute.xlu1 %v8590_v23  ;;  %v1562_v53 = vpop.f32.mrf.mxu2 }
 0x2a2   : > { %3719 = vperm.xlu1 %4662, %v6881_v15   ;;  %v3669_v39 = vpop.permute.xlu1 %3668  ;;  %v3913_v12 = vrot.slane %v3876_v25, 1  ;;  %4663 = vset.pattern.permute.xlu2 %v8579_v49  ;;  %v7338_v62 = vadd.f32 %v1562_v53, %v1128_v48  ;;  %v3367_v48 = vor.u32 %v3365_v52, %v3363_v3  ;;  %v3214_v53 = vrot.slane %v7283_v59, 7  ;;  %v3675_v52 = vpop.permute.xlu0 %3674 }
 0x2a3   : > { %v3756_v31 = vrot.slane %v3669_v39, 6  ;;  %v7340_v41 = vpop.f32.mrf.mxu1  ;;  %3174 = vperm.xlu2 %4663, %v6966_v27   ;;  %v8736_v39 = vld [vmem:[#allocation2_spill] sm:$0xff] }
 0x2a4   : > { %v1900_v21 = vpop.f32.mrf.mxu3  ;;  %v3914_v35 = vsel %vm1406_vm4, %v7250_v9, %v3913_v12  ;;  %v8735_v9 = vpack.c.bf16 %v7000_v7, %v7003_v30  ;;  %v1131_v0 = vadd.f32 %v7240_v29, %v8736_v39 }
 0x2a5   : > { %v3757_v60 = vsel %vm912_vm0, %v3754_v32, %v3756_v31  ;;  %v3759_v10 = vsel %vm912_vm0, %v3756_v31, %v3758_v20  ;;  %v1950_v8 = vadd.f32 %v1900_v21, %v7168_v1  ;;  %4486 = vmatmul.msk.bf16.gmra.mxu0 %vm863_vm3, %v3914_v35  ;;  %v7353_v25 = vpop.permute.xlu2 %3680 }
 0x2a6   : > { %v3847_v32 = vmul.f32 %v8721_v34, %v3757_v60  ;;  %v3848_v1 = vmul.f32 %v8722_v6, %v3759_v10  ;;  %v8737_v10 = vld [vmem:[#allocation37_spill] sm:$0xff] }
 0x2a7   : > { %v7356_v57 = vadd.f32 %v7253_v36, %v1950_v8  ;;  %4456 = vmatmul.msk.bf16.gmra.mxu2 %vm863_vm3, %v8735_v9  ;;  %v3371_v36 = vrot.slane %v3369_v51, 1  ;;  %v7388_v8 = vpop.f32.mrf.mxu0 }
 0x2a8   : > { %v3877_v34 = vpack.c.bf16 %v3848_v1, %v3847_v32 }
 0x2a9   : > { %v3372_v29 = vsel %vm730_vm2, %v3367_v48, %v3371_v36  ;;  %v3760_v48 = vrot.slane %v3675_v52, 6 }
 0x2aa   : > { %4664 = vset.pattern.permute.xlu1 %v8681_v40  ;;  %v1565_v31 = vpop.f32.mrf.mxu2  ;;  %v7392_v51 = vrot.slane %v3877_v34, 1 }
 0x2ab   : > { %v7368_v21 = vadd.f32 %v1565_v31, %v1131_v0  ;;  %2840 = vperm.xlu1 %4664, %v7267_v38   ;;  %v3127_v30 = vpop.permute.xlu1 %3126  ;;  %v7371_v7 = vpop.f32.mrf.mxu1  ;;  %4665 = vset.pattern.permute.xlu2 %v8681_v40 }
 0x2ac   : > { %v3212_v6 = vrot.slane %v3127_v30, 7  ;;  %v1902_v3 = vpop.f32.mrf.mxu3  ;;  %2844 = vperm.xlu2 %4665, %v6881_v15   ;;  %v3916_v34 = vsel %vm1406_vm4, %v3913_v12, %v7392_v51 }
 0x2ad   : > { %v7377_v35 = vadd.f32 %v1902_v3, %v7199_v18  ;;  %4470 = vmatmul.msk.bf16.gmra.mxu3 %vm863_vm3, %v3372_v29  ;;  %v3373_v29 = vshrl.u32 %v7334_v43, 16 }
 0x2ae   : > { %v3213_v38 = vsel %vm581_vm1, %v3210_v45, %v3212_v6  ;;  %v3215_v60 = vsel %vm581_vm1, %v3212_v6, %v3214_v53  ;;  %4441 = vmatmul.msk.bf16.gmra.mxu1 %vm863_vm3, %v8737_v10  ;;  %v7394_v9 = vpop.permute.xlu2 %3141  ;;  %v1133_v45 = vadd.f32 %v7279_v11, %v8738_v4 }
 0x2af   : > { %v3301_v15 = vmul.f32 %v8727_v5, %v3213_v38  ;;  %v3302_v18 = vmul.f32 %v8728_v42, %v3215_v60  ;;  %v8739_v60 = vpack.c.bf16 %v7036_v54, %v7033_v37 }
 0x2b1   : > { %v7398_v32 = vpack.c.bf16 %v3302_v18, %v3301_v15  ;;  %v2233_v15 = vpop.f32.mrf.mxu0  ;;  %v8740_v18 = vld [vmem:[#allocation8_spill] sm:$0xff] }
 0x2b2   : > { %v1567_v1 = vpop.f32.mrf.mxu2  ;;  %v1136_v43 = vadd.f32 %v7314_v2, %v8740_v18 }
 0x2b3   : > { %v7400_v39 = vadd.f32 %v1567_v1, %v1133_v45  ;;  %4667 = vset.pattern.permute.xlu1 %v8590_v23  ;;  %v7403_v0 = vpop.f32.mrf.mxu1  ;;  %v3377_v11 = vshll.u32 %v7398_v32, 16  ;;  %v8741_v1 = vld [vmem:[#allocation19_spill] sm:$0xff] }
 0x2b4   : > { %3725 = vperm.xlu1 %4667, %v6920_v17   ;;  %v3678_v31 = vpop.permute.xlu1 %3677  ;;  %v1905_v30 = vpop.f32.mrf.mxu3  ;;  %4668 = vset.pattern.permute.xlu2 %v8579_v49  ;;  %v3761_v17 = vsel %vm912_vm0, %v3758_v20, %v3760_v48  ;;  %v3216_v20 = vrot.slane %v7317_v55, 7 }
 0x2b5   : > { %v3762_v6 = vrot.slane %v3678_v31, 6  ;;  %v1952_v3 = vadd.f32 %v1905_v30, %v7238_v61  ;;  %4487 = vmatmul.msk.bf16.gmra.mxu0 %vm863_vm3, %v3916_v34  ;;  %3180 = vperm.xlu2 %4668, %v7043_v16   ;;  %v7425_v10 = vrot.slane %v3377_v11, 1  ;;  %v3849_v13 = vmul.f32 %v8727_v5, %v3761_v17  ;;  %v7441_v5 = vpop.permute.xlu0 %3683  ;;  %v8742_v11 = vld [vmem:[#allocation79_spill] sm:$0xff] }
 0x2b6   : > { %v7431_v4 = vpop.permute.xlu2 %3144  ;;  %v3217_v30 = vsel %vm581_vm1, %v3214_v53, %v3216_v20 }
 0x2b7   : > { %v3763_v38 = vsel %vm912_vm0, %v3760_v48, %v3762_v6  ;;  %v7418_v12 = vadd.f32 %v2228_v56, %v1952_v3  ;;  %4457 = vmatmul.msk.bf16.gmra.mxu2 %vm863_vm3, %v8739_v60  ;;  %v3375_v56 = vor.u32 %v3373_v29, %v3371_v36  ;;  %v7449_v36 = vld [vmem:[%s8180_s2 + $0xd8] sm:$0xff]  ;;  %v3764_v3 = vrot.slane %v7353_v25, 6 }
 0x2b8   : > { %v3850_v61 = vmul.f32 %v8728_v42, %v3763_v38  ;;  %v3303_v59 = vmul.f32 %v5288_v46, %v3217_v30 }
 0x2b9   : > { %v3380_v2 = vsel %vm730_vm2, %v3375_v56, %v7425_v10  ;;  %v7469_v60 = vpop.f32.mrf.mxu0 }
 0x2ba   : > { %v1570_v52 = vpop.f32.mrf.mxu2  ;;  %v3878_v54 = vpack.c.bf16 %v3850_v61, %v3849_v13  ;;  %v8743_v13 = vld [vmem:[#allocation29_spill] sm:$0xff] }
 0x2bb   : > { %v7433_v45 = vadd.f32 %v1570_v52, %v1136_v43  ;;  %v2639_v37 = vpop.f32.mrf.mxu1 }
 0x2bc   : > { %4669 = vset.pattern.permute.xlu1 %v8579_v49  ;;  %v1907_v42 = vpop.f32.mrf.mxu3  ;;  %v7437_v48 = vadd.f32 %v2639_v37, %v8741_v1  ;;  %v7463_v17 = vrot.slane %v3878_v54, 1  ;;  %v3222_v37 = vrot.slane %v7394_v9, 7  ;;  %v8744_v9 = vpack.c.bf16 %v6927_v22, %v6934_v33 }
 0x2bd   : > { %v7444_v55 = vadd.f32 %v1907_v42, %v7277_v58  ;;  %3183 = vperm.xlu1 %4669, %v7449_v36   ;;  %v3136_v31 = vpop.permute.xlu1 %3135  ;;  %4471 = vmatmul.msk.bf16.gmra.mxu3 %vm863_vm3, %v3380_v2  ;;  %v3766_v58 = vrot.slane %v7441_v5, 6 }
 0x2be   : > { %v3218_v34 = vrot.slane %v3136_v31, 7  ;;  %4442 = vmatmul.msk.bf16.gmra.mxu1 %vm863_vm3, %v8742_v11  ;;  %4670 = vset.pattern.permute.xlu2 %v8681_v40  ;;  %v3918_v52 = vsel %vm1406_vm4, %v7392_v51, %v7463_v17  ;;  %v8745_v11 = vld [vmem:[#allocation26_spill] sm:$0xff] }
 0x2bf   : > { %2848 = vperm.xlu2 %4670, %v6966_v27   ;;  %v3765_v27 = vsel %vm912_vm0, %v3762_v6, %v3764_v3  ;;  %v3767_v25 = vsel %vm912_vm0, %v3764_v3, %v3766_v58  ;;  %v7483_v56 = vpop.permute.xlu2 %3695 }
 0x2c0   : > { %v3219_v29 = vsel %vm581_vm1, %v3216_v20, %v3218_v34  ;;  %v3851_v2 = vmul.f32 %v5288_v46, %v3765_v27  ;;  %v3852_v51 = vmul.f32 %v5295_v50, %v3767_v25  ;;  %v3687_v46 = vpop.permute.xlu0 %3686  ;;  %v8746_v27 = vld [vmem:[#allocation87_spill] sm:$0xff] }
 0x2c1   : > { %v3304_v53 = vmul.f32 %v5295_v50, %v3219_v29 }
 0x2c2   : > { %v7467_v38 = vpop.f32.mrf.mxu2  ;;  %v3879_v22 = vpack.c.bf16 %v3852_v51, %v3851_v2  ;;  %v8748_v2 = vld [vmem:[#allocation70_spill] sm:$0xff] }
 0x2c3   : > { %v7471_v61 = vpack.c.bf16 %v3304_v53, %v3303_v59  ;;  %v2641_v18 = vpop.f32.mrf.mxu1 }
 0x2c4   : > { %v1910_v43 = vpop.f32.mrf.mxu3  ;;  %v7478_v20 = vadd.f32 %v2641_v18, %v8743_v13  ;;  %v8747_v13 = vld [vmem:[#allocation80_spill] sm:$0xff] }
 0x2c5   : > { %v1954_v54 = vadd.f32 %v1910_v43, %v7312_v47  ;;  %4672 = vset.pattern.permute.xlu1 %v8590_v23  ;;  %v3139_v6 = vpop.permute.xlu1 %3138  ;;  %4488 = vmatmul.msk.bf16.gmra.mxu0 %vm863_vm3, %v3918_v52  ;;  %v3385_v42 = vshll.u32 %v7471_v61, 16  ;;  %v3381_v47 = vshrl.u32 %v7398_v32, 16 }
 0x2c6   : > { %v3220_v1 = vrot.slane %v3139_v6, 7  ;;  %3728 = vperm.xlu1 %4672, %v7043_v16   ;;  %v1141_v16 = vadd.f32 %v7371_v7, %v8745_v11  ;;  %v7535_v6 = vrot.slane %v3879_v22, 1 }
 0x2c7   : > { %v7493_v31 = vadd.f32 %v2233_v15, %v1954_v54  ;;  %4458 = vmatmul.msk.bf16.gmra.mxu2 %vm863_vm3, %v8744_v9  ;;  %4673 = vset.pattern.permute.xlu2 %v8590_v23  ;;  %v3387_v30 = vrot.slane %v3385_v42, 1  ;;  %v3383_v33 = vor.u32 %v3381_v47, %v7425_v10  ;;  %v7529_v54 = vld [vmem:[%s8180_s2 + $0xe0] sm:$0xff]  ;;  %v3768_v9 = vrot.slane %v3687_v46, 6 }
 0x2c8   : > { %3731 = vperm.xlu2 %4673, %v7449_v36   ;;  %v3221_v50 = vsel %vm581_vm1, %v3218_v34, %v3220_v1  ;;  %v3223_v15 = vsel %vm581_vm1, %v3220_v1, %v3222_v37  ;;  %v2238_v34 = vpop.f32.mrf.mxu0  ;;  %v7524_v52 = vpop.permute.xlu2 %3153  ;;  %v3224_v47 = vrot.slane %v7431_v4, 7 }
 0x2c9   : > { %v3305_v53 = vmul.f32 %v5269_v26, %v3221_v50  ;;  %v3306_v32 = vmul.f32 %v8686_v28, %v3223_v15  ;;  %v3388_v7 = vsel %vm730_vm2, %v3383_v33, %v3387_v30  ;;  %v7537_v42 = vpop.permute.xlu0 %3147  ;;  %v8749_v15 = vld [vmem:[#allocation77_spill] sm:$0xff]  ;;  %v3920_v33 = vsel %vm1406_vm4, %v7463_v17, %v7535_v6 }
 0x2ca   : > { %v1575_v3 = vpop.f32.mrf.mxu2 }
 0x2cb   : > { %v7507_v29 = vadd.f32 %v1575_v3, %v1141_v16  ;;  %v2644_v59 = vpop.f32.mrf.mxu1  ;;  %v8350_v16 = vrot.slane %v7537_v42, 7 }
 0x2cc   : > { %v1912_v18 = vpop.f32.mrf.mxu3  ;;  %v7512_v25 = vadd.f32 %v2644_v59, %v8746_v27  ;;  %v8751_v27 = vld [vmem:[#allocation94_spill] sm:$0xff] }
 0x2cd   : > { %v7516_v43 = vadd.f32 %v1912_v18, %v7338_v62  ;;  %4472 = vmatmul.msk.bf16.gmra.mxu3 %vm863_vm3, %v3388_v7  ;;  %v7532_v62 = vpack.c.bf16 %v3306_v32, %v3305_v53  ;;  %v3769_v32 = vsel %vm912_vm0, %v3766_v58, %v3768_v9  ;;  %v3225_v18 = vsel %vm581_vm1, %v3222_v37, %v3224_v47  ;;  %v8752_v7 = vld [vmem:[#allocation84_spill] sm:$0xff] }
 0x2ce   : > { %4674 = vset.pattern.permute.xlu1 %v8579_v49  ;;  %v7520_v10 = vpop.permute.xlu1 %3689  ;;  %4443 = vmatmul.msk.bf16.gmra.mxu1 %vm863_vm3, %v8747_v13  ;;  %v8753_v13 = vpack.c.bf16 %v8751_v27, %v8752_v7  ;;  %v3389_v58 = vshrl.u32 %v7471_v61, 16  ;;  %v8756_v61 = vld [vmem:[#allocation44_spill] sm:$0xff] }
 0x2cf   : > { %3186 = vperm.xlu1 %4674, %v7529_v54   ;;  %v3770_v1 = vrot.slane %v7520_v10, 6  ;;  %v3393_v22 = vshll.u32 %v7532_v62, 16 }
 0x2d0   : > { %4675 = vset.pattern.permute.xlu2 %v8579_v49  ;;  %v7557_v53 = vpop.f32.mrf.mxu0  ;;  %v7575_v5 = vpop.permute.xlu2 %3156 }
 0x2d1   : > { %3189 = vperm.xlu2 %4675, %v8748_v2   ;;  %v3771_v59 = vsel %vm912_vm0, %v3768_v9, %v3770_v1  ;;  %8750 = vst [vmem:[#allocation39_spill] sm:$0xff] %v7557_v53  ;;  %v3395_v37 = vrot.slane %v3393_v22, 1 }
 0x2d2   : > { %v7541_v51 = vpop.f32.mrf.mxu2 }
 0x2d3   : > { %v2646_v11 = vpop.f32.mrf.mxu1 }
 0x2d4   : > { %v1915_v50 = vpop.f32.mrf.mxu3  ;;  %v7546_v3 = vadd.f32 %v2646_v11, %v8749_v15  ;;  %v3854_v11 = vmul.f32 %v8686_v28, %v3771_v59  ;;  %v8754_v15 = vld [vmem:[#allocation52_spill] sm:$0xff] }
 0x2d5   : > { %v1956_v46 = vadd.f32 %v1915_v50, %v7368_v21  ;;  %4489 = vmatmul.msk.bf16.gmra.mxu0 %vm863_vm3, %v3920_v33  ;;  %v3227_v21 = vsel %vm581_vm1, %v3224_v47, %v8350_v16  ;;  %v3391_v50 = vor.u32 %v3389_v58, %v3387_v30  ;;  %v3307_v33 = vmul.f32 %v8754_v15, %v3225_v18  ;;  %v8755_v47 = vld [vmem:[#allocation51_spill] sm:$0xff]  ;;  %v8759_v58 = vld [vmem:[#allocation81_spill] sm:$0xff]  ;;  %v8763_v16 = vld [vmem:[#allocation6_spill] sm:$0xff] }
 0x2d6   : > { %v3693_v4 = vpop.permute.xlu1 %3692  ;;  %v8758_v30 = vld [vmem:[#allocation31_spill] sm:$0xff] }
 0x2d7   : > { %v7563_v17 = vadd.f32 %v2238_v34, %v1956_v46  ;;  %4676 = vset.pattern.permute.xlu1 %v8681_v40  ;;  %4459 = vmatmul.msk.bf16.gmra.mxu2 %vm863_vm3, %v8753_v13  ;;  %v3853_v34 = vmul.f32 %v5269_v26, %v3769_v32  ;;  %v3308_v46 = vmul.f32 %v8755_v47, %v3227_v21  ;;  %v3774_v21 = vrot.slane %v7483_v56, 6 }
 0x2d8   : > { %2860 = vperm.xlu1 %4676, %v7449_v36   ;;  %v3396_v7 = vsel %vm730_vm2, %v3391_v50, %v3395_v37  ;;  %v2243_v13 = vpop.f32.mrf.mxu0  ;;  %v8776_v56 = vrot.slane %v7524_v52, 7 }
 0x2d9   : > { %4677 = vset.pattern.permute.xlu2 %v8590_v23  ;;  %v3880_v59 = vpack.c.bf16 %v3854_v11, %v3853_v34  ;;  %v7596_v32 = vpack.c.bf16 %v3308_v46, %v3307_v33  ;;  %v3772_v11 = vrot.slane %v3693_v4, 6  ;;  %v8760_v33 = vld [vmem:[#allocation15_spill] sm:$0xff] }
 0x2da   : > { %v2989_v9 = vpop.f32.mrf.mxu2  ;;  %3734 = vperm.xlu2 %4677, %v7529_v54   ;;  %v7605_v34 = vpop.permute.xlu2 %3704 }
 0x2db   : > { %v7584_v28 = vadd.f32 %v2989_v9, %v7437_v48  ;;  %v2649_v36 = vpop.f32.mrf.mxu1  ;;  %v7599_v18 = vrot.slane %v3880_v59, 1  ;;  %v3401_v50 = vshll.u32 %v7596_v32, 16  ;;  %v8761_v59 = vld [vmem:[#allocation7_spill] sm:$0xff] }
 0x2dc   : > { %v1917_v27 = vpop.f32.mrf.mxu3  ;;  %v7587_v22 = vadd.f32 %v2649_v36, %v8756_v61  ;;  %v3397_v61 = vshrl.u32 %v7532_v62, 16 }
 0x2dd   : > { %v7591_v26 = vadd.f32 %v1917_v27, %v7400_v39  ;;  %4473 = vmatmul.msk.bf16.gmra.mxu3 %vm863_vm3, %v3396_v7  ;;  %v3922_v4 = vsel %vm1406_vm4, %v7535_v6, %v7599_v18  ;;  %v3775_v7 = vsel %vm912_vm0, %v3772_v11, %v3774_v21  ;;  %v3403_v10 = vrot.slane %v3401_v50, 1 }
 0x2de   : > { %4444 = vmatmul.msk.bf16.gmra.mxu1 %vm863_vm3, %v8758_v30  ;;  %v3399_v62 = vor.u32 %v3397_v61, %v3395_v37  ;;  %v3856_v53 = vmul.f32 %v8755_v47, %v3775_v7 }
 0x2df   : > { %8757 = vst [vmem:[#allocation88_spill] sm:$0xff] %v7591_v26  ;;  %v3151_v48 = vpop.permute.xlu1 %3150 }
 0x2e0   : > { %4679 = vset.pattern.permute.xlu1 %v8579_v49  ;;  %v3228_v30 = vrot.slane %v3151_v48, 7  ;;  %v8765_v48 = vld [vmem:[#allocation36_spill] sm:$0xff] }
 0x2e1   : > { %3192 = vperm.xlu1 %4679, %v8759_v58  }
 0x2e2   : > { %v7603_v39 = vpop.f32.mrf.mxu2  ;;  %4680 = vset.pattern.permute.xlu2 %v8579_v49  ;;  %v3773_v49 = vsel %vm912_vm0, %v3770_v1, %v3772_v11  ;;  %v8766_v11 = vrot.slane %v7537_v42, 7  ;;  %v3404_v42 = vsel %vm730_vm2, %v3399_v62, %v3403_v10 }
 0x2e3   : > { %v2651_v9 = vpop.f32.mrf.mxu1  ;;  %3195 = vperm.xlu2 %4680, %v8760_v33   ;;  %v3855_v1 = vmul.f32 %v8754_v15, %v3773_v49  ;;  %v7646_v15 = vpop.f32.mrf.mxu0  ;;  %v8770_v49 = vld [vmem:[#allocation54_spill] sm:$0xff] }
 0x2e4   : > { %v1920_v36 = vpop.f32.mrf.mxu3  ;;  %v7612_v27 = vadd.f32 %v2651_v9, %v8761_v59  ;;  %v8762_v59 = vld [vmem:[#allocation35_spill] sm:$0xff]  ;;  %8768 = vst [vmem:[#allocation91_spill] sm:$0xff] %v7646_v15 }
 0x2e5   : > { %v1958_v46 = vadd.f32 %v1920_v36, %v7433_v45  ;;  %4490 = vmatmul.msk.bf16.gmra.mxu0 %vm863_vm3, %v3922_v4  ;;  %v8764_v6 = vpack.c.bf16 %v8762_v59, %v8763_v16  ;;  %v1138_v45 = vadd.f32 %v7340_v41, %v8765_v48  ;;  %v3881_v36 = vpack.c.bf16 %v3856_v53, %v3855_v1  ;;  %v8769_v4 = vld [vmem:[#allocation53_spill] sm:$0xff]  ;;  %v3699_v48 = vpop.permute.xlu0 %3698 }
 0x2e7   : > { %v7626_v9 = vadd.f32 %v2243_v13, %v1958_v46  ;;  %4460 = vmatmul.msk.bf16.gmra.mxu2 %vm863_vm3, %v8764_v6  ;;  %v3229_v13 = vsel %vm581_vm1, %v8766_v11, %v3228_v30  ;;  %v8767_v46 = vrot.slane %v7524_v52, 7  ;;  %v1609_v47 = vadd.f32 %v7467_v38, %v1138_v45  ;;  %v7659_v6 = vpop.permute.xlu2 %3165  ;;  %v8780_v52 = vld [vmem:[#allocation60_spill] sm:$0xff] }
 0x2e8   : > { %v7634_v26 = vpop.permute.xlu1 %3701  ;;  %v3309_v61 = vmul.f32 %v8769_v4, %v3229_v13  ;;  %v3923_v53 = vrot.slane %v3881_v36, 1  ;;  %v3405_v36 = vshrl.u32 %v7596_v32, 16 }
 0x2e9   : > { %v3231_v16 = vsel %vm581_vm1, %v3228_v30, %v8767_v46  ;;  %4681 = vset.pattern.permute.xlu1 %v8681_v40  ;;  %v3778_v62 = vrot.slane %v7634_v26, 6  ;;  %v8773_v46 = vld [vmem:[#allocation23_spill] sm:$0xff] }
 0x2ea   : > { %2864 = vperm.xlu1 %4681, %v7529_v54   ;;  %v2994_v37 = vpop.f32.mrf.mxu2  ;;  %v3310_v7 = vmul.f32 %v8770_v49, %v3231_v16  ;;  %v8771_v54 = vld [vmem:[#allocation30_spill] sm:$0xff] }
 0x2eb   : > { %v7650_v50 = vadd.f32 %v2994_v37, %v7512_v25  ;;  %v2654_v41 = vpop.f32.mrf.mxu1  ;;  %4682 = vset.pattern.permute.xlu2 %v8681_v40  ;;  %v8772_v25 = vld [vmem:[#allocation20_spill] sm:$0xff]  ;;  %v3924_v37 = vsel %vm1406_vm4, %v7599_v18, %v3923_v53 }
 0x2ec   : > { %v1922_v30 = vpop.f32.mrf.mxu3  ;;  %v7657_v59 = vadd.f32 %v2654_v41, %v8771_v54  ;;  %2868 = vperm.xlu2 %4682, %v8748_v2   ;;  %v7667_v40 = vpack.c.bf16 %v3310_v7, %v3309_v61  ;;  %v3776_v2 = vrot.slane %v3699_v48, 6  ;;  %v3232_v61 = vrot.slane %v7575_v5, 7  ;;  %v8775_v54 = vld [vmem:[#allocation17_spill] sm:$0xff] }
 0x2ed   : > { %v7662_v38 = vadd.f32 %v1922_v30, %v1609_v47  ;;  %4474 = vmatmul.msk.bf16.gmra.mxu3 %vm863_vm3, %v3404_v42  ;;  %v2248_v47 = vpop.f32.mrf.mxu0 }
 0x2ee   : > { %4445 = vmatmul.msk.bf16.gmra.mxu1 %vm863_vm3, %v8772_v25  ;;  %v3409_v26 = vshll.u32 %v7667_v40, 16  ;;  %v3777_v18 = vsel %vm912_vm0, %v3774_v21, %v3776_v2  ;;  %v3233_v21 = vsel %vm581_vm1, %v8776_v56, %v3232_v61 }
 0x2ef   : > { %v3857_v48 = vmul.f32 %v8769_v4, %v3777_v18  ;;  %v3780_v18 = vrot.slane %v7605_v34, 6 }
 0x2f0   : > { %v3411_v30 = vrot.slane %v3409_v26, 1 }
 0x2f1   : > { %v7670_v1 = vpop.permute.xlu1 %3159  ;;  %v3781_v34 = vsel %vm912_vm0, %v3778_v62, %v3780_v18 }
 0x2f2   : > { %4683 = vset.pattern.permute.xlu1 %v8590_v23  ;;  %v7673_v45 = vpop.f32.mrf.mxu2  ;;  %v3779_v23 = vsel %vm912_vm0, %v3776_v2, %v3778_v62  ;;  %v3234_v41 = vrot.slane %v7670_v1, 7 }
 0x2f3   : > { %3743 = vperm.xlu1 %4683, %v8760_v33   ;;  %v2656_v11 = vpop.f32.mrf.mxu1  ;;  %v7687_v33 = vpop.permute.xlu2 %3168 }
 0x2f4   : > { %v1925_v13 = vpop.f32.mrf.mxu3  ;;  %v7677_v16 = vadd.f32 %v2656_v11, %v8773_v46  ;;  %2872 = vperm.xlu2 %4682, %v8759_v58   ;;  %v3858_v58 = vmul.f32 %v8770_v49, %v3779_v23  ;;  %v3235_v25 = vsel %vm581_vm1, %v3232_v61, %v3234_v41  ;;  %v3407_v11 = vor.u32 %v3405_v36, %v3403_v10  ;;  %v8777_v46 = vld [vmem:[#allocation59_spill] sm:$0xff]  ;;  %v7717_v23 = vpop.permute.xlu0 %3707 }
 0x2f5   : > { %v1960_v42 = vadd.f32 %v1925_v13, %v7507_v29  ;;  %4491 = vmatmul.msk.bf16.gmra.mxu0 %vm863_vm3, %v3924_v37  ;;  %v1143_v29 = vadd.f32 %v7403_v0, %v8775_v54  ;;  %v3312_v0 = vmul.f32 %v8777_v46, %v3235_v25  ;;  %v8782_v54 = vld [vmem:[#allocation68_spill] sm:$0xff] }
 0x2f6   : > { %v3882_v13 = vpack.c.bf16 %v3858_v58, %v3857_v48  ;;  %v3412_v4 = vsel %vm730_vm2, %v3407_v11, %v3411_v30  ;;  %v8351_v58 = vrot.slane %v7717_v23, 6  ;;  %v3238_v11 = vrot.slane %v7659_v6, 7 }
 0x2f7   : > { %v7694_v7 = vadd.f32 %v2248_v47, %v1960_v42  ;;  %v1611_v5 = vadd.f32 %v7541_v51, %v1143_v29  ;;  %v8778_v47 = vld [vmem:[#allocation82_spill] sm:$0xff]  ;;  %v3311_v51 = vmul.f32 %v8780_v52, %v3233_v21  ;;  %v8783_v29 = vld [vmem:[#allocation11_spill] sm:$0xff] }
 0x2f8   : > { %v3925_v61 = vrot.slane %v3882_v13, 1  ;;  %v2262_v25 = vadd.f32 %v8783_v29, %v8782_v54  ;;  %v8786_v29 = vld [vmem:[#allocation56_spill] sm:$0xff] }
 0x2f9   : > { %8774 = vst [vmem:[#allocation90_spill] sm:$0xff] %v7694_v7  ;;  %v3163_v1 = vpop.permute.xlu1 %3162  ;;  %v7721_v42 = vpack.c.bf16 %v3312_v0, %v3311_v51  ;;  %v3783_v0 = vsel %vm912_vm0, %v3780_v18, %v8351_v58  ;;  %v8793_v7 = vld [vmem:[#allocation55_spill] sm:$0xff] }
 0x2fa   : > { %v2999_v32 = vpop.f32.mrf.mxu2  ;;  %v3860_v51 = vmul.f32 %v8777_v46, %v3783_v0 }
 0x2fb   : > { %v7706_v2 = vadd.f32 %v2999_v32, %v7587_v22  ;;  %v2659_v49 = vpop.f32.mrf.mxu1  ;;  %v8781_v22 = vld [vmem:[#allocation10_spill] sm:$0xff]  ;;  %v7723_v36 = vpop.permute.xlu2 %3716  ;;  %v3417_v13 = vshll.u32 %v7721_v42, 16 }
 0x2fc   : > { %v1927_v37 = vpop.f32.mrf.mxu3  ;;  %v7710_v26 = vadd.f32 %v2659_v49, %v8778_v47  ;;  %v3926_v49 = vsel %vm1406_vm4, %v3923_v53, %v3925_v61  ;;  %v3413_v47 = vshrl.u32 %v7667_v40, 16  ;;  %v3859_v53 = vmul.f32 %v8780_v52, %v3781_v34  ;;  %v8787_v40 = vld [vmem:[#allocation33_spill] sm:$0xff] }
 0x2fd   : > { %v7713_v10 = vadd.f32 %v1927_v37, %v1611_v5  ;;  %4475 = vmatmul.msk.bf16.gmra.mxu3 %vm863_vm3, %v3412_v4  ;;  %v3236_v5 = vrot.slane %v3163_v1, 7  ;;  %v3711_v37 = vpop.permute.xlu0 %3710  ;;  %v7746_v4 = vpop.f32.mrf.mxu0  ;;  %v3419_v62 = vrot.slane %v3417_v13, 1  ;;  %v8788_v13 = vld [vmem:[#allocation40_spill] sm:$0xff] }
 0x2fe   : > { %4446 = vmatmul.msk.bf16.gmra.mxu1 %vm863_vm3, %v8781_v22  ;;  %8784 = vst [vmem:[#allocation50_spill] sm:$0xff] %v7746_v4  ;;  %v8785_v22 = vld [vmem:[#allocation57_spill] sm:$0xff]  ;;  %v3883_v52 = vpack.c.bf16 %v3860_v51, %v3859_v53 }
 0x2ff   : > { %8779 = vst [vmem:[#allocation18_spill] sm:$0xff] %v7713_v10  ;;  %v3237_v6 = vsel %vm581_vm1, %v3234_v41, %v3236_v5  ;;  %v3239_v1 = vsel %vm581_vm1, %v3236_v5, %v3238_v11  ;;  %v2899_v41 = vmul.f32 %v8785_v22, %v8787_v40 }
 0x300   : > { %v3313_v54 = vmul.f32 %v8785_v22, %v3237_v6  ;;  %v3314_v18 = vmul.f32 %v8786_v29, %v3239_v1 }
 0x302   : > { %v7729_v48 = vpop.permute.xlu1 %3713  ;;  %v7731_v32 = vpop.f32.mrf.mxu2  ;;  %v7765_v6 = vpack.c.bf16 %v3314_v18, %v3313_v54  ;;  %v8791_v54 = vld [vmem:[#allocation85_spill] sm:$0xff] }
 0x303   : > { %v2661_v56 = vpop.f32.mrf.mxu1 }
 0x304   : > { %v7734_v21 = vadd.f32 %v2661_v56, %v2262_v25  ;;  %v7752_v25 = vpop.permute.xlu2 %3174 }
 0x305   : > { %4492 = vmatmul.msk.bf16.gmra.mxu0 %vm863_vm3, %v3926_v49  ;;  %v3415_v49 = vor.u32 %v3413_v47, %v3411_v30  ;;  %v8789_v47 = vld [vmem:[#allocation67_spill] sm:$0xff]  ;;  %v7770_v53 = vpop.permute.xlu0 %3171 }
 0x307   : > { %v3420_v0 = vsel %vm730_vm2, %v3415_v49, %v3419_v62  ;;  %v8790_v49 = vld [vmem:[#allocation12_spill] sm:$0xff] }
 0x308   : > { %v2264_v18 = vadd.f32 %v8791_v54, %v8790_v49  ;;  %v8792_v54 = vrot.slane %v7717_v23, 6 }
 0x30a   : > { %v3004_v56 = vpop.f32.mrf.mxu2 }
 0x30b   : > { %v7757_v5 = vadd.f32 %v3004_v56, %v7657_v59  ;;  %v2837_v58 = vpop.permute.xlu1 %2836  ;;  %v2664_v4 = vpop.f32.mrf.mxu1 }
 0x30c   : > { %v2900_v46 = vmul.f32 %v8786_v29, %v2837_v58  ;;  %v7761_v34 = vadd.f32 %v2664_v4, %v8788_v13  ;;  %v7773_v58 = vrot.slane %v3883_v52, 1  ;;  %v8352_v4 = vrot.slane %v7729_v48, 6 }
 0x30d   : > { %4476 = vmatmul.msk.bf16.gmra.mxu3 %vm863_vm3, %v3420_v0  ;;  %v3242_v13 = vrot.slane %v7770_v53, 7  ;;  %v2845_v0 = vpop.permute.xlu2 %2844  ;;  %v7806_v10 = vpop.permute.xlu0 %3177 }
 0x30e   : > { %v2921_v30 = vpack.c.bf16 %v2900_v46, %v2899_v41  ;;  %4447 = vmatmul.msk.bf16.gmra.mxu1 %vm863_vm3, %v8789_v47  ;;  %v3537_v59 = vpop.f32.mrf.mxu3  ;;  %v3425_v41 = vshll.u32 %v7765_v6, 16  ;;  %v3784_v46 = vrot.slane %v3711_v37, 6 }
 0x30f   : > { %v3617_v1 = vadd.f32 %v3537_v59, %v7584_v28  ;;  %v4003_v56 = vpop.f32.mrf.mxu0  ;;  %v3240_v28 = vrot.slane %v7687_v33, 7  ;;  %v3928_v59 = vsel %vm1406_vm4, %v3925_v61, %v7773_v58 }
 0x310   : > { %4461 = vmatmul.msk.bf16.gmra.mxu2 %vm863_vm3, %v2921_v30  ;;  %v3787_v37 = vsel %vm912_vm0, %v3784_v46, %v8352_v4  ;;  %v7796_v49 = vrot.slane %v3425_v41, 1 }
 0x311   : > { %v4083_v51 = vadd.f32 %v4003_v56, %v3617_v1  ;;  %v3070_v1 = vadd.f32 %v7603_v39, %v7478_v20  ;;  %v3421_v56 = vshrl.u32 %v7721_v42, 16  ;;  %v3241_v61 = vsel %vm581_vm1, %v3238_v11, %v3240_v28 }
 0x312   : > { %v7778_v40 = vpop.f32.mrf.mxu2  ;;  %v3243_v20 = vsel %vm581_vm1, %v3240_v28, %v3242_v13  ;;  %v3862_v4 = vmul.f32 %v8786_v29, %v3787_v37 }
 0x313   : > { %v2666_v47 = vpop.f32.mrf.mxu1  ;;  %v4187_v42 = vmul.f32 %v4083_v51, %v4083_v51 }
 0x314   : > { %v7783_v30 = vpop.permute.xlu1 %3719  ;;  %v7785_v52 = vadd.f32 %v2666_v47, %v2264_v18  ;;  %v3785_v18 = vsel %vm912_vm0, %v8792_v54, %v3784_v46  ;;  %v3315_v46 = vmul.f32 %v8793_v7, %v3241_v61  ;;  %v8794_v54 = vld [vmem:[#allocation58_spill] sm:$0xff]  ;;  %v8795_v61 = vld [vmem:[#allocation73_spill] sm:$0xff] }
 0x315   : > { %4493 = vmatmul.msk.bf16.gmra.mxu0 %vm863_vm3, %v3928_v59  ;;  %v3423_v59 = vor.u32 %v3421_v56, %v3419_v62  ;;  %v3861_v23 = vmul.f32 %v8785_v22, %v3785_v18  ;;  %v3316_v11 = vmul.f32 %v8794_v54, %v3243_v20  ;;  %v2902_v22 = vmul.f32 %v8794_v54, %v2845_v0 }
 0x316   : > { %v3539_v33 = vpop.f32.mrf.mxu3  ;;  %v4219_v20 = vsel %vm4115_vm5, %v4187_v42, 0.0  ;;  %v8353_v42 = vrot.slane %v7783_v30, 6 }
 0x317   : > { %v3618_v39 = vadd.f32 %v3539_v33, %v3070_v1  ;;  %v4005_v47 = vpop.f32.mrf.mxu0  ;;  %v3428_v28 = vsel %vm730_vm2, %v3423_v59, %v7796_v49  ;;  %v4116_v1 = vsel %vm4115_vm5, %v4083_v51, 0.0  ;;  %v3884_v56 = vpack.c.bf16 %v3862_v4, %v3861_v23 }
 0x318   : > { %v7830_v4 = vpack.c.bf16 %v3316_v11, %v3315_v46  ;;  %v3788_v46 = vrot.slane %v7723_v36, 6 }
 0x319   : > { %v4084_v41 = vadd.f32 %v4005_v47, %v3618_v39  ;;  %v7823_v47 = vpop.permute.xlu2 %3180 }
 0x31a   : > { %v3009_v15 = vpop.f32.mrf.mxu2  ;;  %v3791_v36 = vsel %vm912_vm0, %v3788_v46, %v8353_v42 }
 0x31b   : > { %v4117_v29 = vsel %vm4115_vm5, %v4084_v41, 0.0  ;;  %v4188_v37 = vmul.f32 %v4084_v41, %v4084_v41  ;;  %v7816_v62 = vadd.f32 %v3009_v15, %v7710_v26  ;;  %v2669_v33 = vpop.f32.mrf.mxu1  ;;  %v8796_v26 = vld [vmem:[#allocation16_spill] sm:$0xff] }
 0x31c   : > { %v4118_v18 = vadd.f32 %v4117_v29, %v4116_v1  ;;  %v7820_v39 = vadd.f32 %v2669_v33, %v8795_v61  ;;  %v7832_v1 = vrot.slane %v3884_v56, 1  ;;  %v7835_v29 = vpop.permute.xlu0 %3722  ;;  %v8797_v33 = vld [vmem:[#allocation76_spill] sm:$0xff] }
 0x31d   : > { %v4220_v51 = vsel %vm4115_vm5, %v4188_v37, 0.0  ;;  %v2841_v59 = vpop.permute.xlu1 %2840  ;;  %4477 = vmatmul.msk.bf16.gmra.mxu3 %vm863_vm3, %v3428_v28  ;;  %v8798_v28 = vld [vmem:[#allocation32_spill] sm:$0xff] }
 0x31e   : > { %v4221_v41 = vadd.f32 %v4220_v51, %v4219_v20  ;;  %v2901_v15 = vmul.f32 %v8793_v7, %v2841_v59  ;;  %4448 = vmatmul.msk.bf16.gmra.mxu1 %vm863_vm3, %v8796_v26  ;;  %v2266_v61 = vadd.f32 %v8798_v28, %v8797_v33  ;;  %v3433_v59 = vshll.u32 %v7830_v4, 16 }
 0x31f   : > { %v3072_v28 = vadd.f32 %v7673_v45, %v7546_v3 }
 0x320   : > { %v2922_v0 = vpack.c.bf16 %v2902_v22, %v2901_v15  ;;  %v3542_v23 = vpop.f32.mrf.mxu3  ;;  %v3244_v15 = vrot.slane %v7752_v25, 7  ;;  %v3429_v25 = vshrl.u32 %v7765_v6, 16 }
 0x321   : > { %v3619_v37 = vadd.f32 %v3542_v23, %v7650_v50  ;;  %v3930_v50 = vsel %vm1406_vm4, %v7773_v58, %v7832_v1  ;;  %v8799_v58 = vrot.slane %v7729_v48, 6 }
 0x322   : > { %v3011_v20 = vpop.f32.mrf.mxu2  ;;  %4462 = vmatmul.msk.bf16.gmra.mxu2 %vm863_vm3, %v2922_v0  ;;  %v4008_v51 = vpop.f32.mrf.mxu0  ;;  %v3246_v0 = vrot.slane %v7806_v10, 7  ;;  %v3431_v6 = vor.u32 %v3429_v25, %v7796_v49 }
 0x323   : > { %v7843_v11 = vadd.f32 %v3011_v20, %v7734_v21  ;;  %v4085_v56 = vadd.f32 %v4008_v51, %v3619_v37  ;;  %v2671_v22 = vpop.f32.mrf.mxu1  ;;  %v2849_v20 = vpop.permute.xlu2 %2848 }
 0x324   : > { %v7847_v26 = vadd.f32 %v2671_v22, %v2266_v61  ;;  %v3789_v61 = vsel %vm912_vm0, %v8799_v58, %v3788_v46  ;;  %v3435_v22 = vrot.slane %v3433_v59, 1  ;;  %v3247_v3 = vsel %vm581_vm1, %v3244_v15, %v3246_v0  ;;  %v2853_v45 = vpop.permute.xlu0 %2852  ;;  %v8801_v58 = vld [vmem:[#allocation61_spill] sm:$0xff] }
 0x325   : > { %v4119_v21 = vsel %vm4115_vm5, %v4085_v56, 0.0  ;;  %v4189_v23 = vmul.f32 %v4085_v56, %v4085_v56  ;;  %4494 = vmatmul.msk.bf16.gmra.mxu0 %vm863_vm3, %v3930_v50  ;;  %v3245_v56 = vsel %vm581_vm1, %v3242_v13, %v3244_v15  ;;  %v3863_v46 = vmul.f32 %v8793_v7, %v3789_v61 }
 0x326   : > { %v4120_v37 = vadd.f32 %v4119_v21, %v4118_v18  ;;  %v7858_v33 = vpop.permute.xlu1 %3725  ;;  %v3864_v18 = vmul.f32 %v8794_v54, %v3791_v36  ;;  %v2904_v53 = vmul.f32 %v8801_v58, %v2853_v45  ;;  %v3318_v25 = vmul.f32 %v8801_v58, %v3247_v3  ;;  %v8803_v45 = vld [vmem:[#allocation13_spill] sm:$0xff] }
 0x327   : > { %v4222_v51 = vsel %vm4115_vm5, %v4189_v23, 0.0  ;;  %v8800_v23 = vld [vmem:[#allocation62_spill] sm:$0xff]  ;;  %v3436_v7 = vsel %vm730_vm2, %v3431_v6, %v3435_v22  ;;  %v3794_v6 = vrot.slane %v7858_v33, 6  ;;  %v3076_v33 = vadd.f32 %v7778_v40, %v7677_v16 }
 0x328   : > { %v4223_v50 = vadd.f32 %v4222_v51, %v4221_v41  ;;  %v3544_v21 = vpop.f32.mrf.mxu3  ;;  %v2903_v59 = vmul.f32 %v8800_v23, %v2849_v20  ;;  %v3317_v54 = vmul.f32 %v8800_v23, %v3245_v56  ;;  %v3885_v15 = vpack.c.bf16 %v3864_v18, %v3863_v46  ;;  %v8802_v51 = vld [vmem:[#allocation3_spill] sm:$0xff] }
 0x329   : > { %v3620_v48 = vadd.f32 %v3544_v21, %v3072_v28 }
 0x32a   : > { %v3014_v42 = vpop.f32.mrf.mxu2  ;;  %v4010_v13 = vpop.f32.mrf.mxu0  ;;  %v2923_v21 = vpack.c.bf16 %v2904_v53, %v2903_v59  ;;  %v7894_v18 = vpack.c.bf16 %v3318_v25, %v3317_v54  ;;  %v7896_v46 = vrot.slane %v3885_v15, 1  ;;  %v8805_v53 = vld [vmem:[#allocation69_spill] sm:$0xff]  ;;  %v3792_v54 = vrot.slane %v7835_v29, 6 }
 0x32b   : > { %v7880_v41 = vadd.f32 %v3014_v42, %v7761_v34  ;;  %v4086_v49 = vadd.f32 %v4010_v13, %v3620_v48  ;;  %v2674_v36 = vpop.f32.mrf.mxu1  ;;  %v7899_v13 = vpop.permute.xlu2 %3731 }
 0x32c   : > { %v7884_v28 = vadd.f32 %v2674_v36, %v8802_v51  ;;  %v3795_v29 = vsel %vm912_vm0, %v3792_v54, %v3794_v6 }
 0x32d   : > { %v4121_v61 = vsel %vm4115_vm5, %v4086_v49, 0.0  ;;  %v4190_v20 = vmul.f32 %v4086_v49, %v4086_v49  ;;  %4478 = vmatmul.msk.bf16.gmra.mxu3 %vm863_vm3, %v3436_v7  ;;  %v3437_v7 = vshrl.u32 %v7830_v4, 16  ;;  %v3248_v4 = vrot.slane %v7823_v47, 7 }
 0x32e   : > { %v4122_v56 = vadd.f32 %v4121_v61, %v4120_v37  ;;  %4449 = vmatmul.msk.bf16.gmra.mxu1 %vm863_vm3, %v8803_v45  ;;  %v8804_v37 = vld [vmem:[#allocation9_spill] sm:$0xff] }
 0x32f   : > { %v4224_v34 = vsel %vm4115_vm5, %v4190_v20, 0.0  ;;  %v7892_v42 = vpop.permute.xlu1 %3183  ;;  %v2268_v49 = vadd.f32 %v8805_v53, %v8804_v37  ;;  %v3439_v53 = vor.u32 %v3437_v7, %v3435_v22  ;;  %v8807_v22 = vld [vmem:[#allocation63_spill] sm:$0xff] }
 0x330   : > { %v4225_v3 = vadd.f32 %v4224_v34, %v4223_v50  ;;  %v3547_v48 = vpop.f32.mrf.mxu3  ;;  %v3250_v61 = vrot.slane %v7892_v42, 7 }
 0x331   : > { %v3621_v59 = vadd.f32 %v3547_v48, %v7706_v2  ;;  %v3932_v2 = vsel %vm1406_vm4, %v7832_v1, %v7896_v46  ;;  %v3074_v48 = vadd.f32 %v7731_v32, %v7612_v27  ;;  %v3249_v27 = vsel %vm581_vm1, %v3246_v0, %v3248_v4  ;;  %v8808_v0 = vld [vmem:[#allocation64_spill] sm:$0xff] }
 0x332   : > { %v3016_v36 = vpop.f32.mrf.mxu2  ;;  %4463 = vmatmul.msk.bf16.gmra.mxu2 %vm863_vm3, %v2923_v21  ;;  %v4013_v51 = vpop.f32.mrf.mxu0  ;;  %v3441_v21 = vshll.u32 %v7894_v18, 16 }
 0x333   : > { %v7907_v50 = vadd.f32 %v3016_v36, %v7785_v52  ;;  %v4087_v25 = vadd.f32 %v4013_v51, %v3621_v59  ;;  %v2676_v15 = vpop.f32.mrf.mxu1  ;;  %v8806_v59 = vrot.slane %v7783_v30, 6  ;;  %v3251_v36 = vsel %vm581_vm1, %v3248_v4, %v3250_v61 }
 0x334   : > { %v7911_v20 = vadd.f32 %v2676_v15, %v2268_v49  ;;  %v3866_v49 = vmul.f32 %v8801_v58, %v3795_v29  ;;  %v3320_v7 = vmul.f32 %v8807_v22, %v3251_v36 }
 0x335   : > { %v4123_v52 = vsel %vm4115_vm5, %v4087_v25, 0.0  ;;  %v4191_v45 = vmul.f32 %v4087_v25, %v4087_v25  ;;  %4495 = vmatmul.msk.bf16.gmra.mxu0 %vm863_vm3, %v3932_v2  ;;  %v3793_v1 = vsel %vm912_vm0, %v8806_v59, %v3792_v54 }
 0x336   : > { %v4124_v34 = vadd.f32 %v4123_v52, %v4122_v56  ;;  %v3443_v56 = vrot.slane %v3441_v21, 1  ;;  %v3865_v32 = vmul.f32 %v8800_v23, %v3793_v1  ;;  %v7941_v52 = vpop.permute.xlu2 %3189  ;;  %v3798_v1 = vrot.slane %v7899_v13, 6 }
 0x337   : > { %v4226_v37 = vsel %vm4115_vm5, %v4191_v45, 0.0  ;;  %v3319_v45 = vmul.f32 %v8808_v0, %v3249_v27 }
 0x338   : > { %v4227_v51 = vadd.f32 %v4226_v37, %v4225_v3  ;;  %v3729_v25 = vpop.permute.xlu1 %3728  ;;  %v3549_v47 = vpop.f32.mrf.mxu3  ;;  %v3886_v3 = vpack.c.bf16 %v3866_v49, %v3865_v32  ;;  %v3444_v10 = vsel %vm730_vm2, %v3439_v53, %v3443_v56 }
 0x339   : > { %v3622_v15 = vadd.f32 %v3549_v47, %v3074_v48  ;;  %v3796_v37 = vrot.slane %v3729_v25, 6  ;;  %v3445_v25 = vshrl.u32 %v7894_v18, 16 }
 0x33a   : > { %v3019_v30 = vpop.f32.mrf.mxu2  ;;  %v4015_v54 = vpop.f32.mrf.mxu0  ;;  %v7954_v36 = vrot.slane %v3886_v3, 1  ;;  %v3254_v3 = vrot.slane %v7941_v52, 7 }
 0x33b   : > { %v7939_v58 = vadd.f32 %v3019_v30, %v7820_v39  ;;  %v4088_v2 = vadd.f32 %v4015_v54, %v3622_v15  ;;  %v2679_v29 = vpop.f32.mrf.mxu1  ;;  %v7950_v39 = vpack.c.bf16 %v3320_v7, %v3319_v45  ;;  %v8809_v15 = vld [vmem:[#allocation24_spill] sm:$0xff] }
 0x33c   : > { %v7944_v21 = vadd.f32 %v2679_v29, %v7215_v24  ;;  %v2270_v27 = vadd.f32 %v8809_v15, %v7246_v19  ;;  %v3797_v29 = vsel %vm912_vm0, %v3794_v6, %v3796_v37  ;;  %v3799_v19 = vsel %vm912_vm0, %v3796_v37, %v3798_v1 }
 0x33d   : > { %v4125_v23 = vsel %vm4115_vm5, %v4088_v2, 0.0  ;;  %v4192_v4 = vmul.f32 %v4088_v2, %v4088_v2  ;;  %4479 = vmatmul.msk.bf16.gmra.mxu3 %vm863_vm3, %v3444_v10 }
 0x33e   : > { %v4126_v48 = vadd.f32 %v4125_v23, %v4124_v34  ;;  %v2857_v34 = vpop.permute.xlu0 %2856  ;;  %v3735_v6 = vpop.permute.xlu2 %3734 }
 0x33f   : > { %v4228_v59 = vsel %vm4115_vm5, %v4192_v4, 0.0  ;;  %v3867_v4 = vmul.f32 %v8808_v0, %v3797_v29  ;;  %v2905_v15 = vmul.f32 %v8808_v0, %v2857_v34 }
 0x340   : > { %v4229_v49 = vadd.f32 %v4228_v59, %v4227_v51  ;;  %v3552_v24 = vpop.f32.mrf.mxu3  ;;  %v3449_v51 = vshll.u32 %v7950_v39, 16  ;;  %v3868_v59 = vmul.f32 %v8807_v22, %v3799_v19  ;;  %v8811_v19 = vld [vmem:[#allocation27_spill] sm:$0xff] }
 0x341   : > { %v3187_v53 = vpop.permute.xlu1 %3186  ;;  %v3623_v47 = vadd.f32 %v3552_v24, %v7757_v5 }
 0x342   : > { %v3021_v32 = vpop.f32.mrf.mxu2  ;;  %v4018_v30 = vpop.f32.mrf.mxu0  ;;  %v3252_v10 = vrot.slane %v3187_v53, 7 }
 0x343   : > { %v7960_v54 = vadd.f32 %v3021_v32, %v7847_v26  ;;  %v4089_v7 = vadd.f32 %v4018_v30, %v3623_v47  ;;  %v2681_v2 = vpop.f32.mrf.mxu1  ;;  %v3934_v26 = vsel %vm1406_vm4, %v7896_v46, %v7954_v36  ;;  %v7983_v46 = vrot.slane %v3449_v51, 1  ;;  %v8810_v51 = vld [vmem:[#allocation66_spill] sm:$0xff] }
 0x344   : > { %v7970_v5 = vadd.f32 %v2681_v2, %v2270_v27  ;;  %v3253_v47 = vsel %vm581_vm1, %v3250_v61, %v3252_v10  ;;  %v3255_v16 = vsel %vm581_vm1, %v3252_v10, %v3254_v3  ;;  %v3887_v30 = vpack.c.bf16 %v3868_v59, %v3867_v4 }
 0x345   : > { %v4127_v18 = vsel %vm4115_vm5, %v4089_v7, 0.0  ;;  %v4193_v45 = vmul.f32 %v4089_v7, %v4089_v7  ;;  %4496 = vmatmul.msk.bf16.gmra.mxu0 %vm863_vm3, %v3934_v26  ;;  %v3321_v29 = vmul.f32 %v8810_v51, %v3253_v47  ;;  %v3322_v26 = vmul.f32 %v8811_v19, %v3255_v16 }
 0x346   : > { %v4128_v23 = vadd.f32 %v4127_v18, %v4126_v48  ;;  %v3447_v48 = vor.u32 %v3445_v25, %v3443_v56  ;;  %v8003_v34 = vpop.permute.xlu0 %3737  ;;  %v8007_v10 = vpop.permute.xlu2 %3195  ;;  %v3800_v18 = vrot.slane %v3735_v6, 6 }
 0x347   : > { %v4230_v37 = vsel %vm4115_vm5, %v4193_v45, 0.0  ;;  %v8011_v4 = vpack.c.bf16 %v3322_v26, %v3321_v29 }
 0x348   : > { %v4231_v24 = vadd.f32 %v4230_v37, %v4229_v49  ;;  %v3554_v53 = vpop.f32.mrf.mxu3  ;;  %v3452_v61 = vsel %vm730_vm2, %v3447_v48, %v7983_v46  ;;  %v8014_v37 = vrot.slane %v3887_v30, 1  ;;  %v3801_v6 = vsel %vm912_vm0, %v3798_v1, %v3800_v18 }
 0x349   : > { %v3624_v40 = vadd.f32 %v3554_v53, %v3076_v33  ;;  %v3802_v33 = vrot.slane %v8003_v34, 6  ;;  %v3258_v1 = vrot.slane %v8007_v10, 7 }
 0x34a   : > { %v2861_v27 = vpop.permute.xlu1 %2860  ;;  %v3024_v32 = vpop.f32.mrf.mxu2 }
 0x34b   : > { %v2906_v7 = vmul.f32 %v8807_v22, %v2861_v27  ;;  %v7994_v49 = vadd.f32 %v3024_v32, %v7884_v28  ;;  %v4020_v2 = vpop.f32.mrf.mxu0  ;;  %v2684_v42 = vpop.f32.mrf.mxu1  ;;  %v3803_v32 = vsel %vm912_vm0, %v3800_v18, %v3802_v33 }
 0x34c   : > { %v4090_v56 = vadd.f32 %v4020_v2, %v3624_v40  ;;  %v8001_v0 = vadd.f32 %v2684_v42, %v7292_v44  ;;  %v8812_v40 = vld [vmem:[#allocation38_spill] sm:$0xff]  ;;  %v3869_v42 = vmul.f32 %v8810_v51, %v3801_v6 }
 0x34d   : > { %v2924_v25 = vpack.c.bf16 %v2906_v7, %v2905_v15  ;;  %4480 = vmatmul.msk.bf16.gmra.mxu3 %vm863_vm3, %v3452_v61  ;;  %v2272_v48 = vadd.f32 %v8812_v40, %v7321_v63  ;;  %v3457_v63 = vshll.u32 %v8011_v4, 16  ;;  %v3870_v61 = vmul.f32 %v8811_v19, %v3803_v32 }
 0x34e   : > { %v4129_v28 = vsel %vm4115_vm5, %v4090_v56, 0.0  ;;  %v4194_v22 = vmul.f32 %v4090_v56, %v4090_v56  ;;  %v2869_v56 = vpop.permute.xlu2 %2868 }
 0x34f   : > { %v4130_v45 = vadd.f32 %v4129_v28, %v4128_v23  ;;  %4464 = vmatmul.msk.bf16.gmra.mxu2 %vm863_vm3, %v2924_v25  ;;  %v3453_v25 = vshrl.u32 %v7950_v39, 16  ;;  %v3459_v28 = vrot.slane %v3457_v63, 1  ;;  %v3741_v63 = vpop.permute.xlu0 %3740 }
 0x350   : > { %v4232_v44 = vsel %vm4115_vm5, %v4194_v22, 0.0  ;;  %v3557_v59 = vpop.f32.mrf.mxu3  ;;  %v4763_v22 = vld [vmem:[%s5127_s6 + $0x88] sm:$0xff]  }
 0x351   : > { %v4233_v53 = vadd.f32 %v4232_v44, %v4231_v24  ;;  %v3625_v47 = vadd.f32 %v3557_v59, %v7816_v62  ;;  %v3936_v62 = vsel %vm1406_vm4, %v7954_v36, %v8014_v37  ;;  %v4574_v18 = vunpack.c.h.bf16 %v4763_v22 }
 0x352   : > { %v3026_v16 = vpop.f32.mrf.mxu2  ;;  %v3455_v40 = vor.u32 %v3453_v25, %v7983_v46 }
 0x353   : > { %v8023_v23 = vadd.f32 %v3026_v16, %v7911_v20  ;;  %v4023_v15 = vpop.f32.mrf.mxu0  ;;  %v3193_v27 = vpop.permute.xlu1 %3192 }
 0x354   : > { %v4091_v24 = vadd.f32 %v4023_v15, %v3625_v47  ;;  %v2686_v30 = vpop.f32.mrf.mxu1  ;;  %v3256_v13 = vrot.slane %v3193_v27, 7  ;;  %v8813_v15 = vld [vmem:[#allocation83_spill] sm:$0xff] }
 0x355   : > { %v8033_v20 = vadd.f32 %v2686_v30, %v2272_v48  ;;  %4497 = vmatmul.msk.bf16.gmra.mxu0 %vm863_vm3, %v3936_v62  ;;  %v3888_v48 = vpack.c.bf16 %v3870_v61, %v3869_v42 }
 0x356   : > { %v4131_v7 = vsel %vm4115_vm5, %v4091_v24, 0.0  ;;  %v4195_v2 = vmul.f32 %v4091_v24, %v4091_v24  ;;  %v3257_v59 = vsel %vm581_vm1, %v3254_v3, %v3256_v13  ;;  %v3259_v47 = vsel %vm581_vm1, %v3256_v13, %v3258_v1 }
 0x357   : > { %v4132_v29 = vadd.f32 %v4131_v7, %v4130_v45  ;;  %v3323_v52 = vmul.f32 %v8813_v15, %v3257_v59  ;;  %v3460_v24 = vsel %vm730_vm2, %v3455_v40, %v3459_v28  ;;  %v3324_v30 = vmul.f32 %v4574_v18, %v3259_v47 }
 0x358   : > { %v4234_v36 = vsel %vm4115_vm5, %v4195_v2, 0.0  ;;  %v3559_v26 = vpop.f32.mrf.mxu3  ;;  %v3937_v42 = vrot.slane %v3888_v48, 1 }
 0x359   : > { %v4235_v44 = vadd.f32 %v4234_v36, %v4233_v53  ;;  %v3626_v45 = vadd.f32 %v3559_v26, %v7843_v11  ;;  %v2908_v53 = vmul.f32 %v8811_v19, %v2869_v56  ;;  %v8063_v61 = vpack.c.bf16 %v3324_v30, %v3323_v52  ;;  %v2873_v52 = vpop.permute.xlu2 %2872 }
 0x35a   : > { %v3029_v16 = vpop.f32.mrf.mxu2  ;;  %v3804_v26 = vrot.slane %v3741_v63, 6  ;;  %v3938_v59 = vsel %vm1406_vm4, %v8014_v37, %v3937_v42 }
 0x35b   : > { %v8051_v39 = vadd.f32 %v3029_v16, %v7944_v21  ;;  %v4025_v6 = vpop.f32.mrf.mxu0  ;;  %v3465_v47 = vshll.u32 %v8063_v61, 16 }
 0x35c   : > { %v4092_v27 = vadd.f32 %v4025_v6, %v3626_v45  ;;  %v2865_v3 = vpop.permute.xlu1 %2864  ;;  %v2689_v32 = vpop.f32.mrf.mxu1 }
 0x35d   : > { %v2907_v11 = vmul.f32 %v8810_v51, %v2865_v3  ;;  %v8058_v62 = vadd.f32 %v2689_v32, %v7356_v57  ;;  %4481 = vmatmul.msk.bf16.gmra.mxu3 %vm863_vm3, %v3460_v24  ;;  %v2877_v6 = vpop.permute.xlu0 %2876  ;;  %v3461_v3 = vshrl.u32 %v8011_v4, 16  ;;  %v3467_v32 = vrot.slane %v3465_v47, 1 }
 0x35e   : > { %v4133_v21 = vsel %vm4115_vm5, %v4092_v27, 0.0  ;;  %v4196_v46 = vmul.f32 %v4092_v27, %v4092_v27 }
 0x35f   : > { %v4134_v19 = vadd.f32 %v4133_v21, %v4132_v29  ;;  %v2925_v13 = vpack.c.bf16 %v2908_v53, %v2907_v11  ;;  %v206_v29 = vld [vmem:[%s5127_s6 + $0x90] sm:$0x1]  ;;  %s4348_s6 = sshll.u32 %s8821_s13, 1 }
 0x360   : > { %v4236_v7 = vsel %vm4115_vm5, %v4196_v46, 0.0  ;;  %v3562_v2 = vpop.f32.mrf.mxu3  ;;  %v243_v40 = vunpack.c.l.bf16 %v206_v29  ;;  %v3463_v46 = vor.u32 %v3461_v3, %v3459_v28  ;;  %s168_s9 = scalar_lea.vmem %s8181_s3, %s4348_s6 }
 0x361   : > { %v4237_v36 = vadd.f32 %v4236_v7, %v4235_v44  ;;  %4465 = vmatmul.msk.bf16.gmra.mxu2 %vm863_vm3, %v2925_v13  ;;  %v3627_v57 = vadd.f32 %v3562_v2, %v7880_v41 }
 0x362   : > { %v3031_v51 = vpop.f32.mrf.mxu2  ;;  %v3325_v7 = vmul.f32 %v3258_v1, %v243_v40  ;;  %v3468_v2 = vsel %vm730_vm2, %v3463_v46, %v3467_v32 }
 0x363   : > { %v8068_v56 = vadd.f32 %v3031_v51, %v7970_v5  ;;  %v4028_v25 = vpop.f32.mrf.mxu0  ;;  %v3805_v5 = vsel %vm912_vm0, %v3802_v33, %v3804_v26  ;;  %v2909_v33 = vmul.f32 %v8813_v15, %v2873_v52 }
 0x364   : > { %v4093_v22 = vadd.f32 %v4028_v25, %v3627_v57  ;;  %v3871_v21 = vmul.f32 %v8813_v15, %v3805_v5  ;;  %v3342_v15 = vpack.c.bf16 %v3325_v7, %v3325_v7  ;;  %v3469_v5 = vshrl.u32 %v8063_v61, 16 }
 0x365   : > { %v3744_v45 = vpop.permute.xlu1 %3743  ;;  %4498 = vmatmul.msk.bf16.gmra.mxu0 %vm863_vm3, %v3938_v59 }
 0x366   : > { %v4135_v44 = vsel %vm4115_vm5, %v4093_v22, 0.0  ;;  %v4197_v16 = vmul.f32 %v4093_v22, %v4093_v22  ;;  %v3806_v41 = vrot.slane %v3744_v45, 6  ;;  %v3473_v59 = vshll.u32 %v3342_v15, 16 }
 0x367   : > { %v4136_v48 = vadd.f32 %v4135_v44, %v4134_v19  ;;  %v2910_v19 = vmul.f32 %v4574_v18, %v2877_v6 }
 0x368   : > { %v4238_v53 = vsel %vm4115_vm5, %v4197_v16, 0.0  ;;  %v3807_v37 = vsel %vm912_vm0, %v3804_v26, %v3806_v41  ;;  %v3564_v27 = vpop.f32.mrf.mxu3  ;;  %v3475_v6 = vrot.slane %v3473_v59, 1 }
 0x369   : > { %v4239_v24 = vadd.f32 %v4238_v53, %v4237_v36  ;;  %v3872_v30 = vmul.f32 %v4574_v18, %v3807_v37  ;;  %v3628_v11 = vadd.f32 %v3564_v27, %v7907_v50  ;;  %v2926_v28 = vpack.c.bf16 %v2910_v19, %v2909_v33 }
 0x36a   : > { %v3034_v34 = vpop.f32.mrf.mxu2  ;;  %v3873_v53 = vmul.f32 %v3806_v41, %v243_v40 }
 0x36b   : > { %v8086_v63 = vadd.f32 %v3034_v34, %v8001_v0  ;;  %v4030_v13 = vpop.f32.mrf.mxu0  ;;  %v3889_v36 = vpack.c.bf16 %v3872_v30, %v3871_v21 }
 0x36c   : > { %v4094_v4 = vadd.f32 %v4030_v13, %v3628_v11 }
 0x36d   : > { %4482 = vmatmul.msk.bf16.gmra.mxu3 %vm863_vm3, %v3468_v2  ;;  %v3939_v26 = vrot.slane %v3889_v36, 1 }
 0x36e   : > { %v4137_v50 = vsel %vm4115_vm5, %v4094_v4, 0.0  ;;  %v4198_v57 = vmul.f32 %v4094_v4, %v4094_v4 }
 0x36f   : > { %v4138_v51 = vadd.f32 %v4137_v50, %v4136_v48  ;;  %v3940_v45 = vsel %vm1406_vm4, %v3937_v42, %v3939_v26 }
 0x370   : > { %v4240_v18 = vsel %vm4115_vm5, %v4198_v57, 0.0  ;;  %v3567_v0 = vpop.f32.mrf.mxu3 }
 0x371   : > { %v4241_v25 = vadd.f32 %v4240_v18, %v4239_v24  ;;  %4466 = vmatmul.msk.bf16.gmra.mxu2 %vm863_vm3, %v2926_v28  ;;  %v3629_v10 = vadd.f32 %v3567_v0, %v7939_v58  ;;  %v3890_v24 = vpack.c.bf16 %v3873_v53, %v3873_v53 }
 0x372   : > { %v3036_v1 = vpop.f32.mrf.mxu2 }
 0x373   : > { %v8097_v29 = vadd.f32 %v3036_v1, %v8033_v20  ;;  %v4033_v22 = vpop.f32.mrf.mxu0  ;;  %v3471_v20 = vor.u32 %v3469_v5, %v3467_v32  ;;  %v3941_v34 = vrot.slane %v3890_v24, 1 }
 0x374   : > { %v4095_v47 = vadd.f32 %v4033_v22, %v3629_v10 }
 0x375   : > { %4499 = vmatmul.msk.bf16.gmra.mxu0 %vm863_vm3, %v3940_v45  ;;  %v3476_v30 = vsel %vm730_vm2, %v3471_v20, %v3475_v6  ;;  %v3942_v19 = vsel %vm1406_vm4, %v3939_v26, %v3941_v34 }
 0x376   : > { %v4139_v44 = vsel %vm4115_vm5, %v4095_v47, 0.0  ;;  %v4199_v16 = vmul.f32 %v4095_v47, %v4095_v47 }
 0x377   : > { %v4140_v48 = vadd.f32 %v4139_v44, %v4138_v51 }
 0x378   : > { %v4242_v58 = vsel %vm4115_vm5, %v4199_v16, 0.0  ;;  %v3569_v37 = vpop.f32.mrf.mxu3 }
 0x379   : > { %v4243_v52 = vadd.f32 %v4242_v58, %v4241_v25  ;;  %v3630_v27 = vadd.f32 %v3569_v37, %v7960_v54  ;;  %v2691_v37 = vpop.f32.mrf.mxu1 }
 0x37b   : > { %v4035_v3 = vpop.f32.mrf.mxu0 }
 0x37c   : > { %v4096_v42 = vadd.f32 %v4035_v3, %v3630_v27 }
 0x37d   : > { %4483 = vmatmul.msk.bf16.gmra.mxu3 %vm863_vm3, %v3476_v30 }
 0x37e   : > { %v4141_v11 = vsel %vm4115_vm5, %v4096_v42, 0.0  ;;  %v4200_v61 = vmul.f32 %v4096_v42, %v4096_v42 }
 0x37f   : > { %v4142_v21 = vadd.f32 %v4141_v11, %v4140_v48 }
 0x380   : > { %v4244_v41 = vsel %vm4115_vm5, %v4200_v61, 0.0  ;;  %v3572_v40 = vpop.f32.mrf.mxu3 }
 0x381   : > { %v4245_v46 = vadd.f32 %v4244_v41, %v4243_v52  ;;  %v3631_v32 = vadd.f32 %v3572_v40, %v7994_v49  ;;  %v2694_v34 = vpop.f32.mrf.mxu1 }
 0x383   : > { %v4038_v33 = vpop.f32.mrf.mxu0 }
 0x384   : > { %v4097_v54 = vadd.f32 %v4038_v33, %v3631_v32 }
 0x385   : > { %4500 = vmatmul.msk.bf16.gmra.mxu0 %vm863_vm3, %v3942_v19 }
 0x386   : > { %v4143_v13 = vsel %vm4115_vm5, %v4097_v54, 0.0  ;;  %v4201_v7 = vmul.f32 %v4097_v54, %v4097_v54 }
 0x387   : > { %v4144_v4 = vadd.f32 %v4143_v13, %v4142_v21 }
 0x388   : > { %v4246_v2 = vsel %vm4115_vm5, %v4201_v7, 0.0  ;;  %v3574_v36 = vpop.f32.mrf.mxu3 }
 0x389   : > { %v4247_v50 = vadd.f32 %v4246_v2, %v4245_v46  ;;  %v3632_v57 = vadd.f32 %v3574_v36, %v8023_v23 }
 0x38b   : > { %v4040_v28 = vpop.f32.mrf.mxu0 }
 0x38c   : > { %v4098_v51 = vadd.f32 %v4040_v28, %v3632_v57  ;;  %v2696_v57 = vpop.f32.mrf.mxu1  ;;  %v2274_v28 = vadd.f32 %v7301_v14, %v7377_v35 }
 0x38e   : > { %v4145_v49 = vsel %vm4115_vm5, %v4098_v51, 0.0  ;;  %v4202_v15 = vmul.f32 %v4098_v51, %v4098_v51 }
 0x38f   : > { %v4146_v18 = vadd.f32 %v4145_v49, %v4144_v4 }
 0x390   : > { %v4248_v0 = vsel %vm4115_vm5, %v4202_v15, 0.0  ;;  %v3577_v26 = vpop.f32.mrf.mxu3  ;;  %v2740_v15 = vadd.f32 %v2691_v37, %v2274_v28 }
 0x391   : > { %v4249_v25 = vadd.f32 %v4248_v0, %v4247_v50  ;;  %v3633_v10 = vadd.f32 %v3577_v26, %v8051_v39 }
 0x393   : > { %v4043_v1 = vpop.f32.mrf.mxu0  ;;  %v3039_v22 = vpop.f32.mrf.mxu2 }
 0x394   : > { %v4099_v59 = vadd.f32 %v4043_v1, %v3633_v10  ;;  %v3089_v47 = vadd.f32 %v3039_v22, %v8058_v62 }
 0x396   : > { %v4147_v45 = vsel %vm4115_vm5, %v4099_v59, 0.0  ;;  %v4203_v23 = vmul.f32 %v4099_v59, %v4099_v59 }
 0x397   : > { %v4148_v44 = vadd.f32 %v4147_v45, %v4146_v18 }
 0x398   : > { %v4250_v16 = vsel %vm4115_vm5, %v4203_v23, 0.0  ;;  %v3579_v5 = vpop.f32.mrf.mxu3 }
 0x399   : > { %v4251_v48 = vadd.f32 %v4250_v16, %v4249_v25  ;;  %v3634_v6 = vadd.f32 %v3579_v5, %v8068_v56 }
 0x39b   : > { %v4045_v53 = vpop.f32.mrf.mxu0  ;;  %v3041_v11 = vpop.f32.mrf.mxu2 }
 0x39c   : > { %v4100_v58 = vadd.f32 %v4045_v53, %v3634_v6  ;;  %v3090_v0 = vadd.f32 %v3041_v11, %v2740_v15 }
 0x39e   : > { %v4149_v39 = vsel %vm4115_vm5, %v4100_v58, 0.0  ;;  %v4204_v20 = vmul.f32 %v4100_v58, %v4100_v58 }
 0x39f   : > { %v4150_v52 = vadd.f32 %v4149_v39, %v4148_v44  ;;  %v2741_v44 = vadd.f32 %v2694_v34, %v7418_v12  ;;  %v2276_v39 = vadd.f32 %v7388_v8, %v7444_v55 }
 0x3a0   : > { %v4252_v27 = vsel %vm4115_vm5, %v4204_v20, 0.0  ;;  %v3582_v62 = vpop.f32.mrf.mxu3 }
 0x3a1   : > { %v4253_v3 = vadd.f32 %v4252_v27, %v4251_v48  ;;  %v3635_v24 = vadd.f32 %v3582_v62, %v8086_v63  ;;  %v2742_v27 = vadd.f32 %v2696_v57, %v2276_v39 }
 0x3a3   : > { %v4048_v42 = vpop.f32.mrf.mxu0 }
 0x3a4   : > { %v4101_v30 = vadd.f32 %v4048_v42, %v3635_v24 }
 0x3a5   : > { %v3044_v19 = vpop.f32.mrf.mxu2 }
 0x3a6   : > { %v4151_v61 = vsel %vm4115_vm5, %v4101_v30, 0.0  ;;  %v4205_v21 = vmul.f32 %v4101_v30, %v4101_v30  ;;  %v3091_v16 = vadd.f32 %v3044_v19, %v2741_v44 }
 0x3a7   : > { %v4152_v56 = vadd.f32 %v4151_v61, %v4150_v52 }
 0x3a8   : > { %v4254_v41 = vsel %vm4115_vm5, %v4205_v21, 0.0  ;;  %v3584_v40 = vpop.f32.mrf.mxu3 }
 0x3a9   : > { %v4255_v46 = vadd.f32 %v4254_v41, %v4253_v3  ;;  %v3636_v32 = vadd.f32 %v3584_v40, %v8097_v29 }
 0x3ab   : > { %v4050_v33 = vpop.f32.mrf.mxu0 }
 0x3ac   : > { %v4102_v54 = vadd.f32 %v4050_v33, %v3636_v32 }
 0x3ad   : > { %v3046_v25 = vpop.f32.mrf.mxu2 }
 0x3ae   : > { %v4153_v13 = vsel %vm4115_vm5, %v4102_v54, 0.0  ;;  %v4206_v63 = vmul.f32 %v4102_v54, %v4102_v54  ;;  %v3092_v24 = vadd.f32 %v3046_v25, %v2742_v27 }
 0x3af   : > { %v4154_v7 = vadd.f32 %v4153_v13, %v4152_v56 }
 0x3b0   : > { %v4256_v4 = vsel %vm4115_vm5, %v4206_v63, 0.0  ;;  %v3587_v2 = vpop.f32.mrf.mxu3 }
 0x3b1   : > { %v4257_v36 = vadd.f32 %v4256_v4, %v4255_v46  ;;  %v3637_v50 = vadd.f32 %v3587_v2, %v3089_v47  ;;  %v2699_v47 = vpop.f32.mrf.mxu1 }
 0x3b2   : > { %v2743_v40 = vadd.f32 %v2699_v47, %v7493_v31 }
 0x3b3   : > { %v4053_v51 = vpop.f32.mrf.mxu0 }
 0x3b4   : > { %v4103_v49 = vadd.f32 %v4053_v51, %v3637_v50 }
 0x3b5   : > { %v3049_v37 = vpop.f32.mrf.mxu2 }
 0x3b6   : > { %v4155_v29 = vsel %vm4115_vm5, %v4103_v49, 0.0  ;;  %v4207_v18 = vmul.f32 %v4103_v49, %v4103_v49  ;;  %v3093_v46 = vadd.f32 %v3049_v37, %v2743_v40 }
 0x3b7   : > { %v4156_v26 = vadd.f32 %v4155_v29, %v4154_v7  ;;  %v2278_v7 = vadd.f32 %v7469_v60, %v7516_v43 }
 0x3b8   : > { %v4258_v10 = vsel %vm4115_vm5, %v4207_v18, 0.0  ;;  %v3589_v1 = vpop.f32.mrf.mxu3 }
 0x3b9   : > { %v4259_v22 = vadd.f32 %v4258_v10, %v4257_v36  ;;  %v3638_v59 = vadd.f32 %v3589_v1, %v3090_v0  ;;  %v2701_v62 = vpop.f32.mrf.mxu1 }
 0x3ba   : > { %v2744_v50 = vadd.f32 %v2701_v62, %v2278_v7 }
 0x3bb   : > { %v4055_v45 = vpop.f32.mrf.mxu0 }
 0x3bc   : > { %v4104_v23 = vadd.f32 %v4055_v45, %v3638_v59 }
 0x3bd   : > { %v3051_v34 = vpop.f32.mrf.mxu2 }
 0x3be   : > { %v4157_v14 = vsel %vm4115_vm5, %v4104_v23, 0.0  ;;  %v4208_v35 = vmul.f32 %v4104_v23, %v4104_v23  ;;  %v3094_v28 = vadd.f32 %v3051_v34, %v2744_v50 }
 0x3bf   : > { %v4158_v5 = vadd.f32 %v4157_v14, %v4156_v26  ;;  %v8814_v14 = vld [vmem:[#allocation88_spill] sm:$0xff] }
 0x3c0   : > { %v4260_v48 = vsel %vm4115_vm5, %v4208_v35, 0.0  ;;  %v3592_v6 = vpop.f32.mrf.mxu3  ;;  %v8815_v35 = vld [vmem:[#allocation39_spill] sm:$0xff] }
 0x3c1   : > { %v4261_v53 = vadd.f32 %v4260_v48, %v4259_v22  ;;  %v3639_v58 = vadd.f32 %v3592_v6, %v3091_v16  ;;  %v2704_v33 = vpop.f32.mrf.mxu1  ;;  %v2280_v16 = vadd.f32 %v8815_v35, %v8814_v14 }
 0x3c2   : > { %v2745_v10 = vadd.f32 %v2704_v33, %v7563_v17 }
 0x3c3   : > { %v4058_v20 = vpop.f32.mrf.mxu0 }
 0x3c4   : > { %v4105_v52 = vadd.f32 %v4058_v20, %v3639_v58 }
 0x3c6   : > { %v4159_v12 = vsel %vm4115_vm5, %v4105_v52, 0.0  ;;  %v4209_v3 = vmul.f32 %v4105_v52, %v4105_v52 }
 0x3c7   : > { %v4160_v42 = vadd.f32 %v4159_v12, %v4158_v5 }
 0x3c8   : > { %v4262_v30 = vsel %vm4115_vm5, %v4209_v3, 0.0  ;;  %v3594_v11 = vpop.f32.mrf.mxu3 }
 0x3c9   : > { %v4263_v61 = vadd.f32 %v4262_v30, %v4261_v53  ;;  %v3640_v21 = vadd.f32 %v3594_v11, %v3092_v24  ;;  %v2706_v0 = vpop.f32.mrf.mxu1 }
 0x3ca   : > { %v2746_v53 = vadd.f32 %v2706_v0, %v2280_v16 }
 0x3cb   : > { %v4060_v56 = vpop.f32.mrf.mxu0 }
 0x3cc   : > { %v4106_v41 = vadd.f32 %v4060_v56, %v3640_v21 }
 0x3ce   : > { %v4161_v8 = vsel %vm4115_vm5, %v4106_v41, 0.0  ;;  %v4210_v55 = vmul.f32 %v4106_v41, %v4106_v41 }
 0x3cf   : > { %v4162_v32 = vadd.f32 %v4161_v8, %v4160_v42 }
 0x3d0   : > { %v4264_v54 = vsel %vm4115_vm5, %v4210_v55, 0.0  ;;  %v3597_v19 = vpop.f32.mrf.mxu3 }
 0x3d1   : > { %v4265_v13 = vadd.f32 %v4264_v54, %v4263_v61  ;;  %v3641_v63 = vadd.f32 %v3597_v19, %v3093_v46  ;;  %v2709_v48 = vpop.f32.mrf.mxu1  ;;  %v8816_v46 = vld [vmem:[#allocation91_spill] sm:$0xff] }
 0x3d2   : > { %v3054_v2 = vpop.f32.mrf.mxu2  ;;  %v2747_v42 = vadd.f32 %v2709_v48, %v7626_v9 }
 0x3d3   : > { %v4063_v4 = vpop.f32.mrf.mxu0  ;;  %v3095_v22 = vadd.f32 %v3054_v2, %v2745_v10 }
 0x3d4   : > { %v4107_v36 = vadd.f32 %v4063_v4, %v3641_v63 }
 0x3d6   : > { %v4163_v31 = vsel %vm4115_vm5, %v4107_v36, 0.0  ;;  %v4211_v57 = vmul.f32 %v4107_v36, %v4107_v36 }
 0x3d7   : > { %v4164_v51 = vadd.f32 %v4163_v31, %v4162_v32  ;;  %v2282_v32 = vadd.f32 %v8816_v46, %v7662_v38 }
 0x3d8   : > { %v4266_v49 = vsel %vm4115_vm5, %v4211_v57, 0.0  ;;  %v3599_v15 = vpop.f32.mrf.mxu3 }
 0x3d9   : > { %v4267_v29 = vadd.f32 %v4266_v49, %v4265_v13  ;;  %v3642_v18 = vadd.f32 %v3599_v15, %v3094_v28  ;;  %v2711_v30 = vpop.f32.mrf.mxu1  ;;  %v8817_v49 = vld [vmem:[#allocation90_spill] sm:$0xff] }
 0x3da   : > { %v3056_v60 = vpop.f32.mrf.mxu2  ;;  %v2748_v19 = vadd.f32 %v2711_v30, %v2282_v32 }
 0x3db   : > { %v4065_v26 = vpop.f32.mrf.mxu0  ;;  %v3096_v39 = vadd.f32 %v3056_v60, %v2746_v53 }
 0x3dc   : > { %v4108_v25 = vadd.f32 %v4065_v26, %v3642_v18 }
 0x3de   : > { %v4165_v43 = vsel %vm4115_vm5, %v4108_v25, 0.0  ;;  %v4212_v1 = vmul.f32 %v4108_v25, %v4108_v25 }
 0x3df   : > { %v4166_v59 = vadd.f32 %v4165_v43, %v4164_v51 }
 0x3e0   : > { %v4268_v45 = vsel %vm4115_vm5, %v4212_v1, 0.0  ;;  %v3602_v47 = vpop.f32.mrf.mxu3  ;;  %v8818_v1 = vld [vmem:[#allocation18_spill] sm:$0xff] }
 0x3e1   : > { %v4269_v23 = vadd.f32 %v4268_v45, %v4267_v29  ;;  %v3643_v44 = vadd.f32 %v3602_v47, %v3095_v22  ;;  %v2714_v4 = vpop.f32.mrf.mxu1  ;;  %v8819_v22 = vld [vmem:[#allocation50_spill] sm:$0xff] }
 0x3e2   : > { %v2749_v15 = vadd.f32 %v2714_v4, %v8817_v49 }
 0x3e3   : > { %v4068_v5 = vpop.f32.mrf.mxu0 }
 0x3e4   : > { %v4109_v6 = vadd.f32 %v4068_v5, %v3643_v44  ;;  %v3059_v37 = vpop.f32.mrf.mxu2 }
 0x3e5   : > { %v3097_v21 = vadd.f32 %v3059_v37, %v2747_v42 }
 0x3e6   : > { %v4167_v17 = vsel %vm4115_vm5, %v4109_v6, 0.0  ;;  %v4213_v58 = vmul.f32 %v4109_v6, %v4109_v6 }
 0x3e7   : > { %v4168_v20 = vadd.f32 %v4167_v17, %v4166_v59  ;;  %v2284_v59 = vadd.f32 %v8819_v22, %v8818_v1 }
 0x3e8   : > { %v4270_v52 = vsel %vm4115_vm5, %v4213_v58, 0.0  ;;  %v3604_v27 = vpop.f32.mrf.mxu3 }
 0x3e9   : > { %v4271_v62 = vadd.f32 %v4270_v52, %v4269_v23  ;;  %v3644_v12 = vadd.f32 %v3604_v27, %v3096_v39  ;;  %v2716_v43 = vpop.f32.mrf.mxu1 }
 0x3ea   : > { %v2750_v44 = vadd.f32 %v2716_v43, %v2284_v59 }
 0x3eb   : > { %v4070_v3 = vpop.f32.mrf.mxu0 }
 0x3ec   : > { %v4110_v24 = vadd.f32 %v4070_v3, %v3644_v12  ;;  %v3061_v41 = vpop.f32.mrf.mxu2 }
 0x3ed   : > { %v3098_v63 = vadd.f32 %v3061_v41, %v2748_v19 }
 0x3ee   : > { %v4169_v11 = vsel %vm4115_vm5, %v4110_v24, 0.0  ;;  %v4214_v61 = vmul.f32 %v4110_v24, %v4110_v24 }
 0x3ef   : > { %v4170_v56 = vadd.f32 %v4169_v11, %v4168_v20 }
 0x3f0   : > { %v4272_v34 = vsel %vm4115_vm5, %v4214_v61, 0.0  ;;  %v3607_v40 = vpop.f32.mrf.mxu3 }
 0x3f1   : > { %v4273_v8 = vadd.f32 %v4272_v34, %v4271_v62  ;;  %v3645_v55 = vadd.f32 %v3607_v40, %v3097_v21 }
 0x3f3   : > { %v4073_v33 = vpop.f32.mrf.mxu0 }
 0x3f4   : > { %v4111_v54 = vadd.f32 %v4073_v33, %v3645_v55  ;;  %v3064_v57 = vpop.f32.mrf.mxu2 }
 0x3f5   : > { %v3099_v18 = vadd.f32 %v3064_v57, %v2749_v15 }
 0x3f6   : > { %v4171_v9 = vsel %vm4115_vm5, %v4111_v54, 0.0  ;;  %v4215_v13 = vmul.f32 %v4111_v54, %v4111_v54 }
 0x3f7   : > { %v4172_v7 = vadd.f32 %v4171_v9, %v4170_v56 }
 0x3f8   : > { %v4274_v2 = vsel %vm4115_vm5, %v4215_v13, 0.0  ;;  %v3609_v36 = vpop.f32.mrf.mxu3 }
 0x3f9   : > { %v4275_v50 = vadd.f32 %v4274_v2, %v4273_v8  ;;  %v3646_v31 = vadd.f32 %v3609_v36, %v3098_v63 }
 0x3fb   : > { %v4075_v28 = vpop.f32.mrf.mxu0 }
 0x3fc   : > { %v4112_v51 = vadd.f32 %v4075_v28, %v3646_v31  ;;  %v3066_v47 = vpop.f32.mrf.mxu2 }
 0x3fd   : > { %v3100_v16 = vadd.f32 %v3066_v47, %v2750_v44 }
 0x3fe   : > { %v4173_v38 = vsel %vm4115_vm5, %v4112_v51, 0.0  ;;  %v4216_v29 = vmul.f32 %v4112_v51, %v4112_v51 }
 0x3ff   : > { %v4174_v0 = vadd.f32 %v4173_v38, %v4172_v7 }
 0x400   : > { %v4276_v26 = vsel %vm4115_vm5, %v4216_v29, 0.0  ;;  %v3612_v25 = vpop.f32.mrf.mxu3 }
 0x401   : > { %v4277_v10 = vadd.f32 %v4276_v26, %v4275_v50  ;;  %v3647_v60 = vadd.f32 %v3612_v25, %v3099_v18 }
 0x403   : > { %v4078_v45 = vpop.f32.mrf.mxu0 }
 0x404   : > { %v4113_v23 = vadd.f32 %v4078_v45, %v3647_v60 }
 0x406   : > { %v4175_v14 = vsel %vm4115_vm5, %v4113_v23, 0.0  ;;  %v4217_v35 = vmul.f32 %v4113_v23, %v4113_v23 }
 0x407   : > { %v4176_v5 = vadd.f32 %v4175_v14, %v4174_v0 }
 0x408   : > { %v4278_v48 = vsel %vm4115_vm5, %v4217_v35, 0.0  ;;  %v3614_v6 = vpop.f32.mrf.mxu3 }
 0x409   : > { %v4279_v53 = vadd.f32 %v4278_v48, %v4277_v10  ;;  %v3648_v17 = vadd.f32 %v3614_v6, %v3100_v16 }
 0x40b   : > { %v4080_v58 = vpop.f32.mrf.mxu0 }
 0x40c   : > { %v4114_v37 = vadd.f32 %v4080_v58, %v3648_v17 }
 0x40e   : > { %v4177_v39 = vsel %vm4115_vm5, %v4114_v37, 0.0  ;;  %v4218_v20 = vmul.f32 %v4114_v37, %v4114_v37 }
 0x40f   : > { %v4178_v52 = vadd.f32 %v4177_v39, %v4176_v5 }
 0x410   : > { %v4280_v27 = vsel %vm4115_vm5, %v4218_v20, 0.0 }
 0x411   : > { %v4179_v62 = vrot.slane %v4178_v52, 4  ;;  %v4281_v12 = vadd.f32 %v4280_v27, %v4279_v53 }
 0x413   : > { %v4180_v3 = vadd.f32 %v4179_v62, %v4178_v52  ;;  %v4282_v24 = vrot.slane %v4281_v12, 4 }
 0x415   : > { %v4181_v42 = vrot.slane %v4180_v3, 2  ;;  %v4283_v30 = vadd.f32 %v4282_v24, %v4281_v12 }
 0x417   : > { %v4182_v11 = vadd.f32 %v4181_v42, %v4180_v3  ;;  %v4284_v61 = vrot.slane %v4283_v30, 2 }
 0x419   : > { %v4183_v21 = vrot.slane %v4182_v11, 1  ;;  %v4285_v56 = vadd.f32 %v4284_v61, %v4283_v30 }
 0x41b   : > { %v4184_v34 = vadd.f32 %v4183_v21, %v4182_v11  ;;  %v4286_v41 = vrot.slane %v4285_v56, 1 }
 0x41d   : > { %4186 = vst.msk [vmem:[%s168_s9] sm:$0x1] %vm4185_vm6, %v4184_v34  ;;  %v4287_v40 = vadd.f32 %v4286_v41, %v4285_v56 }
 0x41f   : > { %4288 = vst.msk [vmem:[%s168_s9 + $0x1] sm:$0x1] %vm4185_vm6, %v4287_v40 }
 0x420 PF: > { %s13_s12 = sadd.s32 1, %s4770_s12  }
 0x421   : > { %p10_p4 = scmp.ge.s32.totalorder %s13_s12, 4  }
 0x423   :  { %12 = sbr.rel (!%p10_p4) target bundleno = 1 (0x1), region = 70 }

</bundles_post_ra>
